<compile_context>
chip_gen: v6e
topology: v6e:2x2x1
jax: 0.10.0
libtpu: 0.0.40
codegen_flags: <defaults>
</compile_context>

<pallas_src>
import functools

import jax
import jax.numpy as jnp
from jax import lax
from jax.experimental import pallas as pl
from jax.experimental.pallas import tpu as pltpu

VMEM_SPEC = pl.BlockSpec(memory_space=pltpu.MemorySpace.VMEM)
CDT = jnp.bfloat16      # MXU input dtype; accumulation stays float32


# ------------------------------ fused kernel ------------------------------- #

def _fused_multimodal_kernel(
    # text branch
    ids_ref, emb_ref, wih_ref, whh_ref, brnn_ref, wtfc_ref, btfc_ref,
    # image branch
    img_ref, w1_ref, b1_ref, w2_ref, b2_ref, wifc_ref, bifc_ref,
    # fusion head
    fcw_ref, fcb_ref,
    # output
    out_ref,
    # scratch
    a1_ref, p2_ref, feat_ref,
    *, B, T, V, H, D, CIN, C1, C2, S1):
  f32 = jnp.float32
  S2 = S1 // 2          # spatial after pool1
  S3 = S2 // 2          # spatial after pool2
  W_OFF = S2            # aligned placement offset of valid cols in p2 scratch

  # ---------------- text branch: embed -> RNN -> linear -------------------- #
  TB = T * B
  ids = ids_ref[...]                                      # (TB, 1) int32, t-major
  iota_v = lax.broadcasted_iota(jnp.int32, (TB, V), 1)
  onehot = (iota_v == ids).astype(f32)                    # gather as matmul
  xall = jnp.dot(onehot, emb_ref[...], preferred_element_type=f32)        # (TB, E)

  # hoisted input projection: all timesteps in one matmul
  xproj = jnp.dot(xall.astype(CDT), wih_ref[...].astype(CDT),
                  preferred_element_type=f32) + brnn_ref[...]             # (TB, H)
  whh = whh_ref[...].astype(CDT)
  h = jnp.zeros((B, H), f32)
  for t in range(T):                                      # statically unrolled
    x_t = xproj[t * B:(t + 1) * B, :]
    h = jnp.tanh(x_t + jnp.dot(h.astype(CDT), whh, preferred_element_type=f32))
  text_out = jnp.dot(h.astype(CDT), wtfc_ref[...].astype(CDT),
                     preferred_element_type=f32) + btfc_ref[...]          # (B, D)

  # -------------- image branch: 2x [conv3x3 + ReLU + maxpool2] ------------- #
  # 0/1 selector matrices: pick even / odd rows via the MXU (avoids strided
  # slicing).  sel_e @ x == x[0::2], sel_o @ x == x[1::2].
  ri = lax.broadcasted_iota(jnp.int32, (S2, S1), 0)
  ci = lax.broadcasted_iota(jnp.int32, (S2, S1), 1)
  sel_e = (ci == 2 * ri).astype(f32)                      # (S2, S1)
  sel_o = (ci == 2 * ri + 1).astype(f32)
  sel_e2 = sel_e[:S3, :S2]                                # (S3, S2)
  sel_o2 = sel_o[:S3, :S2]

  # conv1: 9 shifted-view matmuls from the halo-padded input, accumulated in
  # a VMEM scratch (bias folded into the init).
  a1_ref[...] = jnp.zeros((B * S1 * S1, C1), f32) + b1_ref[...]
  for k in range(9):
    ki, kj = divmod(k, 3)
    patch = img_ref[:, ki:ki + S1, kj:kj + S1, :].reshape(B * S1 * S1, CIN)
    a1_ref[...] += jnp.dot(patch.astype(CDT), w1_ref[k].astype(CDT),
                           preferred_element_type=f32)

  # fused ReLU + 2x2 maxpool, written straight into conv2's padded input
  # scratch (valid cols at [W_OFF, W_OFF+S2) so all stores are aligned).
  p2_ref[...] = jnp.zeros(p2_ref.shape, p2_ref.dtype)
  for b in range(B):
    for oh in range(S2):
      base = (b * S1 + 2 * oh) * S1
      blk = jnp.maximum(a1_ref[base:base + 2 * S1, :], 0.0)    # (2*S1, C1)
      hp = jnp.maximum(blk[:S1, :], blk[S1:, :])               # pool over h
      wp = jnp.maximum(jnp.dot(sel_e, hp, preferred_element_type=f32),
                       jnp.dot(sel_o, hp, preferred_element_type=f32))
      p2_ref[b, 1 + oh, W_OFF:W_OFF + S2, :] = wp              # (S2, C1)

  # conv2 (input halo: rows 0 / S2+1 and cols W_OFF-1 / W_OFF+S2 are zero)
  acc2 = jnp.zeros((B * S2 * S2, C2), f32) + b2_ref[...]
  for k in range(9):
    ki, kj = divmod(k, 3)
    patch = p2_ref[:, ki:ki + S2, W_OFF - 1 + kj:W_OFF - 1 + kj + S2, :]
    patch = patch.reshape(B * S2 * S2, C1)
    acc2 = acc2 + jnp.dot(patch.astype(CDT), w2_ref[k].astype(CDT),
                          preferred_element_type=f32)
  relu2 = jnp.maximum(acc2, 0.0)                               # (B*S2*S2, C2)

  # fused ReLU + 2x2 maxpool -> pooled feature map (B, S3, S3, C2)
  for b in range(B):
    for oh in range(S3):
      base = (b * S2 + 2 * oh) * S2
      blk = relu2[base:base + 2 * S2, :]                       # (2*S2, C2)
      hp = jnp.maximum(blk[:S2, :], blk[S2:, :])
      wp = jnp.maximum(jnp.dot(sel_e2, hp, preferred_element_type=f32),
                       jnp.dot(sel_o2, hp, preferred_element_type=f32))
      feat_ref[b, oh, :, :] = wp                               # (S3, C2)

  # image fc:  flatten(NHWC) @ W  ==  sum_s feat[:, s, :] @ W[s]
  feat = feat_ref[...]                                         # (B, S3, S3, C2)
  wifc = wifc_ref[...]                                         # (S3*S3, C2, D)
  img_out = jnp.zeros((B, D), f32) + bifc_ref[...]
  for s in range(S3 * S3):
    oh, ow = divmod(s, S3)
    x_s = feat[:, oh, ow, :]                                   # (B, C2)
    img_out = img_out + jnp.dot(x_s.astype(CDT), wifc[s].astype(CDT),
                                preferred_element_type=f32)

  # -------------------- fusion: cat -> ReLU -> final fc --------------------- #
  t_act = jnp.maximum(text_out, 0.0)
  i_act = jnp.maximum(img_out, 0.0)
  logits = (jnp.dot(t_act.astype(CDT), fcw_ref[0:D, :].astype(CDT),
                    preferred_element_type=f32)
            + jnp.dot(i_act.astype(CDT), fcw_ref[D:2 * D, :].astype(CDT),
                      preferred_element_type=f32)
            + fcb_ref[...])
  out_ref[...] = logits                                        # (B, 128) lane-dense


# ------------------------------- wrapper ----------------------------------- #

def multimodal_forward(params, text, attention_mask, image_nchw):
  """TextRNN + AlexNet-lite CNN + fusion head, fused into one Pallas kernel."""
  del attention_mask                      # unused for the non-BERT text path
  B, T = text.shape
  V, _ = params["embedding"].shape
  H = params["w_hh"].shape[0]
  D = params["tfc_w"].shape[1]
  CIN, S1 = image_nchw.shape[1], image_nchw.shape[2]
  C1 = params["c1_w"].shape[2]
  C2 = params["c2_w"].shape[2]
  NC = params["fc_w"].shape[1]
  NCPAD = 128                             # lane-dense final store
  S2, S3 = S1 // 2, S1 // 4

  # tiny host-side glue: id layout, NHWC + halo pad, lane-pad of the fc head
  ids = jnp.transpose(text, (1, 0)).reshape(T * B, 1).astype(jnp.int32)  # t-major
  img = jnp.transpose(image_nchw, (0, 2, 3, 1)).astype(jnp.float32)
  img = jnp.pad(img, ((0, 0), (1, 1), (1, 1), (0, 0)))                   # halo pad
  fcw = jnp.pad(params["fc_w"].astype(jnp.float32), ((0, 0), (0, NCPAD - NC)))
  fcb = jnp.pad(params["fc_b"].astype(jnp.float32),
                (0, NCPAD - NC)).reshape(1, NCPAD)

  kernel = functools.partial(
      _fused_multimodal_kernel,
      B=B, T=T, V=V, H=H, D=D, CIN=CIN, C1=C1, C2=C2, S1=S1)

  out = pl.pallas_call(
      kernel,
      out_shape=jax.ShapeDtypeStruct((B, NCPAD), jnp.float32),
      in_specs=[VMEM_SPEC] * 16,
      out_specs=VMEM_SPEC,
      scratch_shapes=[
          pltpu.VMEM((B * S1 * S1, C1), jnp.float32),         # conv1 accumulator
          pltpu.VMEM((B, S2 + 2, S2 + 10, C1), jnp.float32),  # halo-padded conv2 in
          pltpu.VMEM((B, S3, S3, C2), jnp.float32),           # pooled conv2 features
      ],
  )(ids,
    params["embedding"], params["w_ih"], params["w_hh"],
    params["b_rnn"].reshape(1, H), params["tfc_w"], params["tfc_b"].reshape(1, D),
    img, params["c1_w"], params["c1_b"].reshape(1, C1),
    params["c2_w"], params["c2_b"].reshape(1, C2),
    params["ifc_w"], params["ifc_b"].reshape(1, D),
    fcw, fcb)
  return out[:, :NC]


# ------------------------------ init & main -------------------------------- #

def init_params(key, vocab_size, embed_dim, hidden_dim, output_dim, num_classes,
                img_channels, conv1_out=16, conv2_out=32, pooled_hw=4):
  ks = jax.random.split(key, 16)

  def nrm(k, shape, scale=0.1):
    return scale * jax.random.normal(k, shape, dtype=jnp.float32)

  return {
      "embedding": nrm(ks[0], (vocab_size, embed_dim)),
      "w_ih": nrm(ks[1], (embed_dim, hidden_dim)),
      "w_hh": nrm(ks[2], (hidden_dim, hidden_dim)),
      "b_rnn": nrm(ks[3], (hidden_dim,)),                  # b_ih + b_hh combined
      "tfc_w": nrm(ks[4], (hidden_dim, output_dim)),
      "tfc_b": nrm(ks[5], (output_dim,)),
      # conv weights stored (9 kernel positions, Cin, Cout).  NOTE: a real
      # PyTorch Conv2d weight (Cout, Cin, 3, 3) must be permuted to this layout.
      "c1_w": nrm(ks[6], (9, img_channels, conv1_out)),
      "c1_b": nrm(ks[7], (conv1_out,)),
      "c2_w": nrm(ks[8], (9, conv1_out, conv2_out)),
      "c2_b": nrm(ks[9], (conv2_out,)),
      # image fc stored (spatial positions, C2, D) = NHWC-flatten order.
      "ifc_w": nrm(ks[10], (pooled_hw * pooled_hw, conv2_out, output_dim)),
      "ifc_b": nrm(ks[11], (output_dim,)),
      "fc_w": nrm(ks[12], (2 * output_dim, num_classes)),
      "fc_b": nrm(ks[13], (num_classes,)),
  }


if __name__ == "__main__":
  # small shapes consistent with the module
  B, T = 2, 8
  vocab_size, text_embed_dim, text_hidden_dim = 50, 32, 32
  output_dim, num_classes = 32, 5
  C, Hh, Ww = 3, 16, 16

  key = jax.random.PRNGKey(0)
  k_par, k_txt, k_img = jax.random.split(key, 3)

  params = init_params(k_par, vocab_size, text_embed_dim, text_hidden_dim,
                       output_dim, num_classes, C)

  text = jax.random.randint(k_txt, (B, T), 0, vocab_size, dtype=jnp.int32)
  attention_mask = jnp.ones((B, T), dtype=jnp.int32)       # unused (non-BERT)
  image = jax.random.normal(k_img, (B, C, Hh, Ww), dtype=jnp.float32)   # NCHW

  out = jax.jit(multimodal_forward)(params, text, attention_mask, image)
  out = jax.block_until_ready(out)
  assert out.shape == (B, num_classes) and out.dtype == jnp.float32
  assert bool(jnp.all(jnp.isfinite(out)))
  print("KERNEL_OK")
</pallas_src>

<mosaic_0001>
module attributes {stable_mosaic.version = 11 : i64} {
  func.func @_fused_multimodal_kernel(%arg0: memref<16x1xi32, #tpu.memory_space<vmem>>, %arg1: memref<50x32xf32, #tpu.memory_space<vmem>>, %arg2: memref<32x32xf32, #tpu.memory_space<vmem>>, %arg3: memref<32x32xf32, #tpu.memory_space<vmem>>, %arg4: memref<1x32xf32, #tpu.memory_space<vmem>>, %arg5: memref<32x32xf32, #tpu.memory_space<vmem>>, %arg6: memref<1x32xf32, #tpu.memory_space<vmem>>, %arg7: memref<2x18x18x3xf32, #tpu.memory_space<vmem>>, %arg8: memref<9x3x16xf32, #tpu.memory_space<vmem>>, %arg9: memref<1x16xf32, #tpu.memory_space<vmem>>, %arg10: memref<9x16x32xf32, #tpu.memory_space<vmem>>, %arg11: memref<1x32xf32, #tpu.memory_space<vmem>>, %arg12: memref<16x32x32xf32, #tpu.memory_space<vmem>>, %arg13: memref<1x32xf32, #tpu.memory_space<vmem>>, %arg14: memref<64x128xf32, #tpu.memory_space<vmem>>, %arg15: memref<1x128xf32, #tpu.memory_space<vmem>>, %arg16: memref<2x128xf32, #tpu.memory_space<vmem>>, %arg17: memref<512x16xf32, #tpu.memory_space<vmem>>, %arg18: memref<2x10x18x16xf32, #tpu.memory_space<vmem>>, %arg19: memref<2x4x4x32xf32, #tpu.memory_space<vmem>>) attributes {dimension_semantics = [], scalar_prefetch = 0 : i64, scratch_operands = 3 : i64, tpu.core_type = #tpu.core_type<tc>} {
    %c0 = arith.constant 0 : index
    %c0_0 = arith.constant 0 : index
    %0 = vector.load %arg0[%c0, %c0_0] : memref<16x1xi32, #tpu.memory_space<vmem>>, vector<16x1xi32>
    %1 = tpu.iota {dimensions = array<i32: 1>} : vector<16x50xi32>
    %2 = vector.broadcast %0 : vector<16x1xi32> to vector<16x50xi32>
    %3 = arith.cmpi eq, %1, %2 : vector<16x50xi32>
    %4 = arith.extui %3 : vector<16x50xi1> to vector<16x50xi32>
    %5 = arith.sitofp %4 : vector<16x50xi32> to vector<16x50xf32>
    %c0_1 = arith.constant 0 : index
    %c0_2 = arith.constant 0 : index
    %6 = vector.load %arg1[%c0_1, %c0_2] : memref<50x32xf32, #tpu.memory_space<vmem>>, vector<50x32xf32>
    %cst = arith.constant dense<0.000000e+00> : vector<16x32xf32>
    %7 = tpu.matmul %5, %6, %cst {dimension_numbers = #tpu.dot_dimension_numbers<[1], [0], [0], [1], [0, 0, 1, 1], [], []>} : vector<16x50xf32>, vector<50x32xf32>, vector<16x32xf32> -> vector<16x32xf32>
    %8 = arith.truncf %7 : vector<16x32xf32> to vector<16x32xbf16>
    %c0_3 = arith.constant 0 : index
    %c0_4 = arith.constant 0 : index
    %9 = vector.load %arg2[%c0_3, %c0_4] : memref<32x32xf32, #tpu.memory_space<vmem>>, vector<32x32xf32>
    %10 = arith.truncf %9 : vector<32x32xf32> to vector<32x32xbf16>
    %cst_5 = arith.constant dense<0.000000e+00> : vector<16x32xf32>
    %11 = tpu.matmul %8, %10, %cst_5 {dimension_numbers = #tpu.dot_dimension_numbers<[1], [0], [0], [1], [0, 0, 1, 1], [], []>} : vector<16x32xbf16>, vector<32x32xbf16>, vector<16x32xf32> -> vector<16x32xf32>
    %c0_6 = arith.constant 0 : index
    %c0_7 = arith.constant 0 : index
    %12 = vector.load %arg4[%c0_6, %c0_7] : memref<1x32xf32, #tpu.memory_space<vmem>>, vector<1x32xf32>
    %13 = vector.broadcast %12 : vector<1x32xf32> to vector<16x32xf32>
    %14 = arith.addf %11, %13 : vector<16x32xf32>
    %c0_8 = arith.constant 0 : index
    %c0_9 = arith.constant 0 : index
    %15 = vector.load %arg3[%c0_8, %c0_9] : memref<32x32xf32, #tpu.memory_space<vmem>>, vector<32x32xf32>
    %16 = arith.truncf %15 : vector<32x32xf32> to vector<32x32xbf16>
    %cst_10 = arith.constant 0.000000e+00 : f32
    %17 = vector.broadcast %cst_10 : f32 to vector<2x32xf32>
    %18 = vector.extract_strided_slice %14 {offsets = [0, 0], sizes = [2, 32], strides = [1, 1]} : vector<16x32xf32> to vector<2x32xf32>
    %19 = arith.truncf %17 : vector<2x32xf32> to vector<2x32xbf16>
    %cst_11 = arith.constant dense<0.000000e+00> : vector<2x32xf32>
    %20 = tpu.matmul %19, %16, %cst_11 {dimension_numbers = #tpu.dot_dimension_numbers<[1], [0], [0], [1], [0, 0, 1, 1], [], []>} : vector<2x32xbf16>, vector<32x32xbf16>, vector<2x32xf32> -> vector<2x32xf32>
    %21 = arith.addf %18, %20 : vector<2x32xf32>
    %22 = math.tanh %21 : vector<2x32xf32>
    %23 = vector.extract_strided_slice %14 {offsets = [2, 0], sizes = [2, 32], strides = [1, 1]} : vector<16x32xf32> to vector<2x32xf32>
    %24 = arith.truncf %22 : vector<2x32xf32> to vector<2x32xbf16>
    %cst_12 = arith.constant dense<0.000000e+00> : vector<2x32xf32>
    %25 = tpu.matmul %24, %16, %cst_12 {dimension_numbers = #tpu.dot_dimension_numbers<[1], [0], [0], [1], [0, 0, 1, 1], [], []>} : vector<2x32xbf16>, vector<32x32xbf16>, vector<2x32xf32> -> vector<2x32xf32>
    %26 = arith.addf %23, %25 : vector<2x32xf32>
    %27 = math.tanh %26 : vector<2x32xf32>
    %28 = vector.extract_strided_slice %14 {offsets = [4, 0], sizes = [2, 32], strides = [1, 1]} : vector<16x32xf32> to vector<2x32xf32>
    %29 = arith.truncf %27 : vector<2x32xf32> to vector<2x32xbf16>
    %cst_13 = arith.constant dense<0.000000e+00> : vector<2x32xf32>
    %30 = tpu.matmul %29, %16, %cst_13 {dimension_numbers = #tpu.dot_dimension_numbers<[1], [0], [0], [1], [0, 0, 1, 1], [], []>} : vector<2x32xbf16>, vector<32x32xbf16>, vector<2x32xf32> -> vector<2x32xf32>
    %31 = arith.addf %28, %30 : vector<2x32xf32>
    %32 = math.tanh %31 : vector<2x32xf32>
    %33 = vector.extract_strided_slice %14 {offsets = [6, 0], sizes = [2, 32], strides = [1, 1]} : vector<16x32xf32> to vector<2x32xf32>
    %34 = arith.truncf %32 : vector<2x32xf32> to vector<2x32xbf16>
    %cst_14 = arith.constant dense<0.000000e+00> : vector<2x32xf32>
    %35 = tpu.matmul %34, %16, %cst_14 {dimension_numbers = #tpu.dot_dimension_numbers<[1], [0], [0], [1], [0, 0, 1, 1], [], []>} : vector<2x32xbf16>, vector<32x32xbf16>, vector<2x32xf32> -> vector<2x32xf32>
    %36 = arith.addf %33, %35 : vector<2x32xf32>
    %37 = math.tanh %36 : vector<2x32xf32>
    %38 = vector.extract_strided_slice %14 {offsets = [8, 0], sizes = [2, 32], strides = [1, 1]} : vector<16x32xf32> to vector<2x32xf32>
    %39 = arith.truncf %37 : vector<2x32xf32> to vector<2x32xbf16>
    %cst_15 = arith.constant dense<0.000000e+00> : vector<2x32xf32>
    %40 = tpu.matmul %39, %16, %cst_15 {dimension_numbers = #tpu.dot_dimension_numbers<[1], [0], [0], [1], [0, 0, 1, 1], [], []>} : vector<2x32xbf16>, vector<32x32xbf16>, vector<2x32xf32> -> vector<2x32xf32>
    %41 = arith.addf %38, %40 : vector<2x32xf32>
    %42 = math.tanh %41 : vector<2x32xf32>
    %43 = vector.extract_strided_slice %14 {offsets = [10, 0], sizes = [2, 32], strides = [1, 1]} : vector<16x32xf32> to vector<2x32xf32>
    %44 = arith.truncf %42 : vector<2x32xf32> to vector<2x32xbf16>
    %cst_16 = arith.constant dense<0.000000e+00> : vector<2x32xf32>
    %45 = tpu.matmul %44, %16, %cst_16 {dimension_numbers = #tpu.dot_dimension_numbers<[1], [0], [0], [1], [0, 0, 1, 1], [], []>} : vector<2x32xbf16>, vector<32x32xbf16>, vector<2x32xf32> -> vector<2x32xf32>
    %46 = arith.addf %43, %45 : vector<2x32xf32>
    %47 = math.tanh %46 : vector<2x32xf32>
    %48 = vector.extract_strided_slice %14 {offsets = [12, 0], sizes = [2, 32], strides = [1, 1]} : vector<16x32xf32> to vector<2x32xf32>
    %49 = arith.truncf %47 : vector<2x32xf32> to vector<2x32xbf16>
    %cst_17 = arith.constant dense<0.000000e+00> : vector<2x32xf32>
    %50 = tpu.matmul %49, %16, %cst_17 {dimension_numbers = #tpu.dot_dimension_numbers<[1], [0], [0], [1], [0, 0, 1, 1], [], []>} : vector<2x32xbf16>, vector<32x32xbf16>, vector<2x32xf32> -> vector<2x32xf32>
    %51 = arith.addf %48, %50 : vector<2x32xf32>
    %52 = math.tanh %51 : vector<2x32xf32>
    %53 = vector.extract_strided_slice %14 {offsets = [14, 0], sizes = [2, 32], strides = [1, 1]} : vector<16x32xf32> to vector<2x32xf32>
    %54 = arith.truncf %52 : vector<2x32xf32> to vector<2x32xbf16>
    %cst_18 = arith.constant dense<0.000000e+00> : vector<2x32xf32>
    %55 = tpu.matmul %54, %16, %cst_18 {dimension_numbers = #tpu.dot_dimension_numbers<[1], [0], [0], [1], [0, 0, 1, 1], [], []>} : vector<2x32xbf16>, vector<32x32xbf16>, vector<2x32xf32> -> vector<2x32xf32>
    %56 = arith.addf %53, %55 : vector<2x32xf32>
    %57 = math.tanh %56 : vector<2x32xf32>
    %58 = arith.truncf %57 : vector<2x32xf32> to vector<2x32xbf16>
    %c0_19 = arith.constant 0 : index
    %c0_20 = arith.constant 0 : index
    %59 = vector.load %arg5[%c0_19, %c0_20] : memref<32x32xf32, #tpu.memory_space<vmem>>, vector<32x32xf32>
    %60 = arith.truncf %59 : vector<32x32xf32> to vector<32x32xbf16>
    %cst_21 = arith.constant dense<0.000000e+00> : vector<2x32xf32>
    %61 = tpu.matmul %58, %60, %cst_21 {dimension_numbers = #tpu.dot_dimension_numbers<[1], [0], [0], [1], [0, 0, 1, 1], [], []>} : vector<2x32xbf16>, vector<32x32xbf16>, vector<2x32xf32> -> vector<2x32xf32>
    %c0_22 = arith.constant 0 : index
    %c0_23 = arith.constant 0 : index
    %62 = vector.load %arg6[%c0_22, %c0_23] : memref<1x32xf32, #tpu.memory_space<vmem>>, vector<1x32xf32>
    %63 = vector.broadcast %62 : vector<1x32xf32> to vector<2x32xf32>
    %64 = arith.addf %61, %63 : vector<2x32xf32>
    %65 = tpu.iota {dimensions = array<i32: 0>} : vector<8x16xi32>
    %66 = tpu.iota {dimensions = array<i32: 1>} : vector<8x16xi32>
    %c2_i32 = arith.constant 2 : i32
    %67 = vector.broadcast %c2_i32 : i32 to vector<8x16xi32>
    %68 = arith.muli %67, %65 : vector<8x16xi32>
    %69 = arith.cmpi eq, %66, %68 : vector<8x16xi32>
    %70 = arith.extui %69 : vector<8x16xi1> to vector<8x16xi32>
    %71 = arith.sitofp %70 : vector<8x16xi32> to vector<8x16xf32>
    %c2_i32_24 = arith.constant 2 : i32
    %72 = vector.broadcast %c2_i32_24 : i32 to vector<8x16xi32>
    %73 = arith.muli %72, %65 : vector<8x16xi32>
    %c1_i32 = arith.constant 1 : i32
    %74 = vector.broadcast %c1_i32 : i32 to vector<8x16xi32>
    %75 = arith.addi %73, %74 : vector<8x16xi32>
    %76 = arith.cmpi eq, %66, %75 : vector<8x16xi32>
    %77 = arith.extui %76 : vector<8x16xi1> to vector<8x16xi32>
    %78 = arith.sitofp %77 : vector<8x16xi32> to vector<8x16xf32>
    %79 = vector.extract_strided_slice %71 {offsets = [0, 0], sizes = [4, 8], strides = [1, 1]} : vector<8x16xf32> to vector<4x8xf32>
    %80 = vector.extract_strided_slice %78 {offsets = [0, 0], sizes = [4, 8], strides = [1, 1]} : vector<8x16xf32> to vector<4x8xf32>
    %cst_25 = arith.constant 0.000000e+00 : f32
    %81 = vector.broadcast %cst_25 : f32 to vector<512x16xf32>
    %c0_26 = arith.constant 0 : index
    %c0_27 = arith.constant 0 : index
    %82 = vector.load %arg9[%c0_26, %c0_27] : memref<1x16xf32, #tpu.memory_space<vmem>>, vector<1x16xf32>
    %83 = vector.broadcast %82 : vector<1x16xf32> to vector<512x16xf32>
    %84 = arith.addf %81, %83 : vector<512x16xf32>
    %c0_28 = arith.constant 0 : index
    %c0_29 = arith.constant 0 : index
    %85 = vector.load %arg17[%c0_28, %c0_29] : memref<512x16xf32, #tpu.memory_space<vmem>>, vector<512x16xf32>
    tpu.vector_store %arg17[%c0_28, %c0_29], %84 {strides = array<i32>} : memref<512x16xf32, #tpu.memory_space<vmem>>, vector<512x16xf32>,
    %c0_30 = arith.constant 0 : index
    %c0_31 = arith.constant 0 : index
    %c0_32 = arith.constant 0 : index
    %c0_33 = arith.constant 0 : index
    %86 = vector.load %arg7[%c0_30, %c0_31, %c0_32, %c0_33] : memref<2x18x18x3xf32, #tpu.memory_space<vmem>>, vector<2x16x16x3xf32>
    %87 = vector.shape_cast %86 : vector<2x16x16x3xf32> to vector<512x3xf32>
    %c0_34 = arith.constant 0 : index
    %c0_35 = arith.constant 0 : index
    %88 = vector.load %arg17[%c0_34, %c0_35] : memref<512x16xf32, #tpu.memory_space<vmem>>, vector<512x16xf32>
    %89 = arith.truncf %87 : vector<512x3xf32> to vector<512x3xbf16>
    %c0_36 = arith.constant 0 : index
    %c0_37 = arith.constant 0 : index
    %c0_38 = arith.constant 0 : index
    %90 = vector.load %arg8[%c0_36, %c0_37, %c0_38] : memref<9x3x16xf32, #tpu.memory_space<vmem>>, vector<1x3x16xf32>
    %91 = vector.shape_cast %90 : vector<1x3x16xf32> to vector<3x16xf32>
    %92 = arith.truncf %91 : vector<3x16xf32> to vector<3x16xbf16>
    %cst_39 = arith.constant dense<0.000000e+00> : vector<512x16xf32>
    %93 = tpu.matmul %89, %92, %cst_39 {dimension_numbers = #tpu.dot_dimension_numbers<[1], [0], [0], [1], [0, 0, 1, 1], [], []>} : vector<512x3xbf16>, vector<3x16xbf16>, vector<512x16xf32> -> vector<512x16xf32>
    %94 = arith.addf %88, %93 : vector<512x16xf32>
    %c0_40 = arith.constant 0 : index
    %c0_41 = arith.constant 0 : index
    %95 = vector.load %arg17[%c0_40, %c0_41] : memref<512x16xf32, #tpu.memory_space<vmem>>, vector<512x16xf32>
    tpu.vector_store %arg17[%c0_40, %c0_41], %94 {strides = array<i32>} : memref<512x16xf32, #tpu.memory_space<vmem>>, vector<512x16xf32>,
    %c0_42 = arith.constant 0 : index
    %c0_43 = arith.constant 0 : index
    %c1 = arith.constant 1 : index
    %c0_44 = arith.constant 0 : index
    %96 = vector.load %arg7[%c0_42, %c0_43, %c1, %c0_44] : memref<2x18x18x3xf32, #tpu.memory_space<vmem>>, vector<2x16x16x3xf32>
    %97 = vector.shape_cast %96 : vector<2x16x16x3xf32> to vector<512x3xf32>
    %c0_45 = arith.constant 0 : index
    %c0_46 = arith.constant 0 : index
    %98 = vector.load %arg17[%c0_45, %c0_46] : memref<512x16xf32, #tpu.memory_space<vmem>>, vector<512x16xf32>
    %99 = arith.truncf %97 : vector<512x3xf32> to vector<512x3xbf16>
    %c1_47 = arith.constant 1 : index
    %c0_48 = arith.constant 0 : index
    %c0_49 = arith.constant 0 : index
    %100 = vector.load %arg8[%c1_47, %c0_48, %c0_49] : memref<9x3x16xf32, #tpu.memory_space<vmem>>, vector<1x3x16xf32>
    %101 = vector.shape_cast %100 : vector<1x3x16xf32> to vector<3x16xf32>
    %102 = arith.truncf %101 : vector<3x16xf32> to vector<3x16xbf16>
    %cst_50 = arith.constant dense<0.000000e+00> : vector<512x16xf32>
    %103 = tpu.matmul %99, %102, %cst_50 {dimension_numbers = #tpu.dot_dimension_numbers<[1], [0], [0], [1], [0, 0, 1, 1], [], []>} : vector<512x3xbf16>, vector<3x16xbf16>, vector<512x16xf32> -> vector<512x16xf32>
    %104 = arith.addf %98, %103 : vector<512x16xf32>
    %c0_51 = arith.constant 0 : index
    %c0_52 = arith.constant 0 : index
    %105 = vector.load %arg17[%c0_51, %c0_52] : memref<512x16xf32, #tpu.memory_space<vmem>>, vector<512x16xf32>
    tpu.vector_store %arg17[%c0_51, %c0_52], %104 {strides = array<i32>} : memref<512x16xf32, #tpu.memory_space<vmem>>, vector<512x16xf32>,
    %c0_53 = arith.constant 0 : index
    %c0_54 = arith.constant 0 : index
    %c2 = arith.constant 2 : index
    %c0_55 = arith.constant 0 : index
    %106 = vector.load %arg7[%c0_53, %c0_54, %c2, %c0_55] : memref<2x18x18x3xf32, #tpu.memory_space<vmem>>, vector<2x16x16x3xf32>
    %107 = vector.shape_cast %106 : vector<2x16x16x3xf32> to vector<512x3xf32>
    %c0_56 = arith.constant 0 : index
    %c0_57 = arith.constant 0 : index
    %108 = vector.load %arg17[%c0_56, %c0_57] : memref<512x16xf32, #tpu.memory_space<vmem>>, vector<512x16xf32>
    %109 = arith.truncf %107 : vector<512x3xf32> to vector<512x3xbf16>
    %c2_58 = arith.constant 2 : index
    %c0_59 = arith.constant 0 : index
    %c0_60 = arith.constant 0 : index
    %110 = vector.load %arg8[%c2_58, %c0_59, %c0_60] : memref<9x3x16xf32, #tpu.memory_space<vmem>>, vector<1x3x16xf32>
    %111 = vector.shape_cast %110 : vector<1x3x16xf32> to vector<3x16xf32>
    %112 = arith.truncf %111 : vector<3x16xf32> to vector<3x16xbf16>
    %cst_61 = arith.constant dense<0.000000e+00> : vector<512x16xf32>
    %113 = tpu.matmul %109, %112, %cst_61 {dimension_numbers = #tpu.dot_dimension_numbers<[1], [0], [0], [1], [0, 0, 1, 1], [], []>} : vector<512x3xbf16>, vector<3x16xbf16>, vector<512x16xf32> -> vector<512x16xf32>
    %114 = arith.addf %108, %113 : vector<512x16xf32>
    %c0_62 = arith.constant 0 : index
    %c0_63 = arith.constant 0 : index
    %115 = vector.load %arg17[%c0_62, %c0_63] : memref<512x16xf32, #tpu.memory_space<vmem>>, vector<512x16xf32>
    tpu.vector_store %arg17[%c0_62, %c0_63], %114 {strides = array<i32>} : memref<512x16xf32, #tpu.memory_space<vmem>>, vector<512x16xf32>,
    %c0_64 = arith.constant 0 : index
    %c1_65 = arith.constant 1 : index
    %c0_66 = arith.constant 0 : index
    %c0_67 = arith.constant 0 : index
    %116 = vector.load %arg7[%c0_64, %c1_65, %c0_66, %c0_67] : memref<2x18x18x3xf32, #tpu.memory_space<vmem>>, vector<2x16x16x3xf32>
    %117 = vector.shape_cast %116 : vector<2x16x16x3xf32> to vector<512x3xf32>
    %c0_68 = arith.constant 0 : index
    %c0_69 = arith.constant 0 : index
    %118 = vector.load %arg17[%c0_68, %c0_69] : memref<512x16xf32, #tpu.memory_space<vmem>>, vector<512x16xf32>
    %119 = arith.truncf %117 : vector<512x3xf32> to vector<512x3xbf16>
    %c3 = arith.constant 3 : index
    %c0_70 = arith.constant 0 : index
    %c0_71 = arith.constant 0 : index
    %120 = vector.load %arg8[%c3, %c0_70, %c0_71] : memref<9x3x16xf32, #tpu.memory_space<vmem>>, vector<1x3x16xf32>
    %121 = vector.shape_cast %120 : vector<1x3x16xf32> to vector<3x16xf32>
    %122 = arith.truncf %121 : vector<3x16xf32> to vector<3x16xbf16>
    %cst_72 = arith.constant dense<0.000000e+00> : vector<512x16xf32>
    %123 = tpu.matmul %119, %122, %cst_72 {dimension_numbers = #tpu.dot_dimension_numbers<[1], [0], [0], [1], [0, 0, 1, 1], [], []>} : vector<512x3xbf16>, vector<3x16xbf16>, vector<512x16xf32> -> vector<512x16xf32>
    %124 = arith.addf %118, %123 : vector<512x16xf32>
    %c0_73 = arith.constant 0 : index
    %c0_74 = arith.constant 0 : index
    %125 = vector.load %arg17[%c0_73, %c0_74] : memref<512x16xf32, #tpu.memory_space<vmem>>, vector<512x16xf32>
    tpu.vector_store %arg17[%c0_73, %c0_74], %124 {strides = array<i32>} : memref<512x16xf32, #tpu.memory_space<vmem>>, vector<512x16xf32>,
    %c0_75 = arith.constant 0 : index
    %c1_76 = arith.constant 1 : index
    %c1_77 = arith.constant 1 : index
    %c0_78 = arith.constant 0 : index
    %126 = vector.load %arg7[%c0_75, %c1_76, %c1_77, %c0_78] : memref<2x18x18x3xf32, #tpu.memory_space<vmem>>, vector<2x16x16x3xf32>
    %127 = vector.shape_cast %126 : vector<2x16x16x3xf32> to vector<512x3xf32>
    %c0_79 = arith.constant 0 : index
    %c0_80 = arith.constant 0 : index
    %128 = vector.load %arg17[%c0_79, %c0_80] : memref<512x16xf32, #tpu.memory_space<vmem>>, vector<512x16xf32>
    %129 = arith.truncf %127 : vector<512x3xf32> to vector<512x3xbf16>
    %c4 = arith.constant 4 : index
    %c0_81 = arith.constant 0 : index
    %c0_82 = arith.constant 0 : index
    %130 = vector.load %arg8[%c4, %c0_81, %c0_82] : memref<9x3x16xf32, #tpu.memory_space<vmem>>, vector<1x3x16xf32>
    %131 = vector.shape_cast %130 : vector<1x3x16xf32> to vector<3x16xf32>
    %132 = arith.truncf %131 : vector<3x16xf32> to vector<3x16xbf16>
    %cst_83 = arith.constant dense<0.000000e+00> : vector<512x16xf32>
    %133 = tpu.matmul %129, %132, %cst_83 {dimension_numbers = #tpu.dot_dimension_numbers<[1], [0], [0], [1], [0, 0, 1, 1], [], []>} : vector<512x3xbf16>, vector<3x16xbf16>, vector<512x16xf32> -> vector<512x16xf32>
    %134 = arith.addf %128, %133 : vector<512x16xf32>
    %c0_84 = arith.constant 0 : index
    %c0_85 = arith.constant 0 : index
    %135 = vector.load %arg17[%c0_84, %c0_85] : memref<512x16xf32, #tpu.memory_space<vmem>>, vector<512x16xf32>
    tpu.vector_store %arg17[%c0_84, %c0_85], %134 {strides = array<i32>} : memref<512x16xf32, #tpu.memory_space<vmem>>, vector<512x16xf32>,
    %c0_86 = arith.constant 0 : index
    %c1_87 = arith.constant 1 : index
    %c2_88 = arith.constant 2 : index
    %c0_89 = arith.constant 0 : index
    %136 = vector.load %arg7[%c0_86, %c1_87, %c2_88, %c0_89] : memref<2x18x18x3xf32, #tpu.memory_space<vmem>>, vector<2x16x16x3xf32>
    %137 = vector.shape_cast %136 : vector<2x16x16x3xf32> to vector<512x3xf32>
    %c0_90 = arith.constant 0 : index
    %c0_91 = arith.constant 0 : index
    %138 = vector.load %arg17[%c0_90, %c0_91] : memref<512x16xf32, #tpu.memory_space<vmem>>, vector<512x16xf32>
    %139 = arith.truncf %137 : vector<512x3xf32> to vector<512x3xbf16>
    %c5 = arith.constant 5 : index
    %c0_92 = arith.constant 0 : index
    %c0_93 = arith.constant 0 : index
    %140 = vector.load %arg8[%c5, %c0_92, %c0_93] : memref<9x3x16xf32, #tpu.memory_space<vmem>>, vector<1x3x16xf32>
    %141 = vector.shape_cast %140 : vector<1x3x16xf32> to vector<3x16xf32>
    %142 = arith.truncf %141 : vector<3x16xf32> to vector<3x16xbf16>
    %cst_94 = arith.constant dense<0.000000e+00> : vector<512x16xf32>
    %143 = tpu.matmul %139, %142, %cst_94 {dimension_numbers = #tpu.dot_dimension_numbers<[1], [0], [0], [1], [0, 0, 1, 1], [], []>} : vector<512x3xbf16>, vector<3x16xbf16>, vector<512x16xf32> -> vector<512x16xf32>
    %144 = arith.addf %138, %143 : vector<512x16xf32>
    %c0_95 = arith.constant 0 : index
    %c0_96 = arith.constant 0 : index
    %145 = vector.load %arg17[%c0_95, %c0_96] : memref<512x16xf32, #tpu.memory_space<vmem>>, vector<512x16xf32>
    tpu.vector_store %arg17[%c0_95, %c0_96], %144 {strides = array<i32>} : memref<512x16xf32, #tpu.memory_space<vmem>>, vector<512x16xf32>,
    %c0_97 = arith.constant 0 : index
    %c2_98 = arith.constant 2 : index
    %c0_99 = arith.constant 0 : index
    %c0_100 = arith.constant 0 : index
    %146 = vector.load %arg7[%c0_97, %c2_98, %c0_99, %c0_100] : memref<2x18x18x3xf32, #tpu.memory_space<vmem>>, vector<2x16x16x3xf32>
    %147 = vector.shape_cast %146 : vector<2x16x16x3xf32> to vector<512x3xf32>
    %c0_101 = arith.constant 0 : index
    %c0_102 = arith.constant 0 : index
    %148 = vector.load %arg17[%c0_101, %c0_102] : memref<512x16xf32, #tpu.memory_space<vmem>>, vector<512x16xf32>
    %149 = arith.truncf %147 : vector<512x3xf32> to vector<512x3xbf16>
    %c6 = arith.constant 6 : index
    %c0_103 = arith.constant 0 : index
    %c0_104 = arith.constant 0 : index
    %150 = vector.load %arg8[%c6, %c0_103, %c0_104] : memref<9x3x16xf32, #tpu.memory_space<vmem>>, vector<1x3x16xf32>
    %151 = vector.shape_cast %150 : vector<1x3x16xf32> to vector<3x16xf32>
    %152 = arith.truncf %151 : vector<3x16xf32> to vector<3x16xbf16>
    %cst_105 = arith.constant dense<0.000000e+00> : vector<512x16xf32>
    %153 = tpu.matmul %149, %152, %cst_105 {dimension_numbers = #tpu.dot_dimension_numbers<[1], [0], [0], [1], [0, 0, 1, 1], [], []>} : vector<512x3xbf16>, vector<3x16xbf16>, vector<512x16xf32> -> vector<512x16xf32>
    %154 = arith.addf %148, %153 : vector<512x16xf32>
    %c0_106 = arith.constant 0 : index
    %c0_107 = arith.constant 0 : index
    %155 = vector.load %arg17[%c0_106, %c0_107] : memref<512x16xf32, #tpu.memory_space<vmem>>, vector<512x16xf32>
    tpu.vector_store %arg17[%c0_106, %c0_107], %154 {strides = array<i32>} : memref<512x16xf32, #tpu.memory_space<vmem>>, vector<512x16xf32>,
    %c0_108 = arith.constant 0 : index
    %c2_109 = arith.constant 2 : index
    %c1_110 = arith.constant 1 : index
    %c0_111 = arith.constant 0 : index
    %156 = vector.load %arg7[%c0_108, %c2_109, %c1_110, %c0_111] : memref<2x18x18x3xf32, #tpu.memory_space<vmem>>, vector<2x16x16x3xf32>
    %157 = vector.shape_cast %156 : vector<2x16x16x3xf32> to vector<512x3xf32>
    %c0_112 = arith.constant 0 : index
    %c0_113 = arith.constant 0 : index
    %158 = vector.load %arg17[%c0_112, %c0_113] : memref<512x16xf32, #tpu.memory_space<vmem>>, vector<512x16xf32>
    %159 = arith.truncf %157 : vector<512x3xf32> to vector<512x3xbf16>
    %c7 = arith.constant 7 : index
    %c0_114 = arith.constant 0 : index
    %c0_115 = arith.constant 0 : index
    %160 = vector.load %arg8[%c7, %c0_114, %c0_115] : memref<9x3x16xf32, #tpu.memory_space<vmem>>, vector<1x3x16xf32>
    %161 = vector.shape_cast %160 : vector<1x3x16xf32> to vector<3x16xf32>
    %162 = arith.truncf %161 : vector<3x16xf32> to vector<3x16xbf16>
    %cst_116 = arith.constant dense<0.000000e+00> : vector<512x16xf32>
    %163 = tpu.matmul %159, %162, %cst_116 {dimension_numbers = #tpu.dot_dimension_numbers<[1], [0], [0], [1], [0, 0, 1, 1], [], []>} : vector<512x3xbf16>, vector<3x16xbf16>, vector<512x16xf32> -> vector<512x16xf32>
    %164 = arith.addf %158, %163 : vector<512x16xf32>
    %c0_117 = arith.constant 0 : index
    %c0_118 = arith.constant 0 : index
    %165 = vector.load %arg17[%c0_117, %c0_118] : memref<512x16xf32, #tpu.memory_space<vmem>>, vector<512x16xf32>
    tpu.vector_store %arg17[%c0_117, %c0_118], %164 {strides = array<i32>} : memref<512x16xf32, #tpu.memory_space<vmem>>, vector<512x16xf32>,
    %c0_119 = arith.constant 0 : index
    %c2_120 = arith.constant 2 : index
    %c2_121 = arith.constant 2 : index
    %c0_122 = arith.constant 0 : index
    %166 = vector.load %arg7[%c0_119, %c2_120, %c2_121, %c0_122] : memref<2x18x18x3xf32, #tpu.memory_space<vmem>>, vector<2x16x16x3xf32>
    %167 = vector.shape_cast %166 : vector<2x16x16x3xf32> to vector<512x3xf32>
    %c0_123 = arith.constant 0 : index
    %c0_124 = arith.constant 0 : index
    %168 = vector.load %arg17[%c0_123, %c0_124] : memref<512x16xf32, #tpu.memory_space<vmem>>, vector<512x16xf32>
    %169 = arith.truncf %167 : vector<512x3xf32> to vector<512x3xbf16>
    %c8 = arith.constant 8 : index
    %c0_125 = arith.constant 0 : index
    %c0_126 = arith.constant 0 : index
    %170 = vector.load %arg8[%c8, %c0_125, %c0_126] : memref<9x3x16xf32, #tpu.memory_space<vmem>>, vector<1x3x16xf32>
    %171 = vector.shape_cast %170 : vector<1x3x16xf32> to vector<3x16xf32>
    %172 = arith.truncf %171 : vector<3x16xf32> to vector<3x16xbf16>
    %cst_127 = arith.constant dense<0.000000e+00> : vector<512x16xf32>
    %173 = tpu.matmul %169, %172, %cst_127 {dimension_numbers = #tpu.dot_dimension_numbers<[1], [0], [0], [1], [0, 0, 1, 1], [], []>} : vector<512x3xbf16>, vector<3x16xbf16>, vector<512x16xf32> -> vector<512x16xf32>
    %174 = arith.addf %168, %173 : vector<512x16xf32>
    %c0_128 = arith.constant 0 : index
    %c0_129 = arith.constant 0 : index
    %175 = vector.load %arg17[%c0_128, %c0_129] : memref<512x16xf32, #tpu.memory_space<vmem>>, vector<512x16xf32>
    tpu.vector_store %arg17[%c0_128, %c0_129], %174 {strides = array<i32>} : memref<512x16xf32, #tpu.memory_space<vmem>>, vector<512x16xf32>,
    %cst_130 = arith.constant 0.000000e+00 : f32
    %176 = vector.broadcast %cst_130 : f32 to vector<2x10x18x16xf32>
    %c0_131 = arith.constant 0 : index
    %c0_132 = arith.constant 0 : index
    %c0_133 = arith.constant 0 : index
    %c0_134 = arith.constant 0 : index
    %177 = vector.load %arg18[%c0_131, %c0_132, %c0_133, %c0_134] : memref<2x10x18x16xf32, #tpu.memory_space<vmem>>, vector<2x10x18x16xf32>
    tpu.vector_store %arg18[%c0_131, %c0_132, %c0_133, %c0_134], %176 {strides = array<i32>} : memref<2x10x18x16xf32, #tpu.memory_space<vmem>>, vector<2x10x18x16xf32>,
    %c0_135 = arith.constant 0 : index
    %c0_136 = arith.constant 0 : index
    %178 = vector.load %arg17[%c0_135, %c0_136] : memref<512x16xf32, #tpu.memory_space<vmem>>, vector<32x16xf32>
    %cst_137 = arith.constant 0.000000e+00 : f32
    %179 = vector.broadcast %cst_137 : f32 to vector<32x16xf32>
    %180 = arith.maximumf %178, %179 : vector<32x16xf32>
    %181 = vector.extract_strided_slice %180 {offsets = [0, 0], sizes = [16, 16], strides = [1, 1]} : vector<32x16xf32> to vector<16x16xf32>
    %182 = vector.extract_strided_slice %180 {offsets = [16, 0], sizes = [16, 16], strides = [1, 1]} : vector<32x16xf32> to vector<16x16xf32>
    %183 = arith.maximumf %181, %182 : vector<16x16xf32>
    %cst_138 = arith.constant dense<0.000000e+00> : vector<8x16xf32>
    %184 = tpu.matmul %71, %183, %cst_138 {dimension_numbers = #tpu.dot_dimension_numbers<[1], [0], [0], [1], [0, 0, 1, 1], [], []>} : vector<8x16xf32>, vector<16x16xf32>, vector<8x16xf32> -> vector<8x16xf32>
    %cst_139 = arith.constant dense<0.000000e+00> : vector<8x16xf32>
    %185 = tpu.matmul %78, %183, %cst_139 {dimension_numbers = #tpu.dot_dimension_numbers<[1], [0], [0], [1], [0, 0, 1, 1], [], []>} : vector<8x16xf32>, vector<16x16xf32>, vector<8x16xf32> -> vector<8x16xf32>
    %186 = arith.maximumf %184, %185 : vector<8x16xf32>
    %c0_140 = arith.constant 0 : index
    %c1_141 = arith.constant 1 : index
    %c8_142 = arith.constant 8 : index
    %c0_143 = arith.constant 0 : index
    %187 = vector.load %arg18[%c0_140, %c1_141, %c8_142, %c0_143] : memref<2x10x18x16xf32, #tpu.memory_space<vmem>>, vector<1x1x8x16xf32>
    %188 = vector.shape_cast %187 : vector<1x1x8x16xf32> to vector<8x16xf32>
    %189 = vector.shape_cast %186 : vector<8x16xf32> to vector<1x1x8x16xf32>
    tpu.vector_store %arg18[%c0_140, %c1_141, %c8_142, %c0_143], %189 {strides = array<i32>} : memref<2x10x18x16xf32, #tpu.memory_space<vmem>>, vector<1x1x8x16xf32>,
    %c32 = arith.constant 32 : index
    %c0_144 = arith.constant 0 : index
    %190 = vector.load %arg17[%c32, %c0_144] : memref<512x16xf32, #tpu.memory_space<vmem>>, vector<32x16xf32>
    %cst_145 = arith.constant 0.000000e+00 : f32
    %191 = vector.broadcast %cst_145 : f32 to vector<32x16xf32>
    %192 = arith.maximumf %190, %191 : vector<32x16xf32>
    %193 = vector.extract_strided_slice %192 {offsets = [0, 0], sizes = [16, 16], strides = [1, 1]} : vector<32x16xf32> to vector<16x16xf32>
    %194 = vector.extract_strided_slice %192 {offsets = [16, 0], sizes = [16, 16], strides = [1, 1]} : vector<32x16xf32> to vector<16x16xf32>
    %195 = arith.maximumf %193, %194 : vector<16x16xf32>
    %cst_146 = arith.constant dense<0.000000e+00> : vector<8x16xf32>
    %196 = tpu.matmul %71, %195, %cst_146 {dimension_numbers = #tpu.dot_dimension_numbers<[1], [0], [0], [1], [0, 0, 1, 1], [], []>} : vector<8x16xf32>, vector<16x16xf32>, vector<8x16xf32> -> vector<8x16xf32>
    %cst_147 = arith.constant dense<0.000000e+00> : vector<8x16xf32>
    %197 = tpu.matmul %78, %195, %cst_147 {dimension_numbers = #tpu.dot_dimension_numbers<[1], [0], [0], [1], [0, 0, 1, 1], [], []>} : vector<8x16xf32>, vector<16x16xf32>, vector<8x16xf32> -> vector<8x16xf32>
    %198 = arith.maximumf %196, %197 : vector<8x16xf32>
    %c0_148 = arith.constant 0 : index
    %c2_149 = arith.constant 2 : index
    %c8_150 = arith.constant 8 : index
    %c0_151 = arith.constant 0 : index
    %199 = vector.load %arg18[%c0_148, %c2_149, %c8_150, %c0_151] : memref<2x10x18x16xf32, #tpu.memory_space<vmem>>, vector<1x1x8x16xf32>
    %200 = vector.shape_cast %199 : vector<1x1x8x16xf32> to vector<8x16xf32>
    %201 = vector.shape_cast %198 : vector<8x16xf32> to vector<1x1x8x16xf32>
    tpu.vector_store %arg18[%c0_148, %c2_149, %c8_150, %c0_151], %201 {strides = array<i32>} : memref<2x10x18x16xf32, #tpu.memory_space<vmem>>, vector<1x1x8x16xf32>,
    %c64 = arith.constant 64 : index
    %c0_152 = arith.constant 0 : index
    %202 = vector.load %arg17[%c64, %c0_152] : memref<512x16xf32, #tpu.memory_space<vmem>>, vector<32x16xf32>
    %cst_153 = arith.constant 0.000000e+00 : f32
    %203 = vector.broadcast %cst_153 : f32 to vector<32x16xf32>
    %204 = arith.maximumf %202, %203 : vector<32x16xf32>
    %205 = vector.extract_strided_slice %204 {offsets = [0, 0], sizes = [16, 16], strides = [1, 1]} : vector<32x16xf32> to vector<16x16xf32>
    %206 = vector.extract_strided_slice %204 {offsets = [16, 0], sizes = [16, 16], strides = [1, 1]} : vector<32x16xf32> to vector<16x16xf32>
    %207 = arith.maximumf %205, %206 : vector<16x16xf32>
    %cst_154 = arith.constant dense<0.000000e+00> : vector<8x16xf32>
    %208 = tpu.matmul %71, %207, %cst_154 {dimension_numbers = #tpu.dot_dimension_numbers<[1], [0], [0], [1], [0, 0, 1, 1], [], []>} : vector<8x16xf32>, vector<16x16xf32>, vector<8x16xf32> -> vector<8x16xf32>
    %cst_155 = arith.constant dense<0.000000e+00> : vector<8x16xf32>
    %209 = tpu.matmul %78, %207, %cst_155 {dimension_numbers = #tpu.dot_dimension_numbers<[1], [0], [0], [1], [0, 0, 1, 1], [], []>} : vector<8x16xf32>, vector<16x16xf32>, vector<8x16xf32> -> vector<8x16xf32>
    %210 = arith.maximumf %208, %209 : vector<8x16xf32>
    %c0_156 = arith.constant 0 : index
    %c3_157 = arith.constant 3 : index
    %c8_158 = arith.constant 8 : index
    %c0_159 = arith.constant 0 : index
    %211 = vector.load %arg18[%c0_156, %c3_157, %c8_158, %c0_159] : memref<2x10x18x16xf32, #tpu.memory_space<vmem>>, vector<1x1x8x16xf32>
    %212 = vector.shape_cast %211 : vector<1x1x8x16xf32> to vector<8x16xf32>
    %213 = vector.shape_cast %210 : vector<8x16xf32> to vector<1x1x8x16xf32>
    tpu.vector_store %arg18[%c0_156, %c3_157, %c8_158, %c0_159], %213 {strides = array<i32>} : memref<2x10x18x16xf32, #tpu.memory_space<vmem>>, vector<1x1x8x16xf32>,
    %c96 = arith.constant 96 : index
    %c0_160 = arith.constant 0 : index
    %214 = vector.load %arg17[%c96, %c0_160] : memref<512x16xf32, #tpu.memory_space<vmem>>, vector<32x16xf32>
    %cst_161 = arith.constant 0.000000e+00 : f32
    %215 = vector.broadcast %cst_161 : f32 to vector<32x16xf32>
    %216 = arith.maximumf %214, %215 : vector<32x16xf32>
    %217 = vector.extract_strided_slice %216 {offsets = [0, 0], sizes = [16, 16], strides = [1, 1]} : vector<32x16xf32> to vector<16x16xf32>
    %218 = vector.extract_strided_slice %216 {offsets = [16, 0], sizes = [16, 16], strides = [1, 1]} : vector<32x16xf32> to vector<16x16xf32>
    %219 = arith.maximumf %217, %218 : vector<16x16xf32>
    %cst_162 = arith.constant dense<0.000000e+00> : vector<8x16xf32>
    %220 = tpu.matmul %71, %219, %cst_162 {dimension_numbers = #tpu.dot_dimension_numbers<[1], [0], [0], [1], [0, 0, 1, 1], [], []>} : vector<8x16xf32>, vector<16x16xf32>, vector<8x16xf32> -> vector<8x16xf32>
    %cst_163 = arith.constant dense<0.000000e+00> : vector<8x16xf32>
    %221 = tpu.matmul %78, %219, %cst_163 {dimension_numbers = #tpu.dot_dimension_numbers<[1], [0], [0], [1], [0, 0, 1, 1], [], []>} : vector<8x16xf32>, vector<16x16xf32>, vector<8x16xf32> -> vector<8x16xf32>
    %222 = arith.maximumf %220, %221 : vector<8x16xf32>
    %c0_164 = arith.constant 0 : index
    %c4_165 = arith.constant 4 : index
    %c8_166 = arith.constant 8 : index
    %c0_167 = arith.constant 0 : index
    %223 = vector.load %arg18[%c0_164, %c4_165, %c8_166, %c0_167] : memref<2x10x18x16xf32, #tpu.memory_space<vmem>>, vector<1x1x8x16xf32>
    %224 = vector.shape_cast %223 : vector<1x1x8x16xf32> to vector<8x16xf32>
    %225 = vector.shape_cast %222 : vector<8x16xf32> to vector<1x1x8x16xf32>
    tpu.vector_store %arg18[%c0_164, %c4_165, %c8_166, %c0_167], %225 {strides = array<i32>} : memref<2x10x18x16xf32, #tpu.memory_space<vmem>>, vector<1x1x8x16xf32>,
    %c128 = arith.constant 128 : index
    %c0_168 = arith.constant 0 : index
    %226 = vector.load %arg17[%c128, %c0_168] : memref<512x16xf32, #tpu.memory_space<vmem>>, vector<32x16xf32>
    %cst_169 = arith.constant 0.000000e+00 : f32
    %227 = vector.broadcast %cst_169 : f32 to vector<32x16xf32>
    %228 = arith.maximumf %226, %227 : vector<32x16xf32>
    %229 = vector.extract_strided_slice %228 {offsets = [0, 0], sizes = [16, 16], strides = [1, 1]} : vector<32x16xf32> to vector<16x16xf32>
    %230 = vector.extract_strided_slice %228 {offsets = [16, 0], sizes = [16, 16], strides = [1, 1]} : vector<32x16xf32> to vector<16x16xf32>
    %231 = arith.maximumf %229, %230 : vector<16x16xf32>
    %cst_170 = arith.constant dense<0.000000e+00> : vector<8x16xf32>
    %232 = tpu.matmul %71, %231, %cst_170 {dimension_numbers = #tpu.dot_dimension_numbers<[1], [0], [0], [1], [0, 0, 1, 1], [], []>} : vector<8x16xf32>, vector<16x16xf32>, vector<8x16xf32> -> vector<8x16xf32>
    %cst_171 = arith.constant dense<0.000000e+00> : vector<8x16xf32>
    %233 = tpu.matmul %78, %231, %cst_171 {dimension_numbers = #tpu.dot_dimension_numbers<[1], [0], [0], [1], [0, 0, 1, 1], [], []>} : vector<8x16xf32>, vector<16x16xf32>, vector<8x16xf32> -> vector<8x16xf32>
    %234 = arith.maximumf %232, %233 : vector<8x16xf32>
    %c0_172 = arith.constant 0 : index
    %c5_173 = arith.constant 5 : index
    %c8_174 = arith.constant 8 : index
    %c0_175 = arith.constant 0 : index
    %235 = vector.load %arg18[%c0_172, %c5_173, %c8_174, %c0_175] : memref<2x10x18x16xf32, #tpu.memory_space<vmem>>, vector<1x1x8x16xf32>
    %236 = vector.shape_cast %235 : vector<1x1x8x16xf32> to vector<8x16xf32>
    %237 = vector.shape_cast %234 : vector<8x16xf32> to vector<1x1x8x16xf32>
    tpu.vector_store %arg18[%c0_172, %c5_173, %c8_174, %c0_175], %237 {strides = array<i32>} : memref<2x10x18x16xf32, #tpu.memory_space<vmem>>, vector<1x1x8x16xf32>,
    %c160 = arith.constant 160 : index
    %c0_176 = arith.constant 0 : index
    %238 = vector.load %arg17[%c160, %c0_176] : memref<512x16xf32, #tpu.memory_space<vmem>>, vector<32x16xf32>
    %cst_177 = arith.constant 0.000000e+00 : f32
    %239 = vector.broadcast %cst_177 : f32 to vector<32x16xf32>
    %240 = arith.maximumf %238, %239 : vector<32x16xf32>
    %241 = vector.extract_strided_slice %240 {offsets = [0, 0], sizes = [16, 16], strides = [1, 1]} : vector<32x16xf32> to vector<16x16xf32>
    %242 = vector.extract_strided_slice %240 {offsets = [16, 0], sizes = [16, 16], strides = [1, 1]} : vector<32x16xf32> to vector<16x16xf32>
    %243 = arith.maximumf %241, %242 : vector<16x16xf32>
    %cst_178 = arith.constant dense<0.000000e+00> : vector<8x16xf32>
    %244 = tpu.matmul %71, %243, %cst_178 {dimension_numbers = #tpu.dot_dimension_numbers<[1], [0], [0], [1], [0, 0, 1, 1], [], []>} : vector<8x16xf32>, vector<16x16xf32>, vector<8x16xf32> -> vector<8x16xf32>
    %cst_179 = arith.constant dense<0.000000e+00> : vector<8x16xf32>
    %245 = tpu.matmul %78, %243, %cst_179 {dimension_numbers = #tpu.dot_dimension_numbers<[1], [0], [0], [1], [0, 0, 1, 1], [], []>} : vector<8x16xf32>, vector<16x16xf32>, vector<8x16xf32> -> vector<8x16xf32>
    %246 = arith.maximumf %244, %245 : vector<8x16xf32>
    %c0_180 = arith.constant 0 : index
    %c6_181 = arith.constant 6 : index
    %c8_182 = arith.constant 8 : index
    %c0_183 = arith.constant 0 : index
    %247 = vector.load %arg18[%c0_180, %c6_181, %c8_182, %c0_183] : memref<2x10x18x16xf32, #tpu.memory_space<vmem>>, vector<1x1x8x16xf32>
    %248 = vector.shape_cast %247 : vector<1x1x8x16xf32> to vector<8x16xf32>
    %249 = vector.shape_cast %246 : vector<8x16xf32> to vector<1x1x8x16xf32>
    tpu.vector_store %arg18[%c0_180, %c6_181, %c8_182, %c0_183], %249 {strides = array<i32>} : memref<2x10x18x16xf32, #tpu.memory_space<vmem>>, vector<1x1x8x16xf32>,
    %c192 = arith.constant 192 : index
    %c0_184 = arith.constant 0 : index
    %250 = vector.load %arg17[%c192, %c0_184] : memref<512x16xf32, #tpu.memory_space<vmem>>, vector<32x16xf32>
    %cst_185 = arith.constant 0.000000e+00 : f32
    %251 = vector.broadcast %cst_185 : f32 to vector<32x16xf32>
    %252 = arith.maximumf %250, %251 : vector<32x16xf32>
    %253 = vector.extract_strided_slice %252 {offsets = [0, 0], sizes = [16, 16], strides = [1, 1]} : vector<32x16xf32> to vector<16x16xf32>
    %254 = vector.extract_strided_slice %252 {offsets = [16, 0], sizes = [16, 16], strides = [1, 1]} : vector<32x16xf32> to vector<16x16xf32>
    %255 = arith.maximumf %253, %254 : vector<16x16xf32>
    %cst_186 = arith.constant dense<0.000000e+00> : vector<8x16xf32>
    %256 = tpu.matmul %71, %255, %cst_186 {dimension_numbers = #tpu.dot_dimension_numbers<[1], [0], [0], [1], [0, 0, 1, 1], [], []>} : vector<8x16xf32>, vector<16x16xf32>, vector<8x16xf32> -> vector<8x16xf32>
    %cst_187 = arith.constant dense<0.000000e+00> : vector<8x16xf32>
    %257 = tpu.matmul %78, %255, %cst_187 {dimension_numbers = #tpu.dot_dimension_numbers<[1], [0], [0], [1], [0, 0, 1, 1], [], []>} : vector<8x16xf32>, vector<16x16xf32>, vector<8x16xf32> -> vector<8x16xf32>
    %258 = arith.maximumf %256, %257 : vector<8x16xf32>
    %c0_188 = arith.constant 0 : index
    %c7_189 = arith.constant 7 : index
    %c8_190 = arith.constant 8 : index
    %c0_191 = arith.constant 0 : index
    %259 = vector.load %arg18[%c0_188, %c7_189, %c8_190, %c0_191] : memref<2x10x18x16xf32, #tpu.memory_space<vmem>>, vector<1x1x8x16xf32>
    %260 = vector.shape_cast %259 : vector<1x1x8x16xf32> to vector<8x16xf32>
    %261 = vector.shape_cast %258 : vector<8x16xf32> to vector<1x1x8x16xf32>
    tpu.vector_store %arg18[%c0_188, %c7_189, %c8_190, %c0_191], %261 {strides = array<i32>} : memref<2x10x18x16xf32, #tpu.memory_space<vmem>>, vector<1x1x8x16xf32>,
    %c224 = arith.constant 224 : index
    %c0_192 = arith.constant 0 : index
    %262 = vector.load %arg17[%c224, %c0_192] : memref<512x16xf32, #tpu.memory_space<vmem>>, vector<32x16xf32>
    %cst_193 = arith.constant 0.000000e+00 : f32
    %263 = vector.broadcast %cst_193 : f32 to vector<32x16xf32>
    %264 = arith.maximumf %262, %263 : vector<32x16xf32>
    %265 = vector.extract_strided_slice %264 {offsets = [0, 0], sizes = [16, 16], strides = [1, 1]} : vector<32x16xf32> to vector<16x16xf32>
    %266 = vector.extract_strided_slice %264 {offsets = [16, 0], sizes = [16, 16], strides = [1, 1]} : vector<32x16xf32> to vector<16x16xf32>
    %267 = arith.maximumf %265, %266 : vector<16x16xf32>
    %cst_194 = arith.constant dense<0.000000e+00> : vector<8x16xf32>
    %268 = tpu.matmul %71, %267, %cst_194 {dimension_numbers = #tpu.dot_dimension_numbers<[1], [0], [0], [1], [0, 0, 1, 1], [], []>} : vector<8x16xf32>, vector<16x16xf32>, vector<8x16xf32> -> vector<8x16xf32>
    %cst_195 = arith.constant dense<0.000000e+00> : vector<8x16xf32>
    %269 = tpu.matmul %78, %267, %cst_195 {dimension_numbers = #tpu.dot_dimension_numbers<[1], [0], [0], [1], [0, 0, 1, 1], [], []>} : vector<8x16xf32>, vector<16x16xf32>, vector<8x16xf32> -> vector<8x16xf32>
    %270 = arith.maximumf %268, %269 : vector<8x16xf32>
    %c0_196 = arith.constant 0 : index
    %c8_197 = arith.constant 8 : index
    %c8_198 = arith.constant 8 : index
    %c0_199 = arith.constant 0 : index
    %271 = vector.load %arg18[%c0_196, %c8_197, %c8_198, %c0_199] : memref<2x10x18x16xf32, #tpu.memory_space<vmem>>, vector<1x1x8x16xf32>
    %272 = vector.shape_cast %271 : vector<1x1x8x16xf32> to vector<8x16xf32>
    %273 = vector.shape_cast %270 : vector<8x16xf32> to vector<1x1x8x16xf32>
    tpu.vector_store %arg18[%c0_196, %c8_197, %c8_198, %c0_199], %273 {strides = array<i32>} : memref<2x10x18x16xf32, #tpu.memory_space<vmem>>, vector<1x1x8x16xf32>,
    %c256 = arith.constant 256 : index
    %c0_200 = arith.constant 0 : index
    %274 = vector.load %arg17[%c256, %c0_200] : memref<512x16xf32, #tpu.memory_space<vmem>>, vector<32x16xf32>
    %cst_201 = arith.constant 0.000000e+00 : f32
    %275 = vector.broadcast %cst_201 : f32 to vector<32x16xf32>
    %276 = arith.maximumf %274, %275 : vector<32x16xf32>
    %277 = vector.extract_strided_slice %276 {offsets = [0, 0], sizes = [16, 16], strides = [1, 1]} : vector<32x16xf32> to vector<16x16xf32>
    %278 = vector.extract_strided_slice %276 {offsets = [16, 0], sizes = [16, 16], strides = [1, 1]} : vector<32x16xf32> to vector<16x16xf32>
    %279 = arith.maximumf %277, %278 : vector<16x16xf32>
    %cst_202 = arith.constant dense<0.000000e+00> : vector<8x16xf32>
    %280 = tpu.matmul %71, %279, %cst_202 {dimension_numbers = #tpu.dot_dimension_numbers<[1], [0], [0], [1], [0, 0, 1, 1], [], []>} : vector<8x16xf32>, vector<16x16xf32>, vector<8x16xf32> -> vector<8x16xf32>
    %cst_203 = arith.constant dense<0.000000e+00> : vector<8x16xf32>
    %281 = tpu.matmul %78, %279, %cst_203 {dimension_numbers = #tpu.dot_dimension_numbers<[1], [0], [0], [1], [0, 0, 1, 1], [], []>} : vector<8x16xf32>, vector<16x16xf32>, vector<8x16xf32> -> vector<8x16xf32>
    %282 = arith.maximumf %280, %281 : vector<8x16xf32>
    %c1_204 = arith.constant 1 : index
    %c1_205 = arith.constant 1 : index
    %c8_206 = arith.constant 8 : index
    %c0_207 = arith.constant 0 : index
    %283 = vector.load %arg18[%c1_204, %c1_205, %c8_206, %c0_207] : memref<2x10x18x16xf32, #tpu.memory_space<vmem>>, vector<1x1x8x16xf32>
    %284 = vector.shape_cast %283 : vector<1x1x8x16xf32> to vector<8x16xf32>
    %285 = vector.shape_cast %282 : vector<8x16xf32> to vector<1x1x8x16xf32>
    tpu.vector_store %arg18[%c1_204, %c1_205, %c8_206, %c0_207], %285 {strides = array<i32>} : memref<2x10x18x16xf32, #tpu.memory_space<vmem>>, vector<1x1x8x16xf32>,
    %c288 = arith.constant 288 : index
    %c0_208 = arith.constant 0 : index
    %286 = vector.load %arg17[%c288, %c0_208] : memref<512x16xf32, #tpu.memory_space<vmem>>, vector<32x16xf32>
    %cst_209 = arith.constant 0.000000e+00 : f32
    %287 = vector.broadcast %cst_209 : f32 to vector<32x16xf32>
    %288 = arith.maximumf %286, %287 : vector<32x16xf32>
    %289 = vector.extract_strided_slice %288 {offsets = [0, 0], sizes = [16, 16], strides = [1, 1]} : vector<32x16xf32> to vector<16x16xf32>
    %290 = vector.extract_strided_slice %288 {offsets = [16, 0], sizes = [16, 16], strides = [1, 1]} : vector<32x16xf32> to vector<16x16xf32>
    %291 = arith.maximumf %289, %290 : vector<16x16xf32>
    %cst_210 = arith.constant dense<0.000000e+00> : vector<8x16xf32>
    %292 = tpu.matmul %71, %291, %cst_210 {dimension_numbers = #tpu.dot_dimension_numbers<[1], [0], [0], [1], [0, 0, 1, 1], [], []>} : vector<8x16xf32>, vector<16x16xf32>, vector<8x16xf32> -> vector<8x16xf32>
    %cst_211 = arith.constant dense<0.000000e+00> : vector<8x16xf32>
    %293 = tpu.matmul %78, %291, %cst_211 {dimension_numbers = #tpu.dot_dimension_numbers<[1], [0], [0], [1], [0, 0, 1, 1], [], []>} : vector<8x16xf32>, vector<16x16xf32>, vector<8x16xf32> -> vector<8x16xf32>
    %294 = arith.maximumf %292, %293 : vector<8x16xf32>
    %c1_212 = arith.constant 1 : index
    %c2_213 = arith.constant 2 : index
    %c8_214 = arith.constant 8 : index
    %c0_215 = arith.constant 0 : index
    %295 = vector.load %arg18[%c1_212, %c2_213, %c8_214, %c0_215] : memref<2x10x18x16xf32, #tpu.memory_space<vmem>>, vector<1x1x8x16xf32>
    %296 = vector.shape_cast %295 : vector<1x1x8x16xf32> to vector<8x16xf32>
    %297 = vector.shape_cast %294 : vector<8x16xf32> to vector<1x1x8x16xf32>
    tpu.vector_store %arg18[%c1_212, %c2_213, %c8_214, %c0_215], %297 {strides = array<i32>} : memref<2x10x18x16xf32, #tpu.memory_space<vmem>>, vector<1x1x8x16xf32>,
    %c320 = arith.constant 320 : index
    %c0_216 = arith.constant 0 : index
    %298 = vector.load %arg17[%c320, %c0_216] : memref<512x16xf32, #tpu.memory_space<vmem>>, vector<32x16xf32>
    %cst_217 = arith.constant 0.000000e+00 : f32
    %299 = vector.broadcast %cst_217 : f32 to vector<32x16xf32>
    %300 = arith.maximumf %298, %299 : vector<32x16xf32>
    %301 = vector.extract_strided_slice %300 {offsets = [0, 0], sizes = [16, 16], strides = [1, 1]} : vector<32x16xf32> to vector<16x16xf32>
    %302 = vector.extract_strided_slice %300 {offsets = [16, 0], sizes = [16, 16], strides = [1, 1]} : vector<32x16xf32> to vector<16x16xf32>
    %303 = arith.maximumf %301, %302 : vector<16x16xf32>
    %cst_218 = arith.constant dense<0.000000e+00> : vector<8x16xf32>
    %304 = tpu.matmul %71, %303, %cst_218 {dimension_numbers = #tpu.dot_dimension_numbers<[1], [0], [0], [1], [0, 0, 1, 1], [], []>} : vector<8x16xf32>, vector<16x16xf32>, vector<8x16xf32> -> vector<8x16xf32>
    %cst_219 = arith.constant dense<0.000000e+00> : vector<8x16xf32>
    %305 = tpu.matmul %78, %303, %cst_219 {dimension_numbers = #tpu.dot_dimension_numbers<[1], [0], [0], [1], [0, 0, 1, 1], [], []>} : vector<8x16xf32>, vector<16x16xf32>, vector<8x16xf32> -> vector<8x16xf32>
    %306 = arith.maximumf %304, %305 : vector<8x16xf32>
    %c1_220 = arith.constant 1 : index
    %c3_221 = arith.constant 3 : index
    %c8_222 = arith.constant 8 : index
    %c0_223 = arith.constant 0 : index
    %307 = vector.load %arg18[%c1_220, %c3_221, %c8_222, %c0_223] : memref<2x10x18x16xf32, #tpu.memory_space<vmem>>, vector<1x1x8x16xf32>
    %308 = vector.shape_cast %307 : vector<1x1x8x16xf32> to vector<8x16xf32>
    %309 = vector.shape_cast %306 : vector<8x16xf32> to vector<1x1x8x16xf32>
    tpu.vector_store %arg18[%c1_220, %c3_221, %c8_222, %c0_223], %309 {strides = array<i32>} : memref<2x10x18x16xf32, #tpu.memory_space<vmem>>, vector<1x1x8x16xf32>,
    %c352 = arith.constant 352 : index
    %c0_224 = arith.constant 0 : index
    %310 = vector.load %arg17[%c352, %c0_224] : memref<512x16xf32, #tpu.memory_space<vmem>>, vector<32x16xf32>
    %cst_225 = arith.constant 0.000000e+00 : f32
    %311 = vector.broadcast %cst_225 : f32 to vector<32x16xf32>
    %312 = arith.maximumf %310, %311 : vector<32x16xf32>
    %313 = vector.extract_strided_slice %312 {offsets = [0, 0], sizes = [16, 16], strides = [1, 1]} : vector<32x16xf32> to vector<16x16xf32>
    %314 = vector.extract_strided_slice %312 {offsets = [16, 0], sizes = [16, 16], strides = [1, 1]} : vector<32x16xf32> to vector<16x16xf32>
    %315 = arith.maximumf %313, %314 : vector<16x16xf32>
    %cst_226 = arith.constant dense<0.000000e+00> : vector<8x16xf32>
    %316 = tpu.matmul %71, %315, %cst_226 {dimension_numbers = #tpu.dot_dimension_numbers<[1], [0], [0], [1], [0, 0, 1, 1], [], []>} : vector<8x16xf32>, vector<16x16xf32>, vector<8x16xf32> -> vector<8x16xf32>
    %cst_227 = arith.constant dense<0.000000e+00> : vector<8x16xf32>
    %317 = tpu.matmul %78, %315, %cst_227 {dimension_numbers = #tpu.dot_dimension_numbers<[1], [0], [0], [1], [0, 0, 1, 1], [], []>} : vector<8x16xf32>, vector<16x16xf32>, vector<8x16xf32> -> vector<8x16xf32>
    %318 = arith.maximumf %316, %317 : vector<8x16xf32>
    %c1_228 = arith.constant 1 : index
    %c4_229 = arith.constant 4 : index
    %c8_230 = arith.constant 8 : index
    %c0_231 = arith.constant 0 : index
    %319 = vector.load %arg18[%c1_228, %c4_229, %c8_230, %c0_231] : memref<2x10x18x16xf32, #tpu.memory_space<vmem>>, vector<1x1x8x16xf32>
    %320 = vector.shape_cast %319 : vector<1x1x8x16xf32> to vector<8x16xf32>
    %321 = vector.shape_cast %318 : vector<8x16xf32> to vector<1x1x8x16xf32>
    tpu.vector_store %arg18[%c1_228, %c4_229, %c8_230, %c0_231], %321 {strides = array<i32>} : memref<2x10x18x16xf32, #tpu.memory_space<vmem>>, vector<1x1x8x16xf32>,
    %c384 = arith.constant 384 : index
    %c0_232 = arith.constant 0 : index
    %322 = vector.load %arg17[%c384, %c0_232] : memref<512x16xf32, #tpu.memory_space<vmem>>, vector<32x16xf32>
    %cst_233 = arith.constant 0.000000e+00 : f32
    %323 = vector.broadcast %cst_233 : f32 to vector<32x16xf32>
    %324 = arith.maximumf %322, %323 : vector<32x16xf32>
    %325 = vector.extract_strided_slice %324 {offsets = [0, 0], sizes = [16, 16], strides = [1, 1]} : vector<32x16xf32> to vector<16x16xf32>
    %326 = vector.extract_strided_slice %324 {offsets = [16, 0], sizes = [16, 16], strides = [1, 1]} : vector<32x16xf32> to vector<16x16xf32>
    %327 = arith.maximumf %325, %326 : vector<16x16xf32>
    %cst_234 = arith.constant dense<0.000000e+00> : vector<8x16xf32>
    %328 = tpu.matmul %71, %327, %cst_234 {dimension_numbers = #tpu.dot_dimension_numbers<[1], [0], [0], [1], [0, 0, 1, 1], [], []>} : vector<8x16xf32>, vector<16x16xf32>, vector<8x16xf32> -> vector<8x16xf32>
    %cst_235 = arith.constant dense<0.000000e+00> : vector<8x16xf32>
    %329 = tpu.matmul %78, %327, %cst_235 {dimension_numbers = #tpu.dot_dimension_numbers<[1], [0], [0], [1], [0, 0, 1, 1], [], []>} : vector<8x16xf32>, vector<16x16xf32>, vector<8x16xf32> -> vector<8x16xf32>
    %330 = arith.maximumf %328, %329 : vector<8x16xf32>
    %c1_236 = arith.constant 1 : index
    %c5_237 = arith.constant 5 : index
    %c8_238 = arith.constant 8 : index
    %c0_239 = arith.constant 0 : index
    %331 = vector.load %arg18[%c1_236, %c5_237, %c8_238, %c0_239] : memref<2x10x18x16xf32, #tpu.memory_space<vmem>>, vector<1x1x8x16xf32>
    %332 = vector.shape_cast %331 : vector<1x1x8x16xf32> to vector<8x16xf32>
    %333 = vector.shape_cast %330 : vector<8x16xf32> to vector<1x1x8x16xf32>
    tpu.vector_store %arg18[%c1_236, %c5_237, %c8_238, %c0_239], %333 {strides = array<i32>} : memref<2x10x18x16xf32, #tpu.memory_space<vmem>>, vector<1x1x8x16xf32>,
    %c416 = arith.constant 416 : index
    %c0_240 = arith.constant 0 : index
    %334 = vector.load %arg17[%c416, %c0_240] : memref<512x16xf32, #tpu.memory_space<vmem>>, vector<32x16xf32>
    %cst_241 = arith.constant 0.000000e+00 : f32
    %335 = vector.broadcast %cst_241 : f32 to vector<32x16xf32>
    %336 = arith.maximumf %334, %335 : vector<32x16xf32>
    %337 = vector.extract_strided_slice %336 {offsets = [0, 0], sizes = [16, 16], strides = [1, 1]} : vector<32x16xf32> to vector<16x16xf32>
    %338 = vector.extract_strided_slice %336 {offsets = [16, 0], sizes = [16, 16], strides = [1, 1]} : vector<32x16xf32> to vector<16x16xf32>
    %339 = arith.maximumf %337, %338 : vector<16x16xf32>
    %cst_242 = arith.constant dense<0.000000e+00> : vector<8x16xf32>
    %340 = tpu.matmul %71, %339, %cst_242 {dimension_numbers = #tpu.dot_dimension_numbers<[1], [0], [0], [1], [0, 0, 1, 1], [], []>} : vector<8x16xf32>, vector<16x16xf32>, vector<8x16xf32> -> vector<8x16xf32>
    %cst_243 = arith.constant dense<0.000000e+00> : vector<8x16xf32>
    %341 = tpu.matmul %78, %339, %cst_243 {dimension_numbers = #tpu.dot_dimension_numbers<[1], [0], [0], [1], [0, 0, 1, 1], [], []>} : vector<8x16xf32>, vector<16x16xf32>, vector<8x16xf32> -> vector<8x16xf32>
    %342 = arith.maximumf %340, %341 : vector<8x16xf32>
    %c1_244 = arith.constant 1 : index
    %c6_245 = arith.constant 6 : index
    %c8_246 = arith.constant 8 : index
    %c0_247 = arith.constant 0 : index
    %343 = vector.load %arg18[%c1_244, %c6_245, %c8_246, %c0_247] : memref<2x10x18x16xf32, #tpu.memory_space<vmem>>, vector<1x1x8x16xf32>
    %344 = vector.shape_cast %343 : vector<1x1x8x16xf32> to vector<8x16xf32>
    %345 = vector.shape_cast %342 : vector<8x16xf32> to vector<1x1x8x16xf32>
    tpu.vector_store %arg18[%c1_244, %c6_245, %c8_246, %c0_247], %345 {strides = array<i32>} : memref<2x10x18x16xf32, #tpu.memory_space<vmem>>, vector<1x1x8x16xf32>,
    %c448 = arith.constant 448 : index
    %c0_248 = arith.constant 0 : index
    %346 = vector.load %arg17[%c448, %c0_248] : memref<512x16xf32, #tpu.memory_space<vmem>>, vector<32x16xf32>
    %cst_249 = arith.constant 0.000000e+00 : f32
    %347 = vector.broadcast %cst_249 : f32 to vector<32x16xf32>
    %348 = arith.maximumf %346, %347 : vector<32x16xf32>
    %349 = vector.extract_strided_slice %348 {offsets = [0, 0], sizes = [16, 16], strides = [1, 1]} : vector<32x16xf32> to vector<16x16xf32>
    %350 = vector.extract_strided_slice %348 {offsets = [16, 0], sizes = [16, 16], strides = [1, 1]} : vector<32x16xf32> to vector<16x16xf32>
    %351 = arith.maximumf %349, %350 : vector<16x16xf32>
    %cst_250 = arith.constant dense<0.000000e+00> : vector<8x16xf32>
    %352 = tpu.matmul %71, %351, %cst_250 {dimension_numbers = #tpu.dot_dimension_numbers<[1], [0], [0], [1], [0, 0, 1, 1], [], []>} : vector<8x16xf32>, vector<16x16xf32>, vector<8x16xf32> -> vector<8x16xf32>
    %cst_251 = arith.constant dense<0.000000e+00> : vector<8x16xf32>
    %353 = tpu.matmul %78, %351, %cst_251 {dimension_numbers = #tpu.dot_dimension_numbers<[1], [0], [0], [1], [0, 0, 1, 1], [], []>} : vector<8x16xf32>, vector<16x16xf32>, vector<8x16xf32> -> vector<8x16xf32>
    %354 = arith.maximumf %352, %353 : vector<8x16xf32>
    %c1_252 = arith.constant 1 : index
    %c7_253 = arith.constant 7 : index
    %c8_254 = arith.constant 8 : index
    %c0_255 = arith.constant 0 : index
    %355 = vector.load %arg18[%c1_252, %c7_253, %c8_254, %c0_255] : memref<2x10x18x16xf32, #tpu.memory_space<vmem>>, vector<1x1x8x16xf32>
    %356 = vector.shape_cast %355 : vector<1x1x8x16xf32> to vector<8x16xf32>
    %357 = vector.shape_cast %354 : vector<8x16xf32> to vector<1x1x8x16xf32>
    tpu.vector_store %arg18[%c1_252, %c7_253, %c8_254, %c0_255], %357 {strides = array<i32>} : memref<2x10x18x16xf32, #tpu.memory_space<vmem>>, vector<1x1x8x16xf32>,
    %c480 = arith.constant 480 : index
    %c0_256 = arith.constant 0 : index
    %358 = vector.load %arg17[%c480, %c0_256] : memref<512x16xf32, #tpu.memory_space<vmem>>, vector<32x16xf32>
    %cst_257 = arith.constant 0.000000e+00 : f32
    %359 = vector.broadcast %cst_257 : f32 to vector<32x16xf32>
    %360 = arith.maximumf %358, %359 : vector<32x16xf32>
    %361 = vector.extract_strided_slice %360 {offsets = [0, 0], sizes = [16, 16], strides = [1, 1]} : vector<32x16xf32> to vector<16x16xf32>
    %362 = vector.extract_strided_slice %360 {offsets = [16, 0], sizes = [16, 16], strides = [1, 1]} : vector<32x16xf32> to vector<16x16xf32>
    %363 = arith.maximumf %361, %362 : vector<16x16xf32>
    %cst_258 = arith.constant dense<0.000000e+00> : vector<8x16xf32>
    %364 = tpu.matmul %71, %363, %cst_258 {dimension_numbers = #tpu.dot_dimension_numbers<[1], [0], [0], [1], [0, 0, 1, 1], [], []>} : vector<8x16xf32>, vector<16x16xf32>, vector<8x16xf32> -> vector<8x16xf32>
    %cst_259 = arith.constant dense<0.000000e+00> : vector<8x16xf32>
    %365 = tpu.matmul %78, %363, %cst_259 {dimension_numbers = #tpu.dot_dimension_numbers<[1], [0], [0], [1], [0, 0, 1, 1], [], []>} : vector<8x16xf32>, vector<16x16xf32>, vector<8x16xf32> -> vector<8x16xf32>
    %366 = arith.maximumf %364, %365 : vector<8x16xf32>
    %c1_260 = arith.constant 1 : index
    %c8_261 = arith.constant 8 : index
    %c8_262 = arith.constant 8 : index
    %c0_263 = arith.constant 0 : index
    %367 = vector.load %arg18[%c1_260, %c8_261, %c8_262, %c0_263] : memref<2x10x18x16xf32, #tpu.memory_space<vmem>>, vector<1x1x8x16xf32>
    %368 = vector.shape_cast %367 : vector<1x1x8x16xf32> to vector<8x16xf32>
    %369 = vector.shape_cast %366 : vector<8x16xf32> to vector<1x1x8x16xf32>
    tpu.vector_store %arg18[%c1_260, %c8_261, %c8_262, %c0_263], %369 {strides = array<i32>} : memref<2x10x18x16xf32, #tpu.memory_space<vmem>>, vector<1x1x8x16xf32>,
    %cst_264 = arith.constant 0.000000e+00 : f32
    %370 = vector.broadcast %cst_264 : f32 to vector<128x32xf32>
    %c0_265 = arith.constant 0 : index
    %c0_266 = arith.constant 0 : index
    %371 = vector.load %arg11[%c0_265, %c0_266] : memref<1x32xf32, #tpu.memory_space<vmem>>, vector<1x32xf32>
    %372 = vector.broadcast %371 : vector<1x32xf32> to vector<128x32xf32>
    %373 = arith.addf %370, %372 : vector<128x32xf32>
    %c0_267 = arith.constant 0 : index
    %c0_268 = arith.constant 0 : index
    %c7_269 = arith.constant 7 : index
    %c0_270 = arith.constant 0 : index
    %374 = vector.load %arg18[%c0_267, %c0_268, %c7_269, %c0_270] : memref<2x10x18x16xf32, #tpu.memory_space<vmem>>, vector<2x8x8x16xf32>
    %375 = vector.shape_cast %374 : vector<2x8x8x16xf32> to vector<128x16xf32>
    %376 = arith.truncf %375 : vector<128x16xf32> to vector<128x16xbf16>
    %c0_271 = arith.constant 0 : index
    %c0_272 = arith.constant 0 : index
    %c0_273 = arith.constant 0 : index
    %377 = vector.load %arg10[%c0_271, %c0_272, %c0_273] : memref<9x16x32xf32, #tpu.memory_space<vmem>>, vector<1x16x32xf32>
    %378 = vector.shape_cast %377 : vector<1x16x32xf32> to vector<16x32xf32>
    %379 = arith.truncf %378 : vector<16x32xf32> to vector<16x32xbf16>
    %cst_274 = arith.constant dense<0.000000e+00> : vector<128x32xf32>
    %380 = tpu.matmul %376, %379, %cst_274 {dimension_numbers = #tpu.dot_dimension_numbers<[1], [0], [0], [1], [0, 0, 1, 1], [], []>} : vector<128x16xbf16>, vector<16x32xbf16>, vector<128x32xf32> -> vector<128x32xf32>
    %381 = arith.addf %373, %380 : vector<128x32xf32>
    %c0_275 = arith.constant 0 : index
    %c0_276 = arith.constant 0 : index
    %c8_277 = arith.constant 8 : index
    %c0_278 = arith.constant 0 : index
    %382 = vector.load %arg18[%c0_275, %c0_276, %c8_277, %c0_278] : memref<2x10x18x16xf32, #tpu.memory_space<vmem>>, vector<2x8x8x16xf32>
    %383 = vector.shape_cast %382 : vector<2x8x8x16xf32> to vector<128x16xf32>
    %384 = arith.truncf %383 : vector<128x16xf32> to vector<128x16xbf16>
    %c1_279 = arith.constant 1 : index
    %c0_280 = arith.constant 0 : index
    %c0_281 = arith.constant 0 : index
    %385 = vector.load %arg10[%c1_279, %c0_280, %c0_281] : memref<9x16x32xf32, #tpu.memory_space<vmem>>, vector<1x16x32xf32>
    %386 = vector.shape_cast %385 : vector<1x16x32xf32> to vector<16x32xf32>
    %387 = arith.truncf %386 : vector<16x32xf32> to vector<16x32xbf16>
    %cst_282 = arith.constant dense<0.000000e+00> : vector<128x32xf32>
    %388 = tpu.matmul %384, %387, %cst_282 {dimension_numbers = #tpu.dot_dimension_numbers<[1], [0], [0], [1], [0, 0, 1, 1], [], []>} : vector<128x16xbf16>, vector<16x32xbf16>, vector<128x32xf32> -> vector<128x32xf32>
    %389 = arith.addf %381, %388 : vector<128x32xf32>
    %c0_283 = arith.constant 0 : index
    %c0_284 = arith.constant 0 : index
    %c9 = arith.constant 9 : index
    %c0_285 = arith.constant 0 : index
    %390 = vector.load %arg18[%c0_283, %c0_284, %c9, %c0_285] : memref<2x10x18x16xf32, #tpu.memory_space<vmem>>, vector<2x8x8x16xf32>
    %391 = vector.shape_cast %390 : vector<2x8x8x16xf32> to vector<128x16xf32>
    %392 = arith.truncf %391 : vector<128x16xf32> to vector<128x16xbf16>
    %c2_286 = arith.constant 2 : index
    %c0_287 = arith.constant 0 : index
    %c0_288 = arith.constant 0 : index
    %393 = vector.load %arg10[%c2_286, %c0_287, %c0_288] : memref<9x16x32xf32, #tpu.memory_space<vmem>>, vector<1x16x32xf32>
    %394 = vector.shape_cast %393 : vector<1x16x32xf32> to vector<16x32xf32>
    %395 = arith.truncf %394 : vector<16x32xf32> to vector<16x32xbf16>
    %cst_289 = arith.constant dense<0.000000e+00> : vector<128x32xf32>
    %396 = tpu.matmul %392, %395, %cst_289 {dimension_numbers = #tpu.dot_dimension_numbers<[1], [0], [0], [1], [0, 0, 1, 1], [], []>} : vector<128x16xbf16>, vector<16x32xbf16>, vector<128x32xf32> -> vector<128x32xf32>
    %397 = arith.addf %389, %396 : vector<128x32xf32>
    %c0_290 = arith.constant 0 : index
    %c1_291 = arith.constant 1 : index
    %c7_292 = arith.constant 7 : index
    %c0_293 = arith.constant 0 : index
    %398 = vector.load %arg18[%c0_290, %c1_291, %c7_292, %c0_293] : memref<2x10x18x16xf32, #tpu.memory_space<vmem>>, vector<2x8x8x16xf32>
    %399 = vector.shape_cast %398 : vector<2x8x8x16xf32> to vector<128x16xf32>
    %400 = arith.truncf %399 : vector<128x16xf32> to vector<128x16xbf16>
    %c3_294 = arith.constant 3 : index
    %c0_295 = arith.constant 0 : index
    %c0_296 = arith.constant 0 : index
    %401 = vector.load %arg10[%c3_294, %c0_295, %c0_296] : memref<9x16x32xf32, #tpu.memory_space<vmem>>, vector<1x16x32xf32>
    %402 = vector.shape_cast %401 : vector<1x16x32xf32> to vector<16x32xf32>
    %403 = arith.truncf %402 : vector<16x32xf32> to vector<16x32xbf16>
    %cst_297 = arith.constant dense<0.000000e+00> : vector<128x32xf32>
    %404 = tpu.matmul %400, %403, %cst_297 {dimension_numbers = #tpu.dot_dimension_numbers<[1], [0], [0], [1], [0, 0, 1, 1], [], []>} : vector<128x16xbf16>, vector<16x32xbf16>, vector<128x32xf32> -> vector<128x32xf32>
    %405 = arith.addf %397, %404 : vector<128x32xf32>
    %c0_298 = arith.constant 0 : index
    %c1_299 = arith.constant 1 : index
    %c8_300 = arith.constant 8 : index
    %c0_301 = arith.constant 0 : index
    %406 = vector.load %arg18[%c0_298, %c1_299, %c8_300, %c0_301] : memref<2x10x18x16xf32, #tpu.memory_space<vmem>>, vector<2x8x8x16xf32>
    %407 = vector.shape_cast %406 : vector<2x8x8x16xf32> to vector<128x16xf32>
    %408 = arith.truncf %407 : vector<128x16xf32> to vector<128x16xbf16>
    %c4_302 = arith.constant 4 : index
    %c0_303 = arith.constant 0 : index
    %c0_304 = arith.constant 0 : index
    %409 = vector.load %arg10[%c4_302, %c0_303, %c0_304] : memref<9x16x32xf32, #tpu.memory_space<vmem>>, vector<1x16x32xf32>
    %410 = vector.shape_cast %409 : vector<1x16x32xf32> to vector<16x32xf32>
    %411 = arith.truncf %410 : vector<16x32xf32> to vector<16x32xbf16>
    %cst_305 = arith.constant dense<0.000000e+00> : vector<128x32xf32>
    %412 = tpu.matmul %408, %411, %cst_305 {dimension_numbers = #tpu.dot_dimension_numbers<[1], [0], [0], [1], [0, 0, 1, 1], [], []>} : vector<128x16xbf16>, vector<16x32xbf16>, vector<128x32xf32> -> vector<128x32xf32>
    %413 = arith.addf %405, %412 : vector<128x32xf32>
    %c0_306 = arith.constant 0 : index
    %c1_307 = arith.constant 1 : index
    %c9_308 = arith.constant 9 : index
    %c0_309 = arith.constant 0 : index
    %414 = vector.load %arg18[%c0_306, %c1_307, %c9_308, %c0_309] : memref<2x10x18x16xf32, #tpu.memory_space<vmem>>, vector<2x8x8x16xf32>
    %415 = vector.shape_cast %414 : vector<2x8x8x16xf32> to vector<128x16xf32>
    %416 = arith.truncf %415 : vector<128x16xf32> to vector<128x16xbf16>
    %c5_310 = arith.constant 5 : index
    %c0_311 = arith.constant 0 : index
    %c0_312 = arith.constant 0 : index
    %417 = vector.load %arg10[%c5_310, %c0_311, %c0_312] : memref<9x16x32xf32, #tpu.memory_space<vmem>>, vector<1x16x32xf32>
    %418 = vector.shape_cast %417 : vector<1x16x32xf32> to vector<16x32xf32>
    %419 = arith.truncf %418 : vector<16x32xf32> to vector<16x32xbf16>
    %cst_313 = arith.constant dense<0.000000e+00> : vector<128x32xf32>
    %420 = tpu.matmul %416, %419, %cst_313 {dimension_numbers = #tpu.dot_dimension_numbers<[1], [0], [0], [1], [0, 0, 1, 1], [], []>} : vector<128x16xbf16>, vector<16x32xbf16>, vector<128x32xf32> -> vector<128x32xf32>
    %421 = arith.addf %413, %420 : vector<128x32xf32>
    %c0_314 = arith.constant 0 : index
    %c2_315 = arith.constant 2 : index
    %c7_316 = arith.constant 7 : index
    %c0_317 = arith.constant 0 : index
    %422 = vector.load %arg18[%c0_314, %c2_315, %c7_316, %c0_317] : memref<2x10x18x16xf32, #tpu.memory_space<vmem>>, vector<2x8x8x16xf32>
    %423 = vector.shape_cast %422 : vector<2x8x8x16xf32> to vector<128x16xf32>
    %424 = arith.truncf %423 : vector<128x16xf32> to vector<128x16xbf16>
    %c6_318 = arith.constant 6 : index
    %c0_319 = arith.constant 0 : index
    %c0_320 = arith.constant 0 : index
    %425 = vector.load %arg10[%c6_318, %c0_319, %c0_320] : memref<9x16x32xf32, #tpu.memory_space<vmem>>, vector<1x16x32xf32>
    %426 = vector.shape_cast %425 : vector<1x16x32xf32> to vector<16x32xf32>
    %427 = arith.truncf %426 : vector<16x32xf32> to vector<16x32xbf16>
    %cst_321 = arith.constant dense<0.000000e+00> : vector<128x32xf32>
    %428 = tpu.matmul %424, %427, %cst_321 {dimension_numbers = #tpu.dot_dimension_numbers<[1], [0], [0], [1], [0, 0, 1, 1], [], []>} : vector<128x16xbf16>, vector<16x32xbf16>, vector<128x32xf32> -> vector<128x32xf32>
    %429 = arith.addf %421, %428 : vector<128x32xf32>
    %c0_322 = arith.constant 0 : index
    %c2_323 = arith.constant 2 : index
    %c8_324 = arith.constant 8 : index
    %c0_325 = arith.constant 0 : index
    %430 = vector.load %arg18[%c0_322, %c2_323, %c8_324, %c0_325] : memref<2x10x18x16xf32, #tpu.memory_space<vmem>>, vector<2x8x8x16xf32>
    %431 = vector.shape_cast %430 : vector<2x8x8x16xf32> to vector<128x16xf32>
    %432 = arith.truncf %431 : vector<128x16xf32> to vector<128x16xbf16>
    %c7_326 = arith.constant 7 : index
    %c0_327 = arith.constant 0 : index
    %c0_328 = arith.constant 0 : index
    %433 = vector.load %arg10[%c7_326, %c0_327, %c0_328] : memref<9x16x32xf32, #tpu.memory_space<vmem>>, vector<1x16x32xf32>
    %434 = vector.shape_cast %433 : vector<1x16x32xf32> to vector<16x32xf32>
    %435 = arith.truncf %434 : vector<16x32xf32> to vector<16x32xbf16>
    %cst_329 = arith.constant dense<0.000000e+00> : vector<128x32xf32>
    %436 = tpu.matmul %432, %435, %cst_329 {dimension_numbers = #tpu.dot_dimension_numbers<[1], [0], [0], [1], [0, 0, 1, 1], [], []>} : vector<128x16xbf16>, vector<16x32xbf16>, vector<128x32xf32> -> vector<128x32xf32>
    %437 = arith.addf %429, %436 : vector<128x32xf32>
    %c0_330 = arith.constant 0 : index
    %c2_331 = arith.constant 2 : index
    %c9_332 = arith.constant 9 : index
    %c0_333 = arith.constant 0 : index
    %438 = vector.load %arg18[%c0_330, %c2_331, %c9_332, %c0_333] : memref<2x10x18x16xf32, #tpu.memory_space<vmem>>, vector<2x8x8x16xf32>
    %439 = vector.shape_cast %438 : vector<2x8x8x16xf32> to vector<128x16xf32>
    %440 = arith.truncf %439 : vector<128x16xf32> to vector<128x16xbf16>
    %c8_334 = arith.constant 8 : index
    %c0_335 = arith.constant 0 : index
    %c0_336 = arith.constant 0 : index
    %441 = vector.load %arg10[%c8_334, %c0_335, %c0_336] : memref<9x16x32xf32, #tpu.memory_space<vmem>>, vector<1x16x32xf32>
    %442 = vector.shape_cast %441 : vector<1x16x32xf32> to vector<16x32xf32>
    %443 = arith.truncf %442 : vector<16x32xf32> to vector<16x32xbf16>
    %cst_337 = arith.constant dense<0.000000e+00> : vector<128x32xf32>
    %444 = tpu.matmul %440, %443, %cst_337 {dimension_numbers = #tpu.dot_dimension_numbers<[1], [0], [0], [1], [0, 0, 1, 1], [], []>} : vector<128x16xbf16>, vector<16x32xbf16>, vector<128x32xf32> -> vector<128x32xf32>
    %445 = arith.addf %437, %444 : vector<128x32xf32>
    %cst_338 = arith.constant 0.000000e+00 : f32
    %446 = vector.broadcast %cst_338 : f32 to vector<128x32xf32>
    %447 = arith.maximumf %445, %446 : vector<128x32xf32>
    %448 = vector.extract_strided_slice %447 {offsets = [0, 0], sizes = [16, 32], strides = [1, 1]} : vector<128x32xf32> to vector<16x32xf32>
    %449 = vector.extract_strided_slice %448 {offsets = [0, 0], sizes = [8, 32], strides = [1, 1]} : vector<16x32xf32> to vector<8x32xf32>
    %450 = vector.extract_strided_slice %448 {offsets = [8, 0], sizes = [8, 32], strides = [1, 1]} : vector<16x32xf32> to vector<8x32xf32>
    %451 = arith.maximumf %449, %450 : vector<8x32xf32>
    %cst_339 = arith.constant dense<0.000000e+00> : vector<4x32xf32>
    %452 = tpu.matmul %79, %451, %cst_339 {dimension_numbers = #tpu.dot_dimension_numbers<[1], [0], [0], [1], [0, 0, 1, 1], [], []>} : vector<4x8xf32>, vector<8x32xf32>, vector<4x32xf32> -> vector<4x32xf32>
    %cst_340 = arith.constant dense<0.000000e+00> : vector<4x32xf32>
    %453 = tpu.matmul %80, %451, %cst_340 {dimension_numbers = #tpu.dot_dimension_numbers<[1], [0], [0], [1], [0, 0, 1, 1], [], []>} : vector<4x8xf32>, vector<8x32xf32>, vector<4x32xf32> -> vector<4x32xf32>
    %454 = arith.maximumf %452, %453 : vector<4x32xf32>
    %c0_341 = arith.constant 0 : index
    %c0_342 = arith.constant 0 : index
    %c0_343 = arith.constant 0 : index
    %c0_344 = arith.constant 0 : index
    %455 = vector.load %arg19[%c0_341, %c0_342, %c0_343, %c0_344] : memref<2x4x4x32xf32, #tpu.memory_space<vmem>>, vector<1x1x4x32xf32>
    %456 = vector.shape_cast %455 : vector<1x1x4x32xf32> to vector<4x32xf32>
    %457 = vector.shape_cast %454 : vector<4x32xf32> to vector<1x1x4x32xf32>
    tpu.vector_store %arg19[%c0_341, %c0_342, %c0_343, %c0_344], %457 {strides = array<i32>} : memref<2x4x4x32xf32, #tpu.memory_space<vmem>>, vector<1x1x4x32xf32>,
    %458 = vector.extract_strided_slice %447 {offsets = [16, 0], sizes = [16, 32], strides = [1, 1]} : vector<128x32xf32> to vector<16x32xf32>
    %459 = vector.extract_strided_slice %458 {offsets = [0, 0], sizes = [8, 32], strides = [1, 1]} : vector<16x32xf32> to vector<8x32xf32>
    %460 = vector.extract_strided_slice %458 {offsets = [8, 0], sizes = [8, 32], strides = [1, 1]} : vector<16x32xf32> to vector<8x32xf32>
    %461 = arith.maximumf %459, %460 : vector<8x32xf32>
    %cst_345 = arith.constant dense<0.000000e+00> : vector<4x32xf32>
    %462 = tpu.matmul %79, %461, %cst_345 {dimension_numbers = #tpu.dot_dimension_numbers<[1], [0], [0], [1], [0, 0, 1, 1], [], []>} : vector<4x8xf32>, vector<8x32xf32>, vector<4x32xf32> -> vector<4x32xf32>
    %cst_346 = arith.constant dense<0.000000e+00> : vector<4x32xf32>
    %463 = tpu.matmul %80, %461, %cst_346 {dimension_numbers = #tpu.dot_dimension_numbers<[1], [0], [0], [1], [0, 0, 1, 1], [], []>} : vector<4x8xf32>, vector<8x32xf32>, vector<4x32xf32> -> vector<4x32xf32>
    %464 = arith.maximumf %462, %463 : vector<4x32xf32>
    %c0_347 = arith.constant 0 : index
    %c1_348 = arith.constant 1 : index
    %c0_349 = arith.constant 0 : index
    %c0_350 = arith.constant 0 : index
    %465 = vector.load %arg19[%c0_347, %c1_348, %c0_349, %c0_350] : memref<2x4x4x32xf32, #tpu.memory_space<vmem>>, vector<1x1x4x32xf32>
    %466 = vector.shape_cast %465 : vector<1x1x4x32xf32> to vector<4x32xf32>
    %467 = vector.shape_cast %464 : vector<4x32xf32> to vector<1x1x4x32xf32>
    tpu.vector_store %arg19[%c0_347, %c1_348, %c0_349, %c0_350], %467 {strides = array<i32>} : memref<2x4x4x32xf32, #tpu.memory_space<vmem>>, vector<1x1x4x32xf32>,
    %468 = vector.extract_strided_slice %447 {offsets = [32, 0], sizes = [16, 32], strides = [1, 1]} : vector<128x32xf32> to vector<16x32xf32>
    %469 = vector.extract_strided_slice %468 {offsets = [0, 0], sizes = [8, 32], strides = [1, 1]} : vector<16x32xf32> to vector<8x32xf32>
    %470 = vector.extract_strided_slice %468 {offsets = [8, 0], sizes = [8, 32], strides = [1, 1]} : vector<16x32xf32> to vector<8x32xf32>
    %471 = arith.maximumf %469, %470 : vector<8x32xf32>
    %cst_351 = arith.constant dense<0.000000e+00> : vector<4x32xf32>
    %472 = tpu.matmul %79, %471, %cst_351 {dimension_numbers = #tpu.dot_dimension_numbers<[1], [0], [0], [1], [0, 0, 1, 1], [], []>} : vector<4x8xf32>, vector<8x32xf32>, vector<4x32xf32> -> vector<4x32xf32>
    %cst_352 = arith.constant dense<0.000000e+00> : vector<4x32xf32>
    %473 = tpu.matmul %80, %471, %cst_352 {dimension_numbers = #tpu.dot_dimension_numbers<[1], [0], [0], [1], [0, 0, 1, 1], [], []>} : vector<4x8xf32>, vector<8x32xf32>, vector<4x32xf32> -> vector<4x32xf32>
    %474 = arith.maximumf %472, %473 : vector<4x32xf32>
    %c0_353 = arith.constant 0 : index
    %c2_354 = arith.constant 2 : index
    %c0_355 = arith.constant 0 : index
    %c0_356 = arith.constant 0 : index
    %475 = vector.load %arg19[%c0_353, %c2_354, %c0_355, %c0_356] : memref<2x4x4x32xf32, #tpu.memory_space<vmem>>, vector<1x1x4x32xf32>
    %476 = vector.shape_cast %475 : vector<1x1x4x32xf32> to vector<4x32xf32>
    %477 = vector.shape_cast %474 : vector<4x32xf32> to vector<1x1x4x32xf32>
    tpu.vector_store %arg19[%c0_353, %c2_354, %c0_355, %c0_356], %477 {strides = array<i32>} : memref<2x4x4x32xf32, #tpu.memory_space<vmem>>, vector<1x1x4x32xf32>,
    %478 = vector.extract_strided_slice %447 {offsets = [48, 0], sizes = [16, 32], strides = [1, 1]} : vector<128x32xf32> to vector<16x32xf32>
    %479 = vector.extract_strided_slice %478 {offsets = [0, 0], sizes = [8, 32], strides = [1, 1]} : vector<16x32xf32> to vector<8x32xf32>
    %480 = vector.extract_strided_slice %478 {offsets = [8, 0], sizes = [8, 32], strides = [1, 1]} : vector<16x32xf32> to vector<8x32xf32>
    %481 = arith.maximumf %479, %480 : vector<8x32xf32>
    %cst_357 = arith.constant dense<0.000000e+00> : vector<4x32xf32>
    %482 = tpu.matmul %79, %481, %cst_357 {dimension_numbers = #tpu.dot_dimension_numbers<[1], [0], [0], [1], [0, 0, 1, 1], [], []>} : vector<4x8xf32>, vector<8x32xf32>, vector<4x32xf32> -> vector<4x32xf32>
    %cst_358 = arith.constant dense<0.000000e+00> : vector<4x32xf32>
    %483 = tpu.matmul %80, %481, %cst_358 {dimension_numbers = #tpu.dot_dimension_numbers<[1], [0], [0], [1], [0, 0, 1, 1], [], []>} : vector<4x8xf32>, vector<8x32xf32>, vector<4x32xf32> -> vector<4x32xf32>
    %484 = arith.maximumf %482, %483 : vector<4x32xf32>
    %c0_359 = arith.constant 0 : index
    %c3_360 = arith.constant 3 : index
    %c0_361 = arith.constant 0 : index
    %c0_362 = arith.constant 0 : index
    %485 = vector.load %arg19[%c0_359, %c3_360, %c0_361, %c0_362] : memref<2x4x4x32xf32, #tpu.memory_space<vmem>>, vector<1x1x4x32xf32>
    %486 = vector.shape_cast %485 : vector<1x1x4x32xf32> to vector<4x32xf32>
    %487 = vector.shape_cast %484 : vector<4x32xf32> to vector<1x1x4x32xf32>
    tpu.vector_store %arg19[%c0_359, %c3_360, %c0_361, %c0_362], %487 {strides = array<i32>} : memref<2x4x4x32xf32, #tpu.memory_space<vmem>>, vector<1x1x4x32xf32>,
    %488 = vector.extract_strided_slice %447 {offsets = [64, 0], sizes = [16, 32], strides = [1, 1]} : vector<128x32xf32> to vector<16x32xf32>
    %489 = vector.extract_strided_slice %488 {offsets = [0, 0], sizes = [8, 32], strides = [1, 1]} : vector<16x32xf32> to vector<8x32xf32>
    %490 = vector.extract_strided_slice %488 {offsets = [8, 0], sizes = [8, 32], strides = [1, 1]} : vector<16x32xf32> to vector<8x32xf32>
    %491 = arith.maximumf %489, %490 : vector<8x32xf32>
    %cst_363 = arith.constant dense<0.000000e+00> : vector<4x32xf32>
    %492 = tpu.matmul %79, %491, %cst_363 {dimension_numbers = #tpu.dot_dimension_numbers<[1], [0], [0], [1], [0, 0, 1, 1], [], []>} : vector<4x8xf32>, vector<8x32xf32>, vector<4x32xf32> -> vector<4x32xf32>
    %cst_364 = arith.constant dense<0.000000e+00> : vector<4x32xf32>
    %493 = tpu.matmul %80, %491, %cst_364 {dimension_numbers = #tpu.dot_dimension_numbers<[1], [0], [0], [1], [0, 0, 1, 1], [], []>} : vector<4x8xf32>, vector<8x32xf32>, vector<4x32xf32> -> vector<4x32xf32>
    %494 = arith.maximumf %492, %493 : vector<4x32xf32>
    %c1_365 = arith.constant 1 : index
    %c0_366 = arith.constant 0 : index
    %c0_367 = arith.constant 0 : index
    %c0_368 = arith.constant 0 : index
    %495 = vector.load %arg19[%c1_365, %c0_366, %c0_367, %c0_368] : memref<2x4x4x32xf32, #tpu.memory_space<vmem>>, vector<1x1x4x32xf32>
    %496 = vector.shape_cast %495 : vector<1x1x4x32xf32> to vector<4x32xf32>
    %497 = vector.shape_cast %494 : vector<4x32xf32> to vector<1x1x4x32xf32>
    tpu.vector_store %arg19[%c1_365, %c0_366, %c0_367, %c0_368], %497 {strides = array<i32>} : memref<2x4x4x32xf32, #tpu.memory_space<vmem>>, vector<1x1x4x32xf32>,
    %498 = vector.extract_strided_slice %447 {offsets = [80, 0], sizes = [16, 32], strides = [1, 1]} : vector<128x32xf32> to vector<16x32xf32>
    %499 = vector.extract_strided_slice %498 {offsets = [0, 0], sizes = [8, 32], strides = [1, 1]} : vector<16x32xf32> to vector<8x32xf32>
    %500 = vector.extract_strided_slice %498 {offsets = [8, 0], sizes = [8, 32], strides = [1, 1]} : vector<16x32xf32> to vector<8x32xf32>
    %501 = arith.maximumf %499, %500 : vector<8x32xf32>
    %cst_369 = arith.constant dense<0.000000e+00> : vector<4x32xf32>
    %502 = tpu.matmul %79, %501, %cst_369 {dimension_numbers = #tpu.dot_dimension_numbers<[1], [0], [0], [1], [0, 0, 1, 1], [], []>} : vector<4x8xf32>, vector<8x32xf32>, vector<4x32xf32> -> vector<4x32xf32>
    %cst_370 = arith.constant dense<0.000000e+00> : vector<4x32xf32>
    %503 = tpu.matmul %80, %501, %cst_370 {dimension_numbers = #tpu.dot_dimension_numbers<[1], [0], [0], [1], [0, 0, 1, 1], [], []>} : vector<4x8xf32>, vector<8x32xf32>, vector<4x32xf32> -> vector<4x32xf32>
    %504 = arith.maximumf %502, %503 : vector<4x32xf32>
    %c1_371 = arith.constant 1 : index
    %c1_372 = arith.constant 1 : index
    %c0_373 = arith.constant 0 : index
    %c0_374 = arith.constant 0 : index
    %505 = vector.load %arg19[%c1_371, %c1_372, %c0_373, %c0_374] : memref<2x4x4x32xf32, #tpu.memory_space<vmem>>, vector<1x1x4x32xf32>
    %506 = vector.shape_cast %505 : vector<1x1x4x32xf32> to vector<4x32xf32>
    %507 = vector.shape_cast %504 : vector<4x32xf32> to vector<1x1x4x32xf32>
    tpu.vector_store %arg19[%c1_371, %c1_372, %c0_373, %c0_374], %507 {strides = array<i32>} : memref<2x4x4x32xf32, #tpu.memory_space<vmem>>, vector<1x1x4x32xf32>,
    %508 = vector.extract_strided_slice %447 {offsets = [96, 0], sizes = [16, 32], strides = [1, 1]} : vector<128x32xf32> to vector<16x32xf32>
    %509 = vector.extract_strided_slice %508 {offsets = [0, 0], sizes = [8, 32], strides = [1, 1]} : vector<16x32xf32> to vector<8x32xf32>
    %510 = vector.extract_strided_slice %508 {offsets = [8, 0], sizes = [8, 32], strides = [1, 1]} : vector<16x32xf32> to vector<8x32xf32>
    %511 = arith.maximumf %509, %510 : vector<8x32xf32>
    %cst_375 = arith.constant dense<0.000000e+00> : vector<4x32xf32>
    %512 = tpu.matmul %79, %511, %cst_375 {dimension_numbers = #tpu.dot_dimension_numbers<[1], [0], [0], [1], [0, 0, 1, 1], [], []>} : vector<4x8xf32>, vector<8x32xf32>, vector<4x32xf32> -> vector<4x32xf32>
    %cst_376 = arith.constant dense<0.000000e+00> : vector<4x32xf32>
    %513 = tpu.matmul %80, %511, %cst_376 {dimension_numbers = #tpu.dot_dimension_numbers<[1], [0], [0], [1], [0, 0, 1, 1], [], []>} : vector<4x8xf32>, vector<8x32xf32>, vector<4x32xf32> -> vector<4x32xf32>
    %514 = arith.maximumf %512, %513 : vector<4x32xf32>
    %c1_377 = arith.constant 1 : index
    %c2_378 = arith.constant 2 : index
    %c0_379 = arith.constant 0 : index
    %c0_380 = arith.constant 0 : index
    %515 = vector.load %arg19[%c1_377, %c2_378, %c0_379, %c0_380] : memref<2x4x4x32xf32, #tpu.memory_space<vmem>>, vector<1x1x4x32xf32>
    %516 = vector.shape_cast %515 : vector<1x1x4x32xf32> to vector<4x32xf32>
    %517 = vector.shape_cast %514 : vector<4x32xf32> to vector<1x1x4x32xf32>
    tpu.vector_store %arg19[%c1_377, %c2_378, %c0_379, %c0_380], %517 {strides = array<i32>} : memref<2x4x4x32xf32, #tpu.memory_space<vmem>>, vector<1x1x4x32xf32>,
    %518 = vector.extract_strided_slice %447 {offsets = [112, 0], sizes = [16, 32], strides = [1, 1]} : vector<128x32xf32> to vector<16x32xf32>
    %519 = vector.extract_strided_slice %518 {offsets = [0, 0], sizes = [8, 32], strides = [1, 1]} : vector<16x32xf32> to vector<8x32xf32>
    %520 = vector.extract_strided_slice %518 {offsets = [8, 0], sizes = [8, 32], strides = [1, 1]} : vector<16x32xf32> to vector<8x32xf32>
    %521 = arith.maximumf %519, %520 : vector<8x32xf32>
    %cst_381 = arith.constant dense<0.000000e+00> : vector<4x32xf32>
    %522 = tpu.matmul %79, %521, %cst_381 {dimension_numbers = #tpu.dot_dimension_numbers<[1], [0], [0], [1], [0, 0, 1, 1], [], []>} : vector<4x8xf32>, vector<8x32xf32>, vector<4x32xf32> -> vector<4x32xf32>
    %cst_382 = arith.constant dense<0.000000e+00> : vector<4x32xf32>
    %523 = tpu.matmul %80, %521, %cst_382 {dimension_numbers = #tpu.dot_dimension_numbers<[1], [0], [0], [1], [0, 0, 1, 1], [], []>} : vector<4x8xf32>, vector<8x32xf32>, vector<4x32xf32> -> vector<4x32xf32>
    %524 = arith.maximumf %522, %523 : vector<4x32xf32>
    %c1_383 = arith.constant 1 : index
    %c3_384 = arith.constant 3 : index
    %c0_385 = arith.constant 0 : index
    %c0_386 = arith.constant 0 : index
    %525 = vector.load %arg19[%c1_383, %c3_384, %c0_385, %c0_386] : memref<2x4x4x32xf32, #tpu.memory_space<vmem>>, vector<1x1x4x32xf32>
    %526 = vector.shape_cast %525 : vector<1x1x4x32xf32> to vector<4x32xf32>
    %527 = vector.shape_cast %524 : vector<4x32xf32> to vector<1x1x4x32xf32>
    tpu.vector_store %arg19[%c1_383, %c3_384, %c0_385, %c0_386], %527 {strides = array<i32>} : memref<2x4x4x32xf32, #tpu.memory_space<vmem>>, vector<1x1x4x32xf32>,
    %c0_387 = arith.constant 0 : index
    %c0_388 = arith.constant 0 : index
    %c0_389 = arith.constant 0 : index
    %c0_390 = arith.constant 0 : index
    %528 = vector.load %arg19[%c0_387, %c0_388, %c0_389, %c0_390] : memref<2x4x4x32xf32, #tpu.memory_space<vmem>>, vector<2x4x4x32xf32>
    %c0_391 = arith.constant 0 : index
    %c0_392 = arith.constant 0 : index
    %c0_393 = arith.constant 0 : index
    %529 = vector.load %arg12[%c0_391, %c0_392, %c0_393] : memref<16x32x32xf32, #tpu.memory_space<vmem>>, vector<16x32x32xf32>
    %cst_394 = arith.constant 0.000000e+00 : f32
    %530 = vector.broadcast %cst_394 : f32 to vector<2x32xf32>
    %c0_395 = arith.constant 0 : index
    %c0_396 = arith.constant 0 : index
    %531 = vector.load %arg13[%c0_395, %c0_396] : memref<1x32xf32, #tpu.memory_space<vmem>>, vector<1x32xf32>
    %532 = vector.broadcast %531 : vector<1x32xf32> to vector<2x32xf32>
    %533 = arith.addf %530, %532 : vector<2x32xf32>
    %534 = vector.extract_strided_slice %528 {offsets = [0, 0, 0, 0], sizes = [2, 1, 1, 32], strides = [1, 1, 1, 1]} : vector<2x4x4x32xf32> to vector<2x1x1x32xf32>
    %535 = vector.shape_cast %534 : vector<2x1x1x32xf32> to vector<2x32xf32>
    %536 = arith.truncf %535 : vector<2x32xf32> to vector<2x32xbf16>
    %537 = vector.extract_strided_slice %529 {offsets = [0, 0, 0], sizes = [1, 32, 32], strides = [1, 1, 1]} : vector<16x32x32xf32> to vector<1x32x32xf32>
    %538 = vector.shape_cast %537 : vector<1x32x32xf32> to vector<32x32xf32>
    %539 = arith.truncf %538 : vector<32x32xf32> to vector<32x32xbf16>
    %cst_397 = arith.constant dense<0.000000e+00> : vector<2x32xf32>
    %540 = tpu.matmul %536, %539, %cst_397 {dimension_numbers = #tpu.dot_dimension_numbers<[1], [0], [0], [1], [0, 0, 1, 1], [], []>} : vector<2x32xbf16>, vector<32x32xbf16>, vector<2x32xf32> -> vector<2x32xf32>
    %541 = arith.addf %533, %540 : vector<2x32xf32>
    %542 = vector.extract_strided_slice %528 {offsets = [0, 0, 1, 0], sizes = [2, 1, 1, 32], strides = [1, 1, 1, 1]} : vector<2x4x4x32xf32> to vector<2x1x1x32xf32>
    %543 = vector.shape_cast %542 : vector<2x1x1x32xf32> to vector<2x32xf32>
    %544 = arith.truncf %543 : vector<2x32xf32> to vector<2x32xbf16>
    %545 = vector.extract_strided_slice %529 {offsets = [1, 0, 0], sizes = [1, 32, 32], strides = [1, 1, 1]} : vector<16x32x32xf32> to vector<1x32x32xf32>
    %546 = vector.shape_cast %545 : vector<1x32x32xf32> to vector<32x32xf32>
    %547 = arith.truncf %546 : vector<32x32xf32> to vector<32x32xbf16>
    %cst_398 = arith.constant dense<0.000000e+00> : vector<2x32xf32>
    %548 = tpu.matmul %544, %547, %cst_398 {dimension_numbers = #tpu.dot_dimension_numbers<[1], [0], [0], [1], [0, 0, 1, 1], [], []>} : vector<2x32xbf16>, vector<32x32xbf16>, vector<2x32xf32> -> vector<2x32xf32>
    %549 = arith.addf %541, %548 : vector<2x32xf32>
    %550 = vector.extract_strided_slice %528 {offsets = [0, 0, 2, 0], sizes = [2, 1, 1, 32], strides = [1, 1, 1, 1]} : vector<2x4x4x32xf32> to vector<2x1x1x32xf32>
    %551 = vector.shape_cast %550 : vector<2x1x1x32xf32> to vector<2x32xf32>
    %552 = arith.truncf %551 : vector<2x32xf32> to vector<2x32xbf16>
    %553 = vector.extract_strided_slice %529 {offsets = [2, 0, 0], sizes = [1, 32, 32], strides = [1, 1, 1]} : vector<16x32x32xf32> to vector<1x32x32xf32>
    %554 = vector.shape_cast %553 : vector<1x32x32xf32> to vector<32x32xf32>
    %555 = arith.truncf %554 : vector<32x32xf32> to vector<32x32xbf16>
    %cst_399 = arith.constant dense<0.000000e+00> : vector<2x32xf32>
    %556 = tpu.matmul %552, %555, %cst_399 {dimension_numbers = #tpu.dot_dimension_numbers<[1], [0], [0], [1], [0, 0, 1, 1], [], []>} : vector<2x32xbf16>, vector<32x32xbf16>, vector<2x32xf32> -> vector<2x32xf32>
    %557 = arith.addf %549, %556 : vector<2x32xf32>
    %558 = vector.extract_strided_slice %528 {offsets = [0, 0, 3, 0], sizes = [2, 1, 1, 32], strides = [1, 1, 1, 1]} : vector<2x4x4x32xf32> to vector<2x1x1x32xf32>
    %559 = vector.shape_cast %558 : vector<2x1x1x32xf32> to vector<2x32xf32>
    %560 = arith.truncf %559 : vector<2x32xf32> to vector<2x32xbf16>
    %561 = vector.extract_strided_slice %529 {offsets = [3, 0, 0], sizes = [1, 32, 32], strides = [1, 1, 1]} : vector<16x32x32xf32> to vector<1x32x32xf32>
    %562 = vector.shape_cast %561 : vector<1x32x32xf32> to vector<32x32xf32>
    %563 = arith.truncf %562 : vector<32x32xf32> to vector<32x32xbf16>
    %cst_400 = arith.constant dense<0.000000e+00> : vector<2x32xf32>
    %564 = tpu.matmul %560, %563, %cst_400 {dimension_numbers = #tpu.dot_dimension_numbers<[1], [0], [0], [1], [0, 0, 1, 1], [], []>} : vector<2x32xbf16>, vector<32x32xbf16>, vector<2x32xf32> -> vector<2x32xf32>
    %565 = arith.addf %557, %564 : vector<2x32xf32>
    %566 = vector.extract_strided_slice %528 {offsets = [0, 1, 0, 0], sizes = [2, 1, 1, 32], strides = [1, 1, 1, 1]} : vector<2x4x4x32xf32> to vector<2x1x1x32xf32>
    %567 = vector.shape_cast %566 : vector<2x1x1x32xf32> to vector<2x32xf32>
    %568 = arith.truncf %567 : vector<2x32xf32> to vector<2x32xbf16>
    %569 = vector.extract_strided_slice %529 {offsets = [4, 0, 0], sizes = [1, 32, 32], strides = [1, 1, 1]} : vector<16x32x32xf32> to vector<1x32x32xf32>
    %570 = vector.shape_cast %569 : vector<1x32x32xf32> to vector<32x32xf32>
    %571 = arith.truncf %570 : vector<32x32xf32> to vector<32x32xbf16>
    %cst_401 = arith.constant dense<0.000000e+00> : vector<2x32xf32>
    %572 = tpu.matmul %568, %571, %cst_401 {dimension_numbers = #tpu.dot_dimension_numbers<[1], [0], [0], [1], [0, 0, 1, 1], [], []>} : vector<2x32xbf16>, vector<32x32xbf16>, vector<2x32xf32> -> vector<2x32xf32>
    %573 = arith.addf %565, %572 : vector<2x32xf32>
    %574 = vector.extract_strided_slice %528 {offsets = [0, 1, 1, 0], sizes = [2, 1, 1, 32], strides = [1, 1, 1, 1]} : vector<2x4x4x32xf32> to vector<2x1x1x32xf32>
    %575 = vector.shape_cast %574 : vector<2x1x1x32xf32> to vector<2x32xf32>
    %576 = arith.truncf %575 : vector<2x32xf32> to vector<2x32xbf16>
    %577 = vector.extract_strided_slice %529 {offsets = [5, 0, 0], sizes = [1, 32, 32], strides = [1, 1, 1]} : vector<16x32x32xf32> to vector<1x32x32xf32>
    %578 = vector.shape_cast %577 : vector<1x32x32xf32> to vector<32x32xf32>
    %579 = arith.truncf %578 : vector<32x32xf32> to vector<32x32xbf16>
    %cst_402 = arith.constant dense<0.000000e+00> : vector<2x32xf32>
    %580 = tpu.matmul %576, %579, %cst_402 {dimension_numbers = #tpu.dot_dimension_numbers<[1], [0], [0], [1], [0, 0, 1, 1], [], []>} : vector<2x32xbf16>, vector<32x32xbf16>, vector<2x32xf32> -> vector<2x32xf32>
    %581 = arith.addf %573, %580 : vector<2x32xf32>
    %582 = vector.extract_strided_slice %528 {offsets = [0, 1, 2, 0], sizes = [2, 1, 1, 32], strides = [1, 1, 1, 1]} : vector<2x4x4x32xf32> to vector<2x1x1x32xf32>
    %583 = vector.shape_cast %582 : vector<2x1x1x32xf32> to vector<2x32xf32>
    %584 = arith.truncf %583 : vector<2x32xf32> to vector<2x32xbf16>
    %585 = vector.extract_strided_slice %529 {offsets = [6, 0, 0], sizes = [1, 32, 32], strides = [1, 1, 1]} : vector<16x32x32xf32> to vector<1x32x32xf32>
    %586 = vector.shape_cast %585 : vector<1x32x32xf32> to vector<32x32xf32>
    %587 = arith.truncf %586 : vector<32x32xf32> to vector<32x32xbf16>
    %cst_403 = arith.constant dense<0.000000e+00> : vector<2x32xf32>
    %588 = tpu.matmul %584, %587, %cst_403 {dimension_numbers = #tpu.dot_dimension_numbers<[1], [0], [0], [1], [0, 0, 1, 1], [], []>} : vector<2x32xbf16>, vector<32x32xbf16>, vector<2x32xf32> -> vector<2x32xf32>
    %589 = arith.addf %581, %588 : vector<2x32xf32>
    %590 = vector.extract_strided_slice %528 {offsets = [0, 1, 3, 0], sizes = [2, 1, 1, 32], strides = [1, 1, 1, 1]} : vector<2x4x4x32xf32> to vector<2x1x1x32xf32>
    %591 = vector.shape_cast %590 : vector<2x1x1x32xf32> to vector<2x32xf32>
    %592 = arith.truncf %591 : vector<2x32xf32> to vector<2x32xbf16>
    %593 = vector.extract_strided_slice %529 {offsets = [7, 0, 0], sizes = [1, 32, 32], strides = [1, 1, 1]} : vector<16x32x32xf32> to vector<1x32x32xf32>
    %594 = vector.shape_cast %593 : vector<1x32x32xf32> to vector<32x32xf32>
    %595 = arith.truncf %594 : vector<32x32xf32> to vector<32x32xbf16>
    %cst_404 = arith.constant dense<0.000000e+00> : vector<2x32xf32>
    %596 = tpu.matmul %592, %595, %cst_404 {dimension_numbers = #tpu.dot_dimension_numbers<[1], [0], [0], [1], [0, 0, 1, 1], [], []>} : vector<2x32xbf16>, vector<32x32xbf16>, vector<2x32xf32> -> vector<2x32xf32>
    %597 = arith.addf %589, %596 : vector<2x32xf32>
    %598 = vector.extract_strided_slice %528 {offsets = [0, 2, 0, 0], sizes = [2, 1, 1, 32], strides = [1, 1, 1, 1]} : vector<2x4x4x32xf32> to vector<2x1x1x32xf32>
    %599 = vector.shape_cast %598 : vector<2x1x1x32xf32> to vector<2x32xf32>
    %600 = arith.truncf %599 : vector<2x32xf32> to vector<2x32xbf16>
    %601 = vector.extract_strided_slice %529 {offsets = [8, 0, 0], sizes = [1, 32, 32], strides = [1, 1, 1]} : vector<16x32x32xf32> to vector<1x32x32xf32>
    %602 = vector.shape_cast %601 : vector<1x32x32xf32> to vector<32x32xf32>
    %603 = arith.truncf %602 : vector<32x32xf32> to vector<32x32xbf16>
    %cst_405 = arith.constant dense<0.000000e+00> : vector<2x32xf32>
    %604 = tpu.matmul %600, %603, %cst_405 {dimension_numbers = #tpu.dot_dimension_numbers<[1], [0], [0], [1], [0, 0, 1, 1], [], []>} : vector<2x32xbf16>, vector<32x32xbf16>, vector<2x32xf32> -> vector<2x32xf32>
    %605 = arith.addf %597, %604 : vector<2x32xf32>
    %606 = vector.extract_strided_slice %528 {offsets = [0, 2, 1, 0], sizes = [2, 1, 1, 32], strides = [1, 1, 1, 1]} : vector<2x4x4x32xf32> to vector<2x1x1x32xf32>
    %607 = vector.shape_cast %606 : vector<2x1x1x32xf32> to vector<2x32xf32>
    %608 = arith.truncf %607 : vector<2x32xf32> to vector<2x32xbf16>
    %609 = vector.extract_strided_slice %529 {offsets = [9, 0, 0], sizes = [1, 32, 32], strides = [1, 1, 1]} : vector<16x32x32xf32> to vector<1x32x32xf32>
    %610 = vector.shape_cast %609 : vector<1x32x32xf32> to vector<32x32xf32>
    %611 = arith.truncf %610 : vector<32x32xf32> to vector<32x32xbf16>
    %cst_406 = arith.constant dense<0.000000e+00> : vector<2x32xf32>
    %612 = tpu.matmul %608, %611, %cst_406 {dimension_numbers = #tpu.dot_dimension_numbers<[1], [0], [0], [1], [0, 0, 1, 1], [], []>} : vector<2x32xbf16>, vector<32x32xbf16>, vector<2x32xf32> -> vector<2x32xf32>
    %613 = arith.addf %605, %612 : vector<2x32xf32>
    %614 = vector.extract_strided_slice %528 {offsets = [0, 2, 2, 0], sizes = [2, 1, 1, 32], strides = [1, 1, 1, 1]} : vector<2x4x4x32xf32> to vector<2x1x1x32xf32>
    %615 = vector.shape_cast %614 : vector<2x1x1x32xf32> to vector<2x32xf32>
    %616 = arith.truncf %615 : vector<2x32xf32> to vector<2x32xbf16>
    %617 = vector.extract_strided_slice %529 {offsets = [10, 0, 0], sizes = [1, 32, 32], strides = [1, 1, 1]} : vector<16x32x32xf32> to vector<1x32x32xf32>
    %618 = vector.shape_cast %617 : vector<1x32x32xf32> to vector<32x32xf32>
    %619 = arith.truncf %618 : vector<32x32xf32> to vector<32x32xbf16>
    %cst_407 = arith.constant dense<0.000000e+00> : vector<2x32xf32>
    %620 = tpu.matmul %616, %619, %cst_407 {dimension_numbers = #tpu.dot_dimension_numbers<[1], [0], [0], [1], [0, 0, 1, 1], [], []>} : vector<2x32xbf16>, vector<32x32xbf16>, vector<2x32xf32> -> vector<2x32xf32>
    %621 = arith.addf %613, %620 : vector<2x32xf32>
    %622 = vector.extract_strided_slice %528 {offsets = [0, 2, 3, 0], sizes = [2, 1, 1, 32], strides = [1, 1, 1, 1]} : vector<2x4x4x32xf32> to vector<2x1x1x32xf32>
    %623 = vector.shape_cast %622 : vector<2x1x1x32xf32> to vector<2x32xf32>
    %624 = arith.truncf %623 : vector<2x32xf32> to vector<2x32xbf16>
    %625 = vector.extract_strided_slice %529 {offsets = [11, 0, 0], sizes = [1, 32, 32], strides = [1, 1, 1]} : vector<16x32x32xf32> to vector<1x32x32xf32>
    %626 = vector.shape_cast %625 : vector<1x32x32xf32> to vector<32x32xf32>
    %627 = arith.truncf %626 : vector<32x32xf32> to vector<32x32xbf16>
    %cst_408 = arith.constant dense<0.000000e+00> : vector<2x32xf32>
    %628 = tpu.matmul %624, %627, %cst_408 {dimension_numbers = #tpu.dot_dimension_numbers<[1], [0], [0], [1], [0, 0, 1, 1], [], []>} : vector<2x32xbf16>, vector<32x32xbf16>, vector<2x32xf32> -> vector<2x32xf32>
    %629 = arith.addf %621, %628 : vector<2x32xf32>
    %630 = vector.extract_strided_slice %528 {offsets = [0, 3, 0, 0], sizes = [2, 1, 1, 32], strides = [1, 1, 1, 1]} : vector<2x4x4x32xf32> to vector<2x1x1x32xf32>
    %631 = vector.shape_cast %630 : vector<2x1x1x32xf32> to vector<2x32xf32>
    %632 = arith.truncf %631 : vector<2x32xf32> to vector<2x32xbf16>
    %633 = vector.extract_strided_slice %529 {offsets = [12, 0, 0], sizes = [1, 32, 32], strides = [1, 1, 1]} : vector<16x32x32xf32> to vector<1x32x32xf32>
    %634 = vector.shape_cast %633 : vector<1x32x32xf32> to vector<32x32xf32>
    %635 = arith.truncf %634 : vector<32x32xf32> to vector<32x32xbf16>
    %cst_409 = arith.constant dense<0.000000e+00> : vector<2x32xf32>
    %636 = tpu.matmul %632, %635, %cst_409 {dimension_numbers = #tpu.dot_dimension_numbers<[1], [0], [0], [1], [0, 0, 1, 1], [], []>} : vector<2x32xbf16>, vector<32x32xbf16>, vector<2x32xf32> -> vector<2x32xf32>
    %637 = arith.addf %629, %636 : vector<2x32xf32>
    %638 = vector.extract_strided_slice %528 {offsets = [0, 3, 1, 0], sizes = [2, 1, 1, 32], strides = [1, 1, 1, 1]} : vector<2x4x4x32xf32> to vector<2x1x1x32xf32>
    %639 = vector.shape_cast %638 : vector<2x1x1x32xf32> to vector<2x32xf32>
    %640 = arith.truncf %639 : vector<2x32xf32> to vector<2x32xbf16>
    %641 = vector.extract_strided_slice %529 {offsets = [13, 0, 0], sizes = [1, 32, 32], strides = [1, 1, 1]} : vector<16x32x32xf32> to vector<1x32x32xf32>
    %642 = vector.shape_cast %641 : vector<1x32x32xf32> to vector<32x32xf32>
    %643 = arith.truncf %642 : vector<32x32xf32> to vector<32x32xbf16>
    %cst_410 = arith.constant dense<0.000000e+00> : vector<2x32xf32>
    %644 = tpu.matmul %640, %643, %cst_410 {dimension_numbers = #tpu.dot_dimension_numbers<[1], [0], [0], [1], [0, 0, 1, 1], [], []>} : vector<2x32xbf16>, vector<32x32xbf16>, vector<2x32xf32> -> vector<2x32xf32>
    %645 = arith.addf %637, %644 : vector<2x32xf32>
    %646 = vector.extract_strided_slice %528 {offsets = [0, 3, 2, 0], sizes = [2, 1, 1, 32], strides = [1, 1, 1, 1]} : vector<2x4x4x32xf32> to vector<2x1x1x32xf32>
    %647 = vector.shape_cast %646 : vector<2x1x1x32xf32> to vector<2x32xf32>
    %648 = arith.truncf %647 : vector<2x32xf32> to vector<2x32xbf16>
    %649 = vector.extract_strided_slice %529 {offsets = [14, 0, 0], sizes = [1, 32, 32], strides = [1, 1, 1]} : vector<16x32x32xf32> to vector<1x32x32xf32>
    %650 = vector.shape_cast %649 : vector<1x32x32xf32> to vector<32x32xf32>
    %651 = arith.truncf %650 : vector<32x32xf32> to vector<32x32xbf16>
    %cst_411 = arith.constant dense<0.000000e+00> : vector<2x32xf32>
    %652 = tpu.matmul %648, %651, %cst_411 {dimension_numbers = #tpu.dot_dimension_numbers<[1], [0], [0], [1], [0, 0, 1, 1], [], []>} : vector<2x32xbf16>, vector<32x32xbf16>, vector<2x32xf32> -> vector<2x32xf32>
    %653 = arith.addf %645, %652 : vector<2x32xf32>
    %654 = vector.extract_strided_slice %528 {offsets = [0, 3, 3, 0], sizes = [2, 1, 1, 32], strides = [1, 1, 1, 1]} : vector<2x4x4x32xf32> to vector<2x1x1x32xf32>
    %655 = vector.shape_cast %654 : vector<2x1x1x32xf32> to vector<2x32xf32>
    %656 = arith.truncf %655 : vector<2x32xf32> to vector<2x32xbf16>
    %657 = vector.extract_strided_slice %529 {offsets = [15, 0, 0], sizes = [1, 32, 32], strides = [1, 1, 1]} : vector<16x32x32xf32> to vector<1x32x32xf32>
    %658 = vector.shape_cast %657 : vector<1x32x32xf32> to vector<32x32xf32>
    %659 = arith.truncf %658 : vector<32x32xf32> to vector<32x32xbf16>
    %cst_412 = arith.constant dense<0.000000e+00> : vector<2x32xf32>
    %660 = tpu.matmul %656, %659, %cst_412 {dimension_numbers = #tpu.dot_dimension_numbers<[1], [0], [0], [1], [0, 0, 1, 1], [], []>} : vector<2x32xbf16>, vector<32x32xbf16>, vector<2x32xf32> -> vector<2x32xf32>
    %661 = arith.addf %653, %660 : vector<2x32xf32>
    %cst_413 = arith.constant 0.000000e+00 : f32
    %662 = vector.broadcast %cst_413 : f32 to vector<2x32xf32>
    %663 = arith.maximumf %64, %662 : vector<2x32xf32>
    %cst_414 = arith.constant 0.000000e+00 : f32
    %664 = vector.broadcast %cst_414 : f32 to vector<2x32xf32>
    %665 = arith.maximumf %661, %664 : vector<2x32xf32>
    %666 = arith.truncf %663 : vector<2x32xf32> to vector<2x32xbf16>
    %c0_415 = arith.constant 0 : index
    %c0_416 = arith.constant 0 : index
    %667 = vector.load %arg14[%c0_415, %c0_416] : memref<64x128xf32, #tpu.memory_space<vmem>>, vector<32x128xf32>
    %668 = arith.truncf %667 : vector<32x128xf32> to vector<32x128xbf16>
    %cst_417 = arith.constant dense<0.000000e+00> : vector<2x128xf32>
    %669 = tpu.matmul %666, %668, %cst_417 {dimension_numbers = #tpu.dot_dimension_numbers<[1], [0], [0], [1], [0, 0, 1, 1], [], []>} : vector<2x32xbf16>, vector<32x128xbf16>, vector<2x128xf32> -> vector<2x128xf32>
    %670 = arith.truncf %665 : vector<2x32xf32> to vector<2x32xbf16>
    %c32_418 = arith.constant 32 : index
    %c0_419 = arith.constant 0 : index
    %671 = vector.load %arg14[%c32_418, %c0_419] : memref<64x128xf32, #tpu.memory_space<vmem>>, vector<32x128xf32>
    %672 = arith.truncf %671 : vector<32x128xf32> to vector<32x128xbf16>
    %cst_420 = arith.constant dense<0.000000e+00> : vector<2x128xf32>
    %673 = tpu.matmul %670, %672, %cst_420 {dimension_numbers = #tpu.dot_dimension_numbers<[1], [0], [0], [1], [0, 0, 1, 1], [], []>} : vector<2x32xbf16>, vector<32x128xbf16>, vector<2x128xf32> -> vector<2x128xf32>
    %674 = arith.addf %669, %673 : vector<2x128xf32>
    %c0_421 = arith.constant 0 : index
    %c0_422 = arith.constant 0 : index
    %675 = vector.load %arg15[%c0_421, %c0_422] : memref<1x128xf32, #tpu.memory_space<vmem>>, vector<1x128xf32>
    %676 = vector.broadcast %675 : vector<1x128xf32> to vector<2x128xf32>
    %677 = arith.addf %674, %676 : vector<2x128xf32>
    %c0_423 = arith.constant 0 : index
    %c0_424 = arith.constant 0 : index
    %678 = vector.load %arg16[%c0_423, %c0_424] : memref<2x128xf32, #tpu.memory_space<vmem>>, vector<2x128xf32>
    tpu.vector_store %arg16[%c0_423, %c0_424], %677 {strides = array<i32>} : memref<2x128xf32, #tpu.memory_space<vmem>>, vector<2x128xf32>,
    return
  }
}

</mosaic_0001>

<bundles_post_ra>
// kernel: multimodal_forward.1
= control target key start
LH: loop header
LB: loop body
LE: loop exit
PB: predicated region body
PF: predicated region fallthrough
CT: control target
= control target key end

     0   :  { %s21061_s0 = inlined_call_operand.vmem [shape: s32[16,1], index: 0, kind: input, shape index: {}]   ;;  %s21062_s1 = inlined_call_operand.vmem [shape: f32[50,32], index: 1, kind: input, shape index: {}]   ;;  %s21063_s2 = inlined_call_operand.vmem [shape: f32[32,32], index: 2, kind: input, shape index: {}]   ;;  %s21064_s3 = inlined_call_operand.vmem [shape: f32[32,32], index: 3, kind: input, shape index: {}]   ;;  %s21065_s4 = inlined_call_operand.vmem [shape: f32[1,32], index: 4, kind: input, shape index: {}]   ;;  %s21066_s5 = inlined_call_operand.vmem [shape: f32[32,32], index: 5, kind: input, shape index: {}]   ;;  %s21067_s6 = inlined_call_operand.vmem [shape: f32[1,32], index: 6, kind: input, shape index: {}]   ;;  %s21068_s7 = inlined_call_operand.vmem [shape: f32[2,18,18,3], index: 7, kind: input, shape index: {}]   ;;  %s21069_s8 = inlined_call_operand.vmem [shape: f32[9,3,16], index: 8, kind: input, shape index: {}]   ;;  %s21070_s9 = inlined_call_operand.vmem [shape: f32[1,16], index: 9, kind: input, shape index: {}]   ;;  %s21071_s10 = inlined_call_operand.vmem [shape: f32[9,16,32], index: 10, kind: input, shape index: {}]   ;;  %s21072_s11 = inlined_call_operand.vmem [shape: f32[1,32], index: 11, kind: input, shape index: {}]   ;;  %s21073_s12 = inlined_call_operand.vmem [shape: f32[16,32,32], index: 12, kind: input, shape index: {}]   ;;  %s21074_s13 = inlined_call_operand.vmem [shape: f32[1,32], index: 13, kind: input, shape index: {}]   ;;  %s21075_s14 = inlined_call_operand.vmem [shape: f32[64,128], index: 14, kind: input, shape index: {}]   ;;  %s21076_s15 = inlined_call_operand.vmem [shape: f32[1,128], index: 15, kind: input, shape index: {}]   ;;  %s21077_s16 = inlined_call_operand.hbm [shape: f32[2,128], index: 16, kind: output, shape index: {}]  }
   0x1   :  { %21089 = sst [smem:[#allocation31_spill]] %s21061_s0 }
   0x2   :  { %s21090_s23 = sld [smem:[#allocation31_spill]]  ;;  %v77_v1 = vld [vmem:[%s21062_s1 + $0x30] sm:$0x3]  ;;  %vm85_vm0 = vcmask 1041408   ;;  %v15884_v2 = vmov 0   ;;  %v76_v3 = vld [vmem:[%s21062_s1 + $0x28] sm:$0xff] }
   0x3   :  { %15845 = vset.pattern.permute.xlu0 %v15884_v2  ;;  %14539 = vmatprep.subr.msk.mxu0 %vm85_vm0, %v77_v1  ;;  %v75_v4 = vld [vmem:[%s21062_s1 + $0x20] sm:$0xff]  ;;  %v21080_v6 = vmov 0.0  }
   0x4   :  { %14540 = vmatpush3.msk.msra.mxu0 %vm85_vm0, %v77_v1  ;;  %14556 = vmatprep.subr.bf16.mxu1 %v21080_v6 }
   0x5   :  { %14541 = vmatprep.subr.mxu0 %v76_v3 }
   0x8   :  { %v55_v0 = vld [vmem:[%s21090_s23] sm:$0xff]  ;;  %v56_v5 = vld [vmem:[%s21090_s23 + $0x8] sm:$0xff] }
   0x9   :  { %60 = vperm.xlu0 %15845, %v55_v0  }
   0xa   :  { %21 = vsyncpa [#allocation6], 0  ;;  %14542 = vmatpush3.msra.mxu0 %v76_v3  ;;  %v74_v7 = vld [vmem:[%s21062_s1 + $0x18] sm:$0xff]  ;;  %v167_v8 = vld [vmem:[%s21063_s2 + $0x10] sm:$0xff]  ;;  %v21079_v14 = vlaneseq  ;;  %vm78_vm1 = vcmask 408576   ;;  %vm15886_vm4 = vmmov 0  }
   0xb   :  { %v168_v9 = vld [vmem:[%s21063_s2 + $0x18] sm:$0xff]  ;;  %14543 = vmatprep.subr.mxu0 %v75_v4  ;;  %v73_v11 = vld [vmem:[%s21062_s1 + $0x10] sm:$0xff]  ;;  %v72_v12 = vld [vmem:[%s21062_s1 + $0x8] sm:$0xff]  ;;  %14560 = vmatprep.mubr.msk.bf16.mxu1 %vm15886_vm4, %v21080_v6  ;;  %vm178_vm5 = vcmask 261120   ;;  %vm1025_vm6 = vcmask 1040384   ;;  %vm928_vm7 = vcmask 23552  }
   0xc   :  { %v170_v10 = vpack.c.bf16 %v168_v9, %v167_v8  ;;  %14544 = vmatpush3.msra.mxu0 %v75_v4  ;;  %v71_v13 = vld [vmem:[%s21062_s1] sm:$0xff]  ;;  %v16014_v15 = vand.u32 127, %v21079_v14  ;;  %v166_v21 = vld [vmem:[%s21063_s2 + $0x8] sm:$0xff]  ;;  %v225_v23 = vld [vmem:[%s21064_s3 + $0x10] sm:$0xff]  ;;  %vm701_vm8 = vcmask 130048   ;;  %vm6884_vm11 = vcmask 123904  }
   0xd   :  { %63 = vperm.xlu0 %15845, %v56_v5   ;;  %14545 = vmatprep.subr.mxu0 %v74_v7  ;;  %v165_v20 = vld [vmem:[%s21063_s2] sm:$0xff]  ;;  %v226_v24 = vld [vmem:[%s21064_s3 + $0x18] sm:$0xff]  ;;  %v224_v27 = vld [vmem:[%s21064_s3 + $0x8] sm:$0xff]  ;;  %6882 = vst.msk [vmem:[#allocation3] sm:$0xff] %vm701_vm8, %v21080_v6  ;;  %vm10906_vm12 = vcmask 64512   ;;  %vm11052_vm13 = vcmask 257024  }
   0xe   :  { %14557 = vmatpush3.bf16.msra.mxu1 %v170_v10  ;;  %14546 = vmatpush3.msra.mxu0 %v74_v7  ;;  %21091 = vst [vmem:[#allocation8_spill] sm:$0xff] %v16014_v15  ;;  %v169_v22 = vpack.c.bf16 %v166_v21, %v165_v20  ;;  %v16035_v25 = vpack.c.bf16 %v226_v24, %v225_v23  ;;  %v223_v26 = vld [vmem:[%s21064_s3] sm:$0xff]  ;;  %6883 = vst.msk [vmem:[#allocation3 + $0x8] sm:$0xff] %vm701_vm8, %v21080_v6  ;;  %vm12151_vm14 = vcmask 1041409   ;;  %s15888_s25 = smov [#allocation5]  }
   0xf   :  { %14558 = vmatprep.subr.bf16.mxu1 %v21080_v6  ;;  %14547 = vmatprep.subr.mxu0 %v73_v11  ;;  %v16047_v28 = vpack.c.bf16 %v224_v27, %v223_v26  ;;  %v13089_v34 = vld [vmem:[%s21065_s4] ss:$0 sm:$0xff]  ;;  %6886 = vst.msk [vmem:[#allocation3 + $0x18] sm:$0xff] %vm701_vm8, %v21080_v6  ;;  %6887 = vst.msk [vmem:[#allocation3 + $0x20] sm:$0xff] %vm701_vm8, %v21080_v6  ;;  %s13076_s26 = sshll.u32 %s15888_s25, 4  ;;  %s13077_s26 = int_to_ptr.vmem [resolvable:$true] %s13076_s26 }
  0x10   :  { %14548 = vmatpush3.msra.mxu0 %v73_v11  ;;  %6889 = vst.msk [vmem:[#allocation3 + $0x30] sm:$0xff] %vm701_vm8, %v21080_v6  ;;  %6890 = vst.msk [vmem:[#allocation3 + $0x38] sm:$0xff] %vm701_vm8, %v21080_v6  ;;  %p15867_p1 = scmp.lt.s32.totalorder %s13077_s26, %s13077_s26 }
  0x11   :  { %14549 = vmatprep.subr.mxu0 %v72_v12  ;;  %6892 = vst.msk [vmem:[#allocation3 + $0x48] sm:$0xff] %vm701_vm8, %v21080_v6  ;;  %6893 = vst.msk [vmem:[#allocation3 + $0x50] sm:$0xff] %vm701_vm8, %v21080_v6 }
  0x12   :  { %14550 = vmatpush3.msra.mxu0 %v72_v12  ;;  %14559 = vmatpush3.bf16.msra.mxu1 %v169_v22  ;;  %6895 = vst.msk [vmem:[#allocation3 + $0x60] sm:$0xff] %vm701_vm8, %v21080_v6  ;;  %6896 = vst.msk [vmem:[#allocation3 + $0x68] sm:$0xff] %vm701_vm8, %v21080_v6 }
  0x13   :  { %14551 = vmatprep.subr.mxu0 %v71_v13  ;;  %14564 = vmatprep.subr.bf16.mxu1 %v21080_v6  ;;  %6898 = vst.msk [vmem:[#allocation3 + $0x78] sm:$0xff] %vm701_vm8, %v21080_v6  ;;  %6899 = vst.msk [vmem:[#allocation3 + $0x80] sm:$0xff] %vm701_vm8, %v21080_v6 }
  0x14   :  { %14552 = vmatpush3.msra.mxu0 %v71_v13  ;;  %6901 = vst.msk [vmem:[#allocation3 + $0x90] sm:$0xff] %vm701_vm8, %v21080_v6  ;;  %6902 = vst.msk [vmem:[#allocation3 + $0x98] sm:$0xff] %vm701_vm8, %v21080_v6 }
  0x15   :  { %14572 = vmatprep.subr.bf16.mxu0 %v21080_v6  ;;  %6904 = vst.msk [vmem:[#allocation3 + $0xa8] sm:$0xff] %vm701_vm8, %v21080_v6  ;;  %6905 = vst.msk [vmem:[#allocation3 + $0xb0] sm:$0xff] %vm701_vm8, %v21080_v6 }
  0x16   :  { %6907 = vst.msk [vmem:[#allocation3 + $0xc0] sm:$0xff] %vm701_vm8, %v21080_v6  ;;  %6908 = vst.msk [vmem:[#allocation3 + $0xc8] sm:$0xff] %vm701_vm8, %v21080_v6 }
  0x17   :  { %6910 = vst.msk [vmem:[#allocation3 + $0xd8] sm:$0xff] %vm701_vm8, %v21080_v6  ;;  %6911 = vst.msk [vmem:[#allocation3 + $0xe0] sm:$0xff] %vm701_vm8, %v21080_v6 }
  0x18   :  { %6913 = vst.msk [vmem:[#allocation3 + $0xf0] sm:$0xff] %vm701_vm8, %v21080_v6  ;;  %6914 = vst.msk [vmem:[#allocation3 + $0xf8] sm:$0xff] %vm701_vm8, %v21080_v6 }
  0x19   :  { %6916 = vst.msk [vmem:[#allocation3 + $0x108] sm:$0xff] %vm701_vm8, %v21080_v6  ;;  %6917 = vst.msk [vmem:[#allocation3 + $0x110] sm:$0xff] %vm701_vm8, %v21080_v6 }
  0x1a   :  { %6919 = vst.msk [vmem:[#allocation3 + $0x120] sm:$0xff] %vm701_vm8, %v21080_v6  ;;  %6920 = vst.msk [vmem:[#allocation3 + $0x128] sm:$0xff] %vm701_vm8, %v21080_v6 }
  0x1b   :  { %6922 = vst.msk [vmem:[#allocation3 + $0x138] sm:$0xff] %vm701_vm8, %v21080_v6  ;;  %6923 = vst.msk [vmem:[#allocation3 + $0x140] sm:$0xff] %vm701_vm8, %v21080_v6 }
  0x1c   :  { %6925 = vst.msk [vmem:[#allocation3 + $0x150] sm:$0xff] %vm701_vm8, %v21080_v6  ;;  %6926 = vst.msk [vmem:[#allocation3 + $0x158] sm:$0xff] %vm701_vm8, %v21080_v6 }
  0x1d   :  { %6928 = vst.msk [vmem:[#allocation3 + $0x168] sm:$0xff] %vm701_vm8, %v21080_v6  ;;  %6929 = vst.msk [vmem:[#allocation3 + $0x170] sm:$0xff] %vm701_vm8, %v21080_v6 }
  0x1e   :  { %6931 = vst.msk [vmem:[#allocation3 + $0x180] sm:$0xff] %vm701_vm8, %v21080_v6  ;;  %6932 = vst.msk [vmem:[#allocation3 + $0x188] sm:$0xff] %vm701_vm8, %v21080_v6 }
  0x1f   :  { %6934 = vst.msk [vmem:[#allocation3 + $0x198] sm:$0xff] %vm701_vm8, %v21080_v6  ;;  %6935 = vst.msk [vmem:[#allocation3 + $0x1a0] sm:$0xff] %vm701_vm8, %v21080_v6 }
  0x20   :  { %6937 = vst.msk [vmem:[#allocation3 + $0x1b0] sm:$0xff] %vm701_vm8, %v21080_v6  ;;  %6938 = vst.msk [vmem:[#allocation3 + $0x1b8] sm:$0xff] %vm701_vm8, %v21080_v6 }
  0x21   :  { %6940 = vst.msk [vmem:[#allocation3 + $0x1c8] sm:$0xff] %vm701_vm8, %v21080_v6  ;;  %6941 = vst.msk [vmem:[#allocation3 + $0x1d0] sm:$0xff] %vm701_vm8, %v21080_v6 }
  0x84   :  { %v61_v16 = vpop.permute.xlu0 %60 }
  0x85   :  { %vm65_vm2 = vcmp.eq.s32.totalorder %v16014_v15, %v61_v16 }
  0x86   :  { %v13084_v17 = vsel %vm65_vm2, 1.0, %v21080_v6 }
  0x87   :  { %14553 = vmatprep.mubr.msk.f32.mxu0 %vm78_vm1, %v13084_v17 }
  0x88   :  { %v64_v18 = vpop.permute.xlu0 %63 }
  0x89   :  { %vm66_vm3 = vcmp.eq.s32.totalorder %v16014_v15, %v64_v18 }
  0x8a   :  { %v13085_v19 = vsel %vm66_vm3, 1.0, %v21080_v6 }
  0x8b   :  { %14554 = vmatmul.mubr.msk.f32.vlgmr.msra.gmra.mxu0 %vm78_vm1, %v13085_v19 }
  0x8c   :  { %14576 = vmatprep.mubr.msk.bf16.mxu0 %vm15886_vm4, %v21080_v6  ;;  %14573 = vmatpush3.bf16.msra.mxu0 %v16035_v25 }
  0x8d   :  { %14574 = vmatprep.subr.bf16.mxu0 %v21080_v6 }
  0x90   :  { %14575 = vmatpush3.bf16.msra.mxu0 %v16047_v28 }
  0x91   :  { %14588 = vmatprep.subr.bf16.mxu0 %v21080_v6 }
 0x14b   :  { %v14555_v29 = vpop.f32.mrf.mxu0 }
 0x14d   :  { %v155_v30 = vpop.f32.mrf.mxu0 }
 0x14e   :  { %v164_v31 = vpack.c.bf16 %v14555_v29, %v155_v30 }
 0x150   :  { %14561 = vmatmul.mubr.msk.bf16.vlgmr.msra.gmra.mxu1 %vm178_vm5, %v164_v31  ;;  %v926_v31 = vld [vmem:[%s21069_s8] sm:$0x7] }
 0x151   :  { %14565 = vmatpush3.bf16.msra.mxu1 %v16035_v25  ;;  %14568 = vmatprep.mubr.msk.bf16.mxu1 %vm15886_vm4, %v21080_v6 }
 0x152   :  { %14566 = vmatprep.subr.bf16.mxu1 %v21080_v6 }
 0x155   :  { %14567 = vmatpush3.bf16.msra.mxu1 %v16047_v28 }
 0x156   :  { %14580 = vmatprep.subr.bf16.mxu1 %v21080_v6 }
 0x158   :  { %14569 = vmatmul.mubr.bf16.vlgmr.msra.gmra.mxu1 %v15884_v2 }
 0x159   :  { %14581 = vmatpush3.bf16.msra.mxu1 %v16035_v25  ;;  %14584 = vmatprep.mubr.msk.bf16.mxu1 %vm15886_vm4, %v21080_v6 }
 0x15a   :  { %14582 = vmatprep.subr.bf16.mxu1 %v21080_v6 }
 0x15d   :  { %14583 = vmatpush3.bf16.msra.mxu1 %v16047_v28 }
 0x15e   :  { %14596 = vmatprep.subr.bf16.mxu1 %v21080_v6 }
 0x210   :  { %v216_v32 = vpop.f32.mrf.mxu1 }
 0x211   :  { %v217_v38 = vadd.f32 %v13089_v34, %v216_v32  ;;  %v927_v32 = vpack.c.bf16 %v926_v31, %v926_v31  ;;  %v798_v31 = vld [vmem:[%s21068_s7 + $0x1b0] sm:$0xff] }
 0x212   :  { %v14562_v33 = vpop.f32.mrf.mxu1 }
 0x214   :  { %v219_v35 = vpop.f32.mrf.mxu1 }
 0x215   :  { %v16068_v36 = vadd.f32 %v13089_v34, %v219_v35 }
 0x216   :  { %v14563_v37 = vpop.f32.mrf.mxu1 }
 0x218   :  { %v266_v39 = vpop.f32.mrf.mxu1 }
 0x219   :  { %v272_v40 = vadd.f32 %v266_v39, %v217_v38 }
 0x21a   :  { %v14570_v41 = vpop.f32.mrf.mxu1 }
 0x21b   :  { %15846 = vtanh.f32 %v272_v40  ;;  %v766_v41 = vld [vmem:[%s21068_s7] sm:$0xff] }
 0x21c   :  { %v269_v42 = vpop.f32.mrf.mxu1 }
 0x21d   :  { %v767_v42 = vld [vmem:[%s21068_s7 + $0x8] sm:$0xff] }
 0x21e   :  { %v14571_v43 = vpop.f32.mrf.mxu1 }
 0x228   :  { %v15847_v44 = vpop.eup %15846 }
 0x229   :  { %v274_v45 = vpack.c.bf16 %v15847_v44, %v15847_v44 }
 0x22b   :  { %14577 = vmatmul.mubr.msk.bf16.vlgmr.msra.gmra.mxu0 %vm178_vm5, %v274_v45  ;;  %v894_v45 = vpack.c.bf16 %v767_v42, %v766_v41  ;;  %v804_v42 = vld [vmem:[%s21068_s7 + $0x1f8] sm:$0xff] }
 0x22c   :  { %14589 = vmatpush3.bf16.msra.mxu0 %v16035_v25  ;;  %14592 = vmatprep.mubr.msk.bf16.mxu0 %vm15886_vm4, %v21080_v6 }
 0x22d   :  { %14590 = vmatprep.subr.bf16.mxu0 %v21080_v6 }
 0x230   :  { %14591 = vmatpush3.bf16.msra.mxu0 %v16047_v28 }
 0x231   :  { %14604 = vmatprep.subr.bf16.mxu0 %v21080_v6 }
 0x2eb   :  { %v312_v46 = vpop.f32.mrf.mxu0 }
 0x2ec   :  { %v319_v47 = vrot.slane %v312_v46, 6 }
 0x2ed   :  { %v14578_v48 = vpop.f32.mrf.mxu0 }
 0x2ee   :  { %v321_v49 = vadd.f32 %v319_v47, %v217_v38  ;;  %v768_v47 = vld [vmem:[%s21068_s7 + $0x18] sm:$0xff]  ;;  %v769_v48 = vld [vmem:[%s21068_s7 + $0x20] sm:$0xff] }
 0x2ef   :  { %v315_v50 = vpop.f32.mrf.mxu0 }
 0x2f0   :  { %15848 = vtanh.f32 %v321_v49  ;;  %v770_v49 = vld [vmem:[%s21068_s7 + $0x30] sm:$0xff]  ;;  %v771_v50 = vld [vmem:[%s21068_s7 + $0x38] sm:$0xff] }
 0x2f1   :  { %v14579_v51 = vpop.f32.mrf.mxu0 }
 0x2f2   :  { %v895_v51 = vpack.c.bf16 %v769_v48, %v768_v47  ;;  %v627_v48 = vld [vmem:[%s21066_s5 + $0x10] sm:$0xff] }
 0x2fd   :  { %v15849_v52 = vpop.eup %15848 }
 0x2fe   :  { %v323_v53 = vpack.c.bf16 %v15849_v52, %v15849_v52  ;;  %v896_v52 = vpack.c.bf16 %v771_v50, %v770_v49  ;;  %v628_v49 = vld [vmem:[%s21066_s5 + $0x18] sm:$0xff] }
 0x2ff   :  { %v630_v50 = vpack.c.bf16 %v628_v49, %v627_v48  ;;  %v2137_v49 = vld [vmem:[%s21068_s7 + $0x7a] sm:$0xff] }
 0x300   :  { %v325_v54 = vrot.slane %v323_v53, 1  ;;  %v772_v53 = vld [vmem:[%s21068_s7 + $0x48] sm:$0xff] }
 0x302   :  { %14585 = vmatmul.mubr.msk.bf16.vlgmr.msra.gmra.mxu1 %vm178_vm5, %v325_v54  ;;  %v773_v54 = vld [vmem:[%s21068_s7 + $0x50] sm:$0xff] }
 0x303   :  { %14597 = vmatpush3.bf16.msra.mxu1 %v16035_v25  ;;  %14600 = vmatprep.mubr.msk.bf16.mxu1 %vm15886_vm4, %v21080_v6 }
 0x304   :  { %14598 = vmatprep.subr.bf16.mxu1 %v21080_v6 }
 0x307   :  { %14599 = vmatpush3.bf16.msra.mxu1 %v16047_v28 }
 0x308   :  { %14612 = vmatprep.subr.bf16.mxu1 %v21080_v6 }
 0x3c2   :  { %v363_v55 = vpop.f32.mrf.mxu1 }
 0x3c3   :  { %v370_v56 = vrot.slane %v363_v55, 4  ;;  %v774_v55 = vld [vmem:[%s21068_s7 + $0x60] sm:$0xff] }
 0x3c4   :  { %v14586_v57 = vpop.f32.mrf.mxu1 }
 0x3c5   :  { %v372_v58 = vadd.f32 %v370_v56, %v217_v38  ;;  %v775_v56 = vld [vmem:[%s21068_s7 + $0x68] sm:$0xff]  ;;  %v897_v57 = vpack.c.bf16 %v773_v54, %v772_v53  ;;  %v625_v53 = vld [vmem:[%s21066_s5] sm:$0xff] }
 0x3c6   :  { %v366_v59 = vpop.f32.mrf.mxu1  ;;  %v626_v54 = vld [vmem:[%s21066_s5 + $0x8] sm:$0xff] }
 0x3c7   :  { %15850 = vtanh.f32 %v372_v58  ;;  %v898_v58 = vpack.c.bf16 %v775_v56, %v774_v55  ;;  %v776_v59 = vld [vmem:[%s21068_s7 + $0x78] sm:$0xff]  ;;  %v810_v55 = vld [vmem:[%s21068_s7 + $0x240] sm:$0xff]  ;;  %v811_v56 = vld [vmem:[%s21068_s7 + $0x248] sm:$0xff] }
 0x3c8   :  { %v14587_v60 = vpop.f32.mrf.mxu1 }
 0x3c9   :  { %v777_v60 = vld [vmem:[%s21068_s7 + $0x80] sm:$0xff] }
 0x3d4   :  { %v15851_v61 = vpop.eup %15850 }
 0x3d5   :  { %v374_v62 = vpack.c.bf16 %v15851_v61, %v15851_v61  ;;  %v778_v61 = vld [vmem:[%s21068_s7 + $0x90] sm:$0xff] }
 0x3d7   :  { %v376_v63 = vrot.slane %v374_v62, 2  ;;  %v779_v62 = vld [vmem:[%s21068_s7 + $0x98] sm:$0xff] }
 0x3d9   :  { %14593 = vmatmul.mubr.msk.bf16.vlgmr.msra.gmra.mxu0 %vm178_vm5, %v376_v63  ;;  %v899_v63 = vpack.c.bf16 %v777_v60, %v776_v59  ;;  %v916_v59 = vpack.c.bf16 %v811_v56, %v810_v55  ;;  %v13135_v60 = vld [vmem:[%s21069_s8 + $0x4] sm:$0x7]  ;;  %v2141_v55 = vld [vmem:[%s21068_s7 + $0xaa] sm:$0xff]  ;;  %v2142_v56 = vld [vmem:[%s21068_s7 + $0xb2] sm:$0xff] }
 0x3da   :  { %14605 = vmatpush3.bf16.msra.mxu0 %v16035_v25  ;;  %14608 = vmatprep.mubr.msk.bf16.mxu0 %vm15886_vm4, %v21080_v6 }
 0x3db   :  { %14606 = vmatprep.subr.bf16.mxu0 %v21080_v6 }
 0x3de   :  { %14607 = vmatpush3.bf16.msra.mxu0 %v16047_v28 }
 0x3df   :  { %14620 = vmatprep.subr.bf16.mxu0 %v21080_v6 }
 0x499   :  { %v414_v0 = vpop.f32.mrf.mxu0 }
 0x49a   :  { %v421_v1 = vrot.slane %v414_v0, 2  ;;  %v900_v0 = vpack.c.bf16 %v779_v62, %v778_v61  ;;  %v1610_v61 = vpack.c.bf16 %v13135_v60, %v13135_v60  ;;  %v812_v62 = vld [vmem:[%s21068_s7 + $0x258] sm:$0xff] }
 0x49b   :  { %v14594_v2 = vpop.f32.mrf.mxu0 }
 0x49c   :  { %v423_v3 = vadd.f32 %v421_v1, %v217_v38  ;;  %v780_v1 = vld [vmem:[%s21068_s7 + $0xa8] sm:$0xff]  ;;  %v781_v2 = vld [vmem:[%s21068_s7 + $0xb0] sm:$0xff] }
 0x49d   :  { %v417_v4 = vpop.f32.mrf.mxu0 }
 0x49e   :  { %15852 = vtanh.f32 %v423_v3  ;;  %v782_v3 = vld [vmem:[%s21068_s7 + $0xc0] sm:$0xff]  ;;  %v783_v4 = vld [vmem:[%s21068_s7 + $0xc8] sm:$0xff] }
 0x49f   :  { %v14595_v5 = vpop.f32.mrf.mxu0 }
 0x4a0   :  { %v901_v5 = vpack.c.bf16 %v781_v2, %v780_v1  ;;  %v814_v1 = vld [vmem:[%s21068_s7 + $0x270] sm:$0xff]  ;;  %v815_v2 = vld [vmem:[%s21068_s7 + $0x278] sm:$0xff] }
 0x4ab   :  { %v15853_v7 = vpop.eup %15852 }
 0x4ac   :  { %v425_v8 = vpack.c.bf16 %v15853_v7, %v15853_v7  ;;  %v902_v7 = vpack.c.bf16 %v783_v4, %v782_v3  ;;  %v13168_v3 = vld [vmem:[%s21069_s8 + $0x8] sm:$0x7] }
 0x4ad   :  { %v2289_v4 = vpack.c.bf16 %v13168_v3, %v13168_v3 }
 0x4ae   :  { %v427_v9 = vrot.slane %v425_v8, 3  ;;  %v784_v8 = vld [vmem:[%s21068_s7 + $0xd8] sm:$0xff] }
 0x4b0   :  { %14601 = vmatmul.mubr.msk.bf16.vlgmr.msra.gmra.mxu1 %vm178_vm5, %v427_v9  ;;  %v785_v9 = vld [vmem:[%s21068_s7 + $0xe0] sm:$0xff] }
 0x4b1   :  { %14613 = vmatpush3.bf16.msra.mxu1 %v16035_v25  ;;  %14616 = vmatprep.mubr.msk.bf16.mxu1 %vm15886_vm4, %v21080_v6 }
 0x4b2   :  { %14614 = vmatprep.subr.bf16.mxu1 %v21080_v6 }
 0x4b5   :  { %14615 = vmatpush3.bf16.msra.mxu1 %v16047_v28 }
 0x4b6   :  { %14628 = vmatprep.subr.bf16.mxu1 %v21080_v6 }
 0x570   :  { %v465_v10 = vpop.f32.mrf.mxu1 }
 0x571   :  { %v471_v11 = vadd.f32 %v465_v10, %v16068_v36  ;;  %v786_v10 = vld [vmem:[%s21068_s7 + $0xf0] sm:$0xff] }
 0x572   :  { %v14602_v12 = vpop.f32.mrf.mxu1 }
 0x573   :  { %15854 = vtanh.f32 %v471_v11  ;;  %v787_v11 = vld [vmem:[%s21068_s7 + $0xf8] sm:$0xff]  ;;  %v903_v12 = vpack.c.bf16 %v785_v9, %v784_v8  ;;  %v816_v9 = vld [vmem:[%s21068_s7 + $0x288] sm:$0xff] }
 0x574   :  { %v468_v13 = vpop.f32.mrf.mxu1 }
 0x575   :  { %v904_v13 = vpack.c.bf16 %v787_v11, %v786_v10  ;;  %v817_v10 = vld [vmem:[%s21068_s7 + $0x290] sm:$0xff]  ;;  %v818_v11 = vld [vmem:[%s21068_s7 + $0x2a0] sm:$0xff] }
 0x576   :  { %v14603_v16 = vpop.f32.mrf.mxu1 }
 0x577   :  { %v788_v16 = vld [vmem:[%s21068_s7 + $0x108] sm:$0xff] }
 0x580   :  { %v15855_v17 = vpop.eup %15854 }
 0x581   :  { %v473_v18 = vpack.c.bf16 %v15855_v17, %v15855_v17  ;;  %v789_v17 = vld [vmem:[%s21068_s7 + $0x110] sm:$0xff] }
 0x583   :  { %14609 = vmatmul.mubr.msk.bf16.vlgmr.msra.gmra.mxu0 %vm178_vm5, %v473_v18  ;;  %v790_v18 = vld [vmem:[%s21068_s7 + $0x120] sm:$0xff] }
 0x584   :  { %14621 = vmatpush3.bf16.msra.mxu0 %v16035_v25  ;;  %14624 = vmatprep.mubr.msk.bf16.mxu0 %vm15886_vm4, %v21080_v6  ;;  %v15887_v25 = vmov 65535  }
 0x585   :  { %14622 = vmatprep.subr.bf16.mxu0 %v21080_v6  ;;  %v1026_v30 = vsel %vm1025_vm6, 4294967295, %v15887_v25  ;;  %v796_v25 = vld [vmem:[%s21068_s7 + $0x168] sm:$0xff] }
 0x588   :  { %14623 = vmatpush3.bf16.msra.mxu0 %v16047_v28  ;;  %v16110_v28 = vsel %vm85_vm0, %v1026_v30, 0  ;;  %v797_v30 = vld [vmem:[%s21068_s7 + $0x170] sm:$0xff] }
 0x589   :  { %v1029_v33 = vand.u32 %v16110_v28, %v927_v32  ;;  %v799_v32 = vld [vmem:[%s21068_s7 + $0x1b8] sm:$0xff]  ;;  %v2387_v8 = vand.u32 %v2289_v4, %v16110_v28 }
 0x58b   :  { %14636 = vmatprep.subr.bf16.mxu0 %v1029_v33 }
 0x643   :  { %v511_v19 = vpop.f32.mrf.mxu0 }
 0x644   :  { %v518_v20 = vrot.slane %v511_v19, 6  ;;  %v791_v19 = vld [vmem:[%s21068_s7 + $0x128] sm:$0xff] }
 0x645   :  { %v14610_v21 = vpop.f32.mrf.mxu0 }
 0x646   :  { %v520_v22 = vadd.f32 %v518_v20, %v16068_v36  ;;  %v905_v20 = vpack.c.bf16 %v789_v17, %v788_v16  ;;  %v906_v21 = vpack.c.bf16 %v791_v19, %v790_v18  ;;  %v820_v17 = vld [vmem:[%s21068_s7 + $0x2b8] sm:$0xff]  ;;  %v821_v18 = vld [vmem:[%s21068_s7 + $0x2c0] sm:$0xff]  ;;  %v822_v19 = vld [vmem:[%s21068_s7 + $0x2d0] sm:$0xff] }
 0x647   :  { %v514_v23 = vpop.f32.mrf.mxu0 }
 0x648   :  { %15856 = vtanh.f32 %v520_v22  ;;  %v792_v22 = vld [vmem:[%s21068_s7 + $0x138] sm:$0xff]  ;;  %v793_v23 = vld [vmem:[%s21068_s7 + $0x140] sm:$0xff] }
 0x649   :  { %v14611_v24 = vpop.f32.mrf.mxu0 }
 0x64a   :  { %v794_v24 = vld [vmem:[%s21068_s7 + $0x150] sm:$0xff] }
 0x655   :  { %v15857_v26 = vpop.eup %15856 }
 0x656   :  { %v522_v27 = vpack.c.bf16 %v15857_v26, %v15857_v26  ;;  %v795_v26 = vld [vmem:[%s21068_s7 + $0x158] sm:$0xff] }
 0x658   :  { %v524_v29 = vrot.slane %v522_v27, 1  ;;  %v907_v27 = vpack.c.bf16 %v793_v23, %v792_v22  ;;  %v824_v23 = vld [vmem:[%s21068_s7 + $0x2e8] sm:$0xff] }
 0x65a   :  { %14617 = vmatmul.mubr.msk.bf16.vlgmr.msra.gmra.mxu1 %vm178_vm5, %v524_v29  ;;  %v908_v29 = vpack.c.bf16 %v795_v26, %v794_v24  ;;  %v825_v24 = vld [vmem:[%s21068_s7 + $0x2f0] sm:$0xff]  ;;  %v826_v26 = vld [vmem:[%s21068_s7 + $0x300] sm:$0xff] }
 0x65b   :  { %14632 = vmatprep.mubr.msk.bf16.mxu1 %vm15886_vm4, %v21080_v6  ;;  %14629 = vmatpush3.bf16.msra.mxu1 %v630_v50  ;;  %v2138_v50 = vld [vmem:[%s21068_s7 + $0x82] sm:$0xff] }
 0x65c   :  { %14630 = vmatprep.subr.bf16.mxu1 %v21080_v6 }
 0x71a   :  { %v562_v34 = vpop.f32.mrf.mxu1 }
 0x71b   :  { %v569_v35 = vrot.slane %v562_v34, 4  ;;  %v910_v34 = vpack.c.bf16 %v799_v32, %v798_v31  ;;  %v829_v31 = vld [vmem:[%s21068_s7 + $0x320] sm:$0xff] }
 0x71c   :  { %v14618_v37 = vpop.f32.mrf.mxu1  ;;  %v2127_v32 = vld [vmem:[%s21068_s7 + $0x2] sm:$0xff] }
 0x71d   :  { %v571_v38 = vadd.f32 %v569_v35, %v16068_v36  ;;  %v800_v35 = vld [vmem:[%s21068_s7 + $0x1c8] sm:$0xff]  ;;  %v801_v37 = vld [vmem:[%s21068_s7 + $0x1d0] sm:$0xff] }
 0x71e   :  { %v565_v39 = vpop.f32.mrf.mxu1 }
 0x71f   :  { %15858 = vtanh.f32 %v571_v38  ;;  %v802_v38 = vld [vmem:[%s21068_s7 + $0x1e0] sm:$0xff]  ;;  %v803_v39 = vld [vmem:[%s21068_s7 + $0x1e8] sm:$0xff] }
 0x720   :  { %v14619_v40 = vpop.f32.mrf.mxu1  ;;  %v912_v41 = vpack.c.bf16 %v803_v39, %v802_v38  ;;  %v2130_v38 = vld [vmem:[%s21068_s7 + $0x22] sm:$0xff]  ;;  %v2131_v39 = vld [vmem:[%s21068_s7 + $0x32] sm:$0xff] }
 0x721   :  { %v911_v40 = vpack.c.bf16 %v801_v37, %v800_v35  ;;  %v2129_v37 = vld [vmem:[%s21068_s7 + $0x1a] sm:$0xff] }
 0x72c   :  { %v15859_v43 = vpop.eup %15858 }
 0x72d   :  { %v573_v44 = vpack.c.bf16 %v15859_v43, %v15859_v43  ;;  %v805_v43 = vld [vmem:[%s21068_s7 + $0x200] sm:$0xff] }
 0x72f   :  { %v575_v46 = vrot.slane %v573_v44, 2  ;;  %v806_v44 = vld [vmem:[%s21068_s7 + $0x210] sm:$0xff] }
 0x731   :  { %14625 = vmatmul.mubr.msk.bf16.vlgmr.msra.gmra.mxu0 %vm178_vm5, %v575_v46  ;;  %v913_v46 = vpack.c.bf16 %v805_v43, %v804_v42  ;;  %v2133_v43 = vld [vmem:[%s21068_s7 + $0x4a] sm:$0xff] }
 0x732   :  { %14637 = vmatpush3.bf16.msra.mxu0 %v1029_v33  ;;  %14638 = vmatprep.mubr.msk.bf16.mxu0 %vm928_vm7, %v894_v45  ;;  %v909_v33 = vpack.c.bf16 %v797_v30, %v796_v25  ;;  %v807_v45 = vld [vmem:[%s21068_s7 + $0x218] sm:$0xff] }
 0x733   :  { %v914_v47 = vpack.c.bf16 %v807_v45, %v806_v44  ;;  %14768 = vmatprep.subr.bf16.mxu0 %v2387_v8  ;;  %v828_v30 = vld [vmem:[%s21068_s7 + $0x318] sm:$0xff]  ;;  %v2135_v45 = vld [vmem:[%s21068_s7 + $0x62] sm:$0xff] }
 0x734   :  { %v2134_v44 = vld [vmem:[%s21068_s7 + $0x52] sm:$0xff] }
 0x739   :  { %14639 = vmatmul.mubr.msk.bf16.vlgmr.msra.gmra.mxu0 %vm928_vm7, %v895_v51  ;;  %v808_v51 = vld [vmem:[%s21068_s7 + $0x228] sm:$0xff] }
 0x73a   :  { %14642 = vmatprep.mubr.msk.bf16.mxu0 %vm928_vm7, %v896_v52  ;;  %v809_v52 = vld [vmem:[%s21068_s7 + $0x230] sm:$0xff]  ;;  %14769 = vmatpush3.bf16.msra.mxu0 %v2387_v8  ;;  %v2151_v8 = vld [vmem:[%s21068_s7 + $0x122] sm:$0xff] }
 0x741   :  { %14643 = vmatmul.mubr.msk.bf16.gmra.mxu0 %vm928_vm7, %v897_v57  ;;  %v629_v57 = vpack.c.bf16 %v626_v54, %v625_v53  ;;  %v2260_v53 = vpack.c.bf16 %v2138_v50, %v2137_v49 }
 0x742   :  { %14646 = vmatprep.mubr.msk.bf16.mxu0 %vm928_vm7, %v898_v58  ;;  %v915_v58 = vpack.c.bf16 %v809_v52, %v808_v51  ;;  %v2139_v51 = vld [vmem:[%s21068_s7 + $0x92] sm:$0xff]  ;;  %v2140_v52 = vld [vmem:[%s21068_s7 + $0x9a] sm:$0xff] }
 0x743   :  { %14631 = vmatpush3.bf16.msra.mxu1 %v629_v57  ;;  %v2261_v54 = vpack.c.bf16 %v2140_v52, %v2139_v51  ;;  %v16424_v57 = vld [vmem:[%s21068_s7 + $0xc2] sm:$0xff] }
 0x749   :  { %14647 = vmatmul.mubr.msk.bf16.gmra.mxu0 %vm928_vm7, %v899_v63  ;;  %v813_v63 = vld [vmem:[%s21068_s7 + $0x260] sm:$0xff] }
 0x74a   :  { %14650 = vmatprep.mubr.msk.bf16.mxu0 %vm928_vm7, %v900_v0  ;;  %v16302_v0 = vand.u32 %v1610_v61, %v16110_v28  ;;  %v16436_v61 = vld [vmem:[%s21070_s9] ss:$0 sm:$0xff] }
 0x74b   :  { %704 = vst.msk [vmem:[#allocation2 + $0x10] sm:$0xff] %vm701_vm8, %v16436_v61  ;;  %702 = vst.msk [vmem:[#allocation2] sm:$0xff] %vm701_vm8, %v16436_v61 }
 0x74c   :  { %14702 = vmatprep.subr.bf16.mxu1 %v16302_v0  ;;  %703 = vst.msk [vmem:[#allocation2 + $0x8] sm:$0xff] %vm701_vm8, %v16436_v61  ;;  %705 = vst.msk [vmem:[#allocation2 + $0x18] sm:$0xff] %vm701_vm8, %v16436_v61 }
 0x74d   :  { %706 = vst.msk [vmem:[#allocation2 + $0x20] sm:$0xff] %vm701_vm8, %v16436_v61  ;;  %707 = vst.msk [vmem:[#allocation2 + $0x28] sm:$0xff] %vm701_vm8, %v16436_v61 }
 0x74e   :  { %708 = vst.msk [vmem:[#allocation2 + $0x30] sm:$0xff] %vm701_vm8, %v16436_v61  ;;  %709 = vst.msk [vmem:[#allocation2 + $0x38] sm:$0xff] %vm701_vm8, %v16436_v61 }
 0x74f   :  { %710 = vst.msk [vmem:[#allocation2 + $0x40] sm:$0xff] %vm701_vm8, %v16436_v61  ;;  %711 = vst.msk [vmem:[#allocation2 + $0x48] sm:$0xff] %vm701_vm8, %v16436_v61 }
 0x750   :  { %712 = vst.msk [vmem:[#allocation2 + $0x50] sm:$0xff] %vm701_vm8, %v16436_v61  ;;  %713 = vst.msk [vmem:[#allocation2 + $0x58] sm:$0xff] %vm701_vm8, %v16436_v61 }
 0x751   :  { %14651 = vmatmul.mubr.msk.bf16.gmra.mxu0 %vm928_vm7, %v901_v5  ;;  %v917_v5 = vpack.c.bf16 %v813_v63, %v812_v62  ;;  %714 = vst.msk [vmem:[#allocation2 + $0x60] sm:$0xff] %vm701_vm8, %v16436_v61  ;;  %715 = vst.msk [vmem:[#allocation2 + $0x68] sm:$0xff] %vm701_vm8, %v16436_v61  ;;  %v2145_v62 = vld [vmem:[%s21068_s7 + $0xda] sm:$0xff]  ;;  %v2146_v63 = vld [vmem:[%s21068_s7 + $0xe2] sm:$0xff] }
 0x752   :  { %14654 = vmatprep.mubr.msk.bf16.mxu0 %vm928_vm7, %v902_v7  ;;  %v918_v7 = vpack.c.bf16 %v815_v2, %v814_v1  ;;  %716 = vst.msk [vmem:[#allocation2 + $0x70] sm:$0xff] %vm701_vm8, %v16436_v61  ;;  %717 = vst.msk [vmem:[#allocation2 + $0x78] sm:$0xff] %vm701_vm8, %v16436_v61  ;;  %v2147_v1 = vld [vmem:[%s21068_s7 + $0xf2] sm:$0xff]  ;;  %v2148_v2 = vld [vmem:[%s21068_s7 + $0xfa] sm:$0xff]  ;;  %v2264_v3 = vpack.c.bf16 %v2146_v63, %v2145_v62 }
 0x753   :  { %718 = vst.msk [vmem:[#allocation2 + $0x80] sm:$0xff] %vm701_vm8, %v16436_v61  ;;  %719 = vst.msk [vmem:[#allocation2 + $0x88] sm:$0xff] %vm701_vm8, %v16436_v61  ;;  %v2265_v4 = vpack.c.bf16 %v2148_v2, %v2147_v1  ;;  %v831_v51 = vld [vmem:[#allocation2 + $0x8] sm:$0xff] }
 0x754   :  { %720 = vst.msk [vmem:[#allocation2 + $0x90] sm:$0xff] %vm701_vm8, %v16436_v61  ;;  %721 = vst.msk [vmem:[#allocation2 + $0x98] sm:$0xff] %vm701_vm8, %v16436_v61 }
 0x755   :  { %722 = vst.msk [vmem:[#allocation2 + $0xa0] sm:$0xff] %vm701_vm8, %v16436_v61  ;;  %723 = vst.msk [vmem:[#allocation2 + $0xa8] sm:$0xff] %vm701_vm8, %v16436_v61  ;;  %v837_v2 = vld [vmem:[#allocation2 + $0x38] sm:$0xff] }
 0x756   :  { %724 = vst.msk [vmem:[#allocation2 + $0xb0] sm:$0xff] %vm701_vm8, %v16436_v61  ;;  %725 = vst.msk [vmem:[#allocation2 + $0xb8] sm:$0xff] %vm701_vm8, %v16436_v61 }
 0x757   :  { %726 = vst.msk [vmem:[#allocation2 + $0xc0] sm:$0xff] %vm701_vm8, %v16436_v61  ;;  %727 = vst.msk [vmem:[#allocation2 + $0xc8] sm:$0xff] %vm701_vm8, %v16436_v61 }
 0x758   :  { %728 = vst.msk [vmem:[#allocation2 + $0xd0] sm:$0xff] %vm701_vm8, %v16436_v61  ;;  %729 = vst.msk [vmem:[#allocation2 + $0xd8] sm:$0xff] %vm701_vm8, %v16436_v61 }
 0x759   :  { %14655 = vmatmul.mubr.msk.bf16.gmra.mxu0 %vm928_vm7, %v903_v12  ;;  %v819_v12 = vld [vmem:[%s21068_s7 + $0x2a8] sm:$0xff]  ;;  %730 = vst.msk [vmem:[#allocation2 + $0xe0] sm:$0xff] %vm701_vm8, %v16436_v61  ;;  %731 = vst.msk [vmem:[#allocation2 + $0xe8] sm:$0xff] %vm701_vm8, %v16436_v61 }
 0x75a   :  { %14658 = vmatprep.mubr.msk.bf16.mxu0 %vm928_vm7, %v904_v13  ;;  %v919_v13 = vpack.c.bf16 %v817_v10, %v816_v9  ;;  %v920_v16 = vpack.c.bf16 %v819_v12, %v818_v11  ;;  %732 = vst.msk [vmem:[#allocation2 + $0xf0] sm:$0xff] %vm701_vm8, %v16436_v61  ;;  %733 = vst.msk [vmem:[#allocation2 + $0xf8] sm:$0xff] %vm701_vm8, %v16436_v61  ;;  %v2152_v9 = vld [vmem:[%s21068_s7 + $0x12a] sm:$0xff]  ;;  %v2153_v12 = vld [vmem:[%s21068_s7 + $0x13a] sm:$0xff] }
 0x75b   :  { %734 = vst.msk [vmem:[#allocation2 + $0x100] sm:$0xff] %vm701_vm8, %v16436_v61  ;;  %735 = vst.msk [vmem:[#allocation2 + $0x108] sm:$0xff] %vm701_vm8, %v16436_v61  ;;  %v2267_v11 = vpack.c.bf16 %v2152_v9, %v2151_v8  ;;  %v2171_v8 = vld [vmem:[%s21068_s7 + $0x242] sm:$0xff]  ;;  %v2172_v9 = vld [vmem:[%s21068_s7 + $0x24a] sm:$0xff] }
 0x75c   :  { %736 = vst.msk [vmem:[#allocation2 + $0x110] sm:$0xff] %vm701_vm8, %v16436_v61  ;;  %737 = vst.msk [vmem:[#allocation2 + $0x118] sm:$0xff] %vm701_vm8, %v16436_v61 }
 0x75d   :  { %738 = vst.msk [vmem:[#allocation2 + $0x120] sm:$0xff] %vm701_vm8, %v16436_v61  ;;  %739 = vst.msk [vmem:[#allocation2 + $0x128] sm:$0xff] %vm701_vm8, %v16436_v61 }
 0x75e   :  { %740 = vst.msk [vmem:[#allocation2 + $0x130] sm:$0xff] %vm701_vm8, %v16436_v61  ;;  %741 = vst.msk [vmem:[#allocation2 + $0x138] sm:$0xff] %vm701_vm8, %v16436_v61 }
 0x75f   :  { %742 = vst.msk [vmem:[#allocation2 + $0x140] sm:$0xff] %vm701_vm8, %v16436_v61  ;;  %743 = vst.msk [vmem:[#allocation2 + $0x148] sm:$0xff] %vm701_vm8, %v16436_v61 }
 0x760   :  { %744 = vst.msk [vmem:[#allocation2 + $0x150] sm:$0xff] %vm701_vm8, %v16436_v61  ;;  %745 = vst.msk [vmem:[#allocation2 + $0x158] sm:$0xff] %vm701_vm8, %v16436_v61 }
 0x761   :  { %14659 = vmatmul.mubr.msk.bf16.gmra.mxu0 %vm928_vm7, %v905_v20  ;;  %v823_v20 = vld [vmem:[%s21068_s7 + $0x2d8] sm:$0xff]  ;;  %746 = vst.msk [vmem:[#allocation2 + $0x160] sm:$0xff] %vm701_vm8, %v16436_v61  ;;  %747 = vst.msk [vmem:[#allocation2 + $0x168] sm:$0xff] %vm701_vm8, %v16436_v61 }
 0x762   :  { %14662 = vmatprep.mubr.msk.bf16.mxu0 %vm928_vm7, %v906_v21  ;;  %v921_v21 = vpack.c.bf16 %v821_v18, %v820_v17  ;;  %v922_v22 = vpack.c.bf16 %v823_v20, %v822_v19  ;;  %748 = vst.msk [vmem:[#allocation2 + $0x170] sm:$0xff] %vm701_vm8, %v16436_v61  ;;  %749 = vst.msk [vmem:[#allocation2 + $0x178] sm:$0xff] %vm701_vm8, %v16436_v61  ;;  %v2156_v17 = vld [vmem:[%s21068_s7 + $0x15a] sm:$0xff]  ;;  %v2157_v20 = vld [vmem:[%s21068_s7 + $0x16a] sm:$0xff] }
 0x763   :  { %750 = vst.msk [vmem:[#allocation2 + $0x180] sm:$0xff] %vm701_vm8, %v16436_v61  ;;  %751 = vst.msk [vmem:[#allocation2 + $0x188] sm:$0xff] %vm701_vm8, %v16436_v61 }
 0x764   :  { %752 = vst.msk [vmem:[#allocation2 + $0x190] sm:$0xff] %vm701_vm8, %v16436_v61  ;;  %753 = vst.msk [vmem:[#allocation2 + $0x198] sm:$0xff] %vm701_vm8, %v16436_v61 }
 0x765   :  { %754 = vst.msk [vmem:[#allocation2 + $0x1a0] sm:$0xff] %vm701_vm8, %v16436_v61  ;;  %755 = vst.msk [vmem:[#allocation2 + $0x1a8] sm:$0xff] %vm701_vm8, %v16436_v61 }
 0x766   :  { %756 = vst.msk [vmem:[#allocation2 + $0x1b0] sm:$0xff] %vm701_vm8, %v16436_v61  ;;  %757 = vst.msk [vmem:[#allocation2 + $0x1b8] sm:$0xff] %vm701_vm8, %v16436_v61 }
 0x767   :  { %758 = vst.msk [vmem:[#allocation2 + $0x1c0] sm:$0xff] %vm701_vm8, %v16436_v61  ;;  %759 = vst.msk [vmem:[#allocation2 + $0x1c8] sm:$0xff] %vm701_vm8, %v16436_v61 }
 0x768   :  { %760 = vst.msk [vmem:[#allocation2 + $0x1d0] sm:$0xff] %vm701_vm8, %v16436_v61  ;;  %761 = vst.msk [vmem:[#allocation2 + $0x1d8] sm:$0xff] %vm701_vm8, %v16436_v61 }
 0x769   :  { %14663 = vmatmul.mubr.msk.bf16.gmra.mxu0 %vm928_vm7, %v907_v27  ;;  %v827_v27 = vld [vmem:[%s21068_s7 + $0x308] sm:$0xff]  ;;  %762 = vst.msk [vmem:[#allocation2 + $0x1e0] sm:$0xff] %vm701_vm8, %v16436_v61  ;;  %763 = vst.msk [vmem:[#allocation2 + $0x1e8] sm:$0xff] %vm701_vm8, %v16436_v61 }
 0x76a   :  { %14666 = vmatprep.mubr.msk.bf16.mxu0 %vm928_vm7, %v908_v29  ;;  %v923_v29 = vpack.c.bf16 %v825_v24, %v824_v23  ;;  %v924_v25 = vpack.c.bf16 %v827_v27, %v826_v26  ;;  %764 = vst.msk [vmem:[#allocation2 + $0x1f0] sm:$0xff] %vm701_vm8, %v16436_v61  ;;  %765 = vst.msk [vmem:[#allocation2 + $0x1f8] sm:$0xff] %vm701_vm8, %v16436_v61  ;;  %v2160_v23 = vld [vmem:[%s21068_s7 + $0x1ba] sm:$0xff]  ;;  %v1449_v61 = vld [vmem:[%s21068_s7 + $0x9] sm:$0xff] }
 0x771   :  { %14667 = vmatmul.mubr.msk.bf16.gmra.mxu0 %vm928_vm7, %v909_v33  ;;  %v2128_v33 = vld [vmem:[%s21068_s7 + $0xa] sm:$0xff] }
 0x772   :  { %14670 = vmatprep.mubr.msk.bf16.mxu0 %vm928_vm7, %v910_v34  ;;  %v925_v34 = vpack.c.bf16 %v829_v31, %v828_v30  ;;  %v2255_v35 = vpack.c.bf16 %v2128_v33, %v2127_v32  ;;  %v2162_v30 = vld [vmem:[%s21068_s7 + $0x1d2] sm:$0xff]  ;;  %v2163_v32 = vld [vmem:[%s21068_s7 + $0x1e2] sm:$0xff]  ;;  %v2164_v33 = vld [vmem:[%s21068_s7 + $0x1ea] sm:$0xff] }
 0x779   :  { %14671 = vmatmul.mubr.msk.bf16.gmra.mxu0 %vm928_vm7, %v911_v40  ;;  %v2132_v40 = vld [vmem:[%s21068_s7 + $0x3a] sm:$0xff] }
 0x77a   :  { %14674 = vmatprep.mubr.msk.bf16.mxu0 %vm928_vm7, %v912_v41  ;;  %v2256_v41 = vpack.c.bf16 %v2130_v38, %v2129_v37  ;;  %v2257_v42 = vpack.c.bf16 %v2132_v40, %v2131_v39  ;;  %v2273_v38 = vpack.c.bf16 %v2164_v33, %v2163_v32  ;;  %v832_v40 = vld [vmem:[#allocation2 + $0x10] sm:$0xff]  ;;  %v841_v33 = vld [vmem:[#allocation2 + $0x58] sm:$0xff] }
 0x781   :  { %14675 = vmatmul.mubr.msk.bf16.gmra.mxu0 %vm928_vm7, %v913_v46  ;;  %v2136_v46 = vld [vmem:[%s21068_s7 + $0x6a] sm:$0xff] }
 0x782   :  { %14678 = vmatprep.mubr.msk.bf16.mxu0 %vm928_vm7, %v914_v47  ;;  %v2258_v47 = vpack.c.bf16 %v2134_v44, %v2133_v43  ;;  %v2259_v48 = vpack.c.bf16 %v2136_v46, %v2135_v45  ;;  %v2165_v44 = vld [vmem:[%s21068_s7 + $0x1fa] sm:$0xff] }
 0x783   :  { %v833_v46 = vld [vmem:[#allocation2 + $0x18] sm:$0xff] }
 0x789   :  { %14679 = vmatmul.mubr.msk.bf16.gmra.mxu0 %vm928_vm7, %v915_v58  ;;  %v16429_v58 = vld [vmem:[%s21068_s7 + $0xca] sm:$0xff] }
 0x78a   :  { %14682 = vmatprep.mubr.msk.bf16.mxu0 %vm928_vm7, %v916_v59  ;;  %v2262_v59 = vpack.c.bf16 %v2142_v56, %v2141_v55  ;;  %v2263_v60 = vpack.c.bf16 %v16429_v58, %v16424_v57  ;;  %v836_v56 = vld [vmem:[#allocation2 + $0x30] sm:$0xff] }
 0x791   :  { %14683 = vmatmul.mubr.msk.bf16.gmra.mxu0 %vm928_vm7, %v917_v5  ;;  %v2149_v5 = vld [vmem:[%s21068_s7 + $0x10a] sm:$0xff] }
 0x792   :  { %14686 = vmatprep.mubr.msk.bf16.mxu0 %vm928_vm7, %v918_v7  ;;  %v2150_v7 = vld [vmem:[%s21068_s7 + $0x112] sm:$0xff] }
 0x793   :  { %v2266_v10 = vpack.c.bf16 %v2150_v7, %v2149_v5 }
 0x799   :  { %14687 = vmatmul.mubr.msk.bf16.gmra.mxu0 %vm928_vm7, %v919_v13  ;;  %v2154_v13 = vld [vmem:[%s21068_s7 + $0x142] sm:$0xff] }
 0x79a   :  { %14690 = vmatprep.mubr.msk.bf16.mxu0 %vm928_vm7, %v920_v16  ;;  %v2155_v16 = vld [vmem:[%s21068_s7 + $0x152] sm:$0xff]  ;;  %v2268_v18 = vpack.c.bf16 %v2154_v13, %v2153_v12  ;;  %v835_v12 = vld [vmem:[#allocation2 + $0x28] sm:$0xff] }
 0x79b   :  { %v2269_v19 = vpack.c.bf16 %v2156_v17, %v2155_v16 }
 0x7a1   :  { %14691 = vmatmul.mubr.msk.bf16.gmra.mxu0 %vm928_vm7, %v921_v21  ;;  %v2158_v21 = vld [vmem:[%s21068_s7 + $0x172] sm:$0xff] }
 0x7a2   :  { %14694 = vmatprep.mubr.msk.bf16.mxu0 %vm928_vm7, %v922_v22  ;;  %v2159_v22 = vld [vmem:[%s21068_s7 + $0x1b2] sm:$0xff]  ;;  %v2270_v24 = vpack.c.bf16 %v2158_v21, %v2157_v20  ;;  %v2277_v20 = vpack.c.bf16 %v2172_v9, %v2171_v8  ;;  %v13265_v21 = vld [vmem:[%s21069_s8 + $0xc] sm:$0x7] }
 0x7a3   :  { %v2271_v26 = vpack.c.bf16 %v2160_v23, %v2159_v22  ;;  %v2969_v23 = vpack.c.bf16 %v13265_v21, %v13265_v21  ;;  %v1461_v21 = vld [vmem:[%s21068_s7 + $0x99] sm:$0xff] }
 0x7a9   :  { %14695 = vmatmul.mubr.msk.bf16.gmra.mxu0 %vm928_vm7, %v923_v29 }
 0x7aa   :  { %14698 = vmatprep.mubr.msk.bf16.mxu0 %vm928_vm7, %v924_v25  ;;  %v2161_v25 = vld [vmem:[%s21068_s7 + $0x1ca] sm:$0xff] }
 0x7ab   :  { %v2272_v37 = vpack.c.bf16 %v2162_v30, %v2161_v25  ;;  %v1452_v25 = vld [vmem:[%s21068_s7 + $0x31] sm:$0xff] }
 0x7b1   :  { %14699 = vmatmul.mubr.msk.bf16.gmra.mxu0 %vm928_vm7, %v925_v34 }
 0x7b2   :  { %14770 = vmatprep.mubr.msk.bf16.mxu0 %vm928_vm7, %v2255_v35 }
 0x7b9   :  { %14771 = vmatmul.mubr.msk.bf16.vlgmr.msra.gmra.mxu0 %vm928_vm7, %v2256_v41 }
 0x7ba   :  { %14774 = vmatprep.mubr.msk.bf16.mxu0 %vm928_vm7, %v2257_v42  ;;  %v830_v42 = vld [vmem:[#allocation2] sm:$0xff] }
 0x7c1   :  { %14775 = vmatmul.mubr.msk.bf16.gmra.mxu0 %vm928_vm7, %v2258_v47  ;;  %v2167_v47 = vld [vmem:[%s21068_s7 + $0x212] sm:$0xff] }
 0x7c2   :  { %14778 = vmatprep.mubr.msk.bf16.mxu0 %vm928_vm7, %v2259_v48  ;;  %v2168_v48 = vld [vmem:[%s21068_s7 + $0x21a] sm:$0xff] }
 0x7c9   :  { %14779 = vmatmul.mubr.msk.bf16.gmra.mxu0 %vm928_vm7, %v2260_v53 }
 0x7ca   :  { %14782 = vmatprep.mubr.msk.bf16.mxu0 %vm928_vm7, %v2261_v54  ;;  %v2275_v54 = vpack.c.bf16 %v2168_v48, %v2167_v47  ;;  %v844_v48 = vld [vmem:[#allocation2 + $0x70] sm:$0xff] }
 0x7d1   :  { %14783 = vmatmul.mubr.msk.bf16.gmra.mxu0 %vm928_vm7, %v2262_v59  ;;  %v834_v59 = vld [vmem:[#allocation2 + $0x20] sm:$0xff] }
 0x7d2   :  { %14786 = vmatprep.mubr.msk.bf16.mxu0 %vm928_vm7, %v2263_v60  ;;  %v1448_v60 = vld [vmem:[%s21068_s7 + $0x1] sm:$0xff] }
 0x7d9   :  { %14787 = vmatmul.mubr.msk.bf16.gmra.mxu0 %vm928_vm7, %v2264_v3  ;;  %v2169_v3 = vld [vmem:[%s21068_s7 + $0x22a] sm:$0xff] }
 0x7da   :  { %14790 = vmatprep.mubr.msk.bf16.mxu0 %vm928_vm7, %v2265_v4  ;;  %v2170_v4 = vld [vmem:[%s21068_s7 + $0x232] sm:$0xff] }
 0x7db   :  { %v2276_v17 = vpack.c.bf16 %v2170_v4, %v2169_v3  ;;  %v2180_v3 = vld [vmem:[%s21068_s7 + $0x2aa] sm:$0xff] }
 0x7e1   :  { %14791 = vmatmul.mubr.msk.bf16.gmra.mxu0 %vm928_vm7, %v2266_v10  ;;  %v1576_v10 = vpack.c.bf16 %v1449_v61, %v1448_v60  ;;  %v845_v60 = vld [vmem:[#allocation2 + $0x78] sm:$0xff]  ;;  %v2177_v61 = vld [vmem:[%s21068_s7 + $0x28a] sm:$0xff] }
 0x7e2   :  { %14794 = vmatprep.mubr.msk.bf16.mxu0 %vm928_vm7, %v2267_v11 }
 0x7e9   :  { %14795 = vmatmul.mubr.msk.bf16.gmra.mxu0 %vm928_vm7, %v2268_v18 }
 0x7ea   :  { %14798 = vmatprep.mubr.msk.bf16.mxu0 %vm928_vm7, %v2269_v19  ;;  %v840_v19 = vld [vmem:[#allocation2 + $0x50] sm:$0xff] }
 0x7f1   :  { %v613_v27 = vpop.f32.mrf.mxu0  ;;  %14799 = vmatmul.mubr.msk.bf16.gmra.mxu0 %vm928_vm7, %v2270_v24  ;;  %v1450_v24 = vld [vmem:[%s21068_s7 + $0x19] sm:$0xff] }
 0x7f2   :  { %v620_v29 = vrot.slane %v613_v27, 2  ;;  %14802 = vmatprep.mubr.msk.bf16.mxu0 %vm928_vm7, %v2271_v26  ;;  %v1451_v26 = vld [vmem:[%s21068_s7 + $0x21] sm:$0xff] }
 0x7f3   :  { %v14626_v31 = vpop.f32.mrf.mxu0 }
 0x7f4   :  { %v622_v34 = vadd.f32 %v620_v29, %v16068_v36  ;;  %v2166_v36 = vld [vmem:[%s21068_s7 + $0x202] sm:$0xff]  ;;  %v3067_v31 = vand.u32 %v2969_v23, %v16110_v28 }
 0x7f5   :  { %v616_v35 = vpop.f32.mrf.mxu0  ;;  %v2274_v52 = vpack.c.bf16 %v2166_v36, %v2165_v44  ;;  %v838_v29 = vld [vmem:[#allocation2 + $0x40] sm:$0xff]  ;;  %v839_v44 = vld [vmem:[#allocation2 + $0x48] sm:$0xff] }
 0x7f6   :  { %15860 = vtanh.f32 %v622_v34  ;;  %v2173_v34 = vld [vmem:[%s21068_s7 + $0x25a] sm:$0xff]  ;;  %v2174_v35 = vld [vmem:[%s21068_s7 + $0x262] sm:$0xff] }
 0x7f7   :  { %v14627_v39 = vpop.f32.mrf.mxu0 }
 0x7f8   :  { %v2175_v39 = vld [vmem:[%s21068_s7 + $0x272] sm:$0xff] }
 0x7f9   :  { %v14640_v41 = vpop.f32.mrf.mxu0  ;;  %14803 = vmatmul.mubr.msk.bf16.gmra.mxu0 %vm928_vm7, %v2272_v37  ;;  %v16789_v37 = vpack.c.bf16 %v1451_v26, %v1450_v24  ;;  %v849_v24 = vld [vmem:[#allocation2 + $0x98] sm:$0xff] }
 0x7fa   :  { %v1322_v43 = vadd.f32 %v14640_v41, %v832_v40  ;;  %14806 = vmatprep.mubr.msk.bf16.mxu0 %vm928_vm7, %v2273_v38  ;;  %v2176_v40 = vld [vmem:[%s21068_s7 + $0x27a] sm:$0xff]  ;;  %v13362_v41 = vld [vmem:[%s21069_s8 + $0x10] sm:$0x7] }
 0x7fb   :  { %v1065_v45 = vpop.f32.mrf.mxu0  ;;  %v3648_v36 = vpack.c.bf16 %v13362_v41, %v13362_v41  ;;  %v2181_v26 = vld [vmem:[%s21068_s7 + $0x2ba] sm:$0xff] }
 0x7fc   :  { %1386 = vst.msk [vmem:[#allocation2 + $0x10] sm:$0xff] %vm701_vm8, %v1322_v43  ;;  %v1320_v49 = vadd.f32 %v1065_v45, %v830_v42 }
 0x7fd   :  { %v14641_v50 = vpop.f32.mrf.mxu0 }
 0x7fe   :  { %1384 = vst.msk [vmem:[#allocation2] sm:$0xff] %vm701_vm8, %v1320_v49  ;;  %v1323_v53 = vadd.f32 %v14641_v50, %v833_v46  ;;  %v2278_v46 = vpack.c.bf16 %v2174_v35, %v2173_v34  ;;  %v2279_v49 = vpack.c.bf16 %v2176_v40, %v2175_v39  ;;  %v3746_v50 = vand.u32 %v3648_v36, %v16110_v28  ;;  %v852_v39 = vld [vmem:[#allocation2 + $0xb0] sm:$0xff] }
 0x7ff   :  { %v1068_v55 = vpop.f32.mrf.mxu0 }
 0x800   :  { %1387 = vst.msk [vmem:[#allocation2 + $0x18] sm:$0xff] %vm701_vm8, %v1323_v53  ;;  %v1321_v57 = vadd.f32 %v1068_v55, %v831_v51  ;;  %v1455_v53 = vld [vmem:[%s21068_s7 + $0x51] sm:$0xff]  ;;  %v842_v55 = vld [vmem:[#allocation2 + $0x60] sm:$0xff]  ;;  %14900 = vmatprep.subr.bf16.mxu0 %v3746_v50 }
 0x801   :  { %v14644_v58 = vpop.f32.mrf.mxu0  ;;  %14807 = vmatmul.mubr.msk.bf16.gmra.mxu0 %vm928_vm7, %v2274_v52  ;;  %v1454_v52 = vld [vmem:[%s21068_s7 + $0x49] sm:$0xff] }
 0x802   :  { %1385 = vst.msk [vmem:[#allocation2 + $0x8] sm:$0xff] %vm701_vm8, %v1321_v57  ;;  %v1326_v62 = vadd.f32 %v14644_v58, %v836_v56  ;;  %14810 = vmatprep.mubr.msk.bf16.mxu0 %vm928_vm7, %v2275_v54  ;;  %v1456_v56 = vld [vmem:[%s21068_s7 + $0x61] sm:$0xff]  ;;  %v1457_v57 = vld [vmem:[%s21068_s7 + $0x69] sm:$0xff]  ;;  %14901 = vmatpush3.bf16.msra.mxu0 %v3746_v50  ;;  %v853_v50 = vld [vmem:[#allocation2 + $0xb8] sm:$0xff] }
 0x803   :  { %v15861_v63 = vpop.eup %15860  ;;  %v1081_v1 = vpop.f32.mrf.mxu0  ;;  %v1580_v4 = vpack.c.bf16 %v1457_v57, %v1456_v56  ;;  %v2188_v56 = vld [vmem:[%s21068_s7 + $0x30a] sm:$0xff] }
 0x804   :  { %v624_v5 = vpack.c.bf16 %v15861_v63, %v15861_v63  ;;  %1390 = vst.msk [vmem:[#allocation2 + $0x30] sm:$0xff] %vm701_vm8, %v1326_v62  ;;  %v1324_v7 = vadd.f32 %v1081_v1, %v834_v59  ;;  %v2178_v62 = vld [vmem:[%s21068_s7 + $0x292] sm:$0xff]  ;;  %v1579_v63 = vpack.c.bf16 %v1455_v53, %v1454_v52 }
 0x805   :  { %v14645_v11 = vpop.f32.mrf.mxu0  ;;  %v2280_v9 = vpack.c.bf16 %v2178_v62, %v2177_v61  ;;  %v2186_v52 = vld [vmem:[%s21068_s7 + $0x2f2] sm:$0xff] }
 0x806   :  { %v639_v13 = vrot.slane %v624_v5, 3  ;;  %1388 = vst.msk [vmem:[#allocation2 + $0x20] sm:$0xff] %vm701_vm8, %v1324_v7  ;;  %v1327_v16 = vadd.f32 %v14645_v11, %v837_v2  ;;  %v2179_v2 = vld [vmem:[%s21068_s7 + $0x2a2] sm:$0xff]  ;;  %v848_v11 = vld [vmem:[#allocation2 + $0x90] sm:$0xff] }
 0x807   :  { %v1084_v18 = vpop.f32.mrf.mxu0  ;;  %v843_v7 = vld [vmem:[#allocation2 + $0x68] sm:$0xff] }
 0x808   :  { %14633 = vmatmul.mubr.msk.bf16.vlgmr.msra.gmra.mxu1 %vm178_vm5, %v639_v13  ;;  %1391 = vst.msk [vmem:[#allocation2 + $0x38] sm:$0xff] %vm701_vm8, %v1327_v16  ;;  %v1325_v22 = vadd.f32 %v1084_v18, %v835_v12  ;;  %v2281_v12 = vpack.c.bf16 %v2180_v3, %v2179_v2  ;;  %v1458_v16 = vld [vmem:[%s21068_s7 + $0x79] sm:$0xff] }
 0x809   :  { %14703 = vmatpush3.bf16.msra.mxu1 %v16302_v0  ;;  %14704 = vmatprep.mubr.msk.bf16.mxu1 %vm928_vm7, %v1576_v10  ;;  %v14648_v27 = vpop.f32.mrf.mxu0  ;;  %v1453_v0 = vld [vmem:[%s21068_s7 + $0x39] sm:$0xff] }
 0x80a   :  { %1389 = vst.msk [vmem:[#allocation2 + $0x28] sm:$0xff] %vm701_vm8, %v1325_v22  ;;  %v1330_v30 = vadd.f32 %v14648_v27, %v840_v19  ;;  %14811 = vmatmul.mubr.msk.bf16.gmra.mxu0 %vm928_vm7, %v2276_v17  ;;  %14834 = vmatprep.subr.bf16.mxu1 %v3067_v31  ;;  %v16801_v42 = vpack.c.bf16 %v1453_v0, %v1452_v25  ;;  %v1459_v17 = vld [vmem:[%s21068_s7 + $0x81] sm:$0xff]  ;;  %v2183_v0 = vld [vmem:[%s21068_s7 + $0x2d2] sm:$0xff] }
 0x80b   :  { %v1097_v32 = vpop.f32.mrf.mxu0  ;;  %14814 = vmatprep.mubr.msk.bf16.mxu0 %vm928_vm7, %v2277_v20  ;;  %v846_v19 = vld [vmem:[#allocation2 + $0x80] sm:$0xff]  ;;  %v1460_v20 = vld [vmem:[%s21068_s7 + $0x91] sm:$0xff] }
 0x80c   :  { %1394 = vst.msk [vmem:[#allocation2 + $0x50] sm:$0xff] %vm701_vm8, %v1330_v30  ;;  %v1328_v38 = vadd.f32 %v1097_v32, %v838_v29  ;;  %v2182_v27 = vld [vmem:[%s21068_s7 + $0x2c2] sm:$0xff]  ;;  %v1581_v29 = vpack.c.bf16 %v1459_v17, %v1458_v16  ;;  %v2184_v30 = vld [vmem:[%s21068_s7 + $0x2da] sm:$0xff] }
 0x80d   :  { %v14649_v43 = vpop.f32.mrf.mxu0  ;;  %v2282_v35 = vpack.c.bf16 %v2182_v27, %v2181_v26  ;;  %v2283_v40 = vpack.c.bf16 %v2184_v30, %v2183_v0  ;;  %v1466_v3 = vld [vmem:[%s21068_s7 + $0xd9] sm:$0xff]  ;;  %v2190_v16 = vld [vmem:[%s21068_s7 + $0x322] sm:$0xff]  ;;  %v860_v26 = vld [vmem:[#allocation2 + $0xf0] sm:$0xff] }
 0x80e   :  { %1392 = vst.msk [vmem:[#allocation2 + $0x40] sm:$0xff] %vm701_vm8, %v1328_v38  ;;  %v1331_v45 = vadd.f32 %v14649_v43, %v841_v33  ;;  %v847_v33 = vld [vmem:[#allocation2 + $0x88] sm:$0xff]  ;;  %v858_v30 = vld [vmem:[#allocation2 + $0xe0] sm:$0xff] }
 0x80f   :  { %v1100_v47 = vpop.f32.mrf.mxu0  ;;  %v1462_v43 = vld [vmem:[%s21068_s7 + $0xa9] sm:$0xff] }
 0x810   :  { %14705 = vmatmul.mubr.msk.bf16.vlgmr.msra.gmra.mxu1 %vm928_vm7, %v16789_v37  ;;  %1395 = vst.msk [vmem:[#allocation2 + $0x58] sm:$0xff] %vm701_vm8, %v1331_v45  ;;  %v1329_v51 = vadd.f32 %v1100_v47, %v839_v44  ;;  %v1463_v44 = vld [vmem:[%s21068_s7 + $0xb1] sm:$0xff]  ;;  %v850_v45 = vld [vmem:[#allocation2 + $0xa0] sm:$0xff]  ;;  %v1465_v47 = vld [vmem:[%s21068_s7 + $0xc9] sm:$0xff] }
 0x811   :  { %14708 = vmatprep.mubr.msk.bf16.mxu1 %vm928_vm7, %v16801_v42  ;;  %v14652_v54 = vpop.f32.mrf.mxu0  ;;  %14835 = vmatpush3.bf16.msra.mxu1 %v3067_v31  ;;  %v1582_v31 = vpack.c.bf16 %v1461_v21, %v1460_v20  ;;  %v1583_v53 = vpack.c.bf16 %v1463_v44, %v1462_v43  ;;  %v855_v21 = vld [vmem:[#allocation2 + $0xc8] sm:$0xff] }
 0x812   :  { %1393 = vst.msk [vmem:[#allocation2 + $0x48] sm:$0xff] %vm701_vm8, %v1329_v51  ;;  %v1334_v58 = vadd.f32 %v14652_v54, %v844_v48  ;;  %14815 = vmatmul.mubr.msk.bf16.gmra.mxu0 %vm928_vm7, %v2278_v46  ;;  %v1464_v46 = vld [vmem:[%s21068_s7 + $0xc1] sm:$0xff]  ;;  %v2185_v51 = vld [vmem:[%s21068_s7 + $0x2ea] sm:$0xff] }
 0x813   :  { %v1113_v59 = vpop.f32.mrf.mxu0  ;;  %14818 = vmatprep.mubr.msk.bf16.mxu0 %vm928_vm7, %v2279_v49  ;;  %v1584_v57 = vpack.c.bf16 %v1465_v47, %v1464_v46  ;;  %v2284_v61 = vpack.c.bf16 %v2186_v52, %v2185_v51  ;;  %v862_v52 = vld [vmem:[#allocation2 + $0x100] sm:$0xff] }
 0x814   :  { %1398 = vst.msk [vmem:[#allocation2 + $0x70] sm:$0xff] %vm701_vm8, %v1334_v58  ;;  %v1332_v1 = vadd.f32 %v1113_v59, %v842_v55  ;;  %v2187_v55 = vld [vmem:[%s21068_s7 + $0x302] sm:$0xff] }
 0x815   :  { %v14653_v5 = vpop.f32.mrf.mxu0  ;;  %v851_v59 = vld [vmem:[#allocation2 + $0xa8] sm:$0xff] }
 0x816   :  { %1396 = vst.msk [vmem:[#allocation2 + $0x60] sm:$0xff] %vm701_vm8, %v1332_v1  ;;  %v1335_v8 = vadd.f32 %v14653_v5, %v845_v60  ;;  %v2285_v1 = vpack.c.bf16 %v2188_v56, %v2187_v55 }
 0x817   :  { %v1116_v10 = vpop.f32.mrf.mxu0 }
 0x818   :  { %14709 = vmatmul.mubr.msk.bf16.gmra.mxu1 %vm928_vm7, %v1579_v63  ;;  %1399 = vst.msk [vmem:[#allocation2 + $0x78] sm:$0xff] %vm701_vm8, %v1335_v8  ;;  %v1333_v13 = vadd.f32 %v1116_v10, %v843_v7  ;;  %v856_v63 = vld [vmem:[#allocation2 + $0xd0] sm:$0xff]  ;;  %v854_v7 = vld [vmem:[#allocation2 + $0xc0] sm:$0xff] }
 0x819   :  { %14712 = vmatprep.mubr.msk.bf16.mxu1 %vm928_vm7, %v1580_v4  ;;  %v14656_v18 = vpop.f32.mrf.mxu0  ;;  %v1467_v4 = vld [vmem:[%s21068_s7 + $0xe1] sm:$0xff]  ;;  %v1468_v8 = vld [vmem:[%s21068_s7 + $0xf1] sm:$0xff] }
 0x81a   :  { %1397 = vst.msk [vmem:[#allocation2 + $0x68] sm:$0xff] %vm701_vm8, %v1333_v13  ;;  %v1338_v22 = vadd.f32 %v14656_v18, %v848_v11  ;;  %14819 = vmatmul.mubr.msk.bf16.gmra.mxu0 %vm928_vm7, %v2280_v9  ;;  %v1469_v9 = vld [vmem:[%s21068_s7 + $0xf9] sm:$0xff]  ;;  %v1585_v17 = vpack.c.bf16 %v1467_v4, %v1466_v3 }
 0x81b   :  { %v1129_v23 = vpop.f32.mrf.mxu0  ;;  %14822 = vmatprep.mubr.msk.bf16.mxu0 %vm928_vm7, %v2281_v12  ;;  %v857_v12 = vld [vmem:[#allocation2 + $0xd8] sm:$0xff] }
 0x81c   :  { %1402 = vst.msk [vmem:[#allocation2 + $0x90] sm:$0xff] %vm701_vm8, %v1338_v22  ;;  %v1336_v25 = vadd.f32 %v1129_v23, %v846_v19  ;;  %v2189_v13 = vld [vmem:[%s21068_s7 + $0x31a] sm:$0xff]  ;;  %v1586_v19 = vpack.c.bf16 %v1469_v9, %v1468_v8 }
 0x81d   :  { %v14657_v32 = vpop.f32.mrf.mxu0  ;;  %v2286_v23 = vpack.c.bf16 %v2190_v16, %v2189_v13  ;;  %v866_v13 = vld [vmem:[#allocation2 + $0x120] sm:$0xff]  ;;  %v1480_v16 = vld [vmem:[%s21068_s7 + $0x1b1] sm:$0xff] }
 0x81e   :  { %1400 = vst.msk [vmem:[#allocation2 + $0x80] sm:$0xff] %vm701_vm8, %v1336_v25  ;;  %v1339_v34 = vadd.f32 %v14657_v32, %v849_v24  ;;  %v1471_v25 = vld [vmem:[%s21068_s7 + $0x111] sm:$0xff]  ;;  %v1473_v32 = vld [vmem:[%s21068_s7 + $0x129] sm:$0xff] }
 0x81f   :  { %v1132_v38 = vpop.f32.mrf.mxu0 }
 0x820   :  { %14713 = vmatmul.mubr.msk.bf16.gmra.mxu1 %vm928_vm7, %v1581_v29  ;;  %1403 = vst.msk [vmem:[#allocation2 + $0x98] sm:$0xff] %vm701_vm8, %v1339_v34  ;;  %v1337_v41 = vadd.f32 %v1132_v38, %v847_v33  ;;  %v1470_v29 = vld [vmem:[%s21068_s7 + $0x109] sm:$0xff] }
 0x821   :  { %14716 = vmatprep.mubr.msk.bf16.mxu1 %vm928_vm7, %v1582_v31  ;;  %v14660_v36 = vpop.f32.mrf.mxu0  ;;  %v1472_v31 = vld [vmem:[%s21068_s7 + $0x121] sm:$0xff]  ;;  %v1587_v38 = vpack.c.bf16 %v1471_v25, %v1470_v29 }
 0x822   :  { %1401 = vst.msk [vmem:[#allocation2 + $0x88] sm:$0xff] %vm701_vm8, %v1337_v41  ;;  %v1342_v48 = vadd.f32 %v14660_v36, %v852_v39  ;;  %14823 = vmatmul.mubr.msk.bf16.gmra.mxu0 %vm928_vm7, %v2282_v35  ;;  %v861_v35 = vld [vmem:[#allocation2 + $0xf8] sm:$0xff]  ;;  %v1588_v43 = vpack.c.bf16 %v1473_v32, %v1472_v31  ;;  %v859_v36 = vld [vmem:[#allocation2 + $0xe8] sm:$0xff] }
 0x823   :  { %v1145_v49 = vpop.f32.mrf.mxu0  ;;  %14826 = vmatprep.mubr.msk.bf16.mxu0 %vm928_vm7, %v2283_v40  ;;  %v13302_v40 = vld [vmem:[%s21068_s7 + $0x49] sm:$0xff]  ;;  %v13303_v41 = vld [vmem:[%s21068_s7 + $0x51] sm:$0xff] }
 0x824   :  { %1406 = vst.msk [vmem:[#allocation2 + $0xb0] sm:$0xff] %vm701_vm8, %v1342_v48  ;;  %v1340_v54 = vadd.f32 %v1145_v49, %v850_v45  ;;  %v3616_v47 = vpack.c.bf16 %v13303_v41, %v13302_v40  ;;  %v1474_v49 = vld [vmem:[%s21068_s7 + $0x139] sm:$0xff] }
 0x825   :  { %v14661_v58 = vpop.f32.mrf.mxu0  ;;  %v870_v41 = vld [vmem:[#allocation2 + $0x140] sm:$0xff] }
 0x826   :  { %1404 = vst.msk [vmem:[#allocation2 + $0xa0] sm:$0xff] %vm701_vm8, %v1340_v54  ;;  %v1343_v60 = vadd.f32 %v14661_v58, %v853_v50  ;;  %v1475_v50 = vld [vmem:[%s21068_s7 + $0x141] sm:$0xff]  ;;  %v1477_v54 = vld [vmem:[%s21068_s7 + $0x159] sm:$0xff] }
 0x827   :  { %v1148_v62 = vpop.f32.mrf.mxu0  ;;  %v13304_v58 = vld [vmem:[%s21068_s7 + $0x61] sm:$0xff] }
 0x828   :  { %14717 = vmatmul.mubr.msk.bf16.gmra.mxu1 %vm928_vm7, %v1583_v53  ;;  %1407 = vst.msk [vmem:[#allocation2 + $0xb8] sm:$0xff] %vm701_vm8, %v1343_v60  ;;  %v1341_v2 = vadd.f32 %v1148_v62, %v851_v59  ;;  %v1476_v53 = vld [vmem:[%s21068_s7 + $0x151] sm:$0xff]  ;;  %v13305_v59 = vld [vmem:[%s21068_s7 + $0x69] sm:$0xff]  ;;  %v1589_v60 = vpack.c.bf16 %v1475_v50, %v1474_v49  ;;  %v13307_v62 = vld [vmem:[%s21068_s7 + $0x81] sm:$0xff] }
 0x829   :  { %14720 = vmatprep.mubr.msk.bf16.mxu1 %vm928_vm7, %v1584_v57  ;;  %v14664_v5 = vpop.f32.mrf.mxu0  ;;  %v865_v57 = vld [vmem:[#allocation2 + $0x118] sm:$0xff]  ;;  %v3617_v4 = vpack.c.bf16 %v13305_v59, %v13304_v58  ;;  %v876_v58 = vld [vmem:[#allocation2 + $0x170] sm:$0xff] }
 0x82a   :  { %1405 = vst.msk [vmem:[#allocation2 + $0xa8] sm:$0xff] %vm701_vm8, %v1341_v2  ;;  %v1346_v10 = vadd.f32 %v14664_v5, %v856_v63  ;;  %14827 = vmatmul.mubr.msk.bf16.gmra.mxu0 %vm928_vm7, %v2284_v61  ;;  %v1590_v63 = vpack.c.bf16 %v1477_v54, %v1476_v53  ;;  %v863_v2 = vld [vmem:[#allocation2 + $0x108] sm:$0xff]  ;;  %v13314_v50 = vld [vmem:[%s21068_s7 + $0xd9] sm:$0xff] }
 0x82b   :  { %v1161_v11 = vpop.f32.mrf.mxu0  ;;  %14830 = vmatprep.mubr.msk.bf16.mxu0 %vm928_vm7, %v2285_v1  ;;  %v871_v54 = vld [vmem:[#allocation2 + $0x148] sm:$0xff] }
 0x82c   :  { %1410 = vst.msk [vmem:[#allocation2 + $0xd0] sm:$0xff] %vm701_vm8, %v1346_v10  ;;  %v1344_v18 = vadd.f32 %v1161_v11, %v854_v7  ;;  %v868_v7 = vld [vmem:[#allocation2 + $0x130] sm:$0xff] }
 0x82d   :  { %v14665_v20 = vpop.f32.mrf.mxu0  ;;  %v1478_v10 = vld [vmem:[%s21068_s7 + $0x169] sm:$0xff]  ;;  %v1479_v11 = vld [vmem:[%s21068_s7 + $0x171] sm:$0xff] }
 0x82e   :  { %1408 = vst.msk [vmem:[#allocation2 + $0xc0] sm:$0xff] %vm701_vm8, %v1344_v18  ;;  %v1347_v22 = vadd.f32 %v14665_v20, %v857_v12  ;;  %v869_v20 = vld [vmem:[#allocation2 + $0x138] sm:$0xff] }
 0x82f   :  { %v1164_v24 = vpop.f32.mrf.mxu0 }
 0x830   :  { %14721 = vmatmul.mubr.msk.bf16.gmra.mxu1 %vm928_vm7, %v1585_v17  ;;  %1411 = vst.msk [vmem:[#allocation2 + $0xd8] sm:$0xff] %vm701_vm8, %v1347_v22  ;;  %v1345_v27 = vadd.f32 %v1164_v24, %v855_v21  ;;  %v1481_v17 = vld [vmem:[%s21068_s7 + $0x1b9] sm:$0xff]  ;;  %v13308_v21 = vld [vmem:[%s21068_s7 + $0x91] sm:$0xff] }
 0x831   :  { %14724 = vmatprep.mubr.msk.bf16.mxu1 %vm928_vm7, %v1586_v19  ;;  %v14668_v0 = vpop.f32.mrf.mxu0  ;;  %v13309_v22 = vld [vmem:[%s21068_s7 + $0x99] sm:$0xff]  ;;  %v1592_v29 = vpack.c.bf16 %v1481_v17, %v1480_v16  ;;  %v875_v17 = vld [vmem:[#allocation2 + $0x168] sm:$0xff] }
 0x832   :  { %1409 = vst.msk [vmem:[#allocation2 + $0xc8] sm:$0xff] %vm701_vm8, %v1345_v27  ;;  %v1350_v33 = vadd.f32 %v14668_v0, %v860_v26  ;;  %14831 = vmatmul.mubr.msk.bf16.gmra.mxu0 %vm928_vm7, %v2286_v23  ;;  %v1591_v23 = vpack.c.bf16 %v1479_v11, %v1478_v10  ;;  %v13310_v26 = vld [vmem:[%s21068_s7 + $0xa9] sm:$0xff]  ;;  %v13311_v27 = vld [vmem:[%s21068_s7 + $0xb1] sm:$0xff]  ;;  %v3619_v31 = vpack.c.bf16 %v13309_v22, %v13308_v21 }
 0x833   :  { %v1177_v34 = vpop.f32.mrf.mxu0  ;;  %14902 = vmatprep.mubr.msk.bf16.mxu0 %vm928_vm7, %v16789_v37  ;;  %v864_v37 = vld [vmem:[#allocation2 + $0x110] sm:$0xff]  ;;  %v867_v0 = vld [vmem:[#allocation2 + $0x128] sm:$0xff] }
 0x834   :  { %1414 = vst.msk [vmem:[#allocation2 + $0xf0] sm:$0xff] %vm701_vm8, %v1350_v33  ;;  %v1348_v39 = vadd.f32 %v1177_v34, %v858_v30  ;;  %v872_v33 = vld [vmem:[#allocation2 + $0x150] sm:$0xff]  ;;  %v3620_v34 = vpack.c.bf16 %v13311_v27, %v13310_v26 }
 0x835   :  { %v14669_v44 = vpop.f32.mrf.mxu0  ;;  %v13318_v11 = vld [vmem:[%s21068_s7 + $0x109] sm:$0xff]  ;;  %v1491_v26 = vld [vmem:[%s21068_s7 + $0x231] sm:$0xff] }
 0x836   :  { %1412 = vst.msk [vmem:[#allocation2 + $0xe0] sm:$0xff] %vm701_vm8, %v1348_v39  ;;  %v1351_v45 = vadd.f32 %v14669_v44, %v861_v35  ;;  %v1483_v39 = vld [vmem:[%s21068_s7 + $0x1d1] sm:$0xff]  ;;  %v1485_v44 = vld [vmem:[%s21068_s7 + $0x1e9] sm:$0xff] }
 0x837   :  { %v1180_v46 = vpop.f32.mrf.mxu0  ;;  %v880_v21 = vld [vmem:[#allocation2 + $0x190] sm:$0xff] }
 0x838   :  { %14725 = vmatmul.mubr.msk.bf16.gmra.mxu1 %vm928_vm7, %v1587_v38  ;;  %1415 = vst.msk [vmem:[#allocation2 + $0xf8] sm:$0xff] %vm701_vm8, %v1351_v45  ;;  %v1349_v48 = vadd.f32 %v1180_v46, %v859_v36  ;;  %v1482_v38 = vld [vmem:[%s21068_s7 + $0x1c9] sm:$0xff]  ;;  %v873_v46 = vld [vmem:[#allocation2 + $0x158] sm:$0xff] }
 0x839   :  { %14728 = vmatprep.mubr.msk.bf16.mxu1 %vm928_vm7, %v1588_v43  ;;  %v14672_v51 = vpop.f32.mrf.mxu0  ;;  %v1484_v43 = vld [vmem:[%s21068_s7 + $0x1e1] sm:$0xff] }
 0x83a   :  { %1413 = vst.msk [vmem:[#allocation2 + $0xe8] sm:$0xff] %vm701_vm8, %v1349_v48  ;;  %v1354_v55 = vadd.f32 %v14672_v51, %v864_v37  ;;  %14903 = vmatmul.mubr.msk.bf16.vlgmr.msra.gmra.mxu0 %vm928_vm7, %v16801_v42  ;;  %v13306_v42 = vld [vmem:[%s21068_s7 + $0x79] sm:$0xff]  ;;  %v13312_v37 = vld [vmem:[%s21068_s7 + $0xc1] sm:$0xff]  ;;  %v1593_v48 = vpack.c.bf16 %v1483_v39, %v1482_v38 }
 0x83b   :  { %v1193_v56 = vpop.f32.mrf.mxu0  ;;  %14906 = vmatprep.mubr.msk.bf16.mxu0 %vm928_vm7, %v3616_v47  ;;  %v3618_v8 = vpack.c.bf16 %v13307_v62, %v13306_v42  ;;  %v13313_v47 = vld [vmem:[%s21068_s7 + $0xc9] sm:$0xff]  ;;  %v13315_v51 = vld [vmem:[%s21068_s7 + $0xe1] sm:$0xff]  ;;  %v13322_v39 = vld [vmem:[%s21068_s7 + $0x139] sm:$0xff] }
 0x83c   :  { %1418 = vst.msk [vmem:[#allocation2 + $0x110] sm:$0xff] %vm701_vm8, %v1354_v55  ;;  %v1352_v61 = vadd.f32 %v1193_v56, %v862_v52  ;;  %v1594_v52 = vpack.c.bf16 %v1485_v44, %v1484_v43  ;;  %v3621_v56 = vpack.c.bf16 %v13313_v47, %v13312_v37  ;;  %v3622_v59 = vpack.c.bf16 %v13315_v51, %v13314_v50  ;;  %v1487_v42 = vld [vmem:[%s21068_s7 + $0x201] sm:$0xff]  ;;  %v884_v37 = vld [vmem:[#allocation2 + $0x1b0] sm:$0xff] }
 0x83d   :  { %v14673_v1 = vpop.f32.mrf.mxu0  ;;  %v879_v44 = vld [vmem:[#allocation2 + $0x188] sm:$0xff] }
 0x83e   :  { %1416 = vst.msk [vmem:[#allocation2 + $0x100] sm:$0xff] %vm701_vm8, %v1352_v61  ;;  %v1355_v3 = vadd.f32 %v14673_v1, %v865_v57  ;;  %v1486_v61 = vld [vmem:[%s21068_s7 + $0x1f9] sm:$0xff]  ;;  %v1488_v1 = vld [vmem:[%s21068_s7 + $0x211] sm:$0xff]  ;;  %v1495_v50 = vld [vmem:[%s21068_s7 + $0x261] sm:$0xff] }
 0x83f   :  { %v1196_v5 = vpop.f32.mrf.mxu0 }
 0x840   :  { %14729 = vmatmul.mubr.msk.bf16.gmra.mxu1 %vm928_vm7, %v1589_v60  ;;  %1419 = vst.msk [vmem:[#allocation2 + $0x118] sm:$0xff] %vm701_vm8, %v1355_v3  ;;  %v1353_v9 = vadd.f32 %v1196_v5, %v863_v2  ;;  %v1489_v2 = vld [vmem:[%s21068_s7 + $0x219] sm:$0xff] }
 0x841   :  { %14732 = vmatprep.mubr.msk.bf16.mxu1 %vm928_vm7, %v1590_v63  ;;  %v14676_v12 = vpop.f32.mrf.mxu0  ;;  %v874_v63 = vld [vmem:[#allocation2 + $0x160] sm:$0xff]  ;;  %v877_v5 = vld [vmem:[#allocation2 + $0x178] sm:$0xff] }
 0x842   :  { %1417 = vst.msk [vmem:[#allocation2 + $0x108] sm:$0xff] %vm701_vm8, %v1353_v9  ;;  %v1358_v18 = vadd.f32 %v14676_v12, %v868_v7  ;;  %14907 = vmatmul.mubr.msk.bf16.gmra.mxu0 %vm928_vm7, %v3617_v4  ;;  %v13316_v7 = vld [vmem:[%s21068_s7 + $0xf1] sm:$0xff]  ;;  %v1595_v9 = vpack.c.bf16 %v1487_v42, %v1486_v61  ;;  %v13326_v42 = vld [vmem:[%s21068_s7 + $0x169] sm:$0xff] }
 0x843   :  { %v1209_v19 = vpop.f32.mrf.mxu0  ;;  %14910 = vmatprep.mubr.msk.bf16.mxu0 %vm928_vm7, %v3618_v8  ;;  %v13317_v8 = vld [vmem:[%s21068_s7 + $0xf9] sm:$0xff]  ;;  %v13319_v12 = vld [vmem:[%s21068_s7 + $0x111] sm:$0xff] }
 0x844   :  { %1422 = vst.msk [vmem:[#allocation2 + $0x130] sm:$0xff] %vm701_vm8, %v1358_v18  ;;  %v1356_v24 = vadd.f32 %v1209_v19, %v866_v13  ;;  %v1596_v13 = vpack.c.bf16 %v1489_v2, %v1488_v1  ;;  %v3623_v19 = vpack.c.bf16 %v13317_v8, %v13316_v7  ;;  %v3624_v22 = vpack.c.bf16 %v13319_v12, %v13318_v11  ;;  %v883_v2 = vld [vmem:[#allocation2 + $0x1a8] sm:$0xff]  ;;  %v888_v7 = vld [vmem:[#allocation2 + $0x1d0] sm:$0xff] }
 0x845   :  { %v14677_v25 = vpop.f32.mrf.mxu0  ;;  %v1499_v11 = vld [vmem:[%s21068_s7 + $0x291] sm:$0xff] }
 0x846   :  { %1420 = vst.msk [vmem:[#allocation2 + $0x120] sm:$0xff] %vm701_vm8, %v1356_v24  ;;  %v1359_v30 = vadd.f32 %v14677_v25, %v869_v20  ;;  %v1490_v24 = vld [vmem:[%s21068_s7 + $0x229] sm:$0xff]  ;;  %v1492_v25 = vld [vmem:[%s21068_s7 + $0x241] sm:$0xff] }
 0x847   :  { %v1212_v32 = vpop.f32.mrf.mxu0 }
 0x848   :  { %14733 = vmatmul.mubr.msk.bf16.gmra.mxu1 %vm928_vm7, %v1591_v23  ;;  %1423 = vst.msk [vmem:[#allocation2 + $0x138] sm:$0xff] %vm701_vm8, %v1359_v30  ;;  %v1357_v35 = vadd.f32 %v1212_v32, %v867_v0  ;;  %v1493_v0 = vld [vmem:[%s21068_s7 + $0x249] sm:$0xff]  ;;  %v881_v32 = vld [vmem:[#allocation2 + $0x198] sm:$0xff] }
 0x849   :  { %14736 = vmatprep.mubr.msk.bf16.mxu1 %vm928_vm7, %v1592_v29  ;;  %v14680_v40 = vpop.f32.mrf.mxu0  ;;  %v878_v29 = vld [vmem:[#allocation2 + $0x180] sm:$0xff] }
 0x84a   :  { %1421 = vst.msk [vmem:[#allocation2 + $0x128] sm:$0xff] %vm701_vm8, %v1357_v35  ;;  %v1362_v36 = vadd.f32 %v14680_v40, %v872_v33  ;;  %14911 = vmatmul.mubr.msk.bf16.gmra.mxu0 %vm928_vm7, %v3619_v31  ;;  %v13320_v33 = vld [vmem:[%s21068_s7 + $0x121] sm:$0xff]  ;;  %v1597_v35 = vpack.c.bf16 %v1491_v26, %v1490_v24  ;;  %v13330_v26 = vld [vmem:[%s21068_s7 + $0x1c9] sm:$0xff] }
 0x84b   :  { %v1225_v45 = vpop.f32.mrf.mxu0  ;;  %14914 = vmatprep.mubr.msk.bf16.mxu0 %vm928_vm7, %v3620_v34  ;;  %v13321_v34 = vld [vmem:[%s21068_s7 + $0x129] sm:$0xff]  ;;  %v13323_v40 = vld [vmem:[%s21068_s7 + $0x141] sm:$0xff] }
 0x84c   :  { %1426 = vst.msk [vmem:[#allocation2 + $0x150] sm:$0xff] %vm701_vm8, %v1362_v36  ;;  %v1360_v49 = vadd.f32 %v1225_v45, %v870_v41  ;;  %v1598_v41 = vpack.c.bf16 %v1493_v0, %v1492_v25  ;;  %v3625_v45 = vpack.c.bf16 %v13321_v34, %v13320_v33  ;;  %v3626_v47 = vpack.c.bf16 %v13323_v40, %v13322_v39  ;;  %v887_v0 = vld [vmem:[#allocation2 + $0x1c8] sm:$0xff]  ;;  %v892_v33 = vld [vmem:[#allocation2 + $0x1f0] sm:$0xff] }
 0x84d   :  { %v14681_v53 = vpop.f32.mrf.mxu0  ;;  %v1503_v39 = vld [vmem:[%s21068_s7 + $0x2c1] sm:$0xff] }
 0x84e   :  { %1424 = vst.msk [vmem:[#allocation2 + $0x140] sm:$0xff] %vm701_vm8, %v1360_v49  ;;  %v1363_v55 = vadd.f32 %v14681_v53, %v873_v46  ;;  %v1494_v49 = vld [vmem:[%s21068_s7 + $0x259] sm:$0xff]  ;;  %v1496_v53 = vld [vmem:[%s21068_s7 + $0x271] sm:$0xff] }
 0x84f   :  { %v1228_v57 = vpop.f32.mrf.mxu0 }
 0x850   :  { %14737 = vmatmul.mubr.msk.bf16.gmra.mxu1 %vm928_vm7, %v1593_v48  ;;  %1427 = vst.msk [vmem:[#allocation2 + $0x158] sm:$0xff] %vm701_vm8, %v1363_v55  ;;  %v1361_v60 = vadd.f32 %v1228_v57, %v871_v54  ;;  %v1497_v54 = vld [vmem:[%s21068_s7 + $0x279] sm:$0xff] }
 0x851   :  { %14740 = vmatprep.mubr.msk.bf16.mxu1 %vm928_vm7, %v1594_v52  ;;  %v14684_v62 = vpop.f32.mrf.mxu0  ;;  %v882_v52 = vld [vmem:[#allocation2 + $0x1a0] sm:$0xff]  ;;  %v885_v57 = vld [vmem:[#allocation2 + $0x1b8] sm:$0xff] }
 0x852   :  { %1425 = vst.msk [vmem:[#allocation2 + $0x148] sm:$0xff] %vm701_vm8, %v1361_v60  ;;  %v1366_v3 = vadd.f32 %v14684_v62, %v876_v58  ;;  %14915 = vmatmul.mubr.msk.bf16.gmra.mxu0 %vm928_vm7, %v3621_v56  ;;  %v13324_v58 = vld [vmem:[%s21068_s7 + $0x151] sm:$0xff]  ;;  %v1599_v60 = vpack.c.bf16 %v1495_v50, %v1494_v49  ;;  %v13334_v50 = vld [vmem:[%s21068_s7 + $0x1f9] sm:$0xff] }
 0x853   :  { %v1241_v4 = vpop.f32.mrf.mxu0  ;;  %14918 = vmatprep.mubr.msk.bf16.mxu0 %vm928_vm7, %v3622_v59  ;;  %v13325_v59 = vld [vmem:[%s21068_s7 + $0x159] sm:$0xff]  ;;  %v13327_v62 = vld [vmem:[%s21068_s7 + $0x171] sm:$0xff] }
 0x854   :  { %1430 = vst.msk [vmem:[#allocation2 + $0x170] sm:$0xff] %vm701_vm8, %v1366_v3  ;;  %v1364_v10 = vadd.f32 %v1241_v4, %v874_v63  ;;  %v1600_v63 = vpack.c.bf16 %v1497_v54, %v1496_v53  ;;  %v3627_v4 = vpack.c.bf16 %v13325_v59, %v13324_v58  ;;  %v3628_v8 = vpack.c.bf16 %v13327_v62, %v13326_v42  ;;  %v891_v54 = vld [vmem:[#allocation2 + $0x1e8] sm:$0xff] }
 0x855   :  { %v14685_v16 = vpop.f32.mrf.mxu0  ;;  %v1508_v62 = vld [vmem:[%s21068_s7 + $0x301] sm:$0xff] }
 0x856   :  { %1428 = vst.msk [vmem:[#allocation2 + $0x160] sm:$0xff] %vm701_vm8, %v1364_v10  ;;  %v1367_v18 = vadd.f32 %v14685_v16, %v877_v5  ;;  %v1498_v10 = vld [vmem:[%s21068_s7 + $0x289] sm:$0xff]  ;;  %v1500_v16 = vld [vmem:[%s21068_s7 + $0x2a1] sm:$0xff] }
 0x857   :  { %v1244_v20 = vpop.f32.mrf.mxu0 }
 0x858   :  { %14741 = vmatmul.mubr.msk.bf16.gmra.mxu1 %vm928_vm7, %v1595_v9  ;;  %1431 = vst.msk [vmem:[#allocation2 + $0x178] sm:$0xff] %vm701_vm8, %v1367_v18  ;;  %v1365_v23 = vadd.f32 %v1244_v20, %v875_v17  ;;  %v1501_v17 = vld [vmem:[%s21068_s7 + $0x2a9] sm:$0xff]  ;;  %v889_v20 = vld [vmem:[#allocation2 + $0x1d8] sm:$0xff] }
 0x859   :  { %14744 = vmatprep.mubr.msk.bf16.mxu1 %vm928_vm7, %v1596_v13  ;;  %v14688_v27 = vpop.f32.mrf.mxu0  ;;  %v886_v13 = vld [vmem:[#allocation2 + $0x1c0] sm:$0xff] }
 0x85a   :  { %1429 = vst.msk [vmem:[#allocation2 + $0x168] sm:$0xff] %vm701_vm8, %v1365_v23  ;;  %v1370_v30 = vadd.f32 %v14688_v27, %v880_v21  ;;  %14919 = vmatmul.mubr.msk.bf16.gmra.mxu0 %vm928_vm7, %v3623_v19  ;;  %v13328_v21 = vld [vmem:[%s21068_s7 + $0x181] sm:$0xff]  ;;  %v1601_v23 = vpack.c.bf16 %v1499_v11, %v1498_v10  ;;  %v13331_v27 = vld [vmem:[%s21068_s7 + $0x1d1] sm:$0xff] }
 0x85b   :  { %v1257_v31 = vpop.f32.mrf.mxu0  ;;  %14922 = vmatprep.mubr.msk.bf16.mxu0 %vm928_vm7, %v3624_v22  ;;  %v13329_v22 = vld [vmem:[%s21068_s7 + $0x189] sm:$0xff]  ;;  %v3630_v34 = vpack.c.bf16 %v13331_v27, %v13330_v26  ;;  %v13343_v26 = vld [vmem:[%s21068_s7 + $0x261] sm:$0xff] }
 0x85c   :  { %1434 = vst.msk [vmem:[#allocation2 + $0x190] sm:$0xff] %vm701_vm8, %v1370_v30  ;;  %v1368_v38 = vadd.f32 %v1257_v31, %v878_v29  ;;  %v1602_v29 = vpack.c.bf16 %v1501_v17, %v1500_v16  ;;  %v3629_v31 = vpack.c.bf16 %v13329_v22, %v13328_v21  ;;  %v1511_v16 = vld [vmem:[%s21068_s7 + $0x321] sm:$0xff]  ;;  %v13341_v22 = vld [vmem:[%s21068_s7 + $0x249] sm:$0xff] }
 0x85d   :  { %v14689_v43 = vpop.f32.mrf.mxu0  ;;  %v13340_v21 = vld [vmem:[%s21068_s7 + $0x241] sm:$0xff] }
 0x85e   :  { %1432 = vst.msk [vmem:[#allocation2 + $0x180] sm:$0xff] %vm701_vm8, %v1368_v38  ;;  %v1371_v36 = vadd.f32 %v14689_v43, %v881_v32  ;;  %v1502_v38 = vld [vmem:[%s21068_s7 + $0x2b9] sm:$0xff]  ;;  %v1504_v43 = vld [vmem:[%s21068_s7 + $0x2d1] sm:$0xff] }
 0x85f   :  { %v1260_v46 = vpop.f32.mrf.mxu0 }
 0x860   :  { %14745 = vmatmul.mubr.msk.bf16.gmra.mxu1 %vm928_vm7, %v1597_v35  ;;  %1435 = vst.msk [vmem:[#allocation2 + $0x198] sm:$0xff] %vm701_vm8, %v1371_v36  ;;  %v1369_v48 = vadd.f32 %v1260_v46, %v879_v44  ;;  %v1505_v44 = vld [vmem:[%s21068_s7 + $0x2d9] sm:$0xff] }
 0x861   :  { %14748 = vmatprep.mubr.msk.bf16.mxu1 %vm928_vm7, %v1598_v41  ;;  %v14692_v51 = vpop.f32.mrf.mxu0  ;;  %v890_v41 = vld [vmem:[#allocation2 + $0x1e0] sm:$0xff]  ;;  %v893_v46 = vld [vmem:[#allocation2 + $0x1f8] sm:$0xff] }
 0x862   :  { %1433 = vst.msk [vmem:[#allocation2 + $0x188] sm:$0xff] %vm701_vm8, %v1369_v48  ;;  %v1374_v55 = vadd.f32 %v14692_v51, %v884_v37  ;;  %14923 = vmatmul.mubr.msk.bf16.gmra.mxu0 %vm928_vm7, %v3625_v45  ;;  %v13332_v37 = vld [vmem:[%s21068_s7 + $0x1e1] sm:$0xff]  ;;  %v1603_v48 = vpack.c.bf16 %v1503_v39, %v1502_v38  ;;  %v13206_v39 = vld [vmem:[%s21068_s7 + $0x50] sm:$0xff] }
 0x863   :  { %v1273_v56 = vpop.f32.mrf.mxu0  ;;  %14926 = vmatprep.mubr.msk.bf16.mxu0 %vm928_vm7, %v3626_v47  ;;  %v13333_v47 = vld [vmem:[%s21068_s7 + $0x1e9] sm:$0xff]  ;;  %v13335_v51 = vld [vmem:[%s21068_s7 + $0x201] sm:$0xff] }
 0x864   :  { %1438 = vst.msk [vmem:[#allocation2 + $0x1b0] sm:$0xff] %vm701_vm8, %v1374_v55  ;;  %v1372_v61 = vadd.f32 %v1273_v56, %v882_v52  ;;  %v1604_v52 = vpack.c.bf16 %v1505_v44, %v1504_v43  ;;  %v3631_v56 = vpack.c.bf16 %v13333_v47, %v13332_v37  ;;  %v3632_v58 = vpack.c.bf16 %v13335_v51, %v13334_v50  ;;  %v13205_v38 = vld [vmem:[%s21068_s7 + $0x48] sm:$0xff]  ;;  %v13344_v43 = vld [vmem:[%s21068_s7 + $0x271] sm:$0xff]  ;;  %v13345_v44 = vld [vmem:[%s21068_s7 + $0x279] sm:$0xff] }
 0x865   :  { %v14693_v1 = vpop.f32.mrf.mxu0  ;;  %v13347_v37 = vld [vmem:[%s21068_s7 + $0x291] sm:$0xff]  ;;  %v3637_v50 = vpack.c.bf16 %v13345_v44, %v13344_v43  ;;  %v13356_v44 = vld [vmem:[%s21068_s7 + $0x301] sm:$0xff] }
 0x866   :  { %1436 = vst.msk [vmem:[#allocation2 + $0x1a0] sm:$0xff] %vm701_vm8, %v1372_v61  ;;  %v1375_v3 = vadd.f32 %v14693_v1, %v885_v57  ;;  %v1507_v61 = vld [vmem:[%s21068_s7 + $0x2f1] sm:$0xff] }
 0x867   :  { %v1276_v5 = vpop.f32.mrf.mxu0 }
 0x868   :  { %14749 = vmatmul.mubr.msk.bf16.gmra.mxu1 %vm928_vm7, %v1599_v60  ;;  %1439 = vst.msk [vmem:[#allocation2 + $0x1b8] sm:$0xff] %vm701_vm8, %v1375_v3  ;;  %v1373_v9 = vadd.f32 %v1276_v5, %v883_v2  ;;  %v1506_v60 = vld [vmem:[%s21068_s7 + $0x2e9] sm:$0xff]  ;;  %v13336_v2 = vld [vmem:[%s21068_s7 + $0x211] sm:$0xff]  ;;  %v13337_v3 = vld [vmem:[%s21068_s7 + $0x219] sm:$0xff] }
 0x869   :  { %14752 = vmatprep.mubr.msk.bf16.mxu1 %vm928_vm7, %v1600_v63  ;;  %v14696_v12 = vpop.f32.mrf.mxu0  ;;  %v1509_v63 = vld [vmem:[%s21068_s7 + $0x309] sm:$0xff]  ;;  %v3633_v10 = vpack.c.bf16 %v13337_v3, %v13336_v2  ;;  %v13351_v2 = vld [vmem:[%s21068_s7 + $0x2c1] sm:$0xff] }
 0x86a   :  { %1437 = vst.msk [vmem:[#allocation2 + $0x1a8] sm:$0xff] %vm701_vm8, %v1373_v9  ;;  %v1378_v18 = vadd.f32 %v14696_v12, %v888_v7  ;;  %14927 = vmatmul.mubr.msk.bf16.gmra.mxu0 %vm928_vm7, %v3627_v4  ;;  %v1605_v4 = vpack.c.bf16 %v1507_v61, %v1506_v60  ;;  %v13338_v5 = vld [vmem:[%s21068_s7 + $0x229] sm:$0xff]  ;;  %v13339_v7 = vld [vmem:[%s21068_s7 + $0x231] sm:$0xff]  ;;  %v13348_v60 = vld [vmem:[%s21068_s7 + $0x2a1] sm:$0xff] }
 0x86b   :  { %v1289_v19 = vpop.f32.mrf.mxu0  ;;  %14930 = vmatprep.mubr.msk.bf16.mxu0 %vm928_vm7, %v3628_v8  ;;  %v1606_v8 = vpack.c.bf16 %v1509_v63, %v1508_v62  ;;  %v3634_v12 = vpack.c.bf16 %v13339_v7, %v13338_v5  ;;  %v13349_v61 = vld [vmem:[%s21068_s7 + $0x2a9] sm:$0xff]  ;;  %v13350_v63 = vld [vmem:[%s21068_s7 + $0x2b9] sm:$0xff] }
 0x86c   :  { %1442 = vst.msk [vmem:[#allocation2 + $0x1d0] sm:$0xff] %vm701_vm8, %v1378_v18  ;;  %v1376_v24 = vadd.f32 %v1289_v19, %v886_v13  ;;  %v1510_v13 = vld [vmem:[%s21068_s7 + $0x319] sm:$0xff]  ;;  %v3639_v5 = vpack.c.bf16 %v13349_v61, %v13348_v60  ;;  %v13222_v60 = vld [vmem:[%s21068_s7 + $0x110] sm:$0xff] }
 0x86d   :  { %v14697_v25 = vpop.f32.mrf.mxu0  ;;  %v13201_v18 = vld [vmem:[%s21068_s7 + $0x18] sm:$0xff]  ;;  %v13202_v19 = vld [vmem:[%s21068_s7 + $0x20] sm:$0xff] }
 0x86e   :  { %1440 = vst.msk [vmem:[#allocation2 + $0x1c0] sm:$0xff] %vm701_vm8, %v1376_v24  ;;  %v1379_v30 = vadd.f32 %v14697_v25, %v889_v20  ;;  %v13342_v24 = vld [vmem:[%s21068_s7 + $0x259] sm:$0xff]  ;;  %v2935_v27 = vpack.c.bf16 %v13202_v19, %v13201_v18  ;;  %v3635_v25 = vpack.c.bf16 %v13341_v22, %v13340_v21  ;;  %v13214_v18 = vld [vmem:[%s21068_s7 + $0xb0] sm:$0xff] }
 0x86f   :  { %v1292_v32 = vpop.f32.mrf.mxu0  ;;  %v13352_v21 = vld [vmem:[%s21068_s7 + $0x2d1] sm:$0xff]  ;;  %v13353_v22 = vld [vmem:[%s21068_s7 + $0x2d9] sm:$0xff] }
 0x870   :  { %14753 = vmatmul.mubr.msk.bf16.gmra.mxu1 %vm928_vm7, %v1601_v23  ;;  %1443 = vst.msk [vmem:[#allocation2 + $0x1d8] sm:$0xff] %vm701_vm8, %v1379_v30  ;;  %v1377_v35 = vadd.f32 %v1292_v32, %v887_v0  ;;  %v1607_v23 = vpack.c.bf16 %v1511_v16, %v1510_v13  ;;  %v3636_v30 = vpack.c.bf16 %v13343_v26, %v13342_v24  ;;  %v13213_v16 = vld [vmem:[%s21068_s7 + $0xa8] sm:$0xff]  ;;  %v13355_v26 = vld [vmem:[%s21068_s7 + $0x2f1] sm:$0xff] }
 0x871   :  { %14756 = vmatprep.mubr.msk.bf16.mxu1 %vm928_vm7, %v1602_v29  ;;  %v14700_v40 = vpop.f32.mrf.mxu0  ;;  %v13354_v24 = vld [vmem:[%s21068_s7 + $0x2e9] sm:$0xff] }
 0x872   :  { %1441 = vst.msk [vmem:[#allocation2 + $0x1c8] sm:$0xff] %vm701_vm8, %v1377_v35  ;;  %v1382_v36 = vadd.f32 %v14700_v40, %v892_v33  ;;  %14931 = vmatmul.mubr.msk.bf16.gmra.mxu0 %vm928_vm7, %v3629_v31  ;;  %v13459_v31 = vld [vmem:[%s21069_s8 + $0x14] sm:$0x7] }
 0x873   :  { %v1305_v45 = vpop.f32.mrf.mxu0  ;;  %14934 = vmatprep.mubr.msk.bf16.mxu0 %vm928_vm7, %v3630_v34  ;;  %v4327_v32 = vpack.c.bf16 %v13459_v31, %v13459_v31  ;;  %v13203_v33 = vld [vmem:[%s21068_s7 + $0x30] sm:$0xff]  ;;  %v13204_v34 = vld [vmem:[%s21068_s7 + $0x38] sm:$0xff] }
 0x874   :  { %1446 = vst.msk [vmem:[#allocation2 + $0x1f0] sm:$0xff] %vm701_vm8, %v1382_v36  ;;  %v1380_v49 = vadd.f32 %v1305_v45, %v890_v41  ;;  %v13556_v36 = vld [vmem:[%s21069_s8 + $0x18] sm:$0x7]  ;;  %v2936_v45 = vpack.c.bf16 %v13204_v34, %v13203_v33  ;;  %v13215_v33 = vld [vmem:[%s21068_s7 + $0xc0] sm:$0xff]  ;;  %v13216_v34 = vld [vmem:[%s21068_s7 + $0xc8] sm:$0xff] }
 0x875   :  { %v14701_v53 = vpop.f32.mrf.mxu0  ;;  %v4425_v40 = vand.u32 %v4327_v32, %v16110_v28  ;;  %v5007_v47 = vpack.c.bf16 %v13556_v36, %v13556_v36  ;;  %v3642_v32 = vpack.c.bf16 %v13355_v26, %v13354_v24  ;;  %v13357_v36 = vld [vmem:[%s21068_s7 + $0x309] sm:$0xff]  ;;  %v13225_v24 = vld [vmem:[%s21068_s7 + $0x138] sm:$0xff]  ;;  %v13226_v26 = vld [vmem:[%s21068_s7 + $0x140] sm:$0xff] }
 0x876   :  { %1444 = vst.msk [vmem:[#allocation2 + $0x1e0] sm:$0xff] %vm701_vm8, %v1380_v49  ;;  %v1383_v55 = vadd.f32 %v14701_v53, %v893_v46  ;;  %v13346_v46 = vld [vmem:[%s21068_s7 + $0x289] sm:$0xff] }
 0x877   :  { %v1308_v57 = vpop.f32.mrf.mxu0  ;;  %14966 = vmatprep.subr.bf16.mxu1 %v4425_v40  ;;  %v5105_v51 = vand.u32 %v5007_v47, %v16110_v28  ;;  %v3638_v53 = vpack.c.bf16 %v13347_v37, %v13346_v46  ;;  %v13358_v46 = vld [vmem:[%s21068_s7 + $0x319] sm:$0xff]  ;;  %v13359_v37 = vld [vmem:[%s21068_s7 + $0x321] sm:$0xff] }
 0x878   :  { %14757 = vmatmul.mubr.msk.bf16.gmra.mxu1 %vm928_vm7, %v1603_v48  ;;  %1447 = vst.msk [vmem:[#allocation2 + $0x1f8] sm:$0xff] %vm701_vm8, %v1383_v55  ;;  %v1381_v59 = vadd.f32 %v1308_v57, %v891_v54  ;;  %v2937_v48 = vpack.c.bf16 %v13206_v39, %v13205_v38  ;;  %v13207_v54 = vld [vmem:[%s21068_s7 + $0x60] sm:$0xff]  ;;  %v13208_v55 = vld [vmem:[%s21068_s7 + $0x68] sm:$0xff]  ;;  %v13209_v57 = vld [vmem:[%s21068_s7 + $0x78] sm:$0xff] }
 0x879   :  { %14760 = vmatprep.mubr.msk.bf16.mxu1 %vm928_vm7, %v1604_v52  ;;  %v17222_v42 = vpop.f32.mrf.mxu0  ;;  %15032 = vmatprep.subr.bf16.mxu0 %v5105_v51  ;;  %v2938_v62 = vpack.c.bf16 %v13208_v55, %v13207_v54  ;;  %v13217_v39 = vld [vmem:[%s21068_s7 + $0xd8] sm:$0xff]  ;;  %v13219_v54 = vld [vmem:[%s21068_s7 + $0xf0] sm:$0xff] }
 0x87a   :  { %1445 = vst.msk [vmem:[#allocation2 + $0x1e8] sm:$0xff] %vm701_vm8, %v1381_v59  ;;  %14935 = vmatmul.mubr.msk.bf16.gmra.mxu0 %vm928_vm7, %v3631_v56  ;;  %v13220_v55 = vld [vmem:[%s21068_s7 + $0xf8] sm:$0xff] }
 0x87b   :  { %v17232_v1 = vpop.f32.mrf.mxu0  ;;  %14938 = vmatprep.mubr.msk.bf16.mxu0 %vm928_vm7, %v3632_v58  ;;  %v13210_v58 = vld [vmem:[%s21068_s7 + $0x80] sm:$0xff]  ;;  %15033 = vmatpush3.bf16.msra.mxu0 %v5105_v51 }
 0x87c   :  { %v2939_v3 = vpack.c.bf16 %v13210_v58, %v13209_v57  ;;  %v13221_v58 = vld [vmem:[%s21068_s7 + $0x108] sm:$0xff] }
 0x87d   :  { %v17247_v9 = vpop.f32.mrf.mxu0 }
 0x87f   :  { %v17249_v11 = vpop.f32.mrf.mxu0 }
 0x880   :  { %14761 = vmatmul.mubr.msk.bf16.gmra.mxu1 %vm928_vm7, %v1605_v4 }
 0x881   :  { %14764 = vmatprep.mubr.msk.bf16.mxu1 %vm928_vm7, %v1606_v8  ;;  %v17259_v17 = vpop.f32.mrf.mxu0  ;;  %v3640_v8 = vpack.c.bf16 %v13351_v2, %v13350_v63  ;;  %v13361_v63 = vld [vmem:[%s21068_s7 + $0x339] sm:$0xff]  ;;  %v2944_v2 = vpack.c.bf16 %v13220_v55, %v13219_v54  ;;  %v13230_v54 = vld [vmem:[%s21068_s7 + $0x170] sm:$0xff] }
 0x882   :  { %14939 = vmatmul.mubr.msk.bf16.gmra.mxu0 %vm928_vm7, %v3633_v10  ;;  %v13211_v10 = vld [vmem:[%s21068_s7 + $0x90] sm:$0xff] }
 0x883   :  { %v17268_v20 = vpop.f32.mrf.mxu0  ;;  %14942 = vmatprep.mubr.msk.bf16.mxu0 %vm928_vm7, %v3634_v12  ;;  %v13212_v12 = vld [vmem:[%s21068_s7 + $0x98] sm:$0xff] }
 0x885   :  { %v17283_v29 = vpop.f32.mrf.mxu0 }
 0x887   :  { %v17285_v0 = vpop.f32.mrf.mxu0 }
 0x888   :  { %14765 = vmatmul.mubr.msk.bf16.gmra.mxu1 %vm928_vm7, %v1607_v23  ;;  %v2940_v23 = vpack.c.bf16 %v13212_v12, %v13211_v10 }
 0x889   :  { %14836 = vmatprep.mubr.msk.bf16.mxu1 %vm928_vm7, %v2935_v27  ;;  %v17298_v35 = vpop.f32.mrf.mxu0  ;;  %v2941_v27 = vpack.c.bf16 %v13214_v18, %v13213_v16 }
 0x88a   :  { %14943 = vmatmul.mubr.msk.bf16.gmra.mxu0 %vm928_vm7, %v3635_v25 }
 0x88b   :  { %v17308_v41 = vpop.f32.mrf.mxu0  ;;  %14946 = vmatprep.mubr.msk.bf16.mxu0 %vm928_vm7, %v3636_v30  ;;  %v3641_v30 = vpack.c.bf16 %v13353_v22, %v13352_v21  ;;  %v13223_v21 = vld [vmem:[%s21068_s7 + $0x120] sm:$0xff]  ;;  %v13224_v22 = vld [vmem:[%s21068_s7 + $0x128] sm:$0xff] }
 0x88d   :  { %v17326_v49 = vpop.f32.mrf.mxu0 }
 0x88f   :  { %v17329_v52 = vpop.f32.mrf.mxu0 }
 0x890   :  { %14837 = vmatmul.mubr.msk.bf16.vlgmr.msra.gmra.mxu1 %vm928_vm7, %v2936_v45  ;;  %v2942_v45 = vpack.c.bf16 %v13216_v34, %v13215_v33  ;;  %v2946_v33 = vpack.c.bf16 %v13224_v22, %v13223_v21  ;;  %v13496_v34 = vld [vmem:[%s21068_s7 + $0x60] sm:$0xff]  ;;  %v13232_v22 = vld [vmem:[%s21068_s7 + $0x188] sm:$0xff] }
 0x891   :  { %14840 = vmatprep.mubr.msk.bf16.mxu1 %vm928_vm7, %v2937_v48  ;;  %v17339_v56 = vpop.f32.mrf.mxu0  ;;  %14967 = vmatpush3.bf16.msra.mxu1 %v4425_v40  ;;  %v13218_v40 = vld [vmem:[%s21068_s7 + $0xe0] sm:$0xff] }
 0x892   :  { %14947 = vmatmul.mubr.msk.bf16.gmra.mxu0 %vm928_vm7, %v3637_v50  ;;  %v2943_v47 = vpack.c.bf16 %v13218_v40, %v13217_v39  ;;  %v3643_v50 = vpack.c.bf16 %v13357_v36, %v13356_v44  ;;  %v13497_v39 = vld [vmem:[%s21068_s7 + $0x68] sm:$0xff]  ;;  %v2947_v40 = vpack.c.bf16 %v13226_v26, %v13225_v24  ;;  %v13231_v21 = vld [vmem:[%s21068_s7 + $0x180] sm:$0xff] }
 0x893   :  { %v17348_v59 = vpop.f32.mrf.mxu0  ;;  %14950 = vmatprep.mubr.msk.bf16.mxu0 %vm928_vm7, %v3638_v53  ;;  %v3644_v53 = vpack.c.bf16 %v13359_v37, %v13358_v46  ;;  %v4975_v46 = vpack.c.bf16 %v13497_v39, %v13496_v34  ;;  %v13227_v37 = vld [vmem:[%s21068_s7 + $0x150] sm:$0xff]  ;;  %v13233_v26 = vld [vmem:[%s21068_s7 + $0x1c8] sm:$0xff]  ;;  %v2950_v39 = vpack.c.bf16 %v13232_v22, %v13231_v21  ;;  %v13507_v21 = vld [vmem:[%s21068_s7 + $0xe0] sm:$0xff] }
 0x894   :  { %v13503_v34 = vld [vmem:[%s21068_s7 + $0xb0] sm:$0xff] }
 0x895   :  { %v17363_v4 = vpop.f32.mrf.mxu0 }
 0x897   :  { %v17365_v7 = vpop.f32.mrf.mxu0 }
 0x898   :  { %14841 = vmatmul.mubr.msk.bf16.gmra.mxu1 %vm928_vm7, %v2938_v62  ;;  %v13360_v62 = vld [vmem:[%s21068_s7 + $0x331] sm:$0xff] }
 0x899   :  { %14844 = vmatprep.mubr.msk.bf16.mxu1 %vm928_vm7, %v2939_v3  ;;  %v17375_v13 = vpop.f32.mrf.mxu0  ;;  %v13492_v3 = vld [vmem:[%s21068_s7 + $0x30] sm:$0xff]  ;;  %v3645_v12 = vpack.c.bf16 %v13361_v63, %v13360_v62 }
 0x89a   :  { %14951 = vmatmul.mubr.msk.bf16.gmra.mxu0 %vm928_vm7, %v3639_v5  ;;  %v13493_v5 = vld [vmem:[%s21068_s7 + $0x38] sm:$0xff]  ;;  %v13500_v63 = vld [vmem:[%s21068_s7 + $0x90] sm:$0xff] }
 0x89b   :  { %v17384_v19 = vpop.f32.mrf.mxu0  ;;  %14954 = vmatprep.mubr.msk.bf16.mxu0 %vm928_vm7, %v3640_v8  ;;  %v2945_v8 = vpack.c.bf16 %v13222_v60, %v13221_v58  ;;  %v4973_v18 = vpack.c.bf16 %v13493_v5, %v13492_v3  ;;  %v13498_v58 = vld [vmem:[%s21068_s7 + $0x78] sm:$0xff]  ;;  %v13499_v60 = vld [vmem:[%s21068_s7 + $0x80] sm:$0xff] }
 0x89d   :  { %v17399_v25 = vpop.f32.mrf.mxu0 }
 0x89f   :  { %v17401_v31 = vpop.f32.mrf.mxu0 }
 0x8a0   :  { %14845 = vmatmul.mubr.msk.bf16.gmra.mxu1 %vm928_vm7, %v2940_v23 }
 0x8a1   :  { %14848 = vmatprep.mubr.msk.bf16.mxu1 %vm928_vm7, %v2941_v27  ;;  %v17411_v38 = vpop.f32.mrf.mxu0 }
 0x8a2   :  { %14955 = vmatmul.mubr.msk.bf16.gmra.mxu0 %vm928_vm7, %v3641_v30  ;;  %v13494_v30 = vld [vmem:[%s21068_s7 + $0x48] sm:$0xff] }
 0x8a3   :  { %v17420_v43 = vpop.f32.mrf.mxu0  ;;  %14958 = vmatprep.mubr.msk.bf16.mxu0 %vm928_vm7, %v3642_v32  ;;  %v13495_v32 = vld [vmem:[%s21068_s7 + $0x50] sm:$0xff] }
 0x8a4   :  { %v4974_v36 = vpack.c.bf16 %v13495_v32, %v13494_v30  ;;  %v13234_v30 = vld [vmem:[%s21068_s7 + $0x1d0] sm:$0xff] }
 0x8a5   :  { %v17435_v48 = vpop.f32.mrf.mxu0 }
 0x8a7   :  { %v17437_v51 = vpop.f32.mrf.mxu0 }
 0x8a8   :  { %14849 = vmatmul.mubr.msk.bf16.gmra.mxu1 %vm928_vm7, %v2942_v45 }
 0x8a9   :  { %14852 = vmatprep.mubr.msk.bf16.mxu1 %vm928_vm7, %v2943_v47  ;;  %v17447_v57 = vpop.f32.mrf.mxu0  ;;  %v13228_v47 = vld [vmem:[%s21068_s7 + $0x158] sm:$0xff] }
 0x8aa   :  { %14959 = vmatmul.mubr.msk.bf16.gmra.mxu0 %vm928_vm7, %v3643_v50  ;;  %v2948_v62 = vpack.c.bf16 %v13228_v47, %v13227_v37 }
 0x8ab   :  { %v17456_v61 = vpop.f32.mrf.mxu0  ;;  %14962 = vmatprep.mubr.msk.bf16.mxu0 %vm928_vm7, %v3644_v53  ;;  %v13229_v53 = vld [vmem:[%s21068_s7 + $0x168] sm:$0xff] }
 0x8ac   :  { %v2949_v3 = vpack.c.bf16 %v13230_v54, %v13229_v53 }
 0x8ad   :  { %v17471_v10 = vpop.f32.mrf.mxu0 }
 0x8af   :  { %v17473_v16 = vpop.f32.mrf.mxu0 }
 0x8b0   :  { %14853 = vmatmul.mubr.msk.bf16.gmra.mxu1 %vm928_vm7, %v2944_v2  ;;  %v13501_v2 = vld [vmem:[%s21068_s7 + $0x98] sm:$0xff] }
 0x8b1   :  { %14856 = vmatprep.mubr.msk.bf16.mxu1 %vm928_vm7, %v2945_v8  ;;  %v17483_v23 = vpop.f32.mrf.mxu0  ;;  %v4976_v8 = vpack.c.bf16 %v13499_v60, %v13498_v58  ;;  %v13235_v60 = vld [vmem:[%s21068_s7 + $0x1e0] sm:$0xff] }
 0x8b2   :  { %14963 = vmatmul.mubr.msk.bf16.gmra.mxu0 %vm928_vm7, %v3645_v12 }
 0x8b3   :  { %v17492_v27 = vpop.f32.mrf.mxu0  ;;  %15034 = vmatprep.mubr.msk.bf16.mxu0 %vm928_vm7, %v4973_v18  ;;  %v4977_v18 = vpack.c.bf16 %v13501_v2, %v13500_v63  ;;  %v13237_v2 = vld [vmem:[%s21068_s7 + $0x1f8] sm:$0xff] }
 0x8b5   :  { %v17507_v44 = vpop.f32.mrf.mxu0 }
 0x8b7   :  { %v17509_v45 = vpop.f32.mrf.mxu0 }
 0x8b8   :  { %14857 = vmatmul.mubr.msk.bf16.gmra.mxu1 %vm928_vm7, %v2946_v33  ;;  %v13502_v33 = vld [vmem:[%s21068_s7 + $0xa8] sm:$0xff] }
 0x8b9   :  { %14860 = vmatprep.mubr.msk.bf16.mxu1 %vm928_vm7, %v2947_v40  ;;  %v17519_v50 = vpop.f32.mrf.mxu0  ;;  %v13504_v40 = vld [vmem:[%s21068_s7 + $0xc0] sm:$0xff]  ;;  %v4978_v47 = vpack.c.bf16 %v13503_v34, %v13502_v33  ;;  %v13508_v33 = vld [vmem:[%s21068_s7 + $0xf0] sm:$0xff]  ;;  %v13509_v34 = vld [vmem:[%s21068_s7 + $0xf8] sm:$0xff] }
 0x8ba   :  { %15035 = vmatmul.mubr.msk.bf16.vlgmr.msra.gmra.mxu0 %vm928_vm7, %v4974_v36  ;;  %v13505_v36 = vld [vmem:[%s21068_s7 + $0xc8] sm:$0xff] }
 0x8bb   :  { %v17528_v55 = vpop.f32.mrf.mxu0  ;;  %15038 = vmatprep.mubr.msk.bf16.mxu0 %vm928_vm7, %v4975_v46  ;;  %v2951_v46 = vpack.c.bf16 %v13234_v30, %v13233_v26  ;;  %v4979_v54 = vpack.c.bf16 %v13505_v36, %v13504_v40 }
 0x8bd   :  { %v17543_v5 = vpop.f32.mrf.mxu0 }
 0x8bf   :  { %v17545_v12 = vpop.f32.mrf.mxu0 }
 0x8c0   :  { %14861 = vmatmul.mubr.msk.bf16.gmra.mxu1 %vm928_vm7, %v2948_v62  ;;  %v13236_v62 = vld [vmem:[%s21068_s7 + $0x1e8] sm:$0xff] }
 0x8c1   :  { %14864 = vmatprep.mubr.msk.bf16.mxu1 %vm928_vm7, %v2949_v3  ;;  %v17555_v24 = vpop.f32.mrf.mxu0  ;;  %v13238_v3 = vld [vmem:[%s21068_s7 + $0x200] sm:$0xff]  ;;  %v2952_v26 = vpack.c.bf16 %v13236_v62, %v13235_v60 }
 0x8c2   :  { %15039 = vmatmul.mubr.msk.bf16.gmra.mxu0 %vm928_vm7, %v4976_v8 }
 0x8c3   :  { %v17564_v32 = vpop.f32.mrf.mxu0  ;;  %15042 = vmatprep.mubr.msk.bf16.mxu0 %vm928_vm7, %v4977_v18  ;;  %v13506_v18 = vld [vmem:[%s21068_s7 + $0xd8] sm:$0xff] }
 0x8c5   :  { %v17579_v37 = vpop.f32.mrf.mxu0 }
 0x8c7   :  { %v17581_v53 = vpop.f32.mrf.mxu0 }
 0x8c8   :  { %v17583_v58 = vpop.f32.mrf.mxu1  ;;  %14865 = vmatmul.mubr.msk.bf16.gmra.mxu1 %vm928_vm7, %v2950_v39  ;;  %v2953_v39 = vpack.c.bf16 %v13238_v3, %v13237_v2  ;;  %v13240_v2 = vld [vmem:[%s21068_s7 + $0x218] sm:$0xff]  ;;  %v1512_v3 = vld [vmem:[#allocation2] sm:$0xff] }
 0x8c9   :  { %21092 = vst [vmem:[#allocation9_spill] sm:$0xff] %v17583_v58  ;;  %14868 = vmatprep.mubr.msk.bf16.mxu1 %vm928_vm7, %v2951_v46  ;;  %v4980_v46 = vpack.c.bf16 %v13507_v21, %v13506_v18  ;;  %v13241_v21 = vld [vmem:[%s21068_s7 + $0x228] sm:$0xff] }
 0x8ca   :  { %v14634_v63 = vpop.f32.mrf.mxu1  ;;  %v17599_v8 = vpop.f32.mrf.mxu0  ;;  %15043 = vmatmul.mubr.msk.bf16.gmra.mxu0 %vm928_vm7, %v4978_v47  ;;  %v4981_v47 = vpack.c.bf16 %v13509_v34, %v13508_v33 }
 0x8cb   :  { %15046 = vmatprep.mubr.msk.bf16.mxu0 %vm928_vm7, %v4979_v54  ;;  %v1514_v54 = vld [vmem:[#allocation2 + $0x10] sm:$0xff] }
 0x8cc   :  { %v680_v22 = vpop.f32.mrf.mxu1  ;;  %v17609_v30 = vpop.f32.mrf.mxu0 }
 0x8cd   :  { %21093 = vst [vmem:[#allocation10_spill] sm:$0xff] %v17609_v30  ;;  %v13239_v22 = vld [vmem:[%s21068_s7 + $0x210] sm:$0xff] }
 0x8ce   :  { %v14635_v40 = vpop.f32.mrf.mxu1  ;;  %v17617_v36 = vpop.f32.mrf.mxu0  ;;  %v2954_v14 = vpack.c.bf16 %v13240_v2, %v13239_v22 }
 0x8cf   :  { %21094 = vst [vmem:[#allocation11_spill] sm:$0xff] %v17617_v36  ;;  %v13511_v40 = vld [vmem:[%s21068_s7 + $0x110] sm:$0xff] }
 0x8d0   :  { %v14706_v63 = vpop.f32.mrf.mxu1  ;;  %14869 = vmatmul.mubr.msk.bf16.gmra.mxu1 %vm928_vm7, %v2952_v26  ;;  %v17620_v60 = vpop.f32.mrf.mxu0  ;;  %v13242_v26 = vld [vmem:[%s21068_s7 + $0x230] sm:$0xff] }
 0x8d1   :  { %21095 = vst [vmem:[#allocation12_spill] sm:$0xff] %v17620_v60  ;;  %v2001_v62 = vadd.f32 %v14706_v63, %v1514_v54  ;;  %14872 = vmatprep.mubr.msk.bf16.mxu1 %vm928_vm7, %v2953_v39  ;;  %v13510_v39 = vld [vmem:[%s21068_s7 + $0x108] sm:$0xff]  ;;  %v1515_v54 = vld [vmem:[#allocation2 + $0x18] sm:$0xff] }
 0x8d2   :  { %v1744_v18 = vpop.f32.mrf.mxu1  ;;  %v17635_v33 = vpop.f32.mrf.mxu0  ;;  %15047 = vmatmul.mubr.msk.bf16.gmra.mxu0 %vm928_vm7, %v4980_v46  ;;  %v13512_v46 = vld [vmem:[%s21068_s7 + $0x120] sm:$0xff] }
 0x8d3   :  { %21096 = vst [vmem:[#allocation13_spill] sm:$0xff] %v17635_v33  ;;  %2065 = vst.msk [vmem:[#allocation2 + $0x10] sm:$0xff] %vm701_vm8, %v2001_v62  ;;  %v1999_v34 = vadd.f32 %v1744_v18, %v1512_v3  ;;  %15050 = vmatprep.mubr.msk.bf16.mxu0 %vm928_vm7, %v4981_v47  ;;  %v13513_v47 = vld [vmem:[%s21068_s7 + $0x128] sm:$0xff]  ;;  %v2955_v3 = vpack.c.bf16 %v13242_v26, %v13241_v21  ;;  %v4982_v33 = vpack.c.bf16 %v13511_v40, %v13510_v39  ;;  %v13243_v21 = vld [vmem:[%s21068_s7 + $0x240] sm:$0xff] }
 0x8d4   :  { %v14707_v63 = vpop.f32.mrf.mxu1  ;;  %v17646_v6 = vpop.f32.mrf.mxu0  ;;  %v1513_v18 = vld [vmem:[#allocation2 + $0x8] sm:$0xff]  ;;  %v4983_v2 = vpack.c.bf16 %v13513_v47, %v13512_v46  ;;  %v1519_v46 = vld [vmem:[#allocation2 + $0x38] sm:$0xff] }
 0x8d5   :  { %21097 = vst [vmem:[#allocation14_spill] sm:$0xff] %v17646_v6  ;;  %2063 = vst.msk [vmem:[#allocation2] sm:$0xff] %vm701_vm8, %v1999_v34  ;;  %v2002_v62 = vadd.f32 %v14707_v63, %v1515_v54  ;;  %v1518_v6 = vld [vmem:[#allocation2 + $0x30] sm:$0xff]  ;;  %v1516_v54 = vld [vmem:[#allocation2 + $0x20] sm:$0xff] }
 0x8d6   :  { %v1747_v58 = vpop.f32.mrf.mxu1  ;;  %v17655_v15 = vpop.f32.mrf.mxu0  ;;  %v13514_v47 = vld [vmem:[%s21068_s7 + $0x138] sm:$0xff] }
 0x8d7   :  { %21098 = vst [vmem:[#allocation15_spill] sm:$0xff] %v17655_v15  ;;  %2066 = vst.msk [vmem:[#allocation2 + $0x18] sm:$0xff] %vm701_vm8, %v2002_v62  ;;  %v2000_v22 = vadd.f32 %v1747_v58, %v1513_v18  ;;  %v13244_v58 = vld [vmem:[%s21068_s7 + $0x248] sm:$0xff]  ;;  %v13515_v62 = vld [vmem:[%s21068_s7 + $0x140] sm:$0xff] }
 0x8d8   :  { %v14710_v60 = vpop.f32.mrf.mxu1  ;;  %14873 = vmatmul.mubr.msk.bf16.gmra.mxu1 %vm928_vm7, %v2954_v14  ;;  %v17659_v36 = vpop.f32.mrf.mxu0  ;;  %v13245_v14 = vld [vmem:[%s21068_s7 + $0x258] sm:$0xff] }
 0x8d9   :  { %21099 = vst [vmem:[#allocation16_spill] sm:$0xff] %v17659_v36  ;;  %2064 = vst.msk [vmem:[#allocation2 + $0x8] sm:$0xff] %vm701_vm8, %v2000_v22  ;;  %v2005_v34 = vadd.f32 %v14710_v60, %v1518_v6  ;;  %14876 = vmatprep.mubr.msk.bf16.mxu1 %vm928_vm7, %v2955_v3  ;;  %v13246_v6 = vld [vmem:[%s21068_s7 + $0x260] sm:$0xff]  ;;  %v2956_v22 = vpack.c.bf16 %v13244_v58, %v13243_v21  ;;  %v1517_v21 = vld [vmem:[#allocation2 + $0x28] sm:$0xff] }
 0x8da   :  { %v2193_v26 = vld [vmem:[#allocation2 + $0x10] sm:$0xff]  ;;  %v1760_v39 = vpop.f32.mrf.mxu1  ;;  %v17675_v60 = vpop.f32.mrf.mxu0  ;;  %15051 = vmatmul.mubr.msk.bf16.gmra.mxu0 %vm928_vm7, %v4982_v33 }
 0x8db   :  { %21100 = vst [vmem:[#allocation17_spill] sm:$0xff] %v17675_v60  ;;  %v2680_v40 = vadd.f32 %v17222_v42, %v2193_v26  ;;  %2069 = vst.msk [vmem:[#allocation2 + $0x30] sm:$0xff] %vm701_vm8, %v2005_v34  ;;  %v2003_v63 = vadd.f32 %v1760_v39, %v1516_v54  ;;  %15054 = vmatprep.mubr.msk.bf16.mxu0 %vm928_vm7, %v4983_v2  ;;  %v13516_v42 = vld [vmem:[%s21068_s7 + $0x150] sm:$0xff]  ;;  %v13517_v2 = vld [vmem:[%s21068_s7 + $0x158] sm:$0xff]  ;;  %v2957_v26 = vpack.c.bf16 %v13246_v6, %v13245_v14 }
 0x8dc   :  { %v2191_v3 = vld [vmem:[#allocation2] sm:$0xff]  ;;  %v14711_v18 = vpop.f32.mrf.mxu1  ;;  %v17687_v33 = vpop.f32.mrf.mxu0  ;;  %v4984_v60 = vpack.c.bf16 %v13515_v62, %v13514_v47  ;;  %v13248_v47 = vld [vmem:[%s21068_s7 + $0x278] sm:$0xff] }
 0x8dd   :  { %21101 = vst [vmem:[#allocation18_spill] sm:$0xff] %v17687_v33  ;;  %2744 = vst.msk [vmem:[#allocation2 + $0x10] sm:$0xff] %vm701_vm8, %v2680_v40  ;;  %v2678_v34 = vadd.f32 %v17232_v1, %v2191_v3  ;;  %v2006_v54 = vadd.f32 %v14711_v18, %v1519_v46  ;;  %v4985_v40 = vpack.c.bf16 %v13517_v2, %v13516_v42  ;;  %v1522_v1 = vld [vmem:[#allocation2 + $0x50] sm:$0xff]  ;;  %v1520_v46 = vld [vmem:[#allocation2 + $0x40] sm:$0xff] }
 0x8de   :  { %2067 = vst.msk [vmem:[#allocation2 + $0x20] sm:$0xff] %vm701_vm8, %v2003_v63  ;;  %v2194_v39 = vld [vmem:[#allocation2 + $0x18] sm:$0xff]  ;;  %v1763_v58 = vpop.f32.mrf.mxu1  ;;  %v17698_v33 = vpop.f32.mrf.mxu0  ;;  %v13518_v2 = vld [vmem:[%s21068_s7 + $0x168] sm:$0xff] }
 0x8df   :  { %2742 = vst.msk [vmem:[#allocation2] sm:$0xff] %vm701_vm8, %v2678_v34  ;;  %v2681_v36 = vadd.f32 %v17247_v9, %v2194_v39  ;;  %2070 = vst.msk [vmem:[#allocation2 + $0x38] sm:$0xff] %vm701_vm8, %v2006_v54  ;;  %v2004_v15 = vadd.f32 %v1763_v58, %v1517_v21  ;;  %v13247_v9 = vld [vmem:[%s21068_s7 + $0x270] sm:$0xff]  ;;  %v1523_v42 = vld [vmem:[#allocation2 + $0x58] sm:$0xff] }
 0x8e0   :  { %v2192_v30 = vld [vmem:[#allocation2 + $0x8] sm:$0xff]  ;;  %v14714_v3 = vpop.f32.mrf.mxu1  ;;  %14877 = vmatmul.mubr.msk.bf16.gmra.mxu1 %vm928_vm7, %v2956_v22  ;;  %v17704_v14 = vpop.f32.mrf.mxu0  ;;  %v13519_v34 = vld [vmem:[%s21068_s7 + $0x170] sm:$0xff] }
 0x8e1   :  { %2745 = vst.msk [vmem:[#allocation2 + $0x18] sm:$0xff] %vm701_vm8, %v2681_v36  ;;  %v2679_v6 = vadd.f32 %v17249_v11, %v2192_v30  ;;  %2068 = vst.msk [vmem:[#allocation2 + $0x28] sm:$0xff] %vm701_vm8, %v2004_v15  ;;  %v2009_v63 = vadd.f32 %v14714_v3, %v1522_v1  ;;  %14880 = vmatprep.mubr.msk.bf16.mxu1 %vm928_vm7, %v2957_v26  ;;  %v13249_v11 = vld [vmem:[%s21068_s7 + $0x288] sm:$0xff]  ;;  %v13250_v15 = vld [vmem:[%s21068_s7 + $0x290] sm:$0xff]  ;;  %v2958_v26 = vpack.c.bf16 %v13248_v47, %v13247_v9 }
 0x8e2   :  { %v2197_v62 = vld [vmem:[#allocation2 + $0x30] sm:$0xff]  ;;  %v1776_v18 = vpop.f32.mrf.mxu1  ;;  %v17722_v30 = vpop.f32.mrf.mxu0  ;;  %15055 = vmatmul.mubr.msk.bf16.gmra.mxu0 %vm928_vm7, %v4984_v60  ;;  %v13521_v21 = vld [vmem:[%s21068_s7 + $0x188] sm:$0xff]  ;;  %v2959_v1 = vpack.c.bf16 %v13250_v15, %v13249_v11  ;;  %v4986_v9 = vpack.c.bf16 %v13519_v34, %v13518_v2 }
 0x8e3   :  { %2743 = vst.msk [vmem:[#allocation2 + $0x8] sm:$0xff] %vm701_vm8, %v2679_v6  ;;  %v2684_v36 = vadd.f32 %v17259_v17, %v2197_v62  ;;  %2073 = vst.msk [vmem:[#allocation2 + $0x50] sm:$0xff] %vm701_vm8, %v2009_v63  ;;  %v2007_v22 = vadd.f32 %v1776_v18, %v1520_v46  ;;  %15058 = vmatprep.mubr.msk.bf16.mxu0 %vm928_vm7, %v4985_v40  ;;  %v13520_v17 = vld [vmem:[%s21068_s7 + $0x180] sm:$0xff]  ;;  %v1521_v6 = vld [vmem:[#allocation2 + $0x48] sm:$0xff] }
 0x8e4   :  { %v14715_v60 = vpop.f32.mrf.mxu1  ;;  %v17735_v39 = vpop.f32.mrf.mxu0  ;;  %v4987_v18 = vpack.c.bf16 %v13521_v21, %v13520_v17  ;;  %v13252_v2 = vld [vmem:[%s21068_s7 + $0x2a8] sm:$0xff] }
 0x8e5   :  { %v2195_v54 = vld [vmem:[#allocation2 + $0x20] sm:$0xff]  ;;  %2748 = vst.msk [vmem:[#allocation2 + $0x30] sm:$0xff] %vm701_vm8, %v2684_v36  ;;  %2071 = vst.msk [vmem:[#allocation2 + $0x40] sm:$0xff] %vm701_vm8, %v2007_v22  ;;  %v2010_v40 = vadd.f32 %v14715_v60, %v1523_v42 }
 0x8e6   :  { %v2682_v58 = vadd.f32 %v17268_v20, %v2195_v54  ;;  %v2198_v3 = vld [vmem:[#allocation2 + $0x38] sm:$0xff]  ;;  %v1779_v63 = vpop.f32.mrf.mxu1  ;;  %v17746_v46 = vpop.f32.mrf.mxu0  ;;  %v1526_v20 = vld [vmem:[#allocation2 + $0x70] sm:$0xff]  ;;  %v1524_v42 = vld [vmem:[#allocation2 + $0x60] sm:$0xff] }
 0x8e7   :  { %v2685_v47 = vadd.f32 %v17283_v29, %v2198_v3  ;;  %2074 = vst.msk [vmem:[#allocation2 + $0x58] sm:$0xff] %vm701_vm8, %v2010_v40  ;;  %v2008_v62 = vadd.f32 %v1779_v63, %v1521_v6  ;;  %v13251_v29 = vld [vmem:[%s21068_s7 + $0x2a0] sm:$0xff]  ;;  %v1527_v40 = vld [vmem:[#allocation2 + $0x78] sm:$0xff] }
 0x8e8   :  { %2746 = vst.msk [vmem:[#allocation2 + $0x20] sm:$0xff] %vm701_vm8, %v2682_v58  ;;  %v2196_v36 = vld [vmem:[#allocation2 + $0x28] sm:$0xff]  ;;  %v14718_v54 = vpop.f32.mrf.mxu1  ;;  %14881 = vmatmul.mubr.msk.bf16.gmra.mxu1 %vm928_vm7, %v2958_v26  ;;  %v17752_v11 = vpop.f32.mrf.mxu0  ;;  %v13254_v26 = vld [vmem:[%s21068_s7 + $0x2c0] sm:$0xff] }
 0x8e9   :  { %2749 = vst.msk [vmem:[#allocation2 + $0x38] sm:$0xff] %vm701_vm8, %v2685_v47  ;;  %v2683_v15 = vadd.f32 %v17285_v0, %v2196_v36  ;;  %2072 = vst.msk [vmem:[#allocation2 + $0x48] sm:$0xff] %vm701_vm8, %v2008_v62  ;;  %v2013_v22 = vadd.f32 %v14718_v54, %v1526_v20  ;;  %14884 = vmatprep.mubr.msk.bf16.mxu1 %vm928_vm7, %v2959_v1  ;;  %v13253_v0 = vld [vmem:[%s21068_s7 + $0x2b8] sm:$0xff]  ;;  %v13523_v3 = vld [vmem:[%s21068_s7 + $0x1a0] sm:$0xff] }
 0x8ea   :  { %v2201_v34 = vld [vmem:[#allocation2 + $0x50] sm:$0xff]  ;;  %v1792_v60 = vpop.f32.mrf.mxu1  ;;  %v17770_v17 = vpop.f32.mrf.mxu0  ;;  %15059 = vmatmul.mubr.msk.bf16.gmra.mxu0 %vm928_vm7, %v4986_v9  ;;  %v13522_v1 = vld [vmem:[%s21068_s7 + $0x198] sm:$0xff]  ;;  %v2960_v9 = vpack.c.bf16 %v13252_v2, %v13251_v29  ;;  %v13525_v62 = vld [vmem:[%s21068_s7 + $0x1e8] sm:$0xff]  ;;  %v2961_v20 = vpack.c.bf16 %v13254_v26, %v13253_v0 }
 0x8eb   :  { %2747 = vst.msk [vmem:[#allocation2 + $0x28] sm:$0xff] %vm701_vm8, %v2683_v15  ;;  %v2688_v21 = vadd.f32 %v17298_v35, %v2201_v34  ;;  %2077 = vst.msk [vmem:[#allocation2 + $0x70] sm:$0xff] %vm701_vm8, %v2013_v22  ;;  %v2011_v58 = vadd.f32 %v1792_v60, %v1524_v42  ;;  %15062 = vmatprep.mubr.msk.bf16.mxu0 %vm928_vm7, %v4987_v18  ;;  %v13524_v35 = vld [vmem:[%s21068_s7 + $0x1e0] sm:$0xff]  ;;  %v1525_v15 = vld [vmem:[#allocation2 + $0x68] sm:$0xff]  ;;  %v4988_v29 = vpack.c.bf16 %v13523_v3, %v13522_v1 }
 0x8ec   :  { %v2199_v6 = vld [vmem:[#allocation2 + $0x40] sm:$0xff]  ;;  %v14719_v63 = vpop.f32.mrf.mxu1  ;;  %v17783_v47 = vpop.f32.mrf.mxu0  ;;  %v4989_v60 = vpack.c.bf16 %v13525_v62, %v13524_v35  ;;  %v13256_v1 = vld [vmem:[%s21068_s7 + $0x2d8] sm:$0xff] }
 0x8ed   :  { %2752 = vst.msk [vmem:[#allocation2 + $0x50] sm:$0xff] %vm701_vm8, %v2688_v21  ;;  %v2686_v18 = vadd.f32 %v17308_v41, %v2199_v6  ;;  %2075 = vst.msk [vmem:[#allocation2 + $0x60] sm:$0xff] %vm701_vm8, %v2011_v58  ;;  %v2014_v36 = vadd.f32 %v14719_v63, %v1527_v40  ;;  %v1530_v41 = vld [vmem:[#allocation2 + $0x90] sm:$0xff]  ;;  %v1528_v40 = vld [vmem:[#allocation2 + $0x80] sm:$0xff] }
 0x8ee   :  { %v2202_v54 = vld [vmem:[#allocation2 + $0x58] sm:$0xff]  ;;  %v1795_v22 = vpop.f32.mrf.mxu1  ;;  %v17794_v42 = vpop.f32.mrf.mxu0 }
 0x8ef   :  { %2750 = vst.msk [vmem:[#allocation2 + $0x40] sm:$0xff] %vm701_vm8, %v2686_v18  ;;  %v2689_v2 = vadd.f32 %v17326_v49, %v2202_v54  ;;  %2078 = vst.msk [vmem:[#allocation2 + $0x78] sm:$0xff] %vm701_vm8, %v2014_v36  ;;  %v2012_v34 = vadd.f32 %v1795_v22, %v1525_v15  ;;  %v13255_v49 = vld [vmem:[%s21068_s7 + $0x2d0] sm:$0xff]  ;;  %v1531_v36 = vld [vmem:[#allocation2 + $0x98] sm:$0xff] }
 0x8f0   :  { %v2200_v21 = vld [vmem:[#allocation2 + $0x48] sm:$0xff]  ;;  %v14722_v6 = vpop.f32.mrf.mxu1  ;;  %14885 = vmatmul.mubr.msk.bf16.gmra.mxu1 %vm928_vm7, %v2960_v9  ;;  %v17800_v0 = vpop.f32.mrf.mxu0  ;;  %v13258_v9 = vld [vmem:[%s21068_s7 + $0x2f0] sm:$0xff]  ;;  %v13527_v54 = vld [vmem:[%s21068_s7 + $0x200] sm:$0xff] }
 0x8f1   :  { %2753 = vst.msk [vmem:[#allocation2 + $0x58] sm:$0xff] %vm701_vm8, %v2689_v2  ;;  %v2687_v26 = vadd.f32 %v17329_v52, %v2200_v21  ;;  %2076 = vst.msk [vmem:[#allocation2 + $0x68] sm:$0xff] %vm701_vm8, %v2012_v34  ;;  %v2017_v58 = vadd.f32 %v14722_v6, %v1530_v41  ;;  %14888 = vmatprep.mubr.msk.bf16.mxu1 %vm928_vm7, %v2961_v20  ;;  %v13257_v52 = vld [vmem:[%s21068_s7 + $0x2e8] sm:$0xff]  ;;  %v13526_v20 = vld [vmem:[%s21068_s7 + $0x1f8] sm:$0xff] }
 0x8f2   :  { %v2205_v3 = vld [vmem:[#allocation2 + $0x70] sm:$0xff]  ;;  %v1808_v63 = vpop.f32.mrf.mxu1  ;;  %v17818_v35 = vpop.f32.mrf.mxu0  ;;  %15063 = vmatmul.mubr.msk.bf16.gmra.mxu0 %vm928_vm7, %v4988_v29  ;;  %v2962_v29 = vpack.c.bf16 %v13256_v1, %v13255_v49  ;;  %v13529_v34 = vld [vmem:[%s21068_s7 + $0x218] sm:$0xff]  ;;  %v2963_v41 = vpack.c.bf16 %v13258_v9, %v13257_v52  ;;  %v4990_v49 = vpack.c.bf16 %v13527_v54, %v13526_v20  ;;  %v13260_v20 = vld [vmem:[%s21068_s7 + $0x308] sm:$0xff] }
 0x8f3   :  { %2751 = vst.msk [vmem:[#allocation2 + $0x48] sm:$0xff] %vm701_vm8, %v2687_v26  ;;  %v2692_v62 = vadd.f32 %v17339_v56, %v2205_v3  ;;  %2081 = vst.msk [vmem:[#allocation2 + $0x90] sm:$0xff] %vm701_vm8, %v2017_v58  ;;  %v2015_v18 = vadd.f32 %v1808_v63, %v1528_v40  ;;  %15066 = vmatprep.mubr.msk.bf16.mxu0 %vm928_vm7, %v4989_v60  ;;  %v13528_v56 = vld [vmem:[%s21068_s7 + $0x210] sm:$0xff]  ;;  %v1529_v26 = vld [vmem:[#allocation2 + $0x88] sm:$0xff] }
 0x8f4   :  { %v2203_v15 = vld [vmem:[#allocation2 + $0x60] sm:$0xff]  ;;  %v14723_v22 = vpop.f32.mrf.mxu1  ;;  %v17831_v2 = vpop.f32.mrf.mxu0  ;;  %v4991_v63 = vpack.c.bf16 %v13529_v34, %v13528_v56 }
 0x8f5   :  { %2756 = vst.msk [vmem:[#allocation2 + $0x70] sm:$0xff] %vm701_vm8, %v2692_v62  ;;  %v2690_v60 = vadd.f32 %v17348_v59, %v2203_v15  ;;  %2079 = vst.msk [vmem:[#allocation2 + $0x80] sm:$0xff] %vm701_vm8, %v2015_v18  ;;  %v2018_v21 = vadd.f32 %v14723_v22, %v1531_v36  ;;  %v1534_v59 = vld [vmem:[#allocation2 + $0xb0] sm:$0xff]  ;;  %v1532_v36 = vld [vmem:[#allocation2 + $0xa0] sm:$0xff] }
 0x8f6   :  { %v2206_v6 = vld [vmem:[#allocation2 + $0x78] sm:$0xff]  ;;  %v1811_v58 = vpop.f32.mrf.mxu1  ;;  %v17842_v40 = vpop.f32.mrf.mxu0 }
 0x8f7   :  { %2754 = vst.msk [vmem:[#allocation2 + $0x60] sm:$0xff] %vm701_vm8, %v2690_v60  ;;  %v2693_v1 = vadd.f32 %v17363_v4, %v2206_v6  ;;  %2082 = vst.msk [vmem:[#allocation2 + $0x98] sm:$0xff] %vm701_vm8, %v2018_v21  ;;  %v2016_v3 = vadd.f32 %v1811_v58, %v1529_v26  ;;  %v13259_v4 = vld [vmem:[%s21068_s7 + $0x300] sm:$0xff]  ;;  %v1535_v21 = vld [vmem:[#allocation2 + $0xb8] sm:$0xff] }
 0x8f8   :  { %v2204_v62 = vld [vmem:[#allocation2 + $0x68] sm:$0xff]  ;;  %v14726_v15 = vpop.f32.mrf.mxu1  ;;  %14889 = vmatmul.mubr.msk.bf16.gmra.mxu1 %vm928_vm7, %v2962_v29  ;;  %v17848_v52 = vpop.f32.mrf.mxu0  ;;  %v13262_v29 = vld [vmem:[%s21068_s7 + $0x320] sm:$0xff]  ;;  %v13531_v6 = vld [vmem:[%s21068_s7 + $0x230] sm:$0xff] }
 0x8f9   :  { %2757 = vst.msk [vmem:[#allocation2 + $0x78] sm:$0xff] %vm701_vm8, %v2693_v1  ;;  %v2691_v9 = vadd.f32 %v17365_v7, %v2204_v62  ;;  %2080 = vst.msk [vmem:[#allocation2 + $0x88] sm:$0xff] %vm701_vm8, %v2016_v3  ;;  %v2021_v18 = vadd.f32 %v14726_v15, %v1534_v59  ;;  %14892 = vmatprep.mubr.msk.bf16.mxu1 %vm928_vm7, %v2963_v41  ;;  %v13261_v7 = vld [vmem:[%s21068_s7 + $0x318] sm:$0xff]  ;;  %v13530_v41 = vld [vmem:[%s21068_s7 + $0x228] sm:$0xff] }
 0x8fa   :  { %v2209_v54 = vld [vmem:[#allocation2 + $0x90] sm:$0xff]  ;;  %v1824_v22 = vpop.f32.mrf.mxu1  ;;  %v17866_v56 = vpop.f32.mrf.mxu0  ;;  %15067 = vmatmul.mubr.msk.bf16.gmra.mxu0 %vm928_vm7, %v4990_v49  ;;  %v2964_v49 = vpack.c.bf16 %v13260_v20, %v13259_v4  ;;  %v13533_v3 = vld [vmem:[%s21068_s7 + $0x248] sm:$0xff]  ;;  %v2965_v59 = vpack.c.bf16 %v13262_v29, %v13261_v7  ;;  %v4992_v4 = vpack.c.bf16 %v13531_v6, %v13530_v41  ;;  %v13264_v41 = vld [vmem:[%s21068_s7 + $0x338] sm:$0xff] }
 0x8fb   :  { %2755 = vst.msk [vmem:[#allocation2 + $0x68] sm:$0xff] %vm701_vm8, %v2691_v9  ;;  %v2696_v34 = vadd.f32 %v17375_v13, %v2209_v54  ;;  %2085 = vst.msk [vmem:[#allocation2 + $0xb0] sm:$0xff] %vm701_vm8, %v2021_v18  ;;  %v2019_v60 = vadd.f32 %v1824_v22, %v1532_v36  ;;  %15070 = vmatprep.mubr.msk.bf16.mxu0 %vm928_vm7, %v4991_v63  ;;  %v13532_v13 = vld [vmem:[%s21068_s7 + $0x240] sm:$0xff]  ;;  %v1533_v9 = vld [vmem:[#allocation2 + $0xa8] sm:$0xff] }
 0x8fc   :  { %v2207_v26 = vld [vmem:[#allocation2 + $0x80] sm:$0xff]  ;;  %v14727_v58 = vpop.f32.mrf.mxu1  ;;  %v17879_v1 = vpop.f32.mrf.mxu0  ;;  %v4993_v22 = vpack.c.bf16 %v13533_v3, %v13532_v13 }
 0x8fd   :  { %2760 = vst.msk [vmem:[#allocation2 + $0x90] sm:$0xff] %vm701_vm8, %v2696_v34  ;;  %v2694_v63 = vadd.f32 %v17384_v19, %v2207_v26  ;;  %2083 = vst.msk [vmem:[#allocation2 + $0xa0] sm:$0xff] %vm701_vm8, %v2019_v60  ;;  %v2022_v62 = vadd.f32 %v14727_v58, %v1535_v21  ;;  %v1538_v19 = vld [vmem:[#allocation2 + $0xd0] sm:$0xff]  ;;  %v1536_v21 = vld [vmem:[#allocation2 + $0xc0] sm:$0xff] }
 0x8fe   :  { %v2210_v15 = vld [vmem:[#allocation2 + $0x98] sm:$0xff]  ;;  %v1827_v18 = vpop.f32.mrf.mxu1  ;;  %v17890_v36 = vpop.f32.mrf.mxu0 }
 0x8ff   :  { %2758 = vst.msk [vmem:[#allocation2 + $0x80] sm:$0xff] %vm701_vm8, %v2694_v63  ;;  %v2697_v20 = vadd.f32 %v17399_v25, %v2210_v15  ;;  %2086 = vst.msk [vmem:[#allocation2 + $0xb8] sm:$0xff] %vm701_vm8, %v2022_v62  ;;  %v2020_v54 = vadd.f32 %v1827_v18, %v1533_v9  ;;  %v13263_v25 = vld [vmem:[%s21068_s7 + $0x330] sm:$0xff]  ;;  %v1539_v62 = vld [vmem:[#allocation2 + $0xd8] sm:$0xff] }
 0x900   :  { %v2208_v34 = vld [vmem:[#allocation2 + $0x88] sm:$0xff]  ;;  %v14730_v26 = vpop.f32.mrf.mxu1  ;;  %14893 = vmatmul.mubr.msk.bf16.gmra.mxu1 %vm928_vm7, %v2964_v49  ;;  %v17896_v7 = vpop.f32.mrf.mxu0  ;;  %v13535_v15 = vld [vmem:[%s21068_s7 + $0x260] sm:$0xff] }
 0x901   :  { %2761 = vst.msk [vmem:[#allocation2 + $0x98] sm:$0xff] %vm701_vm8, %v2697_v20  ;;  %v2695_v29 = vadd.f32 %v17401_v31, %v2208_v34  ;;  %2084 = vst.msk [vmem:[#allocation2 + $0xa8] sm:$0xff] %vm701_vm8, %v2020_v54  ;;  %v2025_v60 = vadd.f32 %v14730_v26, %v1538_v19  ;;  %14896 = vmatprep.mubr.msk.bf16.mxu1 %vm928_vm7, %v2965_v59  ;;  %v13395_v31 = vld [vmem:[%s21068_s7 + $0x1a] sm:$0xff]  ;;  %v13396_v49 = vld [vmem:[%s21068_s7 + $0x22] sm:$0xff] }
 0x902   :  { %v2213_v6 = vld [vmem:[#allocation2 + $0xb0] sm:$0xff]  ;;  %v1840_v58 = vpop.f32.mrf.mxu1  ;;  %v17914_v13 = vpop.f32.mrf.mxu0  ;;  %15071 = vmatmul.mubr.msk.bf16.gmra.mxu0 %vm928_vm7, %v4992_v4  ;;  %v13534_v59 = vld [vmem:[%s21068_s7 + $0x258] sm:$0xff]  ;;  %v2966_v4 = vpack.c.bf16 %v13264_v41, %v13263_v25  ;;  %v4293_v19 = vpack.c.bf16 %v13396_v49, %v13395_v31 }
 0x903   :  { %2759 = vst.msk [vmem:[#allocation2 + $0x88] sm:$0xff] %vm701_vm8, %v2695_v29  ;;  %v2700_v3 = vadd.f32 %v17411_v38, %v2213_v6  ;;  %2089 = vst.msk [vmem:[#allocation2 + $0xd0] sm:$0xff] %vm701_vm8, %v2025_v60  ;;  %v2023_v63 = vadd.f32 %v1840_v58, %v1536_v21  ;;  %15074 = vmatprep.mubr.msk.bf16.mxu0 %vm928_vm7, %v4993_v22  ;;  %v13536_v38 = vld [vmem:[%s21068_s7 + $0x270] sm:$0xff]  ;;  %v13537_v54 = vld [vmem:[%s21068_s7 + $0x278] sm:$0xff]  ;;  %v4994_v25 = vpack.c.bf16 %v13535_v15, %v13534_v59 }
 0x904   :  { %v2211_v9 = vld [vmem:[#allocation2 + $0xa0] sm:$0xff]  ;;  %v14731_v18 = vpop.f32.mrf.mxu1  ;;  %v17927_v20 = vpop.f32.mrf.mxu0  ;;  %v1537_v29 = vld [vmem:[#allocation2 + $0xc8] sm:$0xff]  ;;  %v4995_v58 = vpack.c.bf16 %v13537_v54, %v13536_v38  ;;  %v1542_v31 = vld [vmem:[#allocation2 + $0xf0] sm:$0xff] }
 0x905   :  { %2764 = vst.msk [vmem:[#allocation2 + $0xb0] sm:$0xff] %vm701_vm8, %v2700_v3  ;;  %v2698_v22 = vadd.f32 %v17420_v43, %v2211_v9  ;;  %2087 = vst.msk [vmem:[#allocation2 + $0xc0] sm:$0xff] %vm701_vm8, %v2023_v63  ;;  %v2026_v34 = vadd.f32 %v14731_v18, %v1539_v62  ;;  %v13653_v43 = vld [vmem:[%s21069_s8 + $0x1c] sm:$0x7]  ;;  %v1540_v15 = vld [vmem:[#allocation2 + $0xe0] sm:$0xff] }
 0x906   :  { %v2214_v26 = vld [vmem:[#allocation2 + $0xb8] sm:$0xff]  ;;  %v1843_v60 = vpop.f32.mrf.mxu1  ;;  %v17938_v21 = vpop.f32.mrf.mxu0  ;;  %v5686_v62 = vpack.c.bf16 %v13653_v43, %v13653_v43 }
 0x907   :  { %2762 = vst.msk [vmem:[#allocation2 + $0xa0] sm:$0xff] %vm701_vm8, %v2698_v22  ;;  %v2701_v41 = vadd.f32 %v17435_v48, %v2214_v26  ;;  %2090 = vst.msk [vmem:[#allocation2 + $0xd8] sm:$0xff] %vm701_vm8, %v2026_v34  ;;  %v2024_v6 = vadd.f32 %v1843_v60, %v1537_v29  ;;  %v13397_v9 = vld [vmem:[%s21068_s7 + $0x32] sm:$0xff]  ;;  %v13398_v18 = vld [vmem:[%s21068_s7 + $0x3a] sm:$0xff] }
 0x908   :  { %v2212_v3 = vld [vmem:[#allocation2 + $0xa8] sm:$0xff]  ;;  %v14734_v49 = vpop.f32.mrf.mxu1  ;;  %14897 = vmatmul.mubr.msk.bf16.gmra.mxu1 %vm928_vm7, %v2966_v4  ;;  %v17947_v63 = vpop.f32.mrf.mxu0  ;;  %v1543_v54 = vld [vmem:[#allocation2 + $0xf8] sm:$0xff] }
 0x909   :  { %2765 = vst.msk [vmem:[#allocation2 + $0xb8] sm:$0xff] %vm701_vm8, %v2701_v41  ;;  %v2699_v48 = vadd.f32 %v17437_v51, %v2212_v3  ;;  %2088 = vst.msk [vmem:[#allocation2 + $0xc8] sm:$0xff] %vm701_vm8, %v2024_v6  ;;  %v2029_v59 = vadd.f32 %v14734_v49, %v1542_v31  ;;  %14968 = vmatprep.mubr.msk.bf16.mxu1 %vm928_vm7, %v4293_v19  ;;  %v13399_v51 = vld [vmem:[%s21068_s7 + $0x4a] sm:$0xff]  ;;  %v13400_v22 = vld [vmem:[%s21068_s7 + $0x52] sm:$0xff]  ;;  %v5784_v19 = vand.u32 %v5686_v62, %v16110_v28 }
 0x90a   :  { %v2217_v4 = vld [vmem:[#allocation2 + $0xd0] sm:$0xff]  ;;  %v1856_v38 = vpop.f32.mrf.mxu1  ;;  %v17965_v34 = vpop.f32.mrf.mxu0  ;;  %15075 = vmatmul.mubr.msk.bf16.gmra.mxu0 %vm928_vm7, %v4994_v25  ;;  %v13538_v60 = vld [vmem:[%s21068_s7 + $0x288] sm:$0xff]  ;;  %v13750_v25 = vld [vmem:[%s21069_s8 + $0x20] sm:$0x7] }
 0x90b   :  { %2763 = vst.msk [vmem:[#allocation2 + $0xa8] sm:$0xff] %vm701_vm8, %v2699_v48  ;;  %v2704_v26 = vadd.f32 %v17447_v57, %v2217_v4  ;;  %2093 = vst.msk [vmem:[#allocation2 + $0xf0] sm:$0xff] %vm701_vm8, %v2029_v59  ;;  %v2027_v29 = vadd.f32 %v1856_v38, %v1540_v15  ;;  %15078 = vmatprep.mubr.msk.bf16.mxu0 %vm928_vm7, %v4995_v58  ;;  %v13539_v41 = vld [vmem:[%s21068_s7 + $0x290] sm:$0xff]  ;;  %v4294_v57 = vpack.c.bf16 %v13398_v18, %v13397_v9  ;;  %v13540_v58 = vld [vmem:[%s21068_s7 + $0x2a0] sm:$0xff] }
 0x90c   :  { %v2215_v6 = vld [vmem:[#allocation2 + $0xc0] sm:$0xff]  ;;  %v14735_v43 = vpop.f32.mrf.mxu1  ;;  %v17982_v3 = vpop.f32.mrf.mxu0  ;;  %v13541_v31 = vld [vmem:[%s21068_s7 + $0x2a8] sm:$0xff]  ;;  %15098 = vmatprep.subr.bf16.mxu1 %v5784_v19  ;;  %v6365_v49 = vpack.c.bf16 %v13750_v25, %v13750_v25  ;;  %v4295_v59 = vpack.c.bf16 %v13400_v22, %v13399_v51  ;;  %v4996_v38 = vpack.c.bf16 %v13539_v41, %v13538_v60 }
 0x90d   :  { %21102 = vst [vmem:[#allocation19_spill] sm:$0xff] %v17982_v3  ;;  %2768 = vst.msk [vmem:[#allocation2 + $0xd0] sm:$0xff] %vm701_vm8, %v2704_v26  ;;  %v2702_v62 = vadd.f32 %v17456_v61, %v2215_v6  ;;  %v2030_v48 = vadd.f32 %v14735_v43, %v1543_v54  ;;  %v1541_v9 = vld [vmem:[#allocation2 + $0xe8] sm:$0xff]  ;;  %v4997_v61 = vpack.c.bf16 %v13541_v31, %v13540_v58 }
 0x90e   :  { %2091 = vst.msk [vmem:[#allocation2 + $0xe0] sm:$0xff] %vm701_vm8, %v2027_v29  ;;  %v2218_v15 = vld [vmem:[#allocation2 + $0xd8] sm:$0xff]  ;;  %v1859_v18 = vpop.f32.mrf.mxu1  ;;  %v17993_v4 = vpop.f32.mrf.mxu0  ;;  %v6463_v3 = vand.u32 %v6365_v49, %v16110_v28  ;;  %v1546_v29 = vld [vmem:[#allocation2 + $0x110] sm:$0xff]  ;;  %v13401_v60 = vld [vmem:[%s21068_s7 + $0x62] sm:$0xff]  ;;  %v21103_v49 = vmov 0.0  }
 0x90f   :  { %2766 = vst.msk [vmem:[#allocation2 + $0xc0] sm:$0xff] %vm701_vm8, %v2702_v62  ;;  %v2705_v25 = vadd.f32 %v17471_v10, %v2218_v15  ;;  %2094 = vst.msk [vmem:[#allocation2 + $0xf8] sm:$0xff] %vm701_vm8, %v2030_v48  ;;  %v2028_v26 = vadd.f32 %v1859_v18, %v1541_v9  ;;  %v1544_v10 = vld [vmem:[#allocation2 + $0x100] sm:$0xff]  ;;  %v13402_v41 = vld [vmem:[%s21068_s7 + $0x6a] sm:$0xff] }
 0x910   :  { %v2216_v6 = vld [vmem:[#allocation2 + $0xc8] sm:$0xff]  ;;  %v14738_v54 = vpop.f32.mrf.mxu1  ;;  %14969 = vmatmul.mubr.msk.bf16.vlgmr.msra.gmra.mxu1 %vm928_vm7, %v4294_v57  ;;  %v18000_v51 = vpop.f32.mrf.mxu0  ;;  %15164 = vmatprep.subr.bf16.mxu0 %v6463_v3  ;;  %v1547_v48 = vld [vmem:[#allocation2 + $0x118] sm:$0xff]  ;;  %v13543_v15 = vld [vmem:[%s21068_s7 + $0x2c0] sm:$0xff] }
 0x911   :  { %2769 = vst.msk [vmem:[#allocation2 + $0xd8] sm:$0xff] %vm701_vm8, %v2705_v25  ;;  %v2703_v28 = vadd.f32 %v17473_v16, %v2216_v6  ;;  %2092 = vst.msk [vmem:[#allocation2 + $0xe8] sm:$0xff] %vm701_vm8, %v2028_v26  ;;  %v2033_v22 = vadd.f32 %v14738_v54, %v1546_v29  ;;  %14972 = vmatprep.mubr.msk.bf16.mxu1 %vm928_vm7, %v4295_v59  ;;  %15099 = vmatpush3.bf16.msra.mxu1 %v5784_v19  ;;  %v13403_v16 = vld [vmem:[%s21068_s7 + $0x7a] sm:$0xff]  ;;  %v13404_v58 = vld [vmem:[%s21068_s7 + $0x82] sm:$0xff] }
 0x912   :  { %v2221_v43 = vld [vmem:[#allocation2 + $0xf0] sm:$0xff]  ;;  %v1872_v57 = vpop.f32.mrf.mxu1  ;;  %v18018_v31 = vpop.f32.mrf.mxu0  ;;  %15079 = vmatmul.mubr.msk.bf16.gmra.mxu0 %vm928_vm7, %v4996_v38  ;;  %15230 = vmatprep.subr.mxu1 %v21103_v49  ;;  %v13542_v59 = vld [vmem:[%s21068_s7 + $0x2b8] sm:$0xff]  ;;  %v4296_v38 = vpack.c.bf16 %v13402_v41, %v13401_v60  ;;  %v4297_v6 = vpack.c.bf16 %v13404_v58, %v13403_v16  ;;  %v1545_v54 = vld [vmem:[#allocation2 + $0x108] sm:$0xff] }
 0x913   :  { %2767 = vst.msk [vmem:[#allocation2 + $0xc8] sm:$0xff] %vm701_vm8, %v2703_v28  ;;  %v2708_v19 = vadd.f32 %v17483_v23, %v2221_v43  ;;  %2097 = vst.msk [vmem:[#allocation2 + $0x110] sm:$0xff] %vm701_vm8, %v2033_v22  ;;  %v2031_v62 = vadd.f32 %v1872_v57, %v1544_v10  ;;  %15082 = vmatprep.mubr.msk.bf16.mxu0 %vm928_vm7, %v4997_v61  ;;  %15165 = vmatpush3.bf16.msra.mxu0 %v6463_v3  ;;  %v13544_v23 = vld [vmem:[%s21068_s7 + $0x2d0] sm:$0xff]  ;;  %v13545_v26 = vld [vmem:[%s21068_s7 + $0x2d8] sm:$0xff] }
 0x914   :  { %v14739_v18 = vpop.f32.mrf.mxu1  ;;  %v18032_v25 = vpop.f32.mrf.mxu0  ;;  %v4998_v10 = vpack.c.bf16 %v13543_v15, %v13542_v59  ;;  %v4999_v43 = vpack.c.bf16 %v13545_v26, %v13544_v23  ;;  %v13406_v59 = vld [vmem:[%s21068_s7 + $0x9a] sm:$0xff] }
 0x915   :  { %v2219_v9 = vld [vmem:[#allocation2 + $0xe0] sm:$0xff]  ;;  %2772 = vst.msk [vmem:[#allocation2 + $0xf0] sm:$0xff] %vm701_vm8, %v2708_v19  ;;  %2095 = vst.msk [vmem:[#allocation2 + $0x100] sm:$0xff] %vm701_vm8, %v2031_v62  ;;  %v2034_v3 = vadd.f32 %v14739_v18, %v1547_v48  ;;  %v13408_v18 = vld [vmem:[%s21068_s7 + $0xb2] sm:$0xff] }
 0x916   :  { %v2706_v61 = vadd.f32 %v17492_v27, %v2219_v9  ;;  %v2222_v29 = vld [vmem:[#allocation2 + $0xf8] sm:$0xff]  ;;  %v1875_v28 = vpop.f32.mrf.mxu1  ;;  %v18043_v22 = vpop.f32.mrf.mxu0  ;;  %v1550_v27 = vld [vmem:[#allocation2 + $0x130] sm:$0xff]  ;;  %v1548_v48 = vld [vmem:[#allocation2 + $0x120] sm:$0xff] }
 0x917   :  { %v2709_v60 = vadd.f32 %v17507_v44, %v2222_v29  ;;  %2098 = vst.msk [vmem:[#allocation2 + $0x118] sm:$0xff] %vm701_vm8, %v2034_v3  ;;  %v2032_v41 = vadd.f32 %v1875_v28, %v1545_v54  ;;  %v13405_v44 = vld [vmem:[%s21068_s7 + $0x92] sm:$0xff]  ;;  %v13546_v3 = vld [vmem:[%s21068_s7 + $0x2e8] sm:$0xff] }
 0x918   :  { %2770 = vst.msk [vmem:[#allocation2 + $0xe0] sm:$0xff] %vm701_vm8, %v2706_v61  ;;  %v2220_v57 = vld [vmem:[#allocation2 + $0xe8] sm:$0xff]  ;;  %v14742_v19 = vpop.f32.mrf.mxu1  ;;  %14973 = vmatmul.mubr.msk.bf16.gmra.mxu1 %vm928_vm7, %v4296_v38  ;;  %v18049_v16 = vpop.f32.mrf.mxu0  ;;  %v1551_v61 = vld [vmem:[#allocation2 + $0x138] sm:$0xff]  ;;  %v4298_v28 = vpack.c.bf16 %v13406_v59, %v13405_v44 }
 0x919   :  { %2773 = vst.msk [vmem:[#allocation2 + $0xf8] sm:$0xff] %vm701_vm8, %v2709_v60  ;;  %v2707_v58 = vadd.f32 %v17509_v45, %v2220_v57  ;;  %2096 = vst.msk [vmem:[#allocation2 + $0x108] sm:$0xff] %vm701_vm8, %v2032_v41  ;;  %v2037_v62 = vadd.f32 %v14742_v19, %v1550_v27  ;;  %14976 = vmatprep.mubr.msk.bf16.mxu1 %vm928_vm7, %v4297_v6  ;;  %v13407_v45 = vld [vmem:[%s21068_s7 + $0xaa] sm:$0xff] }
 0x91a   :  { %v2225_v15 = vld [vmem:[#allocation2 + $0x110] sm:$0xff]  ;;  %v1888_v9 = vpop.f32.mrf.mxu1  ;;  %v18067_v38 = vpop.f32.mrf.mxu0  ;;  %15083 = vmatmul.mubr.msk.bf16.gmra.mxu0 %vm928_vm7, %v4998_v10  ;;  %v13549_v60 = vld [vmem:[%s21068_s7 + $0x308] sm:$0xff]  ;;  %v4299_v57 = vpack.c.bf16 %v13408_v18, %v13407_v45 }
 0x91b   :  { %2771 = vst.msk [vmem:[#allocation2 + $0xe8] sm:$0xff] %vm701_vm8, %v2707_v58  ;;  %v2712_v23 = vadd.f32 %v17519_v50, %v2225_v15  ;;  %2101 = vst.msk [vmem:[#allocation2 + $0x130] sm:$0xff] %vm701_vm8, %v2037_v62  ;;  %v2035_v26 = vadd.f32 %v1888_v9, %v1548_v48  ;;  %15086 = vmatprep.mubr.msk.bf16.mxu0 %vm928_vm7, %v4999_v43  ;;  %v13547_v6 = vld [vmem:[%s21068_s7 + $0x2f0] sm:$0xff]  ;;  %v13548_v50 = vld [vmem:[%s21068_s7 + $0x300] sm:$0xff] }
 0x91c   :  { %v2223_v29 = vld [vmem:[#allocation2 + $0x100] sm:$0xff]  ;;  %v14743_v54 = vpop.f32.mrf.mxu1  ;;  %v18080_v10 = vpop.f32.mrf.mxu0  ;;  %v1549_v19 = vld [vmem:[#allocation2 + $0x128] sm:$0xff]  ;;  %v5000_v48 = vpack.c.bf16 %v13547_v6, %v13546_v3  ;;  %v5001_v15 = vpack.c.bf16 %v13549_v60, %v13548_v50 }
 0x91d   :  { %2776 = vst.msk [vmem:[#allocation2 + $0x110] sm:$0xff] %vm701_vm8, %v2712_v23  ;;  %v2710_v41 = vadd.f32 %v17528_v55, %v2223_v29  ;;  %2099 = vst.msk [vmem:[#allocation2 + $0x120] sm:$0xff] %vm701_vm8, %v2035_v26  ;;  %v2038_v43 = vadd.f32 %v14743_v54, %v1551_v61  ;;  %v1554_v55 = vld [vmem:[#allocation2 + $0x150] sm:$0xff]  ;;  %v1552_v61 = vld [vmem:[#allocation2 + $0x140] sm:$0xff] }
 0x91e   :  { %v2226_v27 = vld [vmem:[#allocation2 + $0x118] sm:$0xff]  ;;  %v1891_v58 = vpop.f32.mrf.mxu1  ;;  %v18091_v62 = vpop.f32.mrf.mxu0  ;;  %v13410_v3 = vld [vmem:[%s21068_s7 + $0xca] sm:$0xff]  ;;  %v13412_v54 = vld [vmem:[%s21068_s7 + $0xe2] sm:$0xff] }
 0x91f   :  { %2774 = vst.msk [vmem:[#allocation2 + $0x100] sm:$0xff] %vm701_vm8, %v2710_v41  ;;  %v2713_v44 = vadd.f32 %v17543_v5, %v2226_v27  ;;  %2102 = vst.msk [vmem:[#allocation2 + $0x138] sm:$0xff] %vm701_vm8, %v2038_v43  ;;  %v2036_v59 = vadd.f32 %v1891_v58, %v1549_v19  ;;  %v13409_v5 = vld [vmem:[%s21068_s7 + $0xc2] sm:$0xff]  ;;  %v1555_v41 = vld [vmem:[#allocation2 + $0x158] sm:$0xff] }
 0x920   :  { %v2224_v9 = vld [vmem:[#allocation2 + $0x108] sm:$0xff]  ;;  %v14746_v23 = vpop.f32.mrf.mxu1  ;;  %14977 = vmatmul.mubr.msk.bf16.gmra.mxu1 %vm928_vm7, %v4298_v28  ;;  %v18097_v45 = vpop.f32.mrf.mxu0  ;;  %v13550_v43 = vld [vmem:[%s21068_s7 + $0x318] sm:$0xff]  ;;  %v4300_v58 = vpack.c.bf16 %v13410_v3, %v13409_v5 }
 0x921   :  { %2777 = vst.msk [vmem:[#allocation2 + $0x118] sm:$0xff] %vm701_vm8, %v2713_v44  ;;  %v2711_v18 = vadd.f32 %v17545_v12, %v2224_v9  ;;  %2100 = vst.msk [vmem:[#allocation2 + $0x128] sm:$0xff] %vm701_vm8, %v2036_v59  ;;  %v2041_v26 = vadd.f32 %v14746_v23, %v1554_v55  ;;  %14980 = vmatprep.mubr.msk.bf16.mxu1 %vm928_vm7, %v4299_v57  ;;  %v13411_v12 = vld [vmem:[%s21068_s7 + $0xda] sm:$0xff]  ;;  %v1553_v23 = vld [vmem:[#allocation2 + $0x148] sm:$0xff] }
 0x922   :  { %v2229_v6 = vld [vmem:[#allocation2 + $0x130] sm:$0xff]  ;;  %v1904_v29 = vpop.f32.mrf.mxu1  ;;  %v18115_v28 = vpop.f32.mrf.mxu0  ;;  %15087 = vmatmul.mubr.msk.bf16.gmra.mxu0 %vm928_vm7, %v5000_v48  ;;  %v13551_v57 = vld [vmem:[%s21068_s7 + $0x320] sm:$0xff]  ;;  %v13553_v44 = vld [vmem:[%s21068_s7 + $0x338] sm:$0xff]  ;;  %v4301_v9 = vpack.c.bf16 %v13412_v54, %v13411_v12 }
 0x923   :  { %2775 = vst.msk [vmem:[#allocation2 + $0x108] sm:$0xff] %vm701_vm8, %v2711_v18  ;;  %v2716_v50 = vadd.f32 %v17555_v24, %v2229_v6  ;;  %2105 = vst.msk [vmem:[#allocation2 + $0x150] sm:$0xff] %vm701_vm8, %v2041_v26  ;;  %v2039_v60 = vadd.f32 %v1904_v29, %v1552_v61  ;;  %15090 = vmatprep.mubr.msk.bf16.mxu0 %vm928_vm7, %v5001_v15  ;;  %v13552_v24 = vld [vmem:[%s21068_s7 + $0x330] sm:$0xff]  ;;  %v5002_v61 = vpack.c.bf16 %v13551_v57, %v13550_v43  ;;  %v13414_v43 = vld [vmem:[%s21068_s7 + $0xfa] sm:$0xff] }
 0x924   :  { %v2227_v27 = vld [vmem:[#allocation2 + $0x120] sm:$0xff]  ;;  %v14747_v19 = vpop.f32.mrf.mxu1  ;;  %v18128_v48 = vpop.f32.mrf.mxu0  ;;  %v5003_v6 = vpack.c.bf16 %v13553_v44, %v13552_v24 }
 0x925   :  { %2780 = vst.msk [vmem:[#allocation2 + $0x130] sm:$0xff] %vm701_vm8, %v2716_v50  ;;  %v2714_v59 = vadd.f32 %v17564_v32, %v2227_v27  ;;  %2103 = vst.msk [vmem:[#allocation2 + $0x140] sm:$0xff] %vm701_vm8, %v2039_v60  ;;  %v2042_v15 = vadd.f32 %v14747_v19, %v1555_v41  ;;  %v1558_v32 = vld [vmem:[#allocation2 + $0x170] sm:$0xff]  ;;  %v1556_v41 = vld [vmem:[#allocation2 + $0x160] sm:$0xff] }
 0x926   :  { %v2230_v55 = vld [vmem:[#allocation2 + $0x138] sm:$0xff]  ;;  %v1907_v18 = vpop.f32.mrf.mxu1  ;;  %v18139_v26 = vpop.f32.mrf.mxu0 }
 0x927   :  { %2778 = vst.msk [vmem:[#allocation2 + $0x120] sm:$0xff] %vm701_vm8, %v2714_v59  ;;  %v2717_v5 = vadd.f32 %v17579_v37, %v2230_v55  ;;  %2106 = vst.msk [vmem:[#allocation2 + $0x158] sm:$0xff] %vm701_vm8, %v2042_v15  ;;  %v2040_v3 = vadd.f32 %v1907_v18, %v1553_v23  ;;  %v13413_v37 = vld [vmem:[%s21068_s7 + $0xf2] sm:$0xff]  ;;  %v13554_v15 = vld [vmem:[%s21068_s7 + $0x348] sm:$0xff] }
 0x928   :  { %v2228_v29 = vld [vmem:[#allocation2 + $0x128] sm:$0xff]  ;;  %v14750_v50 = vpop.f32.mrf.mxu1  ;;  %14981 = vmatmul.mubr.msk.bf16.gmra.mxu1 %vm928_vm7, %v4300_v58  ;;  %v18145_v12 = vpop.f32.mrf.mxu0  ;;  %v13416_v19 = vld [vmem:[%s21068_s7 + $0x112] sm:$0xff]  ;;  %v4302_v18 = vpack.c.bf16 %v13414_v43, %v13413_v37  ;;  %v21106_v43 = vld [vmem:[#allocation11_spill] sm:$0xff] }
 0x929   :  { %2781 = vst.msk [vmem:[#allocation2 + $0x138] sm:$0xff] %vm701_vm8, %v2717_v5  ;;  %v2715_v54 = vadd.f32 %v17581_v53, %v2228_v29  ;;  %2104 = vst.msk [vmem:[#allocation2 + $0x148] sm:$0xff] %vm701_vm8, %v2040_v3  ;;  %v2045_v60 = vadd.f32 %v14750_v50, %v1558_v32  ;;  %14984 = vmatprep.mubr.msk.bf16.mxu1 %vm928_vm7, %v4301_v9  ;;  %v13415_v53 = vld [vmem:[%s21068_s7 + $0x10a] sm:$0xff]  ;;  %v1559_v59 = vld [vmem:[#allocation2 + $0x178] sm:$0xff] }
 0x92a   :  { %v2233_v57 = vld [vmem:[#allocation2 + $0x150] sm:$0xff]  ;;  %v1920_v27 = vpop.f32.mrf.mxu1  ;;  %v18163_v58 = vpop.f32.mrf.mxu0  ;;  %15091 = vmatmul.mubr.msk.bf16.gmra.mxu0 %vm928_vm7, %v5002_v61  ;;  %v13687_v5 = vld [vmem:[%s21068_s7 + $0x3a] sm:$0xff]  ;;  %v4303_v32 = vpack.c.bf16 %v13416_v19, %v13415_v53  ;;  %v21108_v19 = vld [vmem:[#allocation12_spill] sm:$0xff] }
 0x92b   :  { %2779 = vst.msk [vmem:[#allocation2 + $0x128] sm:$0xff] %vm701_vm8, %v2715_v54  ;;  %v2720_v24 = vadd.f32 %v17599_v8, %v2233_v57  ;;  %2109 = vst.msk [vmem:[#allocation2 + $0x170] sm:$0xff] %vm701_vm8, %v2045_v60  ;;  %v2043_v44 = vadd.f32 %v1920_v27, %v1556_v41  ;;  %15094 = vmatprep.mubr.msk.bf16.mxu0 %vm928_vm7, %v5003_v6  ;;  %v13555_v9 = vld [vmem:[%s21068_s7 + $0x350] sm:$0xff]  ;;  %v1557_v54 = vld [vmem:[#allocation2 + $0x168] sm:$0xff] }
 0x92c   :  { %v2231_v55 = vld [vmem:[#allocation2 + $0x140] sm:$0xff]  ;;  %v14751_v23 = vpop.f32.mrf.mxu1  ;;  %v18176_v61 = vpop.f32.mrf.mxu0  ;;  %v13686_v8 = vld [vmem:[%s21068_s7 + $0x32] sm:$0xff]  ;;  %v5004_v37 = vpack.c.bf16 %v13555_v9, %v13554_v15 }
 0x92d   :  { %2784 = vst.msk [vmem:[#allocation2 + $0x150] sm:$0xff] %vm701_vm8, %v2720_v24  ;;  %v21104_v3 = vld [vmem:[#allocation10_spill] sm:$0xff]  ;;  %2107 = vst.msk [vmem:[#allocation2 + $0x160] sm:$0xff] %vm701_vm8, %v2043_v44  ;;  %v2046_v29 = vadd.f32 %v14751_v23, %v1559_v59  ;;  %v6331_v24 = vpack.c.bf16 %v13687_v5, %v13686_v8  ;;  %v1560_v15 = vld [vmem:[#allocation2 + $0x180] sm:$0xff] }
 0x92e   :  { %v2718_v6 = vadd.f32 %v21104_v3, %v2231_v55  ;;  %v2234_v50 = vld [vmem:[#allocation2 + $0x158] sm:$0xff]  ;;  %v1923_v60 = vpop.f32.mrf.mxu1  ;;  %v18187_v41 = vpop.f32.mrf.mxu0  ;;  %v1562_v55 = vld [vmem:[#allocation2 + $0x190] sm:$0xff]  ;;  %v13417_v9 = vld [vmem:[%s21068_s7 + $0x122] sm:$0xff] }
 0x92f   :  { %21105 = vst [vmem:[#allocation10_spill] sm:$0xff] %v18187_v41  ;;  %v2721_v57 = vadd.f32 %v21106_v43, %v2234_v50  ;;  %2110 = vst.msk [vmem:[#allocation2 + $0x178] sm:$0xff] %vm701_vm8, %v2046_v29  ;;  %v2044_v27 = vadd.f32 %v1923_v60, %v1557_v54  ;;  %v13418_v23 = vld [vmem:[%s21068_s7 + $0x12a] sm:$0xff]  ;;  %v13420_v5 = vld [vmem:[%s21068_s7 + $0x142] sm:$0xff] }
 0x930   :  { %2782 = vst.msk [vmem:[#allocation2 + $0x140] sm:$0xff] %vm701_vm8, %v2718_v6  ;;  %v2232_v49 = vld [vmem:[#allocation2 + $0x148] sm:$0xff]  ;;  %v14754_v3 = vpop.f32.mrf.mxu1  ;;  %14985 = vmatmul.mubr.msk.bf16.gmra.mxu1 %vm928_vm7, %v4302_v18  ;;  %v18193_v53 = vpop.f32.mrf.mxu0  ;;  %v1563_v54 = vld [vmem:[#allocation2 + $0x198] sm:$0xff] }
 0x931   :  { %21107 = vst [vmem:[#allocation11_spill] sm:$0xff] %v18193_v53  ;;  %2785 = vst.msk [vmem:[#allocation2 + $0x158] sm:$0xff] %vm701_vm8, %v2721_v57  ;;  %v2719_v44 = vadd.f32 %v21108_v19, %v2232_v49  ;;  %v2049_v59 = vadd.f32 %v14754_v3, %v1562_v55  ;;  %14988 = vmatprep.mubr.msk.bf16.mxu1 %vm928_vm7, %v4303_v32  ;;  %v13419_v49 = vld [vmem:[%s21068_s7 + $0x13a] sm:$0xff]  ;;  %v21110_v29 = vld [vmem:[#allocation13_spill] sm:$0xff] }
 0x932   :  { %2108 = vst.msk [vmem:[#allocation2 + $0x168] sm:$0xff] %vm701_vm8, %v2044_v27  ;;  %v2237_v18 = vld [vmem:[#allocation2 + $0x170] sm:$0xff]  ;;  %v1936_v8 = vpop.f32.mrf.mxu1  ;;  %v18211_v6 = vpop.f32.mrf.mxu0  ;;  %15095 = vmatmul.mubr.msk.bf16.gmra.mxu0 %vm928_vm7, %v5004_v37  ;;  %v4304_v27 = vpack.c.bf16 %v13418_v23, %v13417_v9  ;;  %v13690_v3 = vld [vmem:[%s21068_s7 + $0x62] sm:$0xff] }
 0x933   :  { %21109 = vst [vmem:[#allocation12_spill] sm:$0xff] %v18211_v6  ;;  %2783 = vst.msk [vmem:[#allocation2 + $0x148] sm:$0xff] %vm701_vm8, %v2719_v44  ;;  %v2724_v32 = vadd.f32 %v21110_v29, %v2237_v18  ;;  %v2047_v50 = vadd.f32 %v1936_v8, %v1560_v15  ;;  %15166 = vmatprep.mubr.msk.bf16.mxu0 %vm928_vm7, %v6331_v24  ;;  %v13688_v60 = vld [vmem:[%s21068_s7 + $0x4a] sm:$0xff]  ;;  %v13689_v43 = vld [vmem:[%s21068_s7 + $0x52] sm:$0xff]  ;;  %v4305_v15 = vpack.c.bf16 %v13420_v5, %v13419_v49 }
 0x934   :  { %2113 = vst.msk [vmem:[#allocation2 + $0x190] sm:$0xff] %vm701_vm8, %v2049_v59  ;;  %v2235_v57 = vld [vmem:[#allocation2 + $0x160] sm:$0xff]  ;;  %v14755_v37 = vpop.f32.mrf.mxu1  ;;  %v18224_v55 = vpop.f32.mrf.mxu0  ;;  %v13691_v24 = vld [vmem:[%s21068_s7 + $0x6a] sm:$0xff]  ;;  %v21112_v19 = vld [vmem:[#allocation14_spill] sm:$0xff]  ;;  %v6332_v29 = vpack.c.bf16 %v13689_v43, %v13688_v60 }
 0x935   :  { %21111 = vst [vmem:[#allocation13_spill] sm:$0xff] %v18224_v55  ;;  %2788 = vst.msk [vmem:[#allocation2 + $0x170] sm:$0xff] %vm701_vm8, %v2724_v32  ;;  %v2722_v44 = vadd.f32 %v21112_v19, %v2235_v57  ;;  %v2050_v59 = vadd.f32 %v14755_v37, %v1563_v54  ;;  %v1561_v9 = vld [vmem:[#allocation2 + $0x188] sm:$0xff]  ;;  %v21113_v55 = vld [vmem:[#allocation15_spill] sm:$0xff]  ;;  %v6333_v32 = vpack.c.bf16 %v13691_v24, %v13690_v3 }
 0x936   :  { %2111 = vst.msk [vmem:[#allocation2 + $0x180] sm:$0xff] %vm701_vm8, %v2047_v50  ;;  %v2238_v18 = vld [vmem:[#allocation2 + $0x178] sm:$0xff]  ;;  %v1939_v23 = vpop.f32.mrf.mxu1  ;;  %v18235_v8 = vpop.f32.mrf.mxu0  ;;  %v1566_v57 = vld [vmem:[#allocation2 + $0x1b0] sm:$0xff]  ;;  %v21115_v5 = vld [vmem:[#allocation16_spill] sm:$0xff] }
 0x937   :  { %2786 = vst.msk [vmem:[#allocation2 + $0x160] sm:$0xff] %vm701_vm8, %v2722_v44  ;;  %v2725_v6 = vadd.f32 %v21113_v55, %v2238_v18  ;;  %2114 = vst.msk [vmem:[#allocation2 + $0x198] sm:$0xff] %vm701_vm8, %v2050_v59  ;;  %v2048_v53 = vadd.f32 %v1939_v23, %v1561_v9  ;;  %v1564_v60 = vld [vmem:[#allocation2 + $0x1a0] sm:$0xff]  ;;  %v13421_v43 = vld [vmem:[%s21068_s7 + $0x152] sm:$0xff] }
 0x938   :  { %v14758_v19 = vpop.f32.mrf.mxu1  ;;  %14989 = vmatmul.mubr.msk.bf16.gmra.mxu1 %vm928_vm7, %v4304_v27  ;;  %v18241_v49 = vpop.f32.mrf.mxu0  ;;  %v13422_v37 = vld [vmem:[%s21068_s7 + $0x15a] sm:$0xff]  ;;  %v21117_v3 = vld [vmem:[#allocation17_spill] sm:$0xff]  ;;  %v13693_v18 = vld [vmem:[%s21068_s7 + $0x82] sm:$0xff] }
 0x939   :  { %v2236_v41 = vld [vmem:[#allocation2 + $0x168] sm:$0xff]  ;;  %21114 = vst [vmem:[#allocation14_spill] sm:$0xff] %v18241_v49  ;;  %2789 = vst.msk [vmem:[#allocation2 + $0x178] sm:$0xff] %vm701_vm8, %v2725_v6  ;;  %v2053_v54 = vadd.f32 %v14758_v19, %v1566_v57  ;;  %14992 = vmatprep.mubr.msk.bf16.mxu1 %vm928_vm7, %v4305_v15  ;;  %v1567_v59 = vld [vmem:[#allocation2 + $0x1b8] sm:$0xff] }
 0x93a   :  { %v2723_v50 = vadd.f32 %v21115_v5, %v2236_v41  ;;  %2112 = vst.msk [vmem:[#allocation2 + $0x188] sm:$0xff] %vm701_vm8, %v2048_v53  ;;  %v1952_v55 = vpop.f32.mrf.mxu1  ;;  %v13423_v41 = vld [vmem:[%s21068_s7 + $0x16a] sm:$0xff]  ;;  %v13424_v53 = vld [vmem:[%s21068_s7 + $0x172] sm:$0xff]  ;;  %v18259_v6 = vpop.f32.mrf.mxu0  ;;  %15167 = vmatmul.mubr.msk.bf16.vlgmr.msra.gmra.mxu0 %vm928_vm7, %v6332_v29  ;;  %v13692_v15 = vld [vmem:[%s21068_s7 + $0x7a] sm:$0xff]  ;;  %v4306_v29 = vpack.c.bf16 %v13422_v37, %v13421_v43 }
 0x93b   :  { %v2241_v27 = vld [vmem:[#allocation2 + $0x190] sm:$0xff]  ;;  %21116 = vst [vmem:[#allocation15_spill] sm:$0xff] %v18259_v6  ;;  %2117 = vst.msk [vmem:[#allocation2 + $0x1b0] sm:$0xff] %vm701_vm8, %v2053_v54  ;;  %v2051_v44 = vadd.f32 %v1952_v55, %v1564_v60  ;;  %15170 = vmatprep.mubr.msk.bf16.mxu0 %vm928_vm7, %v6333_v32  ;;  %v13695_v32 = vld [vmem:[%s21068_s7 + $0x9a] sm:$0xff]  ;;  %v4307_v60 = vpack.c.bf16 %v13424_v53, %v13423_v41 }
 0x93c   :  { %2787 = vst.msk [vmem:[#allocation2 + $0x168] sm:$0xff] %vm701_vm8, %v2723_v50  ;;  %v2728_v24 = vadd.f32 %v21117_v3, %v2241_v27  ;;  %v14759_v23 = vpop.f32.mrf.mxu1  ;;  %v18272_v57 = vpop.f32.mrf.mxu0  ;;  %v13694_v19 = vld [vmem:[%s21068_s7 + $0x92] sm:$0xff]  ;;  %v1565_v43 = vld [vmem:[#allocation2 + $0x1a8] sm:$0xff]  ;;  %v6334_v3 = vpack.c.bf16 %v13693_v18, %v13692_v15 }
 0x93d   :  { %v2239_v9 = vld [vmem:[#allocation2 + $0x180] sm:$0xff]  ;;  %21118 = vst [vmem:[#allocation16_spill] sm:$0xff] %v18272_v57  ;;  %v21119_v5 = vld [vmem:[#allocation18_spill] sm:$0xff]  ;;  %2115 = vst.msk [vmem:[#allocation2 + $0x1a0] sm:$0xff] %vm701_vm8, %v2051_v44  ;;  %v2054_v54 = vadd.f32 %v14759_v23, %v1567_v59 }
 0x93e   :  { %2792 = vst.msk [vmem:[#allocation2 + $0x190] sm:$0xff] %vm701_vm8, %v2728_v24  ;;  %v2726_v50 = vadd.f32 %v21119_v5, %v2239_v9  ;;  %v2242_v27 = vld [vmem:[#allocation2 + $0x198] sm:$0xff]  ;;  %v1955_v37 = vpop.f32.mrf.mxu1  ;;  %v18283_v55 = vpop.f32.mrf.mxu0  ;;  %v6335_v24 = vpack.c.bf16 %v13695_v32, %v13694_v19  ;;  %v1570_v9 = vld [vmem:[#allocation2 + $0x1d0] sm:$0xff]  ;;  %v1568_v59 = vld [vmem:[#allocation2 + $0x1c0] sm:$0xff] }
 0x93f   :  { %v2729_v57 = vadd.f32 %v17698_v33, %v2242_v27  ;;  %2118 = vst.msk [vmem:[#allocation2 + $0x1b8] sm:$0xff] %vm701_vm8, %v2054_v54  ;;  %v2052_v6 = vadd.f32 %v1955_v37, %v1565_v43  ;;  %v13425_v33 = vld [vmem:[%s21068_s7 + $0x182] sm:$0xff]  ;;  %v13426_v15 = vld [vmem:[%s21068_s7 + $0x18a] sm:$0xff]  ;;  %v1571_v19 = vld [vmem:[#allocation2 + $0x1d8] sm:$0xff] }
 0x940   :  { %2790 = vst.msk [vmem:[#allocation2 + $0x180] sm:$0xff] %vm701_vm8, %v2726_v50  ;;  %v14762_v5 = vpop.f32.mrf.mxu1  ;;  %14993 = vmatmul.mubr.msk.bf16.gmra.mxu1 %vm928_vm7, %v4306_v29  ;;  %v18289_v41 = vpop.f32.mrf.mxu0  ;;  %v13696_v32 = vld [vmem:[%s21068_s7 + $0xaa] sm:$0xff]  ;;  %v13697_v50 = vld [vmem:[%s21068_s7 + $0xb2] sm:$0xff]  ;;  %v4308_v27 = vpack.c.bf16 %v13426_v15, %v13425_v33 }
 0x941   :  { %v2240_v49 = vld [vmem:[#allocation2 + $0x188] sm:$0xff]  ;;  %2793 = vst.msk [vmem:[#allocation2 + $0x198] sm:$0xff] %vm701_vm8, %v2729_v57  ;;  %2116 = vst.msk [vmem:[#allocation2 + $0x1a8] sm:$0xff] %vm701_vm8, %v2052_v6  ;;  %v2057_v44 = vadd.f32 %v14762_v5, %v1570_v9  ;;  %14996 = vmatprep.mubr.msk.bf16.mxu1 %vm928_vm7, %v4307_v60  ;;  %v6336_v33 = vpack.c.bf16 %v13697_v50, %v13696_v32 }
 0x942   :  { %v2727_v53 = vadd.f32 %v17704_v14, %v2240_v49  ;;  %v2245_v18 = vld [vmem:[#allocation2 + $0x1b0] sm:$0xff]  ;;  %v1968_v23 = vpop.f32.mrf.mxu1  ;;  %v18307_v6 = vpop.f32.mrf.mxu0  ;;  %15171 = vmatmul.mubr.msk.bf16.gmra.mxu0 %vm928_vm7, %v6334_v3 }
 0x943   :  { %v13427_v14 = vld [vmem:[%s21068_s7 + $0x1ca] sm:$0xff]  ;;  %v13428_v49 = vld [vmem:[%s21068_s7 + $0x1d2] sm:$0xff]  ;;  %v2732_v29 = vadd.f32 %v17722_v30, %v2245_v18  ;;  %2121 = vst.msk [vmem:[#allocation2 + $0x1d0] sm:$0xff] %vm701_vm8, %v2057_v44  ;;  %v2055_v57 = vadd.f32 %v1968_v23, %v1568_v59  ;;  %15174 = vmatprep.mubr.msk.bf16.mxu0 %vm928_vm7, %v6335_v24  ;;  %v13698_v30 = vld [vmem:[%s21068_s7 + $0xc2] sm:$0xff] }
 0x944   :  { %2791 = vst.msk [vmem:[#allocation2 + $0x188] sm:$0xff] %vm701_vm8, %v2727_v53  ;;  %v2243_v54 = vld [vmem:[#allocation2 + $0x1a0] sm:$0xff]  ;;  %v14763_v60 = vpop.f32.mrf.mxu1  ;;  %v18320_v43 = vpop.f32.mrf.mxu0  ;;  %v13699_v37 = vld [vmem:[%s21068_s7 + $0xca] sm:$0xff]  ;;  %v4309_v9 = vpack.c.bf16 %v13428_v49, %v13427_v14 }
 0x945   :  { %2796 = vst.msk [vmem:[#allocation2 + $0x1b0] sm:$0xff] %vm701_vm8, %v2732_v29  ;;  %v2730_v3 = vadd.f32 %v17735_v39, %v2243_v54  ;;  %2119 = vst.msk [vmem:[#allocation2 + $0x1c0] sm:$0xff] %vm701_vm8, %v2055_v57  ;;  %v2058_v24 = vadd.f32 %v14763_v60, %v1571_v19  ;;  %v1569_v53 = vld [vmem:[#allocation2 + $0x1c8] sm:$0xff]  ;;  %v6337_v23 = vpack.c.bf16 %v13699_v37, %v13698_v30  ;;  %v1574_v39 = vld [vmem:[#allocation2 + $0x1f0] sm:$0xff] }
 0x946   :  { %v2246_v5 = vld [vmem:[#allocation2 + $0x1b8] sm:$0xff]  ;;  %v1971_v44 = vpop.f32.mrf.mxu1  ;;  %v18331_v59 = vpop.f32.mrf.mxu0  ;;  %v1572_v19 = vld [vmem:[#allocation2 + $0x1e0] sm:$0xff]  ;;  %v13430_v32 = vld [vmem:[%s21068_s7 + $0x1ea] sm:$0xff] }
 0x947   :  { %2794 = vst.msk [vmem:[#allocation2 + $0x1a0] sm:$0xff] %vm701_vm8, %v2730_v3  ;;  %v2733_v15 = vadd.f32 %v17746_v46, %v2246_v5  ;;  %2122 = vst.msk [vmem:[#allocation2 + $0x1d8] sm:$0xff] %vm701_vm8, %v2058_v24  ;;  %v2056_v18 = vadd.f32 %v1971_v44, %v1569_v53  ;;  %v13429_v46 = vld [vmem:[%s21068_s7 + $0x1e2] sm:$0xff]  ;;  %v1575_v24 = vld [vmem:[#allocation2 + $0x1f8] sm:$0xff] }
 0x948   :  { %v2244_v29 = vld [vmem:[#allocation2 + $0x1a8] sm:$0xff]  ;;  %v14766_v54 = vpop.f32.mrf.mxu1  ;;  %14997 = vmatmul.mubr.msk.bf16.gmra.mxu1 %vm928_vm7, %v4308_v27  ;;  %v18337_v14 = vpop.f32.mrf.mxu0 }
 0x949   :  { %2797 = vst.msk [vmem:[#allocation2 + $0x1b8] sm:$0xff] %vm701_vm8, %v2733_v15  ;;  %v2731_v49 = vadd.f32 %v17752_v11, %v2244_v29  ;;  %2120 = vst.msk [vmem:[#allocation2 + $0x1c8] sm:$0xff] %vm701_vm8, %v2056_v18  ;;  %v2061_v57 = vadd.f32 %v14766_v54, %v1574_v39  ;;  %15000 = vmatprep.mubr.msk.bf16.mxu1 %vm928_vm7, %v4309_v9  ;;  %v13431_v11 = vld [vmem:[%s21068_s7 + $0x1fa] sm:$0xff]  ;;  %v13432_v27 = vld [vmem:[%s21068_s7 + $0x202] sm:$0xff] }
 0x94a   :  { %v2249_v50 = vld [vmem:[#allocation2 + $0x1d0] sm:$0xff]  ;;  %v1984_v60 = vpop.f32.mrf.mxu1  ;;  %v18355_v30 = vpop.f32.mrf.mxu0  ;;  %15175 = vmatmul.mubr.msk.bf16.gmra.mxu0 %vm928_vm7, %v6336_v33  ;;  %v13700_v9 = vld [vmem:[%s21068_s7 + $0xda] sm:$0xff]  ;;  %v13701_v5 = vld [vmem:[%s21068_s7 + $0xe2] sm:$0xff]  ;;  %v4310_v33 = vpack.c.bf16 %v13430_v32, %v13429_v46  ;;  %v4311_v39 = vpack.c.bf16 %v13432_v27, %v13431_v11 }
 0x94b   :  { %2795 = vst.msk [vmem:[#allocation2 + $0x1a8] sm:$0xff] %vm701_vm8, %v2731_v49  ;;  %v2736_v37 = vadd.f32 %v17770_v17, %v2249_v50  ;;  %2125 = vst.msk [vmem:[#allocation2 + $0x1f0] sm:$0xff] %vm701_vm8, %v2061_v57  ;;  %v2059_v3 = vadd.f32 %v1984_v60, %v1572_v19  ;;  %15178 = vmatprep.mubr.msk.bf16.mxu0 %vm928_vm7, %v6337_v23  ;;  %v13702_v17 = vld [vmem:[%s21068_s7 + $0xf2] sm:$0xff]  ;;  %v13703_v18 = vld [vmem:[%s21068_s7 + $0xfa] sm:$0xff]  ;;  %v6338_v46 = vpack.c.bf16 %v13701_v5, %v13700_v9 }
 0x94c   :  { %v2247_v53 = vld [vmem:[#allocation2 + $0x1c0] sm:$0xff]  ;;  %v14767_v44 = vpop.f32.mrf.mxu1  ;;  %v18368_v15 = vpop.f32.mrf.mxu0  ;;  %v1573_v49 = vld [vmem:[#allocation2 + $0x1e8] sm:$0xff]  ;;  %v6339_v60 = vpack.c.bf16 %v13703_v18, %v13702_v17 }
 0x94d   :  { %2800 = vst.msk [vmem:[#allocation2 + $0x1d0] sm:$0xff] %vm701_vm8, %v2736_v37  ;;  %v2734_v23 = vadd.f32 %v17783_v47, %v2247_v53  ;;  %2123 = vst.msk [vmem:[#allocation2 + $0x1e0] sm:$0xff] %vm701_vm8, %v2059_v3  ;;  %v2062_v29 = vadd.f32 %v14767_v44, %v1575_v24  ;;  %v2873_v47 = vld [vmem:[#allocation2 + $0x10] sm:$0xff]  ;;  %v13434_v24 = vld [vmem:[%s21068_s7 + $0x21a] sm:$0xff] }
 0x94e   :  { %v2250_v54 = vld [vmem:[#allocation2 + $0x1d8] sm:$0xff]  ;;  %v1987_v57 = vpop.f32.mrf.mxu1  ;;  %v18379_v19 = vpop.f32.mrf.mxu0  ;;  %v13435_v9 = vld [vmem:[%s21068_s7 + $0x22a] sm:$0xff]  ;;  %v2871_v44 = vld [vmem:[#allocation2] sm:$0xff] }
 0x94f   :  { %2798 = vst.msk [vmem:[#allocation2 + $0x1c0] sm:$0xff] %vm701_vm8, %v2734_v23  ;;  %v2737_v32 = vadd.f32 %v17794_v42, %v2250_v54  ;;  %2126 = vst.msk [vmem:[#allocation2 + $0x1f8] sm:$0xff] %vm701_vm8, %v2062_v29  ;;  %v2060_v50 = vadd.f32 %v1987_v57, %v1573_v49  ;;  %v13433_v42 = vld [vmem:[%s21068_s7 + $0x212] sm:$0xff] }
 0x950   :  { %v2248_v37 = vld [vmem:[#allocation2 + $0x1c8] sm:$0xff]  ;;  %v14838_v53 = vpop.f32.mrf.mxu1  ;;  %15001 = vmatmul.mubr.msk.bf16.gmra.mxu1 %vm928_vm7, %v4310_v33  ;;  %v18385_v11 = vpop.f32.mrf.mxu0  ;;  %v13436_v33 = vld [vmem:[%s21068_s7 + $0x232] sm:$0xff] }
 0x951   :  { %2801 = vst.msk [vmem:[#allocation2 + $0x1d8] sm:$0xff] %vm701_vm8, %v2737_v32  ;;  %v2735_v27 = vadd.f32 %v17800_v0, %v2248_v37  ;;  %2124 = vst.msk [vmem:[#allocation2 + $0x1e8] sm:$0xff] %vm701_vm8, %v2060_v50  ;;  %v3360_v3 = vadd.f32 %v14838_v53, %v2873_v47  ;;  %15004 = vmatprep.mubr.msk.bf16.mxu1 %vm928_vm7, %v4311_v39  ;;  %v2874_v29 = vld [vmem:[#allocation2 + $0x18] sm:$0xff]  ;;  %v13704_v39 = vld [vmem:[%s21068_s7 + $0x10a] sm:$0xff]  ;;  %v4313_v47 = vpack.c.bf16 %v13436_v33, %v13435_v9 }
 0x952   :  { %v2253_v5 = vld [vmem:[#allocation2 + $0x1f0] sm:$0xff]  ;;  %v3103_v0 = vpop.f32.mrf.mxu1  ;;  %v18403_v17 = vpop.f32.mrf.mxu0  ;;  %15179 = vmatmul.mubr.msk.bf16.gmra.mxu0 %vm928_vm7, %v6338_v46  ;;  %v4312_v46 = vpack.c.bf16 %v13434_v24, %v13433_v42 }
 0x953   :  { %2799 = vst.msk [vmem:[#allocation2 + $0x1c8] sm:$0xff] %vm701_vm8, %v2735_v27  ;;  %v2740_v18 = vadd.f32 %v17818_v35, %v2253_v5  ;;  %3424 = vst.msk [vmem:[#allocation2 + $0x10] sm:$0xff] %vm701_vm8, %v3360_v3  ;;  %v3358_v23 = vadd.f32 %v3103_v0, %v2871_v44  ;;  %15182 = vmatprep.mubr.msk.bf16.mxu0 %vm928_vm7, %v6339_v60  ;;  %v13705_v54 = vld [vmem:[%s21068_s7 + $0x112] sm:$0xff]  ;;  %v13706_v35 = vld [vmem:[%s21068_s7 + $0x122] sm:$0xff] }
 0x954   :  { %v2251_v49 = vld [vmem:[#allocation2 + $0x1e0] sm:$0xff]  ;;  %v14839_v57 = vpop.f32.mrf.mxu1  ;;  %v18416_v32 = vpop.f32.mrf.mxu0  ;;  %v13707_v50 = vld [vmem:[%s21068_s7 + $0x12a] sm:$0xff]  ;;  %v6340_v24 = vpack.c.bf16 %v13705_v54, %v13704_v39 }
 0x955   :  { %2804 = vst.msk [vmem:[#allocation2 + $0x1f0] sm:$0xff] %vm701_vm8, %v2740_v18  ;;  %v2738_v60 = vadd.f32 %v17831_v2, %v2251_v49  ;;  %3422 = vst.msk [vmem:[#allocation2] sm:$0xff] %vm701_vm8, %v3358_v23  ;;  %v3361_v37 = vadd.f32 %v14839_v57, %v2874_v29  ;;  %v2872_v27 = vld [vmem:[#allocation2 + $0x8] sm:$0xff]  ;;  %v6341_v0 = vpack.c.bf16 %v13707_v50, %v13706_v35  ;;  %v2877_v2 = vld [vmem:[#allocation2 + $0x30] sm:$0xff] }
 0x956   :  { %v2254_v53 = vld [vmem:[#allocation2 + $0x1f8] sm:$0xff]  ;;  %v3106_v3 = vpop.f32.mrf.mxu1  ;;  %v18427_v42 = vpop.f32.mrf.mxu0  ;;  %v13438_v29 = vld [vmem:[%s21068_s7 + $0x24a] sm:$0xff]  ;;  %v2875_v57 = vld [vmem:[#allocation2 + $0x20] sm:$0xff] }
 0x957   :  { %2802 = vst.msk [vmem:[#allocation2 + $0x1e0] sm:$0xff] %vm701_vm8, %v2738_v60  ;;  %v2741_v5 = vadd.f32 %v17842_v40, %v2254_v53  ;;  %3425 = vst.msk [vmem:[#allocation2 + $0x18] sm:$0xff] %vm701_vm8, %v3361_v37  ;;  %v3359_v44 = vadd.f32 %v3106_v3, %v2872_v27  ;;  %v13437_v40 = vld [vmem:[%s21068_s7 + $0x242] sm:$0xff]  ;;  %v13439_v39 = vld [vmem:[%s21068_s7 + $0x25a] sm:$0xff] }
 0x958   :  { %v2252_v18 = vld [vmem:[#allocation2 + $0x1e8] sm:$0xff]  ;;  %v14842_v49 = vpop.f32.mrf.mxu1  ;;  %15005 = vmatmul.mubr.msk.bf16.gmra.mxu1 %vm928_vm7, %v4312_v46  ;;  %v18433_v9 = vpop.f32.mrf.mxu0  ;;  %v2878_v37 = vld [vmem:[#allocation2 + $0x38] sm:$0xff] }
 0x959   :  { %2805 = vst.msk [vmem:[#allocation2 + $0x1f8] sm:$0xff] %vm701_vm8, %v2741_v5  ;;  %v2739_v33 = vadd.f32 %v17848_v52, %v2252_v18  ;;  %3423 = vst.msk [vmem:[#allocation2 + $0x8] sm:$0xff] %vm701_vm8, %v3359_v44  ;;  %v3364_v23 = vadd.f32 %v14842_v49, %v2877_v2  ;;  %15008 = vmatprep.mubr.msk.bf16.mxu1 %vm928_vm7, %v4313_v47  ;;  %v13440_v46 = vld [vmem:[%s21068_s7 + $0x262] sm:$0xff]  ;;  %v13708_v47 = vld [vmem:[%s21068_s7 + $0x13a] sm:$0xff] }
 0x95a   :  { %v3552_v54 = vld [vmem:[#allocation2 + $0x10] sm:$0xff]  ;;  %v3119_v52 = vpop.f32.mrf.mxu1  ;;  %v18451_v35 = vpop.f32.mrf.mxu0  ;;  %15183 = vmatmul.mubr.msk.bf16.gmra.mxu0 %vm928_vm7, %v6340_v24  ;;  %v13709_v53 = vld [vmem:[%s21068_s7 + $0x142] sm:$0xff]  ;;  %v4314_v24 = vpack.c.bf16 %v13438_v29, %v13437_v40  ;;  %v13711_v44 = vld [vmem:[%s21068_s7 + $0x15a] sm:$0xff]  ;;  %v4315_v2 = vpack.c.bf16 %v13440_v46, %v13439_v39 }
 0x95b   :  { %2803 = vst.msk [vmem:[#allocation2 + $0x1e8] sm:$0xff] %vm701_vm8, %v2739_v33  ;;  %v4039_v50 = vadd.f32 %v17866_v56, %v3552_v54  ;;  %3428 = vst.msk [vmem:[#allocation2 + $0x30] sm:$0xff] %vm701_vm8, %v3364_v23  ;;  %v3362_v60 = vadd.f32 %v3119_v52, %v2875_v57  ;;  %15186 = vmatprep.mubr.msk.bf16.mxu0 %vm928_vm7, %v6341_v0  ;;  %v13710_v56 = vld [vmem:[%s21068_s7 + $0x152] sm:$0xff]  ;;  %v2876_v33 = vld [vmem:[#allocation2 + $0x28] sm:$0xff]  ;;  %v6342_v29 = vpack.c.bf16 %v13709_v53, %v13708_v47 }
 0x95c   :  { %v3550_v27 = vld [vmem:[#allocation2] sm:$0xff]  ;;  %v14843_v3 = vpop.f32.mrf.mxu1  ;;  %v18464_v5 = vpop.f32.mrf.mxu0  ;;  %v6343_v52 = vpack.c.bf16 %v13711_v44, %v13710_v56  ;;  %v13443_v47 = vld [vmem:[%s21068_s7 + $0x28a] sm:$0xff] }
 0x95d   :  { %4103 = vst.msk [vmem:[#allocation2 + $0x10] sm:$0xff] %vm701_vm8, %v4039_v50  ;;  %v4037_v0 = vadd.f32 %v17879_v1, %v3550_v27  ;;  %3426 = vst.msk [vmem:[#allocation2 + $0x20] sm:$0xff] %vm701_vm8, %v3362_v60  ;;  %v3365_v18 = vadd.f32 %v14843_v3, %v2878_v37  ;;  %v2881_v1 = vld [vmem:[#allocation2 + $0x50] sm:$0xff]  ;;  %v13442_v37 = vld [vmem:[%s21068_s7 + $0x27a] sm:$0xff] }
 0x95e   :  { %v3553_v49 = vld [vmem:[#allocation2 + $0x18] sm:$0xff]  ;;  %v3122_v23 = vpop.f32.mrf.mxu1  ;;  %v18475_v40 = vpop.f32.mrf.mxu0  ;;  %v2879_v3 = vld [vmem:[#allocation2 + $0x40] sm:$0xff] }
 0x95f   :  { %4101 = vst.msk [vmem:[#allocation2] sm:$0xff] %vm701_vm8, %v4037_v0  ;;  %v4040_v54 = vadd.f32 %v17890_v36, %v3553_v49  ;;  %3429 = vst.msk [vmem:[#allocation2 + $0x38] sm:$0xff] %vm701_vm8, %v3365_v18  ;;  %v3363_v57 = vadd.f32 %v3122_v23, %v2876_v33  ;;  %v13441_v36 = vld [vmem:[%s21068_s7 + $0x272] sm:$0xff] }
 0x960   :  { %v3551_v50 = vld [vmem:[#allocation2 + $0x8] sm:$0xff]  ;;  %v14846_v27 = vpop.f32.mrf.mxu1  ;;  %15009 = vmatmul.mubr.msk.bf16.gmra.mxu1 %vm928_vm7, %v4314_v24  ;;  %v18481_v39 = vpop.f32.mrf.mxu0  ;;  %v13444_v24 = vld [vmem:[%s21068_s7 + $0x292] sm:$0xff] }
 0x961   :  { %4104 = vst.msk [vmem:[#allocation2 + $0x18] sm:$0xff] %vm701_vm8, %v4040_v54  ;;  %v4038_v46 = vadd.f32 %v17896_v7, %v3551_v50  ;;  %3427 = vst.msk [vmem:[#allocation2 + $0x28] sm:$0xff] %vm701_vm8, %v3363_v57  ;;  %v3368_v60 = vadd.f32 %v14846_v27, %v2881_v1  ;;  %15012 = vmatprep.mubr.msk.bf16.mxu1 %vm928_vm7, %v4315_v2  ;;  %v2882_v18 = vld [vmem:[#allocation2 + $0x58] sm:$0xff]  ;;  %v13712_v2 = vld [vmem:[%s21068_s7 + $0x16a] sm:$0xff]  ;;  %v4317_v1 = vpack.c.bf16 %v13444_v24, %v13443_v47 }
 0x962   :  { %v3556_v53 = vld [vmem:[#allocation2 + $0x30] sm:$0xff]  ;;  %v3135_v7 = vpop.f32.mrf.mxu1  ;;  %v18499_v56 = vpop.f32.mrf.mxu0  ;;  %15187 = vmatmul.mubr.msk.bf16.gmra.mxu0 %vm928_vm7, %v6342_v29  ;;  %v4316_v29 = vpack.c.bf16 %v13442_v37, %v13441_v36 }
 0x963   :  { %4102 = vst.msk [vmem:[#allocation2 + $0x8] sm:$0xff] %vm701_vm8, %v4038_v46  ;;  %v4043_v44 = vadd.f32 %v17914_v13, %v3556_v53  ;;  %3432 = vst.msk [vmem:[#allocation2 + $0x50] sm:$0xff] %vm701_vm8, %v3368_v60  ;;  %v3366_v0 = vadd.f32 %v3135_v7, %v2879_v3  ;;  %15190 = vmatprep.mubr.msk.bf16.mxu0 %vm928_vm7, %v6343_v52  ;;  %v13713_v49 = vld [vmem:[%s21068_s7 + $0x172] sm:$0xff]  ;;  %v13714_v13 = vld [vmem:[%s21068_s7 + $0x182] sm:$0xff] }
 0x964   :  { %v3554_v33 = vld [vmem:[#allocation2 + $0x20] sm:$0xff]  ;;  %v14847_v23 = vpop.f32.mrf.mxu1  ;;  %v18512_v54 = vpop.f32.mrf.mxu0  ;;  %v13715_v57 = vld [vmem:[%s21068_s7 + $0x18a] sm:$0xff]  ;;  %v6344_v37 = vpack.c.bf16 %v13713_v49, %v13712_v2 }
 0x965   :  { %4107 = vst.msk [vmem:[#allocation2 + $0x30] sm:$0xff] %vm701_vm8, %v4043_v44  ;;  %v4041_v52 = vadd.f32 %v17927_v20, %v3554_v33  ;;  %3430 = vst.msk [vmem:[#allocation2 + $0x40] sm:$0xff] %vm701_vm8, %v3366_v0  ;;  %v3369_v50 = vadd.f32 %v14847_v23, %v2882_v18  ;;  %v2880_v46 = vld [vmem:[#allocation2 + $0x48] sm:$0xff]  ;;  %v6345_v7 = vpack.c.bf16 %v13715_v57, %v13714_v13  ;;  %v2885_v20 = vld [vmem:[#allocation2 + $0x70] sm:$0xff] }
 0x966   :  { %v3557_v27 = vld [vmem:[#allocation2 + $0x38] sm:$0xff]  ;;  %v3138_v60 = vpop.f32.mrf.mxu1  ;;  %v18523_v36 = vpop.f32.mrf.mxu0  ;;  %v13446_v18 = vld [vmem:[%s21068_s7 + $0x2aa] sm:$0xff]  ;;  %v2883_v23 = vld [vmem:[#allocation2 + $0x60] sm:$0xff] }
 0x967   :  { %4105 = vst.msk [vmem:[#allocation2 + $0x20] sm:$0xff] %vm701_vm8, %v4041_v52  ;;  %v4044_v53 = vadd.f32 %v17938_v21, %v3557_v27  ;;  %3433 = vst.msk [vmem:[#allocation2 + $0x58] sm:$0xff] %vm701_vm8, %v3369_v50  ;;  %v3367_v3 = vadd.f32 %v3138_v60, %v2880_v46  ;;  %v13445_v21 = vld [vmem:[%s21068_s7 + $0x2a2] sm:$0xff]  ;;  %v13447_v2 = vld [vmem:[%s21068_s7 + $0x2ba] sm:$0xff] }
 0x968   :  { %v3555_v44 = vld [vmem:[#allocation2 + $0x28] sm:$0xff]  ;;  %v14850_v33 = vpop.f32.mrf.mxu1  ;;  %15013 = vmatmul.mubr.msk.bf16.gmra.mxu1 %vm928_vm7, %v4316_v29  ;;  %v18529_v47 = vpop.f32.mrf.mxu0  ;;  %v2886_v50 = vld [vmem:[#allocation2 + $0x78] sm:$0xff] }
 0x969   :  { %4108 = vst.msk [vmem:[#allocation2 + $0x38] sm:$0xff] %vm701_vm8, %v4044_v53  ;;  %v4042_v24 = vadd.f32 %v17947_v63, %v3555_v44  ;;  %3431 = vst.msk [vmem:[#allocation2 + $0x48] sm:$0xff] %vm701_vm8, %v3367_v3  ;;  %v3372_v0 = vadd.f32 %v14850_v33, %v2885_v20  ;;  %15016 = vmatprep.mubr.msk.bf16.mxu1 %vm928_vm7, %v4317_v1  ;;  %v13448_v29 = vld [vmem:[%s21068_s7 + $0x2c2] sm:$0xff]  ;;  %v13716_v1 = vld [vmem:[%s21068_s7 + $0x19a] sm:$0xff] }
 0x96a   :  { %v3560_v49 = vld [vmem:[#allocation2 + $0x50] sm:$0xff]  ;;  %v3151_v63 = vpop.f32.mrf.mxu1  ;;  %v18547_v13 = vpop.f32.mrf.mxu0  ;;  %15191 = vmatmul.mubr.msk.bf16.gmra.mxu0 %vm928_vm7, %v6344_v37  ;;  %v13717_v27 = vld [vmem:[%s21068_s7 + $0x1a2] sm:$0xff]  ;;  %v4318_v37 = vpack.c.bf16 %v13446_v18, %v13445_v21  ;;  %v4319_v33 = vpack.c.bf16 %v13448_v29, %v13447_v2 }
 0x96b   :  { %4106 = vst.msk [vmem:[#allocation2 + $0x28] sm:$0xff] %vm701_vm8, %v4042_v24  ;;  %v4047_v57 = vadd.f32 %v17965_v34, %v3560_v49  ;;  %3436 = vst.msk [vmem:[#allocation2 + $0x70] sm:$0xff] %vm701_vm8, %v3372_v0  ;;  %v3370_v52 = vadd.f32 %v3151_v63, %v2883_v23  ;;  %15194 = vmatprep.mubr.msk.bf16.mxu0 %vm928_vm7, %v6345_v7  ;;  %v13718_v34 = vld [vmem:[%s21068_s7 + $0x1e2] sm:$0xff]  ;;  %v13719_v3 = vld [vmem:[%s21068_s7 + $0x1ea] sm:$0xff]  ;;  %v6346_v49 = vpack.c.bf16 %v13717_v27, %v13716_v1 }
 0x96c   :  { %v3558_v46 = vld [vmem:[#allocation2 + $0x40] sm:$0xff]  ;;  %v14851_v60 = vpop.f32.mrf.mxu1  ;;  %v18560_v53 = vpop.f32.mrf.mxu0  ;;  %v2884_v0 = vld [vmem:[#allocation2 + $0x68] sm:$0xff] }
 0x96d   :  { %21120 = vst [vmem:[#allocation17_spill] sm:$0xff] %v18560_v53  ;;  %4111 = vst.msk [vmem:[#allocation2 + $0x50] sm:$0xff] %vm701_vm8, %v4047_v57  ;;  %v21121_v7 = vld [vmem:[#allocation19_spill] sm:$0xff]  ;;  %v3373_v20 = vadd.f32 %v14851_v60, %v2886_v50  ;;  %v6347_v57 = vpack.c.bf16 %v13719_v3, %v13718_v34  ;;  %v13451_v1 = vld [vmem:[%s21068_s7 + $0x2ea] sm:$0xff] }
 0x96e   :  { %v4045_v44 = vadd.f32 %v21121_v7, %v3558_v46  ;;  %3434 = vst.msk [vmem:[#allocation2 + $0x60] sm:$0xff] %vm701_vm8, %v3370_v52  ;;  %v3561_v24 = vld [vmem:[#allocation2 + $0x58] sm:$0xff]  ;;  %v3154_v21 = vpop.f32.mrf.mxu1  ;;  %v18571_v18 = vpop.f32.mrf.mxu0  ;;  %v2889_v46 = vld [vmem:[#allocation2 + $0x90] sm:$0xff]  ;;  %v2887_v60 = vld [vmem:[#allocation2 + $0x80] sm:$0xff] }
 0x96f   :  { %v4048_v23 = vadd.f32 %v17993_v4, %v3561_v24  ;;  %3437 = vst.msk [vmem:[#allocation2 + $0x78] sm:$0xff] %vm701_vm8, %v3373_v20  ;;  %v3371_v63 = vadd.f32 %v3154_v21, %v2884_v0  ;;  %v13449_v4 = vld [vmem:[%s21068_s7 + $0x2d2] sm:$0xff]  ;;  %v13450_v50 = vld [vmem:[%s21068_s7 + $0x2da] sm:$0xff] }
 0x970   :  { %4109 = vst.msk [vmem:[#allocation2 + $0x40] sm:$0xff] %vm701_vm8, %v4045_v44  ;;  %v3559_v53 = vld [vmem:[#allocation2 + $0x48] sm:$0xff]  ;;  %v14854_v7 = vpop.f32.mrf.mxu1  ;;  %15017 = vmatmul.mubr.msk.bf16.gmra.mxu1 %vm928_vm7, %v4318_v37  ;;  %v18577_v2 = vpop.f32.mrf.mxu0  ;;  %v13452_v37 = vld [vmem:[%s21068_s7 + $0x2f2] sm:$0xff]  ;;  %v13720_v20 = vld [vmem:[%s21068_s7 + $0x1fa] sm:$0xff]  ;;  %v4320_v21 = vpack.c.bf16 %v13450_v50, %v13449_v4 }
 0x971   :  { %4112 = vst.msk [vmem:[#allocation2 + $0x58] sm:$0xff] %vm701_vm8, %v4048_v23  ;;  %v4046_v29 = vadd.f32 %v18000_v51, %v3559_v53  ;;  %3435 = vst.msk [vmem:[#allocation2 + $0x68] sm:$0xff] %vm701_vm8, %v3371_v63  ;;  %v3376_v52 = vadd.f32 %v14854_v7, %v2889_v46  ;;  %15020 = vmatprep.mubr.msk.bf16.mxu1 %vm928_vm7, %v4319_v33  ;;  %v2890_v44 = vld [vmem:[#allocation2 + $0x98] sm:$0xff]  ;;  %v13721_v33 = vld [vmem:[%s21068_s7 + $0x202] sm:$0xff]  ;;  %v4321_v46 = vpack.c.bf16 %v13452_v37, %v13451_v1 }
 0x972   :  { %v3564_v27 = vld [vmem:[#allocation2 + $0x70] sm:$0xff]  ;;  %v3167_v51 = vpop.f32.mrf.mxu1  ;;  %v18595_v53 = vpop.f32.mrf.mxu0  ;;  %15195 = vmatmul.mubr.msk.bf16.gmra.mxu0 %vm928_vm7, %v6346_v49  ;;  %v13723_v23 = vld [vmem:[%s21068_s7 + $0x21a] sm:$0xff]  ;;  %v6348_v50 = vpack.c.bf16 %v13721_v33, %v13720_v20 }
 0x973   :  { %4110 = vst.msk [vmem:[#allocation2 + $0x48] sm:$0xff] %vm701_vm8, %v4046_v29  ;;  %v4051_v34 = vadd.f32 %v18018_v31, %v3564_v27  ;;  %3440 = vst.msk [vmem:[#allocation2 + $0x90] sm:$0xff] %vm701_vm8, %v3376_v52  ;;  %v3374_v3 = vadd.f32 %v3167_v51, %v2887_v60  ;;  %15198 = vmatprep.mubr.msk.bf16.mxu0 %vm928_vm7, %v6347_v57  ;;  %v13722_v31 = vld [vmem:[%s21068_s7 + $0x212] sm:$0xff]  ;;  %v2888_v29 = vld [vmem:[#allocation2 + $0x88] sm:$0xff] }
 0x974   :  { %v14855_v0 = vpop.f32.mrf.mxu1  ;;  %v18608_v49 = vpop.f32.mrf.mxu0  ;;  %v6349_v51 = vpack.c.bf16 %v13723_v23, %v13722_v31  ;;  %v13455_v20 = vld [vmem:[%s21068_s7 + $0x31a] sm:$0xff] }
 0x975   :  { %v3562_v24 = vld [vmem:[#allocation2 + $0x60] sm:$0xff]  ;;  %4115 = vst.msk [vmem:[#allocation2 + $0x70] sm:$0xff] %vm701_vm8, %v4051_v34  ;;  %3438 = vst.msk [vmem:[#allocation2 + $0x80] sm:$0xff] %vm701_vm8, %v3374_v3  ;;  %v3377_v57 = vadd.f32 %v14855_v0, %v2890_v44  ;;  %v13454_v44 = vld [vmem:[%s21068_s7 + $0x30a] sm:$0xff] }
 0x976   :  { %v4049_v63 = vadd.f32 %v18032_v25, %v3562_v24  ;;  %v3565_v7 = vld [vmem:[#allocation2 + $0x78] sm:$0xff]  ;;  %v3170_v52 = vpop.f32.mrf.mxu1  ;;  %v18619_v4 = vpop.f32.mrf.mxu0  ;;  %v2893_v25 = vld [vmem:[#allocation2 + $0xb0] sm:$0xff]  ;;  %v2891_v0 = vld [vmem:[#allocation2 + $0xa0] sm:$0xff] }
 0x977   :  { %v4052_v27 = vadd.f32 %v18043_v22, %v3565_v7  ;;  %3441 = vst.msk [vmem:[#allocation2 + $0x98] sm:$0xff] %vm701_vm8, %v3377_v57  ;;  %v3375_v60 = vadd.f32 %v3170_v52, %v2888_v29  ;;  %v13453_v22 = vld [vmem:[%s21068_s7 + $0x302] sm:$0xff]  ;;  %v2894_v57 = vld [vmem:[#allocation2 + $0xb8] sm:$0xff] }
 0x978   :  { %4113 = vst.msk [vmem:[#allocation2 + $0x60] sm:$0xff] %vm701_vm8, %v4049_v63  ;;  %v3563_v34 = vld [vmem:[#allocation2 + $0x68] sm:$0xff]  ;;  %v14858_v24 = vpop.f32.mrf.mxu1  ;;  %15021 = vmatmul.mubr.msk.bf16.gmra.mxu1 %vm928_vm7, %v4320_v21  ;;  %v18625_v1 = vpop.f32.mrf.mxu0  ;;  %v13725_v7 = vld [vmem:[%s21068_s7 + $0x232] sm:$0xff] }
 0x979   :  { %4116 = vst.msk [vmem:[#allocation2 + $0x78] sm:$0xff] %vm701_vm8, %v4052_v27  ;;  %v4050_v37 = vadd.f32 %v18049_v16, %v3563_v34  ;;  %3439 = vst.msk [vmem:[#allocation2 + $0x88] sm:$0xff] %vm701_vm8, %v3375_v60  ;;  %v3380_v3 = vadd.f32 %v14858_v24, %v2893_v25  ;;  %15024 = vmatprep.mubr.msk.bf16.mxu1 %vm928_vm7, %v4321_v46  ;;  %v13456_v21 = vld [vmem:[%s21068_s7 + $0x322] sm:$0xff]  ;;  %v13724_v46 = vld [vmem:[%s21068_s7 + $0x22a] sm:$0xff] }
 0x97a   :  { %v3568_v33 = vld [vmem:[#allocation2 + $0x90] sm:$0xff]  ;;  %v3183_v16 = vpop.f32.mrf.mxu1  ;;  %v18643_v31 = vpop.f32.mrf.mxu0  ;;  %15199 = vmatmul.mubr.msk.bf16.gmra.mxu0 %vm928_vm7, %v6348_v50  ;;  %v4322_v50 = vpack.c.bf16 %v13454_v44, %v13453_v22  ;;  %v4323_v25 = vpack.c.bf16 %v13456_v21, %v13455_v20  ;;  %v6350_v44 = vpack.c.bf16 %v13725_v7, %v13724_v46 }
 0x97b   :  { %4114 = vst.msk [vmem:[#allocation2 + $0x68] sm:$0xff] %vm701_vm8, %v4050_v37  ;;  %v4055_v23 = vadd.f32 %v18067_v38, %v3568_v33  ;;  %3444 = vst.msk [vmem:[#allocation2 + $0xb0] sm:$0xff] %vm701_vm8, %v3380_v3  ;;  %v3378_v63 = vadd.f32 %v3183_v16, %v2891_v0  ;;  %15202 = vmatprep.mubr.msk.bf16.mxu0 %vm928_vm7, %v6349_v51  ;;  %v13726_v38 = vld [vmem:[%s21068_s7 + $0x242] sm:$0xff]  ;;  %v13727_v60 = vld [vmem:[%s21068_s7 + $0x24a] sm:$0xff] }
 0x97c   :  { %v3566_v29 = vld [vmem:[#allocation2 + $0x80] sm:$0xff]  ;;  %v14859_v52 = vpop.f32.mrf.mxu1  ;;  %v18656_v27 = vpop.f32.mrf.mxu0  ;;  %v2892_v37 = vld [vmem:[#allocation2 + $0xa8] sm:$0xff]  ;;  %v6351_v16 = vpack.c.bf16 %v13727_v60, %v13726_v38  ;;  %v13589_v46 = vld [vmem:[%s21068_s7 + $0x31] sm:$0xff] }
 0x97d   :  { %4119 = vst.msk [vmem:[#allocation2 + $0x90] sm:$0xff] %vm701_vm8, %v4055_v23  ;;  %v4053_v51 = vadd.f32 %v18080_v10, %v3566_v29  ;;  %3442 = vst.msk [vmem:[#allocation2 + $0xa0] sm:$0xff] %vm701_vm8, %v3378_v63  ;;  %v3381_v34 = vadd.f32 %v14859_v52, %v2894_v57  ;;  %v2897_v10 = vld [vmem:[#allocation2 + $0xd0] sm:$0xff]  ;;  %v13458_v57 = vld [vmem:[%s21068_s7 + $0x33a] sm:$0xff] }
 0x97e   :  { %v3569_v24 = vld [vmem:[#allocation2 + $0x98] sm:$0xff]  ;;  %v3186_v3 = vpop.f32.mrf.mxu1  ;;  %v18667_v22 = vpop.f32.mrf.mxu0  ;;  %v2895_v52 = vld [vmem:[#allocation2 + $0xc0] sm:$0xff] }
 0x97f   :  { %4117 = vst.msk [vmem:[#allocation2 + $0x80] sm:$0xff] %vm701_vm8, %v4053_v51  ;;  %v4056_v33 = vadd.f32 %v18091_v62, %v3569_v24  ;;  %3445 = vst.msk [vmem:[#allocation2 + $0xb8] sm:$0xff] %vm701_vm8, %v3381_v34  ;;  %v3379_v0 = vadd.f32 %v3186_v3, %v2892_v37  ;;  %v13457_v62 = vld [vmem:[%s21068_s7 + $0x332] sm:$0xff]  ;;  %v13729_v24 = vld [vmem:[%s21068_s7 + $0x262] sm:$0xff] }
 0x980   :  { %v3567_v23 = vld [vmem:[#allocation2 + $0x88] sm:$0xff]  ;;  %v14862_v29 = vpop.f32.mrf.mxu1  ;;  %15025 = vmatmul.mubr.msk.bf16.gmra.mxu1 %vm928_vm7, %v4322_v50  ;;  %v18673_v20 = vpop.f32.mrf.mxu0  ;;  %v13590_v50 = vld [vmem:[%s21068_s7 + $0x39] sm:$0xff] }
 0x981   :  { %4120 = vst.msk [vmem:[#allocation2 + $0x98] sm:$0xff] %vm701_vm8, %v4056_v33  ;;  %v4054_v21 = vadd.f32 %v18097_v45, %v3567_v23  ;;  %3443 = vst.msk [vmem:[#allocation2 + $0xa8] sm:$0xff] %vm701_vm8, %v3379_v0  ;;  %v3384_v63 = vadd.f32 %v14862_v29, %v2897_v10  ;;  %15028 = vmatprep.mubr.msk.bf16.mxu1 %vm928_vm7, %v4323_v25  ;;  %v2898_v34 = vld [vmem:[#allocation2 + $0xd8] sm:$0xff]  ;;  %v5652_v10 = vpack.c.bf16 %v13590_v50, %v13589_v46 }
 0x982   :  { %v3572_v7 = vld [vmem:[#allocation2 + $0xb0] sm:$0xff]  ;;  %v3199_v45 = vpop.f32.mrf.mxu1  ;;  %v18691_v38 = vpop.f32.mrf.mxu0  ;;  %15203 = vmatmul.mubr.msk.bf16.gmra.mxu0 %vm928_vm7, %v6350_v44  ;;  %v13728_v25 = vld [vmem:[%s21068_s7 + $0x25a] sm:$0xff]  ;;  %v4324_v44 = vpack.c.bf16 %v13458_v57, %v13457_v62 }
 0x983   :  { %4118 = vst.msk [vmem:[#allocation2 + $0x88] sm:$0xff] %vm701_vm8, %v4054_v21  ;;  %v4059_v60 = vadd.f32 %v18115_v28, %v3572_v7  ;;  %3448 = vst.msk [vmem:[#allocation2 + $0xd0] sm:$0xff] %vm701_vm8, %v3384_v63  ;;  %v3382_v51 = vadd.f32 %v3199_v45, %v2895_v52  ;;  %15206 = vmatprep.mubr.msk.bf16.mxu0 %vm928_vm7, %v6351_v16  ;;  %v13730_v28 = vld [vmem:[%s21068_s7 + $0x272] sm:$0xff]  ;;  %v13731_v0 = vld [vmem:[%s21068_s7 + $0x27a] sm:$0xff]  ;;  %v6352_v57 = vpack.c.bf16 %v13729_v24, %v13728_v25 }
 0x984   :  { %v3570_v37 = vld [vmem:[#allocation2 + $0xa0] sm:$0xff]  ;;  %v14863_v3 = vpop.f32.mrf.mxu1  ;;  %v18704_v33 = vpop.f32.mrf.mxu0  ;;  %v2896_v21 = vld [vmem:[#allocation2 + $0xc8] sm:$0xff]  ;;  %v6353_v45 = vpack.c.bf16 %v13731_v0, %v13730_v28 }
 0x985   :  { %4123 = vst.msk [vmem:[#allocation2 + $0xb0] sm:$0xff] %vm701_vm8, %v4059_v60  ;;  %v4057_v16 = vadd.f32 %v18128_v48, %v3570_v37  ;;  %3446 = vst.msk [vmem:[#allocation2 + $0xc0] sm:$0xff] %vm701_vm8, %v3382_v51  ;;  %v3385_v23 = vadd.f32 %v14863_v3, %v2898_v34  ;;  %v2901_v48 = vld [vmem:[#allocation2 + $0xf0] sm:$0xff]  ;;  %v13593_v25 = vld [vmem:[%s21068_s7 + $0x61] sm:$0xff] }
 0x986   :  { %v3573_v29 = vld [vmem:[#allocation2 + $0xb8] sm:$0xff]  ;;  %v3202_v63 = vpop.f32.mrf.mxu1  ;;  %v18715_v62 = vpop.f32.mrf.mxu0  ;;  %v2899_v3 = vld [vmem:[#allocation2 + $0xe0] sm:$0xff] }
 0x987   :  { %4121 = vst.msk [vmem:[#allocation2 + $0xa0] sm:$0xff] %vm701_vm8, %v4057_v16  ;;  %v4060_v7 = vadd.f32 %v18139_v26, %v3573_v29  ;;  %3449 = vst.msk [vmem:[#allocation2 + $0xd8] sm:$0xff] %vm701_vm8, %v3385_v23  ;;  %v3383_v52 = vadd.f32 %v3202_v63, %v2896_v21  ;;  %v13591_v26 = vld [vmem:[%s21068_s7 + $0x49] sm:$0xff]  ;;  %v13592_v34 = vld [vmem:[%s21068_s7 + $0x51] sm:$0xff] }
 0x988   :  { %v3571_v60 = vld [vmem:[#allocation2 + $0xa8] sm:$0xff]  ;;  %v14866_v37 = vpop.f32.mrf.mxu1  ;;  %15029 = vmatmul.mubr.msk.bf16.gmra.mxu1 %vm928_vm7, %v4324_v44  ;;  %v18721_v46 = vpop.f32.mrf.mxu0  ;;  %v2902_v23 = vld [vmem:[#allocation2 + $0xf8] sm:$0xff] }
 0x989   :  { %4124 = vst.msk [vmem:[#allocation2 + $0xb8] sm:$0xff] %vm701_vm8, %v4060_v7  ;;  %v4058_v50 = vadd.f32 %v18145_v12, %v3571_v60  ;;  %3447 = vst.msk [vmem:[#allocation2 + $0xc8] sm:$0xff] %vm701_vm8, %v3383_v52  ;;  %v3388_v51 = vadd.f32 %v14866_v37, %v2901_v48  ;;  %15100 = vmatprep.mubr.msk.bf16.mxu1 %vm928_vm7, %v5652_v10  ;;  %v13594_v44 = vld [vmem:[%s21068_s7 + $0x69] sm:$0xff]  ;;  %v13733_v29 = vld [vmem:[%s21068_s7 + $0x292] sm:$0xff] }
 0x98a   :  { %v3576_v24 = vld [vmem:[#allocation2 + $0xd0] sm:$0xff]  ;;  %v3215_v12 = vpop.f32.mrf.mxu1  ;;  %v18739_v28 = vpop.f32.mrf.mxu0  ;;  %15207 = vmatmul.mubr.msk.bf16.gmra.mxu0 %vm928_vm7, %v6352_v57  ;;  %v5653_v57 = vpack.c.bf16 %v13592_v34, %v13591_v26  ;;  %v5654_v48 = vpack.c.bf16 %v13594_v44, %v13593_v25  ;;  %v21125_v44 = vld [vmem:[#allocation11_spill] sm:$0xff] }
 0x98b   :  { %4122 = vst.msk [vmem:[#allocation2 + $0xa8] sm:$0xff] %vm701_vm8, %v4058_v50  ;;  %v4063_v0 = vadd.f32 %v18163_v58, %v3576_v24  ;;  %3452 = vst.msk [vmem:[#allocation2 + $0xf0] sm:$0xff] %vm701_vm8, %v3388_v51  ;;  %v3386_v16 = vadd.f32 %v3215_v12, %v2899_v3  ;;  %15210 = vmatprep.mubr.msk.bf16.mxu0 %vm928_vm7, %v6353_v45  ;;  %v13732_v10 = vld [vmem:[%s21068_s7 + $0x28a] sm:$0xff]  ;;  %v13734_v58 = vld [vmem:[%s21068_s7 + $0x2a2] sm:$0xff] }
 0x98c   :  { %v3574_v21 = vld [vmem:[#allocation2 + $0xc0] sm:$0xff]  ;;  %v14867_v63 = vpop.f32.mrf.mxu1  ;;  %v18752_v7 = vpop.f32.mrf.mxu0  ;;  %v13735_v52 = vld [vmem:[%s21068_s7 + $0x2aa] sm:$0xff]  ;;  %v6354_v34 = vpack.c.bf16 %v13733_v29, %v13732_v10  ;;  %v21123_v24 = vld [vmem:[#allocation10_spill] sm:$0xff] }
 0x98d   :  { %21122 = vst [vmem:[#allocation18_spill] sm:$0xff] %v18752_v7  ;;  %4127 = vst.msk [vmem:[#allocation2 + $0xd0] sm:$0xff] %vm701_vm8, %v4063_v0  ;;  %v4061_v45 = vadd.f32 %v18176_v61, %v3574_v21  ;;  %v3389_v60 = vadd.f32 %v14867_v63, %v2902_v23  ;;  %v2900_v50 = vld [vmem:[#allocation2 + $0xe8] sm:$0xff]  ;;  %v6355_v0 = vpack.c.bf16 %v13735_v52, %v13734_v58  ;;  %v2905_v61 = vld [vmem:[#allocation2 + $0x110] sm:$0xff] }
 0x98e   :  { %3450 = vst.msk [vmem:[#allocation2 + $0xe0] sm:$0xff] %vm701_vm8, %v3386_v16  ;;  %v3577_v37 = vld [vmem:[#allocation2 + $0xd8] sm:$0xff]  ;;  %v3218_v51 = vpop.f32.mrf.mxu1  ;;  %v18763_v26 = vpop.f32.mrf.mxu0  ;;  %v13596_v29 = vld [vmem:[%s21068_s7 + $0x81] sm:$0xff] }
 0x98f   :  { %4125 = vst.msk [vmem:[#allocation2 + $0xc0] sm:$0xff] %vm701_vm8, %v4061_v45  ;;  %v4064_v3 = vadd.f32 %v21123_v24, %v3577_v37  ;;  %3453 = vst.msk [vmem:[#allocation2 + $0xf8] sm:$0xff] %vm701_vm8, %v3389_v60  ;;  %v3387_v12 = vadd.f32 %v3218_v51, %v2900_v50  ;;  %v13595_v10 = vld [vmem:[%s21068_s7 + $0x79] sm:$0xff]  ;;  %v13597_v63 = vld [vmem:[%s21068_s7 + $0x91] sm:$0xff] }
 0x990   :  { %v3575_v7 = vld [vmem:[#allocation2 + $0xc8] sm:$0xff]  ;;  %v14870_v21 = vpop.f32.mrf.mxu1  ;;  %15101 = vmatmul.mubr.msk.bf16.vlgmr.msra.gmra.mxu1 %vm928_vm7, %v5653_v57  ;;  %v18769_v25 = vpop.f32.mrf.mxu0  ;;  %v2903_v58 = vld [vmem:[#allocation2 + $0x100] sm:$0xff]  ;;  %v2906_v50 = vld [vmem:[#allocation2 + $0x118] sm:$0xff] }
 0x991   :  { %21124 = vst [vmem:[#allocation19_spill] sm:$0xff] %v18769_v25  ;;  %4128 = vst.msk [vmem:[#allocation2 + $0xd8] sm:$0xff] %vm701_vm8, %v4064_v3  ;;  %v4062_v16 = vadd.f32 %v21125_v44, %v3575_v7  ;;  %v3392_v23 = vadd.f32 %v14870_v21, %v2905_v61  ;;  %15104 = vmatprep.mubr.msk.bf16.mxu1 %vm928_vm7, %v5654_v48  ;;  %v13598_v52 = vld [vmem:[%s21068_s7 + $0x99] sm:$0xff]  ;;  %v21127_v60 = vld [vmem:[#allocation12_spill] sm:$0xff] }
 0x992   :  { %3451 = vst.msk [vmem:[#allocation2 + $0xe8] sm:$0xff] %vm701_vm8, %v3387_v12  ;;  %v3580_v57 = vld [vmem:[#allocation2 + $0xf0] sm:$0xff]  ;;  %v3231_v7 = vpop.f32.mrf.mxu1  ;;  %v18787_v45 = vpop.f32.mrf.mxu0  ;;  %15211 = vmatmul.mubr.msk.bf16.gmra.mxu0 %vm928_vm7, %v6354_v34  ;;  %v13736_v51 = vld [vmem:[%s21068_s7 + $0x2ba] sm:$0xff]  ;;  %v13737_v24 = vld [vmem:[%s21068_s7 + $0x2c2] sm:$0xff]  ;;  %v5655_v12 = vpack.c.bf16 %v13596_v29, %v13595_v10 }
 0x993   :  { %21126 = vst [vmem:[#allocation10_spill] sm:$0xff] %v18787_v45  ;;  %4126 = vst.msk [vmem:[#allocation2 + $0xc8] sm:$0xff] %vm701_vm8, %v4062_v16  ;;  %v4067_v48 = vadd.f32 %v21127_v60, %v3580_v57  ;;  %v3390_v37 = vadd.f32 %v3231_v7, %v2903_v58  ;;  %15214 = vmatprep.mubr.msk.bf16.mxu0 %vm928_vm7, %v6355_v0  ;;  %v13738_v21 = vld [vmem:[%s21068_s7 + $0x2d2] sm:$0xff]  ;;  %v13739_v0 = vld [vmem:[%s21068_s7 + $0x2da] sm:$0xff]  ;;  %v5656_v57 = vpack.c.bf16 %v13598_v52, %v13597_v63 }
 0x994   :  { %3456 = vst.msk [vmem:[#allocation2 + $0x110] sm:$0xff] %vm701_vm8, %v3392_v23  ;;  %v14871_v34 = vpop.f32.mrf.mxu1  ;;  %v18800_v61 = vpop.f32.mrf.mxu0  ;;  %v21129_v44 = vld [vmem:[#allocation13_spill] sm:$0xff]  ;;  %v6356_v60 = vpack.c.bf16 %v13737_v24, %v13736_v51  ;;  %v21131_v52 = vld [vmem:[#allocation14_spill] sm:$0xff]  ;;  %v13601_v24 = vld [vmem:[%s21068_s7 + $0xc1] sm:$0xff] }
 0x995   :  { %v3578_v3 = vld [vmem:[#allocation2 + $0xe0] sm:$0xff]  ;;  %21128 = vst [vmem:[#allocation11_spill] sm:$0xff] %v18800_v61  ;;  %4131 = vst.msk [vmem:[#allocation2 + $0xf0] sm:$0xff] %vm701_vm8, %v4067_v48  ;;  %v3393_v23 = vadd.f32 %v14871_v34, %v2906_v50  ;;  %v2904_v10 = vld [vmem:[#allocation2 + $0x108] sm:$0xff]  ;;  %v6357_v48 = vpack.c.bf16 %v13739_v0, %v13738_v21 }
 0x996   :  { %v4065_v16 = vadd.f32 %v21129_v44, %v3578_v3  ;;  %3454 = vst.msk [vmem:[#allocation2 + $0x100] sm:$0xff] %vm701_vm8, %v3390_v37  ;;  %v3581_v58 = vld [vmem:[#allocation2 + $0xf8] sm:$0xff]  ;;  %v3234_v29 = vpop.f32.mrf.mxu1  ;;  %v18811_v7 = vpop.f32.mrf.mxu0  ;;  %v2909_v3 = vld [vmem:[#allocation2 + $0x130] sm:$0xff] }
 0x997   :  { %v4068_v61 = vadd.f32 %v18235_v8, %v3581_v58  ;;  %3457 = vst.msk [vmem:[#allocation2 + $0x118] sm:$0xff] %vm701_vm8, %v3393_v23  ;;  %v3391_v45 = vadd.f32 %v3234_v29, %v2904_v10  ;;  %v13599_v8 = vld [vmem:[%s21068_s7 + $0xa9] sm:$0xff]  ;;  %v13600_v51 = vld [vmem:[%s21068_s7 + $0xb1] sm:$0xff]  ;;  %v21133_v21 = vld [vmem:[#allocation15_spill] sm:$0xff] }
 0x998   :  { %4129 = vst.msk [vmem:[#allocation2 + $0xe0] sm:$0xff] %vm701_vm8, %v4065_v16  ;;  %v14874_v44 = vpop.f32.mrf.mxu1  ;;  %15105 = vmatmul.mubr.msk.bf16.gmra.mxu1 %vm928_vm7, %v5655_v12  ;;  %v18817_v63 = vpop.f32.mrf.mxu0  ;;  %v2907_v12 = vld [vmem:[#allocation2 + $0x120] sm:$0xff]  ;;  %v2910_v23 = vld [vmem:[#allocation2 + $0x138] sm:$0xff] }
 0x999   :  { %v3579_v25 = vld [vmem:[#allocation2 + $0xe8] sm:$0xff]  ;;  %21130 = vst [vmem:[#allocation12_spill] sm:$0xff] %v18817_v63  ;;  %4132 = vst.msk [vmem:[#allocation2 + $0xf8] sm:$0xff] %vm701_vm8, %v4068_v61  ;;  %v3396_v50 = vadd.f32 %v14874_v44, %v2909_v3  ;;  %15108 = vmatprep.mubr.msk.bf16.mxu1 %vm928_vm7, %v5656_v57  ;;  %v13741_v58 = vld [vmem:[%s21068_s7 + $0x2f2] sm:$0xff] }
 0x99a   :  { %v4066_v37 = vadd.f32 %v21131_v52, %v3579_v25  ;;  %3455 = vst.msk [vmem:[#allocation2 + $0x108] sm:$0xff] %vm701_vm8, %v3391_v45  ;;  %v3247_v25 = vpop.f32.mrf.mxu1  ;;  %v13602_v45 = vld [vmem:[%s21068_s7 + $0xc9] sm:$0xff]  ;;  %v18835_v61 = vpop.f32.mrf.mxu0  ;;  %15215 = vmatmul.mubr.msk.bf16.gmra.mxu0 %vm928_vm7, %v6356_v60  ;;  %v5657_v60 = vpack.c.bf16 %v13600_v51, %v13599_v8 }
 0x99b   :  { %v3584_v34 = vld [vmem:[#allocation2 + $0x110] sm:$0xff]  ;;  %21132 = vst [vmem:[#allocation13_spill] sm:$0xff] %v18835_v61  ;;  %3460 = vst.msk [vmem:[#allocation2 + $0x130] sm:$0xff] %vm701_vm8, %v3396_v50  ;;  %v3394_v16 = vadd.f32 %v3247_v25, %v2907_v12  ;;  %15218 = vmatprep.mubr.msk.bf16.mxu0 %vm928_vm7, %v6357_v48  ;;  %v13742_v44 = vld [vmem:[%s21068_s7 + $0x302] sm:$0xff] }
 0x99c   :  { %4130 = vst.msk [vmem:[#allocation2 + $0xe8] sm:$0xff] %vm701_vm8, %v4066_v37  ;;  %v4071_v0 = vadd.f32 %v21133_v21, %v3584_v34  ;;  %v13740_v57 = vld [vmem:[%s21068_s7 + $0x2ea] sm:$0xff]  ;;  %v14875_v29 = vpop.f32.mrf.mxu1  ;;  %v18848_v3 = vpop.f32.mrf.mxu0  ;;  %v21135_v52 = vld [vmem:[#allocation16_spill] sm:$0xff]  ;;  %v5658_v34 = vpack.c.bf16 %v13602_v45, %v13601_v24 }
 0x99d   :  { %v3582_v10 = vld [vmem:[#allocation2 + $0x100] sm:$0xff]  ;;  %21134 = vst [vmem:[#allocation14_spill] sm:$0xff] %v18848_v3  ;;  %v13743_v48 = vld [vmem:[%s21068_s7 + $0x30a] sm:$0xff]  ;;  %3458 = vst.msk [vmem:[#allocation2 + $0x120] sm:$0xff] %vm701_vm8, %v3394_v16  ;;  %v3397_v50 = vadd.f32 %v14875_v29, %v2910_v23  ;;  %v6358_v21 = vpack.c.bf16 %v13741_v58, %v13740_v57 }
 0x99e   :  { %4135 = vst.msk [vmem:[#allocation2 + $0x110] sm:$0xff] %vm701_vm8, %v4071_v0  ;;  %v4069_v37 = vadd.f32 %v21135_v52, %v3582_v10  ;;  %v3585_v12 = vld [vmem:[#allocation2 + $0x118] sm:$0xff]  ;;  %v2908_v8 = vld [vmem:[#allocation2 + $0x128] sm:$0xff]  ;;  %v3250_v51 = vpop.f32.mrf.mxu1  ;;  %v18859_v25 = vpop.f32.mrf.mxu0  ;;  %v6359_v0 = vpack.c.bf16 %v13743_v48, %v13742_v44  ;;  %v2913_v10 = vld [vmem:[#allocation2 + $0x150] sm:$0xff] }
 0x99f   :  { %v4072_v3 = vadd.f32 %v18283_v55, %v3585_v12  ;;  %3461 = vst.msk [vmem:[#allocation2 + $0x138] sm:$0xff] %vm701_vm8, %v3397_v50  ;;  %v3395_v61 = vadd.f32 %v3250_v51, %v2908_v8  ;;  %v13603_v55 = vld [vmem:[%s21068_s7 + $0xd9] sm:$0xff]  ;;  %v13604_v23 = vld [vmem:[%s21068_s7 + $0xe1] sm:$0xff]  ;;  %v13605_v57 = vld [vmem:[%s21068_s7 + $0xf1] sm:$0xff] }
 0x9a0   :  { %4133 = vst.msk [vmem:[#allocation2 + $0x100] sm:$0xff] %vm701_vm8, %v4069_v37  ;;  %v14878_v52 = vpop.f32.mrf.mxu1  ;;  %15109 = vmatmul.mubr.msk.bf16.gmra.mxu1 %vm928_vm7, %v5657_v60  ;;  %v18865_v24 = vpop.f32.mrf.mxu0  ;;  %v2911_v29 = vld [vmem:[#allocation2 + $0x140] sm:$0xff]  ;;  %v2914_v44 = vld [vmem:[#allocation2 + $0x158] sm:$0xff]  ;;  %v5659_v12 = vpack.c.bf16 %v13604_v23, %v13603_v55 }
 0x9a1   :  { %v3583_v63 = vld [vmem:[#allocation2 + $0x108] sm:$0xff]  ;;  %4136 = vst.msk [vmem:[#allocation2 + $0x118] sm:$0xff] %vm701_vm8, %v4072_v3  ;;  %3459 = vst.msk [vmem:[#allocation2 + $0x128] sm:$0xff] %vm701_vm8, %v3395_v61  ;;  %v3400_v16 = vadd.f32 %v14878_v52, %v2913_v10  ;;  %15112 = vmatprep.mubr.msk.bf16.mxu1 %vm928_vm7, %v5658_v34  ;;  %v13744_v48 = vld [vmem:[%s21068_s7 + $0x31a] sm:$0xff] }
 0x9a2   :  { %v4070_v45 = vadd.f32 %v18289_v41, %v3583_v63  ;;  %v3588_v58 = vld [vmem:[#allocation2 + $0x130] sm:$0xff]  ;;  %v3263_v41 = vpop.f32.mrf.mxu1  ;;  %v13606_v63 = vld [vmem:[%s21068_s7 + $0xf9] sm:$0xff]  ;;  %v18883_v61 = vpop.f32.mrf.mxu0  ;;  %15219 = vmatmul.mubr.msk.bf16.gmra.mxu0 %vm928_vm7, %v6358_v21  ;;  %v13745_v37 = vld [vmem:[%s21068_s7 + $0x322] sm:$0xff] }
 0x9a3   :  { %v4075_v60 = vadd.f32 %v18307_v6, %v3588_v58  ;;  %3464 = vst.msk [vmem:[#allocation2 + $0x150] sm:$0xff] %vm701_vm8, %v3400_v16  ;;  %v3398_v3 = vadd.f32 %v3263_v41, %v2911_v29  ;;  %15222 = vmatprep.mubr.msk.bf16.mxu0 %vm928_vm7, %v6359_v0  ;;  %v13746_v6 = vld [vmem:[%s21068_s7 + $0x332] sm:$0xff]  ;;  %v13747_v51 = vld [vmem:[%s21068_s7 + $0x33a] sm:$0xff]  ;;  %v5660_v10 = vpack.c.bf16 %v13606_v63, %v13605_v57 }
 0x9a4   :  { %4134 = vst.msk [vmem:[#allocation2 + $0x108] sm:$0xff] %vm701_vm8, %v4070_v45  ;;  %v3586_v50 = vld [vmem:[#allocation2 + $0x120] sm:$0xff]  ;;  %v14879_v34 = vpop.f32.mrf.mxu1  ;;  %v18896_v8 = vpop.f32.mrf.mxu0  ;;  %v2912_v45 = vld [vmem:[#allocation2 + $0x148] sm:$0xff]  ;;  %v6360_v23 = vpack.c.bf16 %v13745_v37, %v13744_v48  ;;  %v6361_v41 = vpack.c.bf16 %v13747_v51, %v13746_v6 }
 0x9a5   :  { %4139 = vst.msk [vmem:[#allocation2 + $0x130] sm:$0xff] %vm701_vm8, %v4075_v60  ;;  %v4073_v21 = vadd.f32 %v18320_v43, %v3586_v50  ;;  %3462 = vst.msk [vmem:[#allocation2 + $0x140] sm:$0xff] %vm701_vm8, %v3398_v3  ;;  %v3401_v0 = vadd.f32 %v14879_v34, %v2914_v44  ;;  %v2917_v43 = vld [vmem:[#allocation2 + $0x170] sm:$0xff]  ;;  %v13609_v48 = vld [vmem:[%s21068_s7 + $0x121] sm:$0xff] }
 0x9a6   :  { %v3589_v52 = vld [vmem:[#allocation2 + $0x138] sm:$0xff]  ;;  %v3266_v16 = vpop.f32.mrf.mxu1  ;;  %v18907_v55 = vpop.f32.mrf.mxu0  ;;  %v2915_v34 = vld [vmem:[#allocation2 + $0x160] sm:$0xff] }
 0x9a7   :  { %4137 = vst.msk [vmem:[#allocation2 + $0x120] sm:$0xff] %vm701_vm8, %v4073_v21  ;;  %v4076_v58 = vadd.f32 %v18331_v59, %v3589_v52  ;;  %3465 = vst.msk [vmem:[#allocation2 + $0x158] sm:$0xff] %vm701_vm8, %v3401_v0  ;;  %v3399_v29 = vadd.f32 %v3266_v16, %v2912_v45  ;;  %v13607_v59 = vld [vmem:[%s21068_s7 + $0x109] sm:$0xff]  ;;  %v13608_v44 = vld [vmem:[%s21068_s7 + $0x111] sm:$0xff] }
 0x9a8   :  { %v3587_v60 = vld [vmem:[#allocation2 + $0x128] sm:$0xff]  ;;  %v14882_v50 = vpop.f32.mrf.mxu1  ;;  %15113 = vmatmul.mubr.msk.bf16.gmra.mxu1 %vm928_vm7, %v5659_v12  ;;  %v18913_v57 = vpop.f32.mrf.mxu0  ;;  %v2918_v45 = vld [vmem:[#allocation2 + $0x178] sm:$0xff] }
 0x9a9   :  { %4140 = vst.msk [vmem:[#allocation2 + $0x138] sm:$0xff] %vm701_vm8, %v4076_v58  ;;  %v4074_v63 = vadd.f32 %v18337_v14, %v3587_v60  ;;  %3463 = vst.msk [vmem:[#allocation2 + $0x148] sm:$0xff] %vm701_vm8, %v3399_v29  ;;  %v3404_v3 = vadd.f32 %v14882_v50, %v2917_v43  ;;  %15116 = vmatprep.mubr.msk.bf16.mxu1 %vm928_vm7, %v5660_v10  ;;  %v13610_v12 = vld [vmem:[%s21068_s7 + $0x129] sm:$0xff]  ;;  %v13749_v10 = vld [vmem:[%s21068_s7 + $0x352] sm:$0xff] }
 0x9aa   :  { %v3592_v37 = vld [vmem:[#allocation2 + $0x150] sm:$0xff]  ;;  %v3279_v14 = vpop.f32.mrf.mxu1  ;;  %v18931_v6 = vpop.f32.mrf.mxu0  ;;  %15223 = vmatmul.mubr.msk.bf16.gmra.mxu0 %vm928_vm7, %v6360_v23  ;;  %v5661_v23 = vpack.c.bf16 %v13608_v44, %v13607_v59  ;;  %v2916_v43 = vld [vmem:[#allocation2 + $0x168] sm:$0xff] }
 0x9ab   :  { %4138 = vst.msk [vmem:[#allocation2 + $0x128] sm:$0xff] %vm701_vm8, %v4074_v63  ;;  %v4079_v51 = vadd.f32 %v18355_v30, %v3592_v37  ;;  %3468 = vst.msk [vmem:[#allocation2 + $0x170] sm:$0xff] %vm701_vm8, %v3404_v3  ;;  %v3402_v21 = vadd.f32 %v3279_v14, %v2915_v34  ;;  %15226 = vmatprep.mubr.msk.bf16.mxu0 %vm928_vm7, %v6361_v41  ;;  %v13748_v0 = vld [vmem:[%s21068_s7 + $0x34a] sm:$0xff]  ;;  %v5662_v41 = vpack.c.bf16 %v13610_v12, %v13609_v48 }
 0x9ac   :  { %v3590_v52 = vld [vmem:[#allocation2 + $0x140] sm:$0xff]  ;;  %v14883_v16 = vpop.f32.mrf.mxu1  ;;  %v18944_v58 = vpop.f32.mrf.mxu0  ;;  %v6362_v3 = vpack.c.bf16 %v13749_v10, %v13748_v0  ;;  %v2921_v34 = vld [vmem:[#allocation2 + $0x190] sm:$0xff] }
 0x9ad   :  { %4143 = vst.msk [vmem:[#allocation2 + $0x150] sm:$0xff] %vm701_vm8, %v4079_v51  ;;  %v4077_v30 = vadd.f32 %v18368_v15, %v3590_v52  ;;  %3466 = vst.msk [vmem:[#allocation2 + $0x160] sm:$0xff] %vm701_vm8, %v3402_v21  ;;  %v3405_v29 = vadd.f32 %v14883_v16, %v2918_v45  ;;  %v13612_v51 = vld [vmem:[%s21068_s7 + $0x141] sm:$0xff]  ;;  %v13613_v21 = vld [vmem:[%s21068_s7 + $0x151] sm:$0xff] }
 0x9ae   :  { %v3593_v60 = vld [vmem:[#allocation2 + $0x158] sm:$0xff]  ;;  %v3282_v50 = vpop.f32.mrf.mxu1  ;;  %v18949_v63 = vpop.f32.mrf.mxu0  ;;  %v2919_v10 = vld [vmem:[#allocation2 + $0x180] sm:$0xff] }
 0x9af   :  { %4141 = vst.msk [vmem:[#allocation2 + $0x140] sm:$0xff] %vm701_vm8, %v4077_v30  ;;  %v4080_v59 = vadd.f32 %v18379_v19, %v3593_v60  ;;  %3469 = vst.msk [vmem:[#allocation2 + $0x178] sm:$0xff] %vm701_vm8, %v3405_v29  ;;  %v3403_v44 = vadd.f32 %v3282_v50, %v2916_v43  ;;  %v13611_v19 = vld [vmem:[%s21068_s7 + $0x139] sm:$0xff] }
 0x9b0   :  { %v3591_v37 = vld [vmem:[#allocation2 + $0x148] sm:$0xff]  ;;  %v14886_v15 = vpop.f32.mrf.mxu1  ;;  %15117 = vmatmul.mubr.msk.bf16.gmra.mxu1 %vm928_vm7, %v5661_v23  ;;  %v18955_v14 = vpop.f32.mrf.mxu0  ;;  %v13614_v52 = vld [vmem:[%s21068_s7 + $0x159] sm:$0xff]  ;;  %v5663_v60 = vpack.c.bf16 %v13612_v51, %v13611_v19  ;;  %v2925_v19 = vld [vmem:[#allocation2 + $0x1b0] sm:$0xff] }
 0x9b1   :  { %4144 = vst.msk [vmem:[#allocation2 + $0x158] sm:$0xff] %vm701_vm8, %v4080_v59  ;;  %v4078_v48 = vadd.f32 %v18385_v11, %v3591_v37  ;;  %3467 = vst.msk [vmem:[#allocation2 + $0x168] sm:$0xff] %vm701_vm8, %v3403_v44  ;;  %v3408_v12 = vadd.f32 %v14886_v15, %v2921_v34  ;;  %15120 = vmatprep.mubr.msk.bf16.mxu1 %vm928_vm7, %v5662_v41  ;;  %v2922_v29 = vld [vmem:[#allocation2 + $0x198] sm:$0xff]  ;;  %v5664_v59 = vpack.c.bf16 %v13614_v52, %v13613_v21  ;;  %v2920_v37 = vld [vmem:[#allocation2 + $0x188] sm:$0xff] }
 0x9b2   :  { %v3596_v0 = vld [vmem:[#allocation2 + $0x170] sm:$0xff]  ;;  %v3295_v11 = vpop.f32.mrf.mxu1  ;;  %v18973_v45 = vpop.f32.mrf.mxu0  ;;  %15227 = vmatmul.mubr.msk.bf16.gmra.mxu0 %vm928_vm7, %v6362_v3 }
 0x9b3   :  { %4142 = vst.msk [vmem:[#allocation2 + $0x148] sm:$0xff] %vm701_vm8, %v4078_v48  ;;  %v4083_v16 = vadd.f32 %v18403_v17, %v3596_v0  ;;  %3472 = vst.msk [vmem:[#allocation2 + $0x190] sm:$0xff] %vm701_vm8, %v3408_v12  ;;  %v3406_v23 = vadd.f32 %v3295_v11, %v2919_v10  ;;  %v13616_v10 = vld [vmem:[%s21068_s7 + $0x171] sm:$0xff]  ;;  %v13617_v11 = vld [vmem:[%s21068_s7 + $0x181] sm:$0xff] }
 0x9b4   :  { %v3594_v30 = vld [vmem:[#allocation2 + $0x160] sm:$0xff]  ;;  %v14887_v41 = vpop.f32.mrf.mxu1  ;;  %v18979_v43 = vpop.f32.mrf.mxu0 }
 0x9b5   :  { %4147 = vst.msk [vmem:[#allocation2 + $0x170] sm:$0xff] %vm701_vm8, %v4083_v16  ;;  %v4081_v50 = vadd.f32 %v18416_v32, %v3594_v30  ;;  %3470 = vst.msk [vmem:[#allocation2 + $0x180] sm:$0xff] %vm701_vm8, %v3406_v23  ;;  %v3409_v3 = vadd.f32 %v14887_v41, %v2922_v29  ;;  %v2923_v16 = vld [vmem:[#allocation2 + $0x1a0] sm:$0xff]  ;;  %v13618_v23 = vld [vmem:[%s21068_s7 + $0x189] sm:$0xff] }
 0x9b6   :  { %v3597_v44 = vld [vmem:[#allocation2 + $0x178] sm:$0xff]  ;;  %v3298_v17 = vpop.f32.mrf.mxu1  ;;  %v18984_v34 = vpop.f32.mrf.mxu0 }
 0x9b7   :  { %4145 = vst.msk [vmem:[#allocation2 + $0x160] sm:$0xff] %vm701_vm8, %v4081_v50  ;;  %v4084_v15 = vadd.f32 %v18427_v42, %v3597_v44  ;;  %3473 = vst.msk [vmem:[#allocation2 + $0x198] sm:$0xff] %vm701_vm8, %v3409_v3  ;;  %v3407_v48 = vadd.f32 %v3298_v17, %v2920_v37  ;;  %v13615_v42 = vld [vmem:[%s21068_s7 + $0x169] sm:$0xff]  ;;  %v2926_v50 = vld [vmem:[#allocation2 + $0x1b8] sm:$0xff] }
 0x9b8   :  { %v3595_v12 = vld [vmem:[#allocation2 + $0x168] sm:$0xff]  ;;  %v14890_v51 = vpop.f32.mrf.mxu1  ;;  %15121 = vmatmul.mubr.msk.bf16.gmra.mxu1 %vm928_vm7, %v5663_v60  ;;  %v18990_v32 = vpop.f32.mrf.mxu0 }
 0x9b9   :  { %4148 = vst.msk [vmem:[#allocation2 + $0x178] sm:$0xff] %vm701_vm8, %v4084_v15  ;;  %v4082_v21 = vadd.f32 %v18433_v9, %v3595_v12  ;;  %3471 = vst.msk [vmem:[#allocation2 + $0x188] sm:$0xff] %vm701_vm8, %v3407_v48  ;;  %v3412_v0 = vadd.f32 %v14890_v51, %v2925_v19  ;;  %15124 = vmatprep.mubr.msk.bf16.mxu1 %vm928_vm7, %v5664_v59  ;;  %v5665_v59 = vpack.c.bf16 %v13616_v10, %v13615_v42  ;;  %v2924_v12 = vld [vmem:[#allocation2 + $0x1a8] sm:$0xff]  ;;  %v2929_v42 = vld [vmem:[#allocation2 + $0x1d0] sm:$0xff] }
 0x9ba   :  { %v3600_v52 = vld [vmem:[#allocation2 + $0x190] sm:$0xff]  ;;  %v3311_v9 = vpop.f32.mrf.mxu1  ;;  %v19008_v30 = vpop.f32.mrf.mxu0  ;;  %v5666_v15 = vpack.c.bf16 %v13618_v23, %v13617_v11 }
 0x9bb   :  { %4146 = vst.msk [vmem:[#allocation2 + $0x168] sm:$0xff] %vm701_vm8, %v4082_v21  ;;  %v4087_v29 = vadd.f32 %v18451_v35, %v3600_v52  ;;  %3476 = vst.msk [vmem:[#allocation2 + $0x1b0] sm:$0xff] %vm701_vm8, %v3412_v0  ;;  %v3410_v41 = vadd.f32 %v3311_v9, %v2923_v16  ;;  %v13620_v16 = vld [vmem:[%s21068_s7 + $0x1a1] sm:$0xff] }
 0x9bc   :  { %v3598_v60 = vld [vmem:[#allocation2 + $0x180] sm:$0xff]  ;;  %v14891_v3 = vpop.f32.mrf.mxu1  ;;  %v19013_v44 = vpop.f32.mrf.mxu0 }
 0x9bd   :  { %4151 = vst.msk [vmem:[#allocation2 + $0x190] sm:$0xff] %vm701_vm8, %v4087_v29  ;;  %v4085_v37 = vadd.f32 %v18464_v5, %v3598_v60  ;;  %3474 = vst.msk [vmem:[#allocation2 + $0x1a0] sm:$0xff] %vm701_vm8, %v3410_v41  ;;  %v3413_v17 = vadd.f32 %v14891_v3, %v2926_v50  ;;  %v13621_v9 = vld [vmem:[%s21068_s7 + $0x1e1] sm:$0xff]  ;;  %v13622_v41 = vld [vmem:[%s21068_s7 + $0x1e9] sm:$0xff] }
 0x9be   :  { %v3601_v48 = vld [vmem:[#allocation2 + $0x198] sm:$0xff]  ;;  %v3314_v35 = vpop.f32.mrf.mxu1  ;;  %v19018_v19 = vpop.f32.mrf.mxu0  ;;  %v2927_v29 = vld [vmem:[#allocation2 + $0x1c0] sm:$0xff] }
 0x9bf   :  { %4149 = vst.msk [vmem:[#allocation2 + $0x180] sm:$0xff] %vm701_vm8, %v4085_v37  ;;  %v4088_v51 = vadd.f32 %v18475_v40, %v3601_v48  ;;  %3477 = vst.msk [vmem:[#allocation2 + $0x1b8] sm:$0xff] %vm701_vm8, %v3413_v17  ;;  %v3411_v21 = vadd.f32 %v3314_v35, %v2924_v12  ;;  %v13619_v40 = vld [vmem:[%s21068_s7 + $0x199] sm:$0xff] }
 0x9c0   :  { %v3599_v0 = vld [vmem:[#allocation2 + $0x188] sm:$0xff]  ;;  %v14894_v10 = vpop.f32.mrf.mxu1  ;;  %15125 = vmatmul.mubr.msk.bf16.gmra.mxu1 %vm928_vm7, %v5665_v59  ;;  %v19024_v5 = vpop.f32.mrf.mxu0  ;;  %v2930_v37 = vld [vmem:[#allocation2 + $0x1d8] sm:$0xff] }
 0x9c1   :  { %4152 = vst.msk [vmem:[#allocation2 + $0x198] sm:$0xff] %vm701_vm8, %v4088_v51  ;;  %v4086_v11 = vadd.f32 %v18481_v39, %v3599_v0  ;;  %3475 = vst.msk [vmem:[#allocation2 + $0x1a8] sm:$0xff] %vm701_vm8, %v3411_v21  ;;  %v3416_v52 = vadd.f32 %v14894_v10, %v2929_v42  ;;  %15128 = vmatprep.mubr.msk.bf16.mxu1 %vm928_vm7, %v5666_v15  ;;  %v5667_v15 = vpack.c.bf16 %v13620_v16, %v13619_v40  ;;  %v2928_v0 = vld [vmem:[#allocation2 + $0x1c8] sm:$0xff]  ;;  %v2933_v40 = vld [vmem:[#allocation2 + $0x1f0] sm:$0xff] }
 0x9c2   :  { %v3604_v23 = vld [vmem:[#allocation2 + $0x1b0] sm:$0xff]  ;;  %v3327_v39 = vpop.f32.mrf.mxu1  ;;  %v19042_v60 = vpop.f32.mrf.mxu0  ;;  %v5668_v51 = vpack.c.bf16 %v13622_v41, %v13621_v9 }
 0x9c3   :  { %4150 = vst.msk [vmem:[#allocation2 + $0x188] sm:$0xff] %vm701_vm8, %v4086_v11  ;;  %v4091_v50 = vadd.f32 %v18499_v56, %v3604_v23  ;;  %3480 = vst.msk [vmem:[#allocation2 + $0x1d0] sm:$0xff] %vm701_vm8, %v3416_v52  ;;  %v3414_v3 = vadd.f32 %v3327_v39, %v2927_v29  ;;  %v13624_v29 = vld [vmem:[%s21068_s7 + $0x201] sm:$0xff]  ;;  %v13625_v39 = vld [vmem:[%s21068_s7 + $0x211] sm:$0xff] }
 0x9c4   :  { %v3602_v59 = vld [vmem:[#allocation2 + $0x1a0] sm:$0xff]  ;;  %v14895_v17 = vpop.f32.mrf.mxu1  ;;  %v19047_v48 = vpop.f32.mrf.mxu0 }
 0x9c5   :  { %4155 = vst.msk [vmem:[#allocation2 + $0x1b0] sm:$0xff] %vm701_vm8, %v4091_v50  ;;  %v4089_v12 = vadd.f32 %v18512_v54, %v3602_v59  ;;  %3478 = vst.msk [vmem:[#allocation2 + $0x1c0] sm:$0xff] %vm701_vm8, %v3414_v3  ;;  %v3417_v35 = vadd.f32 %v14895_v17, %v2930_v37  ;;  %v2931_v50 = vld [vmem:[#allocation2 + $0x1e0] sm:$0xff] }
 0x9c6   :  { %v3605_v21 = vld [vmem:[#allocation2 + $0x1b8] sm:$0xff]  ;;  %v3330_v56 = vpop.f32.mrf.mxu1  ;;  %v19052_v42 = vpop.f32.mrf.mxu0 }
 0x9c7   :  { %4153 = vst.msk [vmem:[#allocation2 + $0x1a0] sm:$0xff] %vm701_vm8, %v4089_v12  ;;  %v4092_v10 = vadd.f32 %v18523_v36, %v3605_v21  ;;  %3481 = vst.msk [vmem:[#allocation2 + $0x1d8] sm:$0xff] %vm701_vm8, %v3417_v35  ;;  %v3415_v11 = vadd.f32 %v3330_v56, %v2928_v0  ;;  %v13623_v36 = vld [vmem:[%s21068_s7 + $0x1f9] sm:$0xff]  ;;  %v21136_v0 = vld [vmem:[#allocation17_spill] sm:$0xff] }
 0x9c8   :  { %v3603_v52 = vld [vmem:[#allocation2 + $0x1a8] sm:$0xff]  ;;  %v14898_v16 = vpop.f32.mrf.mxu1  ;;  %15129 = vmatmul.mubr.msk.bf16.gmra.mxu1 %vm928_vm7, %v5667_v15  ;;  %v19058_v54 = vpop.f32.mrf.mxu0  ;;  %v13626_v3 = vld [vmem:[%s21068_s7 + $0x219] sm:$0xff] }
 0x9c9   :  { %4156 = vst.msk [vmem:[#allocation2 + $0x1b8] sm:$0xff] %vm701_vm8, %v4092_v10  ;;  %v4090_v9 = vadd.f32 %v18529_v47, %v3603_v52  ;;  %3479 = vst.msk [vmem:[#allocation2 + $0x1c8] sm:$0xff] %vm701_vm8, %v3415_v11  ;;  %v3420_v23 = vadd.f32 %v14898_v16, %v2933_v40  ;;  %15132 = vmatprep.mubr.msk.bf16.mxu1 %vm928_vm7, %v5668_v51  ;;  %v2934_v12 = vld [vmem:[#allocation2 + $0x1f8] sm:$0xff]  ;;  %v5669_v51 = vpack.c.bf16 %v13624_v29, %v13623_v36  ;;  %v2932_v40 = vld [vmem:[#allocation2 + $0x1e8] sm:$0xff] }
 0x9ca   :  { %v3608_v41 = vld [vmem:[#allocation2 + $0x1d0] sm:$0xff]  ;;  %v3343_v47 = vpop.f32.mrf.mxu1  ;;  %v19076_v59 = vpop.f32.mrf.mxu0  ;;  %v5670_v11 = vpack.c.bf16 %v13626_v3, %v13625_v39 }
 0x9cb   :  { %4154 = vst.msk [vmem:[#allocation2 + $0x1a8] sm:$0xff] %vm701_vm8, %v4090_v9  ;;  %v4095_v37 = vadd.f32 %v18547_v13, %v3608_v41  ;;  %3484 = vst.msk [vmem:[#allocation2 + $0x1f0] sm:$0xff] %vm701_vm8, %v3420_v23  ;;  %v3418_v17 = vadd.f32 %v3343_v47, %v2931_v50  ;;  %v4231_v29 = vld [vmem:[#allocation2 + $0x10] sm:$0xff] }
 0x9cc   :  { %v3606_v15 = vld [vmem:[#allocation2 + $0x1c0] sm:$0xff]  ;;  %v14899_v35 = vpop.f32.mrf.mxu1  ;;  %v19081_v21 = vpop.f32.mrf.mxu0  ;;  %v13628_v3 = vld [vmem:[%s21068_s7 + $0x231] sm:$0xff] }
 0x9cd   :  { %4159 = vst.msk [vmem:[#allocation2 + $0x1d0] sm:$0xff] %vm701_vm8, %v4095_v37  ;;  %v4093_v56 = vadd.f32 %v21136_v0, %v3606_v15  ;;  %3482 = vst.msk [vmem:[#allocation2 + $0x1e0] sm:$0xff] %vm701_vm8, %v3418_v17  ;;  %v3421_v10 = vadd.f32 %v14899_v35, %v2934_v12  ;;  %v13629_v37 = vld [vmem:[%s21068_s7 + $0x241] sm:$0xff]  ;;  %v13630_v12 = vld [vmem:[%s21068_s7 + $0x249] sm:$0xff] }
 0x9ce   :  { %v3609_v52 = vld [vmem:[#allocation2 + $0x1d8] sm:$0xff]  ;;  %v3346_v13 = vpop.f32.mrf.mxu1  ;;  %v19086_v16 = vpop.f32.mrf.mxu0  ;;  %v4229_v15 = vld [vmem:[#allocation2] sm:$0xff] }
 0x9cf   :  { %4157 = vst.msk [vmem:[#allocation2 + $0x1c0] sm:$0xff] %vm701_vm8, %v4093_v56  ;;  %v4096_v9 = vadd.f32 %v18571_v18, %v3609_v52  ;;  %3485 = vst.msk [vmem:[#allocation2 + $0x1f8] sm:$0xff] %vm701_vm8, %v3421_v10  ;;  %v3419_v23 = vadd.f32 %v3346_v13, %v2932_v40  ;;  %v13627_v18 = vld [vmem:[%s21068_s7 + $0x229] sm:$0xff]  ;;  %v4232_v10 = vld [vmem:[#allocation2 + $0x18] sm:$0xff] }
 0x9d0   :  { %v3607_v36 = vld [vmem:[#allocation2 + $0x1c8] sm:$0xff]  ;;  %v14970_v41 = vpop.f32.mrf.mxu1  ;;  %15133 = vmatmul.mubr.msk.bf16.gmra.mxu1 %vm928_vm7, %v5669_v51  ;;  %v19092_v50 = vpop.f32.mrf.mxu0  ;;  %v5671_v52 = vpack.c.bf16 %v13628_v3, %v13627_v18  ;;  %v4235_v3 = vld [vmem:[#allocation2 + $0x30] sm:$0xff] }
 0x9d1   :  { %4160 = vst.msk [vmem:[#allocation2 + $0x1d8] sm:$0xff] %vm701_vm8, %v4096_v9  ;;  %v4094_v39 = vadd.f32 %v18577_v2, %v3607_v36  ;;  %3483 = vst.msk [vmem:[#allocation2 + $0x1e8] sm:$0xff] %vm701_vm8, %v3419_v23  ;;  %v4718_v47 = vadd.f32 %v14970_v41, %v4231_v29  ;;  %15136 = vmatprep.mubr.msk.bf16.mxu1 %vm928_vm7, %v5670_v11  ;;  %v5672_v23 = vpack.c.bf16 %v13630_v12, %v13629_v37  ;;  %v4230_v29 = vld [vmem:[#allocation2 + $0x8] sm:$0xff]  ;;  %v13633_v12 = vld [vmem:[%s21068_s7 + $0x271] sm:$0xff] }
 0x9d2   :  { %v3612_v17 = vld [vmem:[#allocation2 + $0x1f0] sm:$0xff]  ;;  %v4461_v2 = vpop.f32.mrf.mxu1  ;;  %v19110_v35 = vpop.f32.mrf.mxu0 }
 0x9d3   :  { %4158 = vst.msk [vmem:[#allocation2 + $0x1c8] sm:$0xff] %vm701_vm8, %v4094_v39  ;;  %v4099_v51 = vadd.f32 %v18595_v53, %v3612_v17  ;;  %4782 = vst.msk [vmem:[#allocation2 + $0x10] sm:$0xff] %vm701_vm8, %v4718_v47  ;;  %v4716_v0 = vadd.f32 %v4461_v2, %v4229_v15  ;;  %v13632_v2 = vld [vmem:[%s21068_s7 + $0x261] sm:$0xff] }
 0x9d4   :  { %v3610_v56 = vld [vmem:[#allocation2 + $0x1e0] sm:$0xff]  ;;  %v14971_v11 = vpop.f32.mrf.mxu1  ;;  %v19115_v40 = vpop.f32.mrf.mxu0 }
 0x9d5   :  { %4163 = vst.msk [vmem:[#allocation2 + $0x1f0] sm:$0xff] %vm701_vm8, %v4099_v51  ;;  %v4097_v13 = vadd.f32 %v18608_v49, %v3610_v56  ;;  %4780 = vst.msk [vmem:[#allocation2] sm:$0xff] %vm701_vm8, %v4716_v0  ;;  %v4719_v9 = vadd.f32 %v14971_v11, %v4232_v10  ;;  %v4233_v0 = vld [vmem:[#allocation2 + $0x20] sm:$0xff] }
 0x9d6   :  { %v3613_v36 = vld [vmem:[#allocation2 + $0x1f8] sm:$0xff]  ;;  %v4464_v53 = vpop.f32.mrf.mxu1  ;;  %v19120_v41 = vpop.f32.mrf.mxu0 }
 0x9d7   :  { %4161 = vst.msk [vmem:[#allocation2 + $0x1e0] sm:$0xff] %vm701_vm8, %v4097_v13  ;;  %v4100_v39 = vadd.f32 %v18619_v4, %v3613_v36  ;;  %4783 = vst.msk [vmem:[#allocation2 + $0x18] sm:$0xff] %vm701_vm8, %v4719_v9  ;;  %v4717_v47 = vadd.f32 %v4464_v53, %v4230_v29  ;;  %v13631_v4 = vld [vmem:[%s21068_s7 + $0x259] sm:$0xff] }
 0x9d8   :  { %v3611_v18 = vld [vmem:[#allocation2 + $0x1e8] sm:$0xff]  ;;  %v14974_v17 = vpop.f32.mrf.mxu1  ;;  %15137 = vmatmul.mubr.msk.bf16.gmra.mxu1 %vm928_vm7, %v5671_v52  ;;  %v19126_v49 = vpop.f32.mrf.mxu0  ;;  %v13634_v56 = vld [vmem:[%s21068_s7 + $0x279] sm:$0xff]  ;;  %v5673_v36 = vpack.c.bf16 %v13632_v2, %v13631_v4  ;;  %v4239_v2 = vld [vmem:[#allocation2 + $0x50] sm:$0xff] }
 0x9d9   :  { %4164 = vst.msk [vmem:[#allocation2 + $0x1f8] sm:$0xff] %vm701_vm8, %v4100_v39  ;;  %v4098_v37 = vadd.f32 %v18625_v1, %v3611_v18  ;;  %4781 = vst.msk [vmem:[#allocation2 + $0x8] sm:$0xff] %vm701_vm8, %v4717_v47  ;;  %v4722_v15 = vadd.f32 %v14974_v17, %v4235_v3  ;;  %15140 = vmatprep.mubr.msk.bf16.mxu1 %vm928_vm7, %v5672_v23  ;;  %v4236_v9 = vld [vmem:[#allocation2 + $0x38] sm:$0xff]  ;;  %v5674_v47 = vpack.c.bf16 %v13634_v56, %v13633_v12  ;;  %v4234_v3 = vld [vmem:[#allocation2 + $0x28] sm:$0xff] }
 0x9da   :  { %v4911_v51 = vld [vmem:[#allocation2 + $0x10] sm:$0xff]  ;;  %v4477_v1 = vpop.f32.mrf.mxu1  ;;  %v19144_v10 = vpop.f32.mrf.mxu0  ;;  %v13637_v56 = vld [vmem:[%s21068_s7 + $0x2a1] sm:$0xff] }
 0x9db   :  { %4162 = vst.msk [vmem:[#allocation2 + $0x1e8] sm:$0xff] %vm701_vm8, %v4098_v37  ;;  %v5398_v11 = vadd.f32 %v18643_v31, %v4911_v51  ;;  %4786 = vst.msk [vmem:[#allocation2 + $0x30] sm:$0xff] %vm701_vm8, %v4722_v15  ;;  %v4720_v52 = vadd.f32 %v4477_v1, %v4233_v0  ;;  %v13636_v1 = vld [vmem:[%s21068_s7 + $0x291] sm:$0xff] }
 0x9dc   :  { %v4909_v13 = vld [vmem:[#allocation2] sm:$0xff]  ;;  %v14975_v23 = vpop.f32.mrf.mxu1  ;;  %v19149_v29 = vpop.f32.mrf.mxu0 }
 0x9dd   :  { %5462 = vst.msk [vmem:[#allocation2 + $0x10] sm:$0xff] %vm701_vm8, %v5398_v11  ;;  %v5396_v53 = vadd.f32 %v18656_v27, %v4909_v13  ;;  %4784 = vst.msk [vmem:[#allocation2 + $0x20] sm:$0xff] %vm701_vm8, %v4720_v52  ;;  %v4723_v39 = vadd.f32 %v14975_v23, %v4236_v9  ;;  %v4237_v52 = vld [vmem:[#allocation2 + $0x40] sm:$0xff]  ;;  %v13638_v13 = vld [vmem:[%s21068_s7 + $0x2a9] sm:$0xff] }
 0x9de   :  { %v4912_v18 = vld [vmem:[#allocation2 + $0x18] sm:$0xff]  ;;  %v4480_v31 = vpop.f32.mrf.mxu1  ;;  %v19154_v17 = vpop.f32.mrf.mxu0 }
 0x9df   :  { %5460 = vst.msk [vmem:[#allocation2] sm:$0xff] %vm701_vm8, %v5396_v53  ;;  %v5399_v37 = vadd.f32 %v18667_v22, %v4912_v18  ;;  %4787 = vst.msk [vmem:[#allocation2 + $0x38] sm:$0xff] %vm701_vm8, %v4723_v39  ;;  %v4721_v15 = vadd.f32 %v4480_v31, %v4234_v3  ;;  %v13635_v22 = vld [vmem:[%s21068_s7 + $0x289] sm:$0xff]  ;;  %v4240_v39 = vld [vmem:[#allocation2 + $0x58] sm:$0xff] }
 0x9e0   :  { %v4910_v4 = vld [vmem:[#allocation2 + $0x8] sm:$0xff]  ;;  %v14978_v51 = vpop.f32.mrf.mxu1  ;;  %15141 = vmatmul.mubr.msk.bf16.gmra.mxu1 %vm928_vm7, %v5673_v36  ;;  %v19160_v27 = vpop.f32.mrf.mxu0  ;;  %v5675_v18 = vpack.c.bf16 %v13636_v1, %v13635_v22  ;;  %v4243_v1 = vld [vmem:[#allocation2 + $0x70] sm:$0xff] }
 0x9e1   :  { %5463 = vst.msk [vmem:[#allocation2 + $0x18] sm:$0xff] %vm701_vm8, %v5399_v37  ;;  %v5397_v12 = vadd.f32 %v18673_v20, %v4910_v4  ;;  %4785 = vst.msk [vmem:[#allocation2 + $0x28] sm:$0xff] %vm701_vm8, %v4721_v15  ;;  %v4726_v0 = vadd.f32 %v14978_v51, %v4239_v2  ;;  %15144 = vmatprep.mubr.msk.bf16.mxu1 %vm928_vm7, %v5674_v47  ;;  %v5676_v15 = vpack.c.bf16 %v13638_v13, %v13637_v56  ;;  %v4238_v2 = vld [vmem:[#allocation2 + $0x48] sm:$0xff]  ;;  %v13641_v13 = vld [vmem:[%s21068_s7 + $0x2d1] sm:$0xff] }
 0x9e2   :  { %v4915_v11 = vld [vmem:[#allocation2 + $0x30] sm:$0xff]  ;;  %v4493_v20 = vpop.f32.mrf.mxu1  ;;  %v19178_v9 = vpop.f32.mrf.mxu0 }
 0x9e3   :  { %5461 = vst.msk [vmem:[#allocation2 + $0x8] sm:$0xff] %vm701_vm8, %v5397_v12  ;;  %v5402_v23 = vadd.f32 %v18691_v38, %v4915_v11  ;;  %4790 = vst.msk [vmem:[#allocation2 + $0x50] sm:$0xff] %vm701_vm8, %v4726_v0  ;;  %v4724_v36 = vadd.f32 %v4493_v20, %v4237_v52  ;;  %v13640_v20 = vld [vmem:[%s21068_s7 + $0x2c1] sm:$0xff] }
 0x9e4   :  { %v4913_v53 = vld [vmem:[#allocation2 + $0x20] sm:$0xff]  ;;  %v14979_v47 = vpop.f32.mrf.mxu1  ;;  %v19183_v3 = vpop.f32.mrf.mxu0 }
 0x9e5   :  { %5466 = vst.msk [vmem:[#allocation2 + $0x30] sm:$0xff] %vm701_vm8, %v5402_v23  ;;  %v5400_v31 = vadd.f32 %v18704_v33, %v4913_v53  ;;  %4788 = vst.msk [vmem:[#allocation2 + $0x40] sm:$0xff] %vm701_vm8, %v4724_v36  ;;  %v4727_v37 = vadd.f32 %v14979_v47, %v4240_v39  ;;  %v4241_v36 = vld [vmem:[#allocation2 + $0x60] sm:$0xff] }
 0x9e6   :  { %v4916_v4 = vld [vmem:[#allocation2 + $0x38] sm:$0xff]  ;;  %v4496_v38 = vpop.f32.mrf.mxu1  ;;  %v19188_v51 = vpop.f32.mrf.mxu0 }
 0x9e7   :  { %5464 = vst.msk [vmem:[#allocation2 + $0x20] sm:$0xff] %vm701_vm8, %v5400_v31  ;;  %v5403_v12 = vadd.f32 %v18715_v62, %v4916_v4  ;;  %4791 = vst.msk [vmem:[#allocation2 + $0x58] sm:$0xff] %vm701_vm8, %v4727_v37  ;;  %v4725_v0 = vadd.f32 %v4496_v38, %v4238_v2  ;;  %v13639_v62 = vld [vmem:[%s21068_s7 + $0x2b9] sm:$0xff] }
 0x9e8   :  { %v4914_v22 = vld [vmem:[#allocation2 + $0x28] sm:$0xff]  ;;  %v14982_v11 = vpop.f32.mrf.mxu1  ;;  %15145 = vmatmul.mubr.msk.bf16.gmra.mxu1 %vm928_vm7, %v5675_v18  ;;  %v19194_v33 = vpop.f32.mrf.mxu0  ;;  %v13642_v53 = vld [vmem:[%s21068_s7 + $0x2d9] sm:$0xff]  ;;  %v5677_v4 = vpack.c.bf16 %v13640_v20, %v13639_v62 }
 0x9e9   :  { %5467 = vst.msk [vmem:[#allocation2 + $0x38] sm:$0xff] %vm701_vm8, %v5403_v12  ;;  %v5401_v56 = vadd.f32 %v18721_v46, %v4914_v22  ;;  %4789 = vst.msk [vmem:[#allocation2 + $0x48] sm:$0xff] %vm701_vm8, %v4725_v0  ;;  %v4730_v52 = vadd.f32 %v14982_v11, %v4243_v1  ;;  %15148 = vmatprep.mubr.msk.bf16.mxu1 %vm928_vm7, %v5676_v15  ;;  %v4244_v37 = vld [vmem:[#allocation2 + $0x78] sm:$0xff]  ;;  %v5678_v22 = vpack.c.bf16 %v13642_v53, %v13641_v13  ;;  %v4242_v11 = vld [vmem:[#allocation2 + $0x68] sm:$0xff] }
 0x9ea   :  { %v4919_v23 = vld [vmem:[#allocation2 + $0x50] sm:$0xff]  ;;  %v4509_v46 = vpop.f32.mrf.mxu1  ;;  %v19212_v39 = vpop.f32.mrf.mxu0  ;;  %v21139_v13 = vld [vmem:[#allocation19_spill] sm:$0xff] }
 0x9eb   :  { %5465 = vst.msk [vmem:[#allocation2 + $0x28] sm:$0xff] %vm701_vm8, %v5401_v56  ;;  %v5406_v47 = vadd.f32 %v18739_v28, %v4919_v23  ;;  %4794 = vst.msk [vmem:[#allocation2 + $0x70] sm:$0xff] %vm701_vm8, %v4730_v52  ;;  %v4728_v18 = vadd.f32 %v4509_v46, %v4241_v36  ;;  %v21137_v38 = vld [vmem:[#allocation18_spill] sm:$0xff] }
 0x9ec   :  { %v4917_v31 = vld [vmem:[#allocation2 + $0x40] sm:$0xff]  ;;  %v14983_v15 = vpop.f32.mrf.mxu1  ;;  %v19217_v2 = vpop.f32.mrf.mxu0  ;;  %v4247_v23 = vld [vmem:[#allocation2 + $0x90] sm:$0xff] }
 0x9ed   :  { %5470 = vst.msk [vmem:[#allocation2 + $0x50] sm:$0xff] %vm701_vm8, %v5406_v47  ;;  %v5404_v12 = vadd.f32 %v21137_v38, %v4917_v31  ;;  %4792 = vst.msk [vmem:[#allocation2 + $0x60] sm:$0xff] %vm701_vm8, %v4728_v18  ;;  %v4731_v0 = vadd.f32 %v14983_v15, %v4244_v37  ;;  %v13644_v18 = vld [vmem:[%s21068_s7 + $0x2f1] sm:$0xff]  ;;  %v13645_v31 = vld [vmem:[%s21068_s7 + $0x301] sm:$0xff] }
 0x9ee   :  { %v4920_v1 = vld [vmem:[#allocation2 + $0x58] sm:$0xff]  ;;  %v4512_v28 = vpop.f32.mrf.mxu1  ;;  %v19222_v56 = vpop.f32.mrf.mxu0  ;;  %v4245_v15 = vld [vmem:[#allocation2 + $0x80] sm:$0xff]  ;;  %v13646_v38 = vld [vmem:[%s21068_s7 + $0x309] sm:$0xff] }
 0x9ef   :  { %5468 = vst.msk [vmem:[#allocation2 + $0x40] sm:$0xff] %vm701_vm8, %v5404_v12  ;;  %v5407_v52 = vadd.f32 %v18763_v26, %v4920_v1  ;;  %4795 = vst.msk [vmem:[#allocation2 + $0x78] sm:$0xff] %vm701_vm8, %v4731_v0  ;;  %v4729_v62 = vadd.f32 %v4512_v28, %v4242_v11  ;;  %v13643_v26 = vld [vmem:[%s21068_s7 + $0x2e9] sm:$0xff]  ;;  %v21141_v0 = vld [vmem:[#allocation10_spill] sm:$0xff] }
 0x9f0   :  { %v4918_v20 = vld [vmem:[#allocation2 + $0x48] sm:$0xff]  ;;  %v14986_v36 = vpop.f32.mrf.mxu1  ;;  %15149 = vmatmul.mubr.msk.bf16.gmra.mxu1 %vm928_vm7, %v5677_v4  ;;  %v19228_v46 = vpop.f32.mrf.mxu0  ;;  %v4248_v28 = vld [vmem:[#allocation2 + $0x98] sm:$0xff] }
 0x9f1   :  { %21138 = vst [vmem:[#allocation15_spill] sm:$0xff] %v19228_v46  ;;  %5471 = vst.msk [vmem:[#allocation2 + $0x58] sm:$0xff] %vm701_vm8, %v5407_v52  ;;  %v5405_v53 = vadd.f32 %v21139_v13, %v4918_v20  ;;  %v4734_v47 = vadd.f32 %v14986_v36, %v4247_v23  ;;  %15152 = vmatprep.mubr.msk.bf16.mxu1 %vm928_vm7, %v5678_v22  ;;  %v21142_v23 = vld [vmem:[#allocation11_spill] sm:$0xff]  ;;  %v4246_v46 = vld [vmem:[#allocation2 + $0x88] sm:$0xff] }
 0x9f2   :  { %4793 = vst.msk [vmem:[#allocation2 + $0x68] sm:$0xff] %vm701_vm8, %v4729_v62  ;;  %v4923_v37 = vld [vmem:[#allocation2 + $0x70] sm:$0xff]  ;;  %v4525_v4 = vpop.f32.mrf.mxu1  ;;  %v19246_v12 = vpop.f32.mrf.mxu0  ;;  %v5679_v62 = vpack.c.bf16 %v13644_v18, %v13643_v26 }
 0x9f3   :  { %21140 = vst [vmem:[#allocation16_spill] sm:$0xff] %v19246_v12  ;;  %5469 = vst.msk [vmem:[#allocation2 + $0x48] sm:$0xff] %vm701_vm8, %v5405_v53  ;;  %v5410_v22 = vadd.f32 %v21141_v0, %v4923_v37  ;;  %v4732_v1 = vadd.f32 %v4525_v4, %v4245_v15  ;;  %v5680_v12 = vpack.c.bf16 %v13646_v38, %v13645_v31  ;;  %v4251_v15 = vld [vmem:[#allocation2 + $0xb0] sm:$0xff]  ;;  %v21145_v31 = vld [vmem:[#allocation12_spill] sm:$0xff] }
 0x9f4   :  { %4798 = vst.msk [vmem:[#allocation2 + $0x90] sm:$0xff] %vm701_vm8, %v4734_v47  ;;  %v4921_v11 = vld [vmem:[#allocation2 + $0x60] sm:$0xff]  ;;  %v14987_v52 = vpop.f32.mrf.mxu1  ;;  %v19251_v20 = vpop.f32.mrf.mxu0 }
 0x9f5   :  { %5474 = vst.msk [vmem:[#allocation2 + $0x70] sm:$0xff] %vm701_vm8, %v5410_v22  ;;  %v5408_v36 = vadd.f32 %v21142_v23, %v4921_v11  ;;  %4796 = vst.msk [vmem:[#allocation2 + $0x80] sm:$0xff] %vm701_vm8, %v4732_v1  ;;  %v4735_v13 = vadd.f32 %v14987_v52, %v4248_v28  ;;  %v13649_v11 = vld [vmem:[%s21068_s7 + $0x331] sm:$0xff]  ;;  %v4249_v52 = vld [vmem:[#allocation2 + $0xa0] sm:$0xff] }
 0x9f6   :  { %v4924_v53 = vld [vmem:[#allocation2 + $0x78] sm:$0xff]  ;;  %v4528_v37 = vpop.f32.mrf.mxu1  ;;  %v19256_v0 = vpop.f32.mrf.mxu0 }
 0x9f7   :  { %21143 = vst [vmem:[#allocation17_spill] sm:$0xff] %v19256_v0  ;;  %5472 = vst.msk [vmem:[#allocation2 + $0x60] sm:$0xff] %vm701_vm8, %v5408_v36  ;;  %v5411_v47 = vadd.f32 %v18811_v7, %v4924_v53  ;;  %v4733_v26 = vadd.f32 %v4528_v37, %v4246_v46  ;;  %v13647_v7 = vld [vmem:[%s21068_s7 + $0x319] sm:$0xff]  ;;  %v13648_v46 = vld [vmem:[%s21068_s7 + $0x321] sm:$0xff] }
 0x9f8   :  { %4799 = vst.msk [vmem:[#allocation2 + $0x98] sm:$0xff] %vm701_vm8, %v4735_v13  ;;  %v14990_v4 = vpop.f32.mrf.mxu1  ;;  %15153 = vmatmul.mubr.msk.bf16.gmra.mxu1 %vm928_vm7, %v5679_v62  ;;  %v19262_v22 = vpop.f32.mrf.mxu0  ;;  %v13650_v23 = vld [vmem:[%s21068_s7 + $0x339] sm:$0xff]  ;;  %v21147_v36 = vld [vmem:[#allocation13_spill] sm:$0xff] }
 0x9f9   :  { %v4922_v18 = vld [vmem:[#allocation2 + $0x68] sm:$0xff]  ;;  %21144 = vst [vmem:[#allocation18_spill] sm:$0xff] %v19262_v22  ;;  %5475 = vst.msk [vmem:[#allocation2 + $0x78] sm:$0xff] %vm701_vm8, %v5411_v47  ;;  %v4738_v1 = vadd.f32 %v14990_v4, %v4251_v15  ;;  %15156 = vmatprep.mubr.msk.bf16.mxu1 %vm928_vm7, %v5680_v12  ;;  %v4252_v47 = vld [vmem:[#allocation2 + $0xb8] sm:$0xff]  ;;  %v5682_v22 = vpack.c.bf16 %v13650_v23, %v13649_v11 }
 0x9fa   :  { %v5409_v38 = vadd.f32 %v21145_v31, %v4922_v18  ;;  %4797 = vst.msk [vmem:[#allocation2 + $0x88] sm:$0xff] %vm701_vm8, %v4733_v26  ;;  %v4541_v62 = vpop.f32.mrf.mxu1  ;;  %v19280_v12 = vpop.f32.mrf.mxu0  ;;  %v5681_v18 = vpack.c.bf16 %v13648_v46, %v13647_v7  ;;  %v21148_v4 = vld [vmem:[#allocation14_spill] sm:$0xff]  ;;  %v4250_v0 = vld [vmem:[#allocation2 + $0xa8] sm:$0xff] }
 0x9fb   :  { %v4927_v28 = vld [vmem:[#allocation2 + $0x90] sm:$0xff]  ;;  %21146 = vst [vmem:[#allocation19_spill] sm:$0xff] %v19280_v12  ;;  %4802 = vst.msk [vmem:[#allocation2 + $0xb0] sm:$0xff] %vm701_vm8, %v4738_v1  ;;  %v4736_v53 = vadd.f32 %v4541_v62, %v4249_v52 }
 0x9fc   :  { %5473 = vst.msk [vmem:[#allocation2 + $0x68] sm:$0xff] %vm701_vm8, %v5409_v38  ;;  %v5414_v13 = vadd.f32 %v21147_v36, %v4927_v28  ;;  %v4925_v37 = vld [vmem:[#allocation2 + $0x80] sm:$0xff]  ;;  %v14991_v26 = vpop.f32.mrf.mxu1  ;;  %v19285_v15 = vpop.f32.mrf.mxu0  ;;  %v4255_v52 = vld [vmem:[#allocation2 + $0xd0] sm:$0xff] }
 0x9fd   :  { %v5412_v31 = vadd.f32 %v21148_v4, %v4925_v37  ;;  %4800 = vst.msk [vmem:[#allocation2 + $0xa0] sm:$0xff] %vm701_vm8, %v4736_v53  ;;  %v4739_v12 = vadd.f32 %v14991_v26, %v4252_v47  ;;  %v4253_v53 = vld [vmem:[#allocation2 + $0xc0] sm:$0xff] }
 0x9fe   :  { %5478 = vst.msk [vmem:[#allocation2 + $0x90] sm:$0xff] %vm701_vm8, %v5414_v13  ;;  %v4544_v28 = vpop.f32.mrf.mxu1  ;;  %v19290_v36 = vpop.f32.mrf.mxu0 }
 0x9ff   :  { %v4928_v38 = vld [vmem:[#allocation2 + $0x98] sm:$0xff]  ;;  %5476 = vst.msk [vmem:[#allocation2 + $0x80] sm:$0xff] %vm701_vm8, %v5412_v31  ;;  %4803 = vst.msk [vmem:[#allocation2 + $0xb8] sm:$0xff] %vm701_vm8, %v4739_v12  ;;  %v4737_v7 = vadd.f32 %v4544_v28, %v4250_v0 }
 0xa00   :  { %v5415_v1 = vadd.f32 %v18859_v25, %v4928_v38  ;;  %v14994_v62 = vpop.f32.mrf.mxu1  ;;  %15157 = vmatmul.mubr.msk.bf16.gmra.mxu1 %vm928_vm7, %v5681_v18  ;;  %v19296_v13 = vpop.f32.mrf.mxu0  ;;  %v13651_v25 = vld [vmem:[%s21068_s7 + $0x349] sm:$0xff]  ;;  %v13652_v0 = vld [vmem:[%s21068_s7 + $0x351] sm:$0xff] }
 0xa01   :  { %v4926_v46 = vld [vmem:[#allocation2 + $0x88] sm:$0xff]  ;;  %4801 = vst.msk [vmem:[#allocation2 + $0xa8] sm:$0xff] %vm701_vm8, %v4737_v7  ;;  %v4742_v23 = vadd.f32 %v14994_v62, %v4255_v52  ;;  %15160 = vmatprep.mubr.msk.bf16.mxu1 %vm928_vm7, %v5682_v22  ;;  %v4256_v18 = vld [vmem:[#allocation2 + $0xd8] sm:$0xff]  ;;  %v5683_v31 = vpack.c.bf16 %v13652_v0, %v13651_v25  ;;  %v4259_v25 = vld [vmem:[#allocation2 + $0xf0] sm:$0xff] }
 0xa02   :  { %5479 = vst.msk [vmem:[#allocation2 + $0x98] sm:$0xff] %vm701_vm8, %v5415_v1  ;;  %v5413_v11 = vadd.f32 %v18865_v24, %v4926_v46  ;;  %v4931_v12 = vld [vmem:[#allocation2 + $0xb0] sm:$0xff]  ;;  %v4557_v37 = vpop.f32.mrf.mxu1  ;;  %v19308_v47 = vpop.f32.mrf.mxu0  ;;  %v4254_v46 = vld [vmem:[#allocation2 + $0xc8] sm:$0xff] }
 0xa03   :  { %v5418_v24 = vadd.f32 %v18883_v61, %v4931_v12  ;;  %4806 = vst.msk [vmem:[#allocation2 + $0xd0] sm:$0xff] %vm701_vm8, %v4742_v23  ;;  %v4740_v22 = vadd.f32 %v4557_v37, %v4253_v53  ;;  %v21149_v37 = vmov 0.0  }
 0xa04   :  { %5477 = vst.msk [vmem:[#allocation2 + $0x88] sm:$0xff] %vm701_vm8, %v5413_v11  ;;  %v4929_v26 = vld [vmem:[#allocation2 + $0xa0] sm:$0xff]  ;;  %v14995_v4 = vpop.f32.mrf.mxu1  ;;  %v19313_v38 = vpop.f32.mrf.mxu0 }
 0xa05   :  { %5482 = vst.msk [vmem:[#allocation2 + $0xb0] sm:$0xff] %vm701_vm8, %v5418_v24  ;;  %v5416_v28 = vadd.f32 %v18896_v8, %v4929_v26  ;;  %4804 = vst.msk [vmem:[#allocation2 + $0xc0] sm:$0xff] %vm701_vm8, %v4740_v22  ;;  %v4743_v1 = vadd.f32 %v14995_v4, %v4256_v18  ;;  %v4257_v24 = vld [vmem:[#allocation2 + $0xe0] sm:$0xff] }
 0xa06   :  { %v4932_v7 = vld [vmem:[#allocation2 + $0xb8] sm:$0xff]  ;;  %v4560_v52 = vpop.f32.mrf.mxu1  ;;  %v19318_v61 = vpop.f32.mrf.mxu0  ;;  %6885 = vst.msk [vmem:[#allocation3 + $0x10] sm:$0x3] %vm6884_vm11, %v21149_v37  ;;  %6888 = vst.msk [vmem:[#allocation3 + $0x28] sm:$0x3] %vm6884_vm11, %v21149_v37 }
 0xa07   :  { %5480 = vst.msk [vmem:[#allocation2 + $0xa0] sm:$0xff] %vm701_vm8, %v5416_v28  ;;  %v5419_v62 = vadd.f32 %v18907_v55, %v4932_v7  ;;  %4807 = vst.msk [vmem:[#allocation2 + $0xd8] sm:$0xff] %vm701_vm8, %v4743_v1  ;;  %v4741_v11 = vadd.f32 %v4560_v52, %v4254_v46 }
 0xa08   :  { %v4930_v23 = vld [vmem:[#allocation2 + $0xa8] sm:$0xff]  ;;  %v14998_v0 = vpop.f32.mrf.mxu1  ;;  %15161 = vmatmul.mubr.msk.bf16.gmra.mxu1 %vm928_vm7, %v5683_v31  ;;  %v19324_v8 = vpop.f32.mrf.mxu0  ;;  %6891 = vst.msk [vmem:[#allocation3 + $0x40] sm:$0x3] %vm6884_vm11, %v21149_v37  ;;  %6894 = vst.msk [vmem:[#allocation3 + $0x58] sm:$0x3] %vm6884_vm11, %v21149_v37 }
 0xa09   :  { %5483 = vst.msk [vmem:[#allocation2 + $0xb8] sm:$0xff] %vm701_vm8, %v5419_v62  ;;  %v5417_v12 = vadd.f32 %v18913_v57, %v4930_v23  ;;  %4805 = vst.msk [vmem:[#allocation2 + $0xc8] sm:$0xff] %vm701_vm8, %v4741_v11  ;;  %v4746_v53 = vadd.f32 %v14998_v0, %v4259_v25  ;;  %15234 = vmatprep.mubr.msk.f32.mxu1 %vm15886_vm4, %v21149_v37  ;;  %v4260_v57 = vld [vmem:[#allocation2 + $0xf8] sm:$0xff]  ;;  %v4258_v62 = vld [vmem:[#allocation2 + $0xe8] sm:$0xff] }
 0xa0a   :  { %v4935_v55 = vld [vmem:[#allocation2 + $0xd0] sm:$0xff]  ;;  %v4573_v22 = vpop.f32.mrf.mxu1  ;;  %v19331_v26 = vpop.f32.mrf.mxu0  ;;  %6897 = vst.msk [vmem:[#allocation3 + $0x70] sm:$0x3] %vm6884_vm11, %v21149_v37  ;;  %6900 = vst.msk [vmem:[#allocation3 + $0x88] sm:$0x3] %vm6884_vm11, %v21149_v37 }
 0xa0b   :  { %5481 = vst.msk [vmem:[#allocation2 + $0xa8] sm:$0xff] %vm701_vm8, %v5417_v12  ;;  %v5422_v18 = vadd.f32 %v18931_v6, %v4935_v55  ;;  %4810 = vst.msk [vmem:[#allocation2 + $0xf0] sm:$0xff] %vm701_vm8, %v4746_v53  ;;  %v4744_v4 = vadd.f32 %v4573_v22, %v4257_v24  ;;  %v4263_v12 = vld [vmem:[#allocation2 + $0x110] sm:$0xff] }
 0xa0c   :  { %v4933_v31 = vld [vmem:[#allocation2 + $0xc0] sm:$0xff]  ;;  %v14999_v28 = vpop.f32.mrf.mxu1  ;;  %v19336_v1 = vpop.f32.mrf.mxu0  ;;  %6903 = vst.msk [vmem:[#allocation3 + $0xa0] sm:$0x3] %vm6884_vm11, %v21149_v37  ;;  %6906 = vst.msk [vmem:[#allocation3 + $0xb8] sm:$0x3] %vm6884_vm11, %v21149_v37 }
 0xa0d   :  { %5486 = vst.msk [vmem:[#allocation2 + $0xd0] sm:$0xff] %vm701_vm8, %v5422_v18  ;;  %v5420_v7 = vadd.f32 %v18944_v58, %v4933_v31  ;;  %4808 = vst.msk [vmem:[#allocation2 + $0xe0] sm:$0xff] %vm701_vm8, %v4744_v4  ;;  %v4747_v46 = vadd.f32 %v14999_v28, %v4260_v57  ;;  %v4261_v18 = vld [vmem:[#allocation2 + $0x100] sm:$0xff] }
 0xa0e   :  { %v4936_v52 = vld [vmem:[#allocation2 + $0xd8] sm:$0xff]  ;;  %v4576_v11 = vpop.f32.mrf.mxu1  ;;  %v19341_v23 = vpop.f32.mrf.mxu0  ;;  %6909 = vst.msk [vmem:[#allocation3 + $0xd0] sm:$0x3] %vm6884_vm11, %v21149_v37  ;;  %6912 = vst.msk [vmem:[#allocation3 + $0xe8] sm:$0x3] %vm6884_vm11, %v21149_v37 }
 0xa0f   :  { %5484 = vst.msk [vmem:[#allocation2 + $0xc0] sm:$0xff] %vm701_vm8, %v5420_v7  ;;  %v5423_v6 = vadd.f32 %v18949_v63, %v4936_v52  ;;  %4811 = vst.msk [vmem:[#allocation2 + $0xf8] sm:$0xff] %vm701_vm8, %v4747_v46  ;;  %v4745_v25 = vadd.f32 %v4576_v11, %v4258_v62  ;;  %v4264_v7 = vld [vmem:[#allocation2 + $0x118] sm:$0xff] }
 0xa10   :  { %v4934_v0 = vld [vmem:[#allocation2 + $0xc8] sm:$0xff]  ;;  %v15002_v53 = vpop.f32.mrf.mxu1  ;;  %v19346_v55 = vpop.f32.mrf.mxu0  ;;  %6915 = vst.msk [vmem:[#allocation3 + $0x100] sm:$0x3] %vm6884_vm11, %v21149_v37  ;;  %6918 = vst.msk [vmem:[#allocation3 + $0x118] sm:$0x3] %vm6884_vm11, %v21149_v37 }
 0xa11   :  { %5487 = vst.msk [vmem:[#allocation2 + $0xd8] sm:$0xff] %vm701_vm8, %v5423_v6  ;;  %v5421_v58 = vadd.f32 %v18955_v14, %v4934_v0  ;;  %4809 = vst.msk [vmem:[#allocation2 + $0xe8] sm:$0xff] %vm701_vm8, %v4745_v25  ;;  %v4750_v24 = vadd.f32 %v15002_v53, %v4263_v12  ;;  %v4262_v6 = vld [vmem:[#allocation2 + $0x108] sm:$0xff] }
 0xa12   :  { %v4939_v22 = vld [vmem:[#allocation2 + $0xf0] sm:$0xff]  ;;  %v4589_v4 = vpop.f32.mrf.mxu1  ;;  %v19351_v31 = vpop.f32.mrf.mxu0  ;;  %6921 = vst.msk [vmem:[#allocation3 + $0x130] sm:$0x3] %vm6884_vm11, %v21149_v37  ;;  %6924 = vst.msk [vmem:[#allocation3 + $0x148] sm:$0x3] %vm6884_vm11, %v21149_v37 }
 0xa13   :  { %5485 = vst.msk [vmem:[#allocation2 + $0xc8] sm:$0xff] %vm701_vm8, %v5421_v58  ;;  %v5426_v63 = vadd.f32 %v18973_v45, %v4939_v22  ;;  %4814 = vst.msk [vmem:[#allocation2 + $0x110] sm:$0xff] %vm701_vm8, %v4750_v24  ;;  %v4748_v57 = vadd.f32 %v4589_v4, %v4261_v18  ;;  %v4267_v58 = vld [vmem:[#allocation2 + $0x130] sm:$0xff] }
 0xa14   :  { %v4937_v28 = vld [vmem:[#allocation2 + $0xe0] sm:$0xff]  ;;  %v15003_v46 = vpop.f32.mrf.mxu1  ;;  %v19356_v52 = vpop.f32.mrf.mxu0  ;;  %6927 = vst.msk [vmem:[#allocation3 + $0x160] sm:$0x3] %vm6884_vm11, %v21149_v37  ;;  %6930 = vst.msk [vmem:[#allocation3 + $0x178] sm:$0x3] %vm6884_vm11, %v21149_v37 }
 0xa15   :  { %5490 = vst.msk [vmem:[#allocation2 + $0xf0] sm:$0xff] %vm701_vm8, %v5426_v63  ;;  %v5424_v14 = vadd.f32 %v18979_v43, %v4937_v28  ;;  %4812 = vst.msk [vmem:[#allocation2 + $0x100] sm:$0xff] %vm701_vm8, %v4748_v57  ;;  %v4751_v62 = vadd.f32 %v15003_v46, %v4264_v7  ;;  %v4265_v63 = vld [vmem:[#allocation2 + $0x120] sm:$0xff]  ;;  %v4268_v46 = vld [vmem:[#allocation2 + $0x138] sm:$0xff] }
 0xa16   :  { %v4940_v11 = vld [vmem:[#allocation2 + $0xf8] sm:$0xff]  ;;  %v4592_v25 = vpop.f32.mrf.mxu1  ;;  %v19361_v0 = vpop.f32.mrf.mxu0  ;;  %6933 = vst.msk [vmem:[#allocation3 + $0x190] sm:$0x3] %vm6884_vm11, %v21149_v37  ;;  %6936 = vst.msk [vmem:[#allocation3 + $0x1a8] sm:$0x3] %vm6884_vm11, %v21149_v37 }
 0xa17   :  { %5488 = vst.msk [vmem:[#allocation2 + $0xe0] sm:$0xff] %vm701_vm8, %v5424_v14  ;;  %v5427_v45 = vadd.f32 %v18984_v34, %v4940_v11  ;;  %4815 = vst.msk [vmem:[#allocation2 + $0x118] sm:$0xff] %vm701_vm8, %v4751_v62  ;;  %v4749_v12 = vadd.f32 %v4592_v25, %v4262_v6  ;;  %v4266_v25 = vld [vmem:[#allocation2 + $0x128] sm:$0xff] }
 0xa18   :  { %v4938_v53 = vld [vmem:[#allocation2 + $0xe8] sm:$0xff]  ;;  %v15006_v24 = vpop.f32.mrf.mxu1  ;;  %v19366_v22 = vpop.f32.mrf.mxu0  ;;  %6939 = vst.msk [vmem:[#allocation3 + $0x1c0] sm:$0x3] %vm6884_vm11, %v21149_v37  ;;  %6942 = vst.msk [vmem:[#allocation3 + $0x1d8] sm:$0x3] %vm6884_vm11, %v21149_v37 }
 0xa19   :  { %5491 = vst.msk [vmem:[#allocation2 + $0xf8] sm:$0xff] %vm701_vm8, %v5427_v45  ;;  %v5425_v43 = vadd.f32 %v18990_v32, %v4938_v53  ;;  %4813 = vst.msk [vmem:[#allocation2 + $0x108] sm:$0xff] %vm701_vm8, %v4749_v12  ;;  %v4754_v18 = vadd.f32 %v15006_v24, %v4267_v58  ;;  %v4271_v58 = vld [vmem:[#allocation2 + $0x150] sm:$0xff] }
 0xa1a   :  { %v4943_v4 = vld [vmem:[#allocation2 + $0x110] sm:$0xff]  ;;  %v4605_v57 = vpop.f32.mrf.mxu1  ;;  %v19374_v62 = vpop.f32.mrf.mxu0 }
 0xa1b   :  { %5489 = vst.msk [vmem:[#allocation2 + $0xe8] sm:$0xff] %vm701_vm8, %v5425_v43  ;;  %v5430_v34 = vadd.f32 %v19008_v30, %v4943_v4  ;;  %4818 = vst.msk [vmem:[#allocation2 + $0x130] sm:$0xff] %vm701_vm8, %v4754_v18  ;;  %v4752_v28 = vadd.f32 %v4605_v57, %v4265_v63  ;;  %v4269_v63 = vld [vmem:[#allocation2 + $0x140] sm:$0xff] }
 0xa1c   :  { %v4941_v7 = vld [vmem:[#allocation2 + $0x100] sm:$0xff]  ;;  %v15007_v14 = vpop.f32.mrf.mxu1  ;;  %v19382_v43 = vpop.f32.mrf.mxu0 }
 0xa1d   :  { %5494 = vst.msk [vmem:[#allocation2 + $0x110] sm:$0xff] %vm701_vm8, %v5430_v34  ;;  %v5428_v32 = vadd.f32 %v19013_v44, %v4941_v7  ;;  %4816 = vst.msk [vmem:[#allocation2 + $0x120] sm:$0xff] %vm701_vm8, %v4752_v28  ;;  %v4755_v11 = vadd.f32 %v15007_v14, %v4268_v46  ;;  %v4272_v7 = vld [vmem:[#allocation2 + $0x158] sm:$0xff] }
 0xa1e   :  { %v4944_v6 = vld [vmem:[#allocation2 + $0x118] sm:$0xff]  ;;  %v4608_v45 = vpop.f32.mrf.mxu1  ;;  %v19390_v14 = vpop.f32.mrf.mxu0 }
 0xa1f   :  { %5492 = vst.msk [vmem:[#allocation2 + $0x100] sm:$0xff] %vm701_vm8, %v5428_v32  ;;  %v5431_v30 = vadd.f32 %v19018_v19, %v4944_v6  ;;  %4819 = vst.msk [vmem:[#allocation2 + $0x138] sm:$0xff] %vm701_vm8, %v4755_v11  ;;  %v4753_v12 = vadd.f32 %v4608_v45, %v4266_v25  ;;  %v4270_v6 = vld [vmem:[#allocation2 + $0x148] sm:$0xff] }
 0xa20   :  { %v4942_v53 = vld [vmem:[#allocation2 + $0x108] sm:$0xff]  ;;  %v15010_v24 = vpop.f32.mrf.mxu1 }
 0xa21   :  { %5495 = vst.msk [vmem:[#allocation2 + $0x118] sm:$0xff] %vm701_vm8, %v5431_v30  ;;  %v5429_v44 = vadd.f32 %v19024_v5, %v4942_v53  ;;  %4817 = vst.msk [vmem:[#allocation2 + $0x128] sm:$0xff] %vm701_vm8, %v4753_v12  ;;  %v4758_v18 = vadd.f32 %v15010_v24, %v4271_v58  ;;  %v4275_v12 = vld [vmem:[#allocation2 + $0x170] sm:$0xff]  ;;  %v19398_v58 = vpop.f32.mrf.mxu0 }
 0xa22   :  { %v4947_v4 = vld [vmem:[#allocation2 + $0x130] sm:$0xff]  ;;  %v4621_v57 = vpop.f32.mrf.mxu1 }
 0xa23   :  { %5493 = vst.msk [vmem:[#allocation2 + $0x108] sm:$0xff] %vm701_vm8, %v5429_v44  ;;  %v5434_v19 = vadd.f32 %v19042_v60, %v4947_v4  ;;  %4822 = vst.msk [vmem:[#allocation2 + $0x150] sm:$0xff] %vm701_vm8, %v4758_v18  ;;  %v4756_v34 = vadd.f32 %v4621_v57, %v4269_v63  ;;  %v4273_v18 = vld [vmem:[#allocation2 + $0x160] sm:$0xff] }
 0xa24   :  { %v4945_v28 = vld [vmem:[#allocation2 + $0x120] sm:$0xff]  ;;  %v15011_v46 = vpop.f32.mrf.mxu1 }
 0xa25   :  { %5498 = vst.msk [vmem:[#allocation2 + $0x130] sm:$0xff] %vm701_vm8, %v5434_v19  ;;  %v5432_v5 = vadd.f32 %v19047_v48, %v4945_v28  ;;  %4820 = vst.msk [vmem:[#allocation2 + $0x140] sm:$0xff] %vm701_vm8, %v4756_v34  ;;  %v4759_v32 = vadd.f32 %v15011_v46, %v4272_v7  ;;  %v4276_v19 = vld [vmem:[#allocation2 + $0x178] sm:$0xff]  ;;  %v19406_v28 = vpop.f32.mrf.mxu0 }
 0xa26   :  { %v4948_v11 = vld [vmem:[#allocation2 + $0x138] sm:$0xff]  ;;  %v4624_v25 = vpop.f32.mrf.mxu1 }
 0xa27   :  { %5496 = vst.msk [vmem:[#allocation2 + $0x120] sm:$0xff] %vm701_vm8, %v5432_v5  ;;  %v5435_v60 = vadd.f32 %v19052_v42, %v4948_v11  ;;  %4823 = vst.msk [vmem:[#allocation2 + $0x158] sm:$0xff] %vm701_vm8, %v4759_v32  ;;  %v4757_v45 = vadd.f32 %v4624_v25, %v4270_v6  ;;  %v4274_v5 = vld [vmem:[#allocation2 + $0x168] sm:$0xff]  ;;  %v4279_v25 = vld [vmem:[#allocation2 + $0x190] sm:$0xff] }
 0xa28   :  { %v4946_v30 = vld [vmem:[#allocation2 + $0x128] sm:$0xff]  ;;  %v15014_v53 = vpop.f32.mrf.mxu1 }
 0xa29   :  { %5499 = vst.msk [vmem:[#allocation2 + $0x138] sm:$0xff] %vm701_vm8, %v5435_v60  ;;  %v5433_v48 = vadd.f32 %v19058_v54, %v4946_v30  ;;  %4821 = vst.msk [vmem:[#allocation2 + $0x148] sm:$0xff] %vm701_vm8, %v4757_v45  ;;  %v4762_v24 = vadd.f32 %v15014_v53, %v4275_v12  ;;  %v19414_v45 = vpop.f32.mrf.mxu0  ;;  %v4277_v53 = vld [vmem:[#allocation2 + $0x180] sm:$0xff] }
 0xa2a   :  { %v4951_v44 = vld [vmem:[#allocation2 + $0x150] sm:$0xff]  ;;  %v4637_v4 = vpop.f32.mrf.mxu1 }
 0xa2b   :  { %5497 = vst.msk [vmem:[#allocation2 + $0x128] sm:$0xff] %vm701_vm8, %v5433_v48  ;;  %v5438_v42 = vadd.f32 %v19076_v59, %v4951_v44  ;;  %4826 = vst.msk [vmem:[#allocation2 + $0x170] sm:$0xff] %vm701_vm8, %v4762_v24  ;;  %v4760_v63 = vadd.f32 %v4637_v4, %v4273_v18  ;;  %v4280_v18 = vld [vmem:[#allocation2 + $0x198] sm:$0xff] }
 0xa2c   :  { %v4949_v57 = vld [vmem:[#allocation2 + $0x140] sm:$0xff]  ;;  %v15015_v34 = vpop.f32.mrf.mxu1 }
 0xa2d   :  { %5502 = vst.msk [vmem:[#allocation2 + $0x150] sm:$0xff] %vm701_vm8, %v5438_v42  ;;  %v5436_v54 = vadd.f32 %v19081_v21, %v4949_v57  ;;  %4824 = vst.msk [vmem:[#allocation2 + $0x160] sm:$0xff] %vm701_vm8, %v4760_v63  ;;  %v4763_v7 = vadd.f32 %v15015_v34, %v4276_v19  ;;  %v19422_v42 = vpop.f32.mrf.mxu0  ;;  %v4278_v19 = vld [vmem:[#allocation2 + $0x188] sm:$0xff] }
 0xa2e   :  { %v4952_v46 = vld [vmem:[#allocation2 + $0x158] sm:$0xff]  ;;  %v4640_v32 = vpop.f32.mrf.mxu1 }
 0xa2f   :  { %5500 = vst.msk [vmem:[#allocation2 + $0x140] sm:$0xff] %vm701_vm8, %v5436_v54  ;;  %v5439_v59 = vadd.f32 %v19086_v16, %v4952_v46  ;;  %4827 = vst.msk [vmem:[#allocation2 + $0x178] sm:$0xff] %vm701_vm8, %v4763_v7  ;;  %v4761_v11 = vadd.f32 %v4640_v32, %v4274_v5  ;;  %v4283_v46 = vld [vmem:[#allocation2 + $0x1b0] sm:$0xff]  ;;  %v19430_v32 = vpop.f32.mrf.mxu0 }
 0xa30   :  { %v4950_v6 = vld [vmem:[#allocation2 + $0x148] sm:$0xff]  ;;  %v15018_v60 = vpop.f32.mrf.mxu1 }
 0xa31   :  { %5503 = vst.msk [vmem:[#allocation2 + $0x158] sm:$0xff] %vm701_vm8, %v5439_v59  ;;  %v5437_v21 = vadd.f32 %v19092_v50, %v4950_v6  ;;  %4825 = vst.msk [vmem:[#allocation2 + $0x168] sm:$0xff] %vm701_vm8, %v4761_v11  ;;  %v4766_v30 = vadd.f32 %v15018_v60, %v4279_v25  ;;  %v4281_v6 = vld [vmem:[#allocation2 + $0x1a0] sm:$0xff] }
 0xa32   :  { %v4955_v12 = vld [vmem:[#allocation2 + $0x170] sm:$0xff]  ;;  %v4653_v48 = vpop.f32.mrf.mxu1 }
 0xa33   :  { %5501 = vst.msk [vmem:[#allocation2 + $0x148] sm:$0xff] %vm701_vm8, %v5437_v21  ;;  %v5442_v16 = vadd.f32 %v19110_v35, %v4955_v12  ;;  %4830 = vst.msk [vmem:[#allocation2 + $0x190] sm:$0xff] %vm701_vm8, %v4766_v30  ;;  %v4764_v24 = vadd.f32 %v4653_v48, %v4277_v53  ;;  %v4284_v30 = vld [vmem:[#allocation2 + $0x1b8] sm:$0xff]  ;;  %v19438_v53 = vpop.f32.mrf.mxu0 }
 0xa34   :  { %v4953_v44 = vld [vmem:[#allocation2 + $0x160] sm:$0xff]  ;;  %v15019_v4 = vpop.f32.mrf.mxu1 }
 0xa35   :  { %5506 = vst.msk [vmem:[#allocation2 + $0x170] sm:$0xff] %vm701_vm8, %v5442_v16  ;;  %v5440_v50 = vadd.f32 %v19115_v40, %v4953_v44  ;;  %4828 = vst.msk [vmem:[#allocation2 + $0x180] sm:$0xff] %vm701_vm8, %v4764_v24  ;;  %v4767_v63 = vadd.f32 %v15019_v4, %v4280_v18  ;;  %v4282_v24 = vld [vmem:[#allocation2 + $0x1a8] sm:$0xff] }
 0xa36   :  { %v4956_v57 = vld [vmem:[#allocation2 + $0x178] sm:$0xff]  ;;  %v4656_v34 = vpop.f32.mrf.mxu1 }
 0xa37   :  { %5504 = vst.msk [vmem:[#allocation2 + $0x160] sm:$0xff] %vm701_vm8, %v5440_v50  ;;  %v5443_v35 = vadd.f32 %v19120_v41, %v4956_v57  ;;  %4831 = vst.msk [vmem:[#allocation2 + $0x198] sm:$0xff] %vm701_vm8, %v4767_v63  ;;  %v4765_v54 = vadd.f32 %v4656_v34, %v4278_v19  ;;  %v4287_v50 = vld [vmem:[#allocation2 + $0x1d0] sm:$0xff]  ;;  %v19446_v57 = vpop.f32.mrf.mxu0 }
 0xa38   :  { %v4954_v7 = vld [vmem:[#allocation2 + $0x168] sm:$0xff]  ;;  %v15022_v5 = vpop.f32.mrf.mxu1 }
 0xa39   :  { %5507 = vst.msk [vmem:[#allocation2 + $0x178] sm:$0xff] %vm701_vm8, %v5443_v35  ;;  %v5441_v40 = vadd.f32 %v19126_v49, %v4954_v7  ;;  %4829 = vst.msk [vmem:[#allocation2 + $0x188] sm:$0xff] %vm701_vm8, %v4765_v54  ;;  %v4770_v59 = vadd.f32 %v15022_v5, %v4283_v46  ;;  %v4285_v35 = vld [vmem:[#allocation2 + $0x1c0] sm:$0xff]  ;;  %v4288_v5 = vld [vmem:[#allocation2 + $0x1d8] sm:$0xff] }
 0xa3a   :  { %v4959_v11 = vld [vmem:[#allocation2 + $0x190] sm:$0xff]  ;;  %v4669_v25 = vpop.f32.mrf.mxu1 }
 0xa3b   :  { %5505 = vst.msk [vmem:[#allocation2 + $0x168] sm:$0xff] %vm701_vm8, %v5441_v40  ;;  %v5446_v41 = vadd.f32 %v19144_v10, %v4959_v11  ;;  %4834 = vst.msk [vmem:[#allocation2 + $0x1b0] sm:$0xff] %vm701_vm8, %v4770_v59  ;;  %v4768_v60 = vadd.f32 %v4669_v25, %v4281_v6  ;;  %v19454_v59 = vpop.f32.mrf.mxu0  ;;  %v4286_v25 = vld [vmem:[#allocation2 + $0x1c8] sm:$0xff] }
 0xa3c   :  { %v4957_v21 = vld [vmem:[#allocation2 + $0x180] sm:$0xff]  ;;  %v15023_v12 = vpop.f32.mrf.mxu1 }
 0xa3d   :  { %5510 = vst.msk [vmem:[#allocation2 + $0x190] sm:$0xff] %vm701_vm8, %v5446_v41  ;;  %v5444_v49 = vadd.f32 %v19149_v29, %v4957_v21  ;;  %4832 = vst.msk [vmem:[#allocation2 + $0x1a0] sm:$0xff] %vm701_vm8, %v4768_v60  ;;  %v4771_v48 = vadd.f32 %v15023_v12, %v4284_v30  ;;  %v4291_v30 = vld [vmem:[#allocation2 + $0x1f0] sm:$0xff] }
 0xa3e   :  { %v4960_v16 = vld [vmem:[#allocation2 + $0x198] sm:$0xff]  ;;  %v4672_v44 = vpop.f32.mrf.mxu1 }
 0xa3f   :  { %5508 = vst.msk [vmem:[#allocation2 + $0x180] sm:$0xff] %vm701_vm8, %v5444_v49  ;;  %v5447_v10 = vadd.f32 %v19154_v17, %v4960_v16  ;;  %4835 = vst.msk [vmem:[#allocation2 + $0x1b8] sm:$0xff] %vm701_vm8, %v4771_v48  ;;  %v4769_v18 = vadd.f32 %v4672_v44, %v4282_v24  ;;  %v19462_v49 = vpop.f32.mrf.mxu0  ;;  %v4289_v24 = vld [vmem:[#allocation2 + $0x1e0] sm:$0xff] }
 0xa40   :  { %v4958_v4 = vld [vmem:[#allocation2 + $0x188] sm:$0xff]  ;;  %v15026_v63 = vpop.f32.mrf.mxu1 }
 0xa41   :  { %5511 = vst.msk [vmem:[#allocation2 + $0x198] sm:$0xff] %vm701_vm8, %v5447_v10  ;;  %v5445_v29 = vadd.f32 %v19160_v27, %v4958_v4  ;;  %4833 = vst.msk [vmem:[#allocation2 + $0x1a8] sm:$0xff] %vm701_vm8, %v4769_v18  ;;  %v4774_v19 = vadd.f32 %v15026_v63, %v4287_v50  ;;  %v4292_v4 = vld [vmem:[#allocation2 + $0x1f8] sm:$0xff]  ;;  %v19470_v63 = vpop.f32.mrf.mxu0 }
 0xa42   :  { %v4963_v34 = vld [vmem:[#allocation2 + $0x1b0] sm:$0xff]  ;;  %v4685_v54 = vpop.f32.mrf.mxu1 }
 0xa43   :  { %5509 = vst.msk [vmem:[#allocation2 + $0x188] sm:$0xff] %vm701_vm8, %v5445_v29  ;;  %v5450_v17 = vadd.f32 %v19178_v9, %v4963_v34  ;;  %4838 = vst.msk [vmem:[#allocation2 + $0x1d0] sm:$0xff] %vm701_vm8, %v4774_v19  ;;  %v4772_v7 = vadd.f32 %v4685_v54, %v4285_v35  ;;  %v4290_v34 = vld [vmem:[#allocation2 + $0x1e8] sm:$0xff] }
 0xa44   :  { %v4961_v46 = vld [vmem:[#allocation2 + $0x1a0] sm:$0xff]  ;;  %v15027_v40 = vpop.f32.mrf.mxu1 }
 0xa45   :  { %5514 = vst.msk [vmem:[#allocation2 + $0x1b0] sm:$0xff] %vm701_vm8, %v5450_v17  ;;  %v5448_v27 = vadd.f32 %v19183_v3, %v4961_v46  ;;  %4836 = vst.msk [vmem:[#allocation2 + $0x1c0] sm:$0xff] %vm701_vm8, %v4772_v7  ;;  %v4775_v11 = vadd.f32 %v15027_v40, %v4288_v5  ;;  %v5590_v7 = vld [vmem:[#allocation2 + $0x10] sm:$0xff]  ;;  %v19478_v5 = vpop.f32.mrf.mxu0 }
 0xa46   :  { %v4964_v6 = vld [vmem:[#allocation2 + $0x1b8] sm:$0xff]  ;;  %v4688_v41 = vpop.f32.mrf.mxu1 }
 0xa47   :  { %5512 = vst.msk [vmem:[#allocation2 + $0x1a0] sm:$0xff] %vm701_vm8, %v5448_v27  ;;  %v5451_v9 = vadd.f32 %v19188_v51, %v4964_v6  ;;  %4839 = vst.msk [vmem:[#allocation2 + $0x1d8] sm:$0xff] %vm701_vm8, %v4775_v11  ;;  %v4773_v60 = vadd.f32 %v4688_v41, %v4286_v25  ;;  %v5588_v6 = vld [vmem:[#allocation2] sm:$0xff] }
 0xa48   :  { %v4962_v21 = vld [vmem:[#allocation2 + $0x1a8] sm:$0xff]  ;;  %v15030_v12 = vpop.f32.mrf.mxu1 }
 0xa49   :  { %5515 = vst.msk [vmem:[#allocation2 + $0x1b8] sm:$0xff] %vm701_vm8, %v5451_v9  ;;  %v5449_v3 = vadd.f32 %v19194_v33, %v4962_v21  ;;  %4837 = vst.msk [vmem:[#allocation2 + $0x1c8] sm:$0xff] %vm701_vm8, %v4773_v60  ;;  %v4778_v48 = vadd.f32 %v15030_v12, %v4291_v30  ;;  %v5591_v21 = vld [vmem:[#allocation2 + $0x18] sm:$0xff]  ;;  %v19486_v12 = vpop.f32.mrf.mxu0 }
 0xa4a   :  { %v4967_v16 = vld [vmem:[#allocation2 + $0x1d0] sm:$0xff]  ;;  %v4701_v44 = vpop.f32.mrf.mxu1 }
 0xa4b   :  { %5513 = vst.msk [vmem:[#allocation2 + $0x1a8] sm:$0xff] %vm701_vm8, %v5449_v3  ;;  %v5454_v51 = vadd.f32 %v19212_v39, %v4967_v16  ;;  %4842 = vst.msk [vmem:[#allocation2 + $0x1f0] sm:$0xff] %vm701_vm8, %v4778_v48  ;;  %v4776_v10 = vadd.f32 %v4701_v44, %v4289_v24  ;;  %v5589_v24 = vld [vmem:[#allocation2 + $0x8] sm:$0xff] }
 0xa4c   :  { %v4965_v18 = vld [vmem:[#allocation2 + $0x1c0] sm:$0xff]  ;;  %v15031_v50 = vpop.f32.mrf.mxu1 }
 0xa4d   :  { %5518 = vst.msk [vmem:[#allocation2 + $0x1d0] sm:$0xff] %vm701_vm8, %v5454_v51  ;;  %v5452_v33 = vadd.f32 %v19217_v2, %v4965_v18  ;;  %4840 = vst.msk [vmem:[#allocation2 + $0x1e0] sm:$0xff] %vm701_vm8, %v4776_v10  ;;  %v4779_v29 = vadd.f32 %v15031_v50, %v4292_v4  ;;  %v21150_v2 = vld [vmem:[#allocation15_spill] sm:$0xff]  ;;  %v21152_v51 = vld [vmem:[#allocation17_spill] sm:$0xff] }
 0xa4e   :  { %v4968_v19 = vld [vmem:[#allocation2 + $0x1d8] sm:$0xff]  ;;  %v4704_v35 = vpop.f32.mrf.mxu1  ;;  %v5594_v50 = vld [vmem:[#allocation2 + $0x30] sm:$0xff] }
 0xa4f   :  { %5516 = vst.msk [vmem:[#allocation2 + $0x1c0] sm:$0xff] %vm701_vm8, %v5452_v33  ;;  %v5455_v39 = vadd.f32 %v19222_v56, %v4968_v19  ;;  %4843 = vst.msk [vmem:[#allocation2 + $0x1f8] sm:$0xff] %vm701_vm8, %v4779_v29  ;;  %v4777_v54 = vadd.f32 %v4704_v35, %v4290_v34  ;;  %v21151_v56 = vld [vmem:[#allocation16_spill] sm:$0xff]  ;;  %v19494_v29 = vpop.f32.mrf.mxu0 }
 0xa50   :  { %v4966_v17 = vld [vmem:[#allocation2 + $0x1c8] sm:$0xff]  ;;  %v15102_v46 = vpop.f32.mrf.mxu1 }
 0xa51   :  { %5519 = vst.msk [vmem:[#allocation2 + $0x1d8] sm:$0xff] %vm701_vm8, %v5455_v39  ;;  %v5453_v40 = vadd.f32 %v21150_v2, %v4966_v17  ;;  %4841 = vst.msk [vmem:[#allocation2 + $0x1e8] sm:$0xff] %vm701_vm8, %v4777_v54  ;;  %v6077_v27 = vadd.f32 %v15102_v46, %v5590_v7  ;;  %v5592_v39 = vld [vmem:[#allocation2 + $0x20] sm:$0xff] }
 0xa52   :  { %v4971_v11 = vld [vmem:[#allocation2 + $0x1f0] sm:$0xff]  ;;  %v5820_v25 = vpop.f32.mrf.mxu1  ;;  %v21154_v17 = vld [vmem:[#allocation19_spill] sm:$0xff] }
 0xa53   :  { %5517 = vst.msk [vmem:[#allocation2 + $0x1c8] sm:$0xff] %vm701_vm8, %v5453_v40  ;;  %v5458_v41 = vadd.f32 %v21151_v56, %v4971_v11  ;;  %6141 = vst.msk [vmem:[#allocation2 + $0x10] sm:$0xff] %vm701_vm8, %v6077_v27  ;;  %v6075_v9 = vadd.f32 %v5820_v25, %v5588_v6  ;;  %v5595_v40 = vld [vmem:[#allocation2 + $0x38] sm:$0xff]  ;;  %v19502_v11 = vpop.f32.mrf.mxu0 }
 0xa54   :  { %v4969_v60 = vld [vmem:[#allocation2 + $0x1e0] sm:$0xff]  ;;  %v15103_v30 = vpop.f32.mrf.mxu1 }
 0xa55   :  { %5522 = vst.msk [vmem:[#allocation2 + $0x1f0] sm:$0xff] %vm701_vm8, %v5458_v41  ;;  %v5456_v3 = vadd.f32 %v19251_v20, %v4969_v60  ;;  %6139 = vst.msk [vmem:[#allocation2] sm:$0xff] %vm701_vm8, %v6075_v9  ;;  %v6078_v48 = vadd.f32 %v15103_v30, %v5591_v21  ;;  %v21153_v20 = vld [vmem:[#allocation18_spill] sm:$0xff]  ;;  %v5593_v41 = vld [vmem:[#allocation2 + $0x28] sm:$0xff] }
 0xa56   :  { %v4972_v16 = vld [vmem:[#allocation2 + $0x1f8] sm:$0xff]  ;;  %v5823_v44 = vpop.f32.mrf.mxu1 }
 0xa57   :  { %5520 = vst.msk [vmem:[#allocation2 + $0x1e0] sm:$0xff] %vm701_vm8, %v5456_v3  ;;  %v5459_v10 = vadd.f32 %v21152_v51, %v4972_v16  ;;  %6142 = vst.msk [vmem:[#allocation2 + $0x18] sm:$0xff] %vm701_vm8, %v6078_v48  ;;  %v6076_v18 = vadd.f32 %v5823_v44, %v5589_v24  ;;  %v5598_v3 = vld [vmem:[#allocation2 + $0x50] sm:$0xff]  ;;  %v19510_v16 = vpop.f32.mrf.mxu0  ;;  %v21155_v44 = vlaneseq }
 0xa58   :  { %v4970_v4 = vld [vmem:[#allocation2 + $0x1e8] sm:$0xff]  ;;  %v15106_v33 = vpop.f32.mrf.mxu1 }
 0xa59   :  { %5523 = vst.msk [vmem:[#allocation2 + $0x1f8] sm:$0xff] %vm701_vm8, %v5459_v10  ;;  %v5457_v19 = vadd.f32 %v21153_v20, %v4970_v4  ;;  %6140 = vst.msk [vmem:[#allocation2 + $0x8] sm:$0xff] %vm701_vm8, %v6076_v18  ;;  %v6081_v34 = vadd.f32 %v15106_v33, %v5594_v50  ;;  %v684_v51 = vshrl.u32 %v21155_v44, 7  ;;  %v5596_v10 = vld [vmem:[#allocation2 + $0x40] sm:$0xff]  ;;  %v5599_v33 = vld [vmem:[#allocation2 + $0x58] sm:$0xff] }
 0xa5a   :  { %v6269_v35 = vld [vmem:[#allocation2 + $0x10] sm:$0xff]  ;;  %v5836_v54 = vpop.f32.mrf.mxu1 }
 0xa5b   :  { %5521 = vst.msk [vmem:[#allocation2 + $0x1e8] sm:$0xff] %vm701_vm8, %v5457_v19  ;;  %v6756_v7 = vadd.f32 %v21154_v17, %v6269_v35  ;;  %6145 = vst.msk [vmem:[#allocation2 + $0x30] sm:$0xff] %vm701_vm8, %v6081_v34  ;;  %v6079_v46 = vadd.f32 %v5836_v54, %v5592_v39  ;;  %v19519_v34 = vpop.f32.mrf.mxu0  ;;  %v685_v39 = vmul.u32 2, %v684_v51  ;;  %v5597_v54 = vld [vmem:[#allocation2 + $0x48] sm:$0xff] }
 0xa5c   :  { %v6267_v2 = vld [vmem:[#allocation2] sm:$0xff]  ;;  %v15107_v27 = vpop.f32.mrf.mxu1 }
 0xa5d   :  { %6820 = vst.msk [vmem:[#allocation2 + $0x10] sm:$0xff] %vm701_vm8, %v6756_v7  ;;  %v6754_v6 = vadd.f32 %v19285_v15, %v6267_v2  ;;  %6143 = vst.msk [vmem:[#allocation2 + $0x20] sm:$0xff] %vm701_vm8, %v6079_v46  ;;  %v6082_v25 = vadd.f32 %v15107_v27, %v5595_v40  ;;  %v5602_v40 = vld [vmem:[#allocation2 + $0x70] sm:$0xff] }
 0xa5e   :  { %v6270_v56 = vld [vmem:[#allocation2 + $0x18] sm:$0xff]  ;;  %v5839_v9 = vpop.f32.mrf.mxu1 }
 0xa5f   :  { %6818 = vst.msk [vmem:[#allocation2] sm:$0xff] %vm701_vm8, %v6754_v6  ;;  %v6757_v60 = vadd.f32 %v19290_v36, %v6270_v56  ;;  %6146 = vst.msk [vmem:[#allocation2 + $0x38] sm:$0xff] %vm701_vm8, %v6082_v25  ;;  %v6080_v21 = vadd.f32 %v5839_v9, %v5593_v41  ;;  %v19527_v56 = vpop.f32.mrf.mxu0  ;;  %v5600_v9 = vld [vmem:[#allocation2 + $0x60] sm:$0xff] }
 0xa60   :  { %v6268_v30 = vld [vmem:[#allocation2 + $0x8] sm:$0xff]  ;;  %v15110_v48 = vpop.f32.mrf.mxu1 }
 0xa61   :  { %6821 = vst.msk [vmem:[#allocation2 + $0x18] sm:$0xff] %vm701_vm8, %v6757_v60  ;;  %v6755_v15 = vadd.f32 %v19296_v13, %v6268_v30  ;;  %6144 = vst.msk [vmem:[#allocation2 + $0x28] sm:$0xff] %vm701_vm8, %v6080_v21  ;;  %v6085_v24 = vadd.f32 %v15110_v48, %v5598_v3  ;;  %v21156_v60 = vld [vmem:[#allocation8_spill] sm:$0xff] }
 0xa62   :  { %v5852_v18 = vpop.f32.mrf.mxu1  ;;  %v6273_v36 = vld [vmem:[#allocation2 + $0x30] sm:$0xff]  ;;  %vm19533_vm9 = vcmp.eq.s32.totalorder %v21156_v60, %v685_v39 }
 0xa63   :  { %6819 = vst.msk [vmem:[#allocation2 + $0x8] sm:$0xff] %vm701_vm8, %v6755_v15  ;;  %6149 = vst.msk [vmem:[#allocation2 + $0x50] sm:$0xff] %vm701_vm8, %v6085_v24  ;;  %v6083_v4 = vadd.f32 %v5852_v18, %v5596_v10  ;;  %v6760_v50 = vadd.f32 %v19308_v47, %v6273_v36  ;;  %v5603_v18 = vld [vmem:[#allocation2 + $0x78] sm:$0xff] }
 0xa64   :  { %v15111_v20 = vpop.f32.mrf.mxu1  ;;  %v6271_v19 = vld [vmem:[#allocation2 + $0x20] sm:$0xff]  ;;  %v6945_v15 = vld [vmem:[#allocation2 + $0x10] sm:$0xff] }
 0xa65   :  { %6147 = vst.msk [vmem:[#allocation2 + $0x40] sm:$0xff] %vm701_vm8, %v6083_v4  ;;  %6824 = vst.msk [vmem:[#allocation2 + $0x30] sm:$0xff] %vm701_vm8, %v6760_v50  ;;  %v6086_v13 = vadd.f32 %v15111_v20, %v5599_v33  ;;  %v6758_v35 = vadd.f32 %v19313_v38, %v6271_v19  ;;  %v19540_v50 = vpop.f32.mrf.mxu0 }
 0xa66   :  { %v5855_v17 = vpop.f32.mrf.mxu1  ;;  %v6274_v7 = vld [vmem:[#allocation2 + $0x38] sm:$0xff]  ;;  %v6943_v2 = vld [vmem:[#allocation2] sm:$0xff] }
 0xa67   :  { %6150 = vst.msk [vmem:[#allocation2 + $0x58] sm:$0xff] %vm701_vm8, %v6086_v13  ;;  %6822 = vst.msk [vmem:[#allocation2 + $0x20] sm:$0xff] %vm701_vm8, %v6758_v35  ;;  %v6084_v47 = vadd.f32 %v5855_v17, %v5597_v54  ;;  %v6761_v46 = vadd.f32 %v19318_v61, %v6274_v7  ;;  %v689_v61 = vadd.s32 1, %v685_v39  ;;  %v6947_v24 = vmax.f32 %v6943_v2, 0.0  ;;  %v5601_v35 = vld [vmem:[#allocation2 + $0x68] sm:$0xff] }
 0xa68   :  { %v15114_v27 = vpop.f32.mrf.mxu1  ;;  %v6272_v6 = vld [vmem:[#allocation2 + $0x28] sm:$0xff]  ;;  %v6946_v25 = vld [vmem:[#allocation2 + $0x18] sm:$0xff]  ;;  %v6949_v13 = vmax.f32 %v6945_v15, 0.0 }
 0xa69   :  { %6148 = vst.msk [vmem:[#allocation2 + $0x48] sm:$0xff] %vm701_vm8, %v6084_v47  ;;  %6825 = vst.msk [vmem:[#allocation2 + $0x38] sm:$0xff] %vm701_vm8, %v6761_v46  ;;  %v6089_v38 = vadd.f32 %v15114_v27, %v5602_v40  ;;  %v6759_v41 = vadd.f32 %v19324_v8, %v6272_v6  ;;  %v6950_v10 = vmax.f32 %v6946_v25, 0.0  ;;  %vm690_vm10 = vcmp.eq.s32.totalorder %v21156_v60, %v689_v61  ;;  %v5606_v46 = vld [vmem:[#allocation2 + $0x90] sm:$0xff]  ;;  %v19555_v6 = vpop.f32.mrf.mxu0 }
 0xa6a   :  { %v5868_v30 = vpop.f32.mrf.mxu1  ;;  %v6277_v3 = vld [vmem:[#allocation2 + $0x50] sm:$0xff]  ;;  %v6944_v48 = vld [vmem:[#allocation2 + $0x8] sm:$0xff] }
 0xa6b   :  { %6153 = vst.msk [vmem:[#allocation2 + $0x70] sm:$0xff] %vm701_vm8, %v6089_v38  ;;  %6823 = vst.msk [vmem:[#allocation2 + $0x28] sm:$0xff] %vm701_vm8, %v6759_v41  ;;  %v6087_v44 = vadd.f32 %v5868_v30, %v5600_v9  ;;  %v6764_v51 = vadd.f32 %v19331_v26, %v6277_v3  ;;  %v6948_v8 = vmax.f32 %v6944_v48, 0.0  ;;  %v19548_v26 = vsel %vm19533_vm9, 1.0, %v21149_v37 }
 0xa6c   :  { %v15115_v36 = vpop.f32.mrf.mxu1  ;;  %v6275_v4 = vld [vmem:[#allocation2 + $0x40] sm:$0xff]  ;;  %21159 = vst [vmem:[#allocation10_spill] sm:$0xff] %v19548_v26  ;;  %v19563_v41 = vsel %vm690_vm10, 1.0, %v21149_v37  ;;  %v7104_v3 = vld [vmem:[#allocation2 + $0x30] sm:$0xff] }
 0xa6d   :  { %6151 = vst.msk [vmem:[#allocation2 + $0x60] sm:$0xff] %vm701_vm8, %v6087_v44  ;;  %6828 = vst.msk [vmem:[#allocation2 + $0x50] sm:$0xff] %vm701_vm8, %v6764_v51  ;;  %v6090_v33 = vadd.f32 %v15115_v36, %v5603_v18  ;;  %v6762_v20 = vadd.f32 %v19336_v1, %v6275_v4  ;;  %v6952_v19 = vmax.f32 %v6948_v8, %v6950_v10  ;;  %v19574_v8 = vpop.f32.mrf.mxu0  ;;  %v7108_v36 = vmax.f32 %v7104_v3, 0.0  ;;  %v5605_v4 = vld [vmem:[#allocation2 + $0x88] sm:$0xff] }
 0xa6e   :  { %v5871_v39 = vpop.f32.mrf.mxu1  ;;  %v6278_v54 = vld [vmem:[#allocation2 + $0x58] sm:$0xff]  ;;  %v6951_v1 = vmax.f32 %v6947_v24, %v6949_v13  ;;  %v7102_v47 = vld [vmem:[#allocation2 + $0x20] sm:$0xff]  ;;  %21160 = vst [vmem:[#allocation11_spill] sm:$0xff] %v19563_v41 }
 0xa6f   :  { %6154 = vst.msk [vmem:[#allocation2 + $0x78] sm:$0xff] %vm701_vm8, %v6090_v33  ;;  %6826 = vst.msk [vmem:[#allocation2 + $0x40] sm:$0xff] %vm701_vm8, %v6762_v20  ;;  %v6088_v17 = vadd.f32 %v5871_v39, %v5601_v35  ;;  %v6765_v7 = vadd.f32 %v19341_v23, %v6278_v54  ;;  %15231 = vmatpush3.msra.mxu1 %v6952_v19  ;;  %v5604_v23 = vld [vmem:[#allocation2 + $0x80] sm:$0xff]  ;;  %v7106_v48 = vmax.f32 %v7102_v47, 0.0  ;;  %v5607_v24 = vld [vmem:[#allocation2 + $0x98] sm:$0xff] }
 0xa70   :  { %v15118_v2 = vpop.f32.mrf.mxu1  ;;  %v6276_v40 = vld [vmem:[#allocation2 + $0x48] sm:$0xff]  ;;  %15232 = vmatprep.subr.mxu1 %v21149_v37  ;;  %v7105_v27 = vld [vmem:[#allocation2 + $0x38] sm:$0xff]  ;;  %v5610_v39 = vld [vmem:[#allocation2 + $0xb0] sm:$0xff] }
 0xa71   :  { %6152 = vst.msk [vmem:[#allocation2 + $0x68] sm:$0xff] %vm701_vm8, %v6088_v17  ;;  %6829 = vst.msk [vmem:[#allocation2 + $0x58] sm:$0xff] %vm701_vm8, %v6765_v7  ;;  %v6093_v25 = vadd.f32 %v15118_v2, %v5606_v46  ;;  %v6763_v38 = vadd.f32 %v19346_v55, %v6276_v40  ;;  %15233 = vmatpush3.msra.mxu1 %v6951_v1  ;;  %v7109_v61 = vmax.f32 %v7105_v27, 0.0  ;;  %v5608_v46 = vld [vmem:[#allocation2 + $0xa0] sm:$0xff] }
 0xa72   :  { %v5884_v9 = vpop.f32.mrf.mxu1  ;;  %v6281_v21 = vld [vmem:[#allocation2 + $0x70] sm:$0xff]  ;;  %15235 = vmatmul.mubr.msk.f32.vlgmr.msra.gmra.mxu1 %vm701_vm8, %v19548_v26  ;;  %15237 = vmatprep.subr.mxu1 %v21149_v37  ;;  %v7103_v30 = vld [vmem:[#allocation2 + $0x28] sm:$0xff] }
 0xa73   :  { %6157 = vst.msk [vmem:[#allocation2 + $0x90] sm:$0xff] %vm701_vm8, %v6093_v25  ;;  %6827 = vst.msk [vmem:[#allocation2 + $0x48] sm:$0xff] %vm701_vm8, %v6763_v38  ;;  %v6091_v55 = vadd.f32 %v5884_v9, %v5604_v23  ;;  %v6768_v15 = vadd.f32 %v19351_v31, %v6281_v21  ;;  %15238 = vmatpush3.msra.mxu1 %v6952_v19  ;;  %15241 = vmatprep.mubr.msk.f32.mxu1 %vm15886_vm4, %v21149_v37  ;;  %v7107_v60 = vmax.f32 %v7103_v30, 0.0  ;;  %v5611_v30 = vld [vmem:[#allocation2 + $0xb8] sm:$0xff] }
 0xa74   :  { %v15119_v44 = vpop.f32.mrf.mxu1  ;;  %v6279_v51 = vld [vmem:[#allocation2 + $0x60] sm:$0xff]  ;;  %15239 = vmatprep.subr.mxu1 %v21149_v37  ;;  %v7257_v25 = vld [vmem:[#allocation2 + $0x50] sm:$0xff] }
 0xa75   :  { %6155 = vst.msk [vmem:[#allocation2 + $0x80] sm:$0xff] %vm701_vm8, %v6091_v55  ;;  %6832 = vst.msk [vmem:[#allocation2 + $0x70] sm:$0xff] %vm701_vm8, %v6768_v15  ;;  %v6094_v10 = vadd.f32 %v15119_v44, %v5607_v24  ;;  %v6766_v31 = vadd.f32 %v19356_v52, %v6279_v51  ;;  %15240 = vmatpush3.msra.mxu1 %v6951_v1  ;;  %v7111_v18 = vmax.f32 %v7107_v60, %v7109_v61  ;;  %v19588_v1 = vpop.f32.mrf.mxu0  ;;  %v5609_v24 = vld [vmem:[#allocation2 + $0xa8] sm:$0xff] }
 0xa76   :  { %v5887_v33 = vpop.f32.mrf.mxu1  ;;  %v6282_v20 = vld [vmem:[#allocation2 + $0x78] sm:$0xff]  ;;  %15242 = vmatmul.mubr.msk.f32.vlgmr.msra.gmra.mxu1 %vm701_vm8, %v19563_v41  ;;  %15244 = vmatprep.subr.mxu1 %v21149_v37  ;;  %v7110_v52 = vmax.f32 %v7106_v48, %v7108_v36  ;;  %v7255_v35 = vld [vmem:[#allocation2 + $0x40] sm:$0xff]  ;;  %v7261_v61 = vmax.f32 %v7257_v25, 0.0  ;;  %v5614_v36 = vld [vmem:[#allocation2 + $0xd0] sm:$0xff] }
 0xa77   :  { %6158 = vst.msk [vmem:[#allocation2 + $0x98] sm:$0xff] %vm701_vm8, %v6094_v10  ;;  %6830 = vst.msk [vmem:[#allocation2 + $0x60] sm:$0xff] %vm701_vm8, %v6766_v31  ;;  %v6092_v19 = vadd.f32 %v5887_v33, %v5605_v4  ;;  %v6769_v13 = vadd.f32 %v19361_v0, %v6282_v20  ;;  %15245 = vmatpush3.msra.mxu1 %v7111_v18  ;;  %15248 = vmatprep.mubr.msk.f32.mxu1 %vm15886_vm4, %v21149_v37  ;;  %v7259_v38 = vmax.f32 %v7255_v35, 0.0  ;;  %v19602_v55 = vpop.f32.mrf.mxu0 }
 0xa78   :  { %v15122_v54 = vpop.f32.mrf.mxu1  ;;  %v6280_v17 = vld [vmem:[#allocation2 + $0x68] sm:$0xff]  ;;  %15246 = vmatprep.subr.mxu1 %v21149_v37  ;;  %v7258_v7 = vld [vmem:[#allocation2 + $0x58] sm:$0xff] }
 0xa79   :  { %6156 = vst.msk [vmem:[#allocation2 + $0x88] sm:$0xff] %vm701_vm8, %v6092_v19  ;;  %6833 = vst.msk [vmem:[#allocation2 + $0x78] sm:$0xff] %vm701_vm8, %v6769_v13  ;;  %v6097_v47 = vadd.f32 %v15122_v54, %v5610_v39  ;;  %v6767_v0 = vadd.f32 %v19366_v22, %v6280_v17  ;;  %15247 = vmatpush3.msra.mxu1 %v7110_v52  ;;  %v7262_v21 = vmax.f32 %v7258_v7, 0.0  ;;  %v19616_v19 = vpop.f32.mrf.mxu0 }
 0xa7a   :  { %v5900_v2 = vpop.f32.mrf.mxu1  ;;  %v6285_v40 = vld [vmem:[#allocation2 + $0x90] sm:$0xff]  ;;  %15249 = vmatmul.mubr.msk.f32.vlgmr.msra.gmra.mxu1 %vm701_vm8, %v19548_v26  ;;  %15251 = vmatprep.subr.mxu1 %v21149_v37  ;;  %v7256_v27 = vld [vmem:[#allocation2 + $0x48] sm:$0xff] }
 0xa7b   :  { %6161 = vst.msk [vmem:[#allocation2 + $0xb0] sm:$0xff] %vm701_vm8, %v6097_v47  ;;  %6831 = vst.msk [vmem:[#allocation2 + $0x68] sm:$0xff] %vm701_vm8, %v6767_v0  ;;  %v6095_v23 = vadd.f32 %v5900_v2, %v5608_v46  ;;  %v6772_v9 = vadd.f32 %v19374_v62, %v6285_v40  ;;  %15252 = vmatpush3.msra.mxu1 %v7111_v18  ;;  %15255 = vmatprep.mubr.msk.f32.mxu1 %vm15886_vm4, %v21149_v37  ;;  %v7260_v22 = vmax.f32 %v7256_v27, 0.0  ;;  %v5615_v2 = vld [vmem:[#allocation2 + $0xd8] sm:$0xff]  ;;  %v19630_v25 = vpop.f32.mrf.mxu0 }
 0xa7c   :  { %v15123_v3 = vpop.f32.mrf.mxu1  ;;  %v6283_v48 = vld [vmem:[#allocation2 + $0x80] sm:$0xff]  ;;  %15253 = vmatprep.subr.mxu1 %v21149_v37  ;;  %v7410_v17 = vld [vmem:[#allocation2 + $0x70] sm:$0xff] }
 0xa7d   :  { %6159 = vst.msk [vmem:[#allocation2 + $0xa0] sm:$0xff] %vm701_vm8, %v6095_v23  ;;  %6836 = vst.msk [vmem:[#allocation2 + $0x90] sm:$0xff] %vm701_vm8, %v6772_v9  ;;  %v6098_v15 = vadd.f32 %v15123_v3, %v5611_v30  ;;  %v6770_v62 = vadd.f32 %v19382_v43, %v6283_v48  ;;  %15254 = vmatpush3.msra.mxu1 %v7110_v52  ;;  %v7264_v60 = vmax.f32 %v7260_v22, %v7262_v21  ;;  %v5612_v52 = vld [vmem:[#allocation2 + $0xc0] sm:$0xff]  ;;  %v5613_v22 = vld [vmem:[#allocation2 + $0xc8] sm:$0xff] }
 0xa7e   :  { %v5903_v44 = vpop.f32.mrf.mxu1  ;;  %v6286_v51 = vld [vmem:[#allocation2 + $0x98] sm:$0xff]  ;;  %15256 = vmatmul.mubr.msk.f32.vlgmr.msra.gmra.mxu1 %vm701_vm8, %v19563_v41  ;;  %15258 = vmatprep.subr.mxu1 %v21149_v37  ;;  %v7263_v43 = vmax.f32 %v7259_v38, %v7261_v61  ;;  %v7408_v18 = vld [vmem:[#allocation2 + $0x60] sm:$0xff]  ;;  %v7414_v9 = vmax.f32 %v7410_v17, 0.0 }
 0xa7f   :  { %6162 = vst.msk [vmem:[#allocation2 + $0xb8] sm:$0xff] %vm701_vm8, %v6098_v15  ;;  %6834 = vst.msk [vmem:[#allocation2 + $0x80] sm:$0xff] %vm701_vm8, %v6770_v62  ;;  %v6096_v10 = vadd.f32 %v5903_v44, %v5609_v24  ;;  %v6773_v31 = vadd.f32 %v19390_v14, %v6286_v51  ;;  %15259 = vmatpush3.msra.mxu1 %v7264_v60  ;;  %15262 = vmatprep.mubr.msk.f32.mxu1 %vm15886_vm4, %v21149_v37  ;;  %v7412_v7 = vmax.f32 %v7408_v18, 0.0  ;;  %v5618_v62 = vld [vmem:[#allocation2 + $0xf0] sm:$0xff]  ;;  %v19644_v44 = vpop.f32.mrf.mxu0 }
 0xa80   :  { %v15126_v4 = vpop.f32.mrf.mxu1  ;;  %v6284_v33 = vld [vmem:[#allocation2 + $0x88] sm:$0xff]  ;;  %15260 = vmatprep.subr.mxu1 %v21149_v37  ;;  %v7411_v20 = vld [vmem:[#allocation2 + $0x78] sm:$0xff] }
 0xa81   :  { %6160 = vst.msk [vmem:[#allocation2 + $0xa8] sm:$0xff] %vm701_vm8, %v6096_v10  ;;  %6837 = vst.msk [vmem:[#allocation2 + $0x98] sm:$0xff] %vm701_vm8, %v6773_v31  ;;  %v6101_v13 = vadd.f32 %v15126_v4, %v5614_v36  ;;  %v6771_v14 = vadd.f32 %v19398_v58, %v6284_v33  ;;  %15261 = vmatpush3.msra.mxu1 %v7263_v43  ;;  %v7415_v46 = vmax.f32 %v7411_v20, 0.0  ;;  %v5616_v10 = vld [vmem:[#allocation2 + $0xe0] sm:$0xff] }
 0xa82   :  { %v5916_v35 = vpop.f32.mrf.mxu1  ;;  %v6289_v39 = vld [vmem:[#allocation2 + $0xb0] sm:$0xff]  ;;  %15263 = vmatmul.mubr.msk.f32.vlgmr.msra.gmra.mxu1 %vm701_vm8, %v19548_v26  ;;  %15265 = vmatprep.subr.mxu1 %v21149_v37  ;;  %v7409_v54 = vld [vmem:[#allocation2 + $0x68] sm:$0xff] }
 0xa83   :  { %6165 = vst.msk [vmem:[#allocation2 + $0xd0] sm:$0xff] %vm701_vm8, %v6101_v13  ;;  %6835 = vst.msk [vmem:[#allocation2 + $0x88] sm:$0xff] %vm701_vm8, %v6771_v14  ;;  %v6099_v47 = vadd.f32 %v5916_v35, %v5612_v52  ;;  %v6776_v0 = vadd.f32 %v19406_v28, %v6289_v39  ;;  %15266 = vmatpush3.msra.mxu1 %v7264_v60  ;;  %15269 = vmatprep.mubr.msk.f32.mxu1 %vm15886_vm4, %v21149_v37  ;;  %v7413_v58 = vmax.f32 %v7409_v54, 0.0  ;;  %v5619_v14 = vld [vmem:[#allocation2 + $0xf8] sm:$0xff]  ;;  %v19658_v39 = vpop.f32.mrf.mxu0 }
 0xa84   :  { %v15127_v40 = vpop.f32.mrf.mxu1  ;;  %v6287_v27 = vld [vmem:[#allocation2 + $0xa0] sm:$0xff]  ;;  %15267 = vmatprep.subr.mxu1 %v21149_v37  ;;  %v7563_v36 = vld [vmem:[#allocation2 + $0x90] sm:$0xff] }
 0xa85   :  { %6163 = vst.msk [vmem:[#allocation2 + $0xc0] sm:$0xff] %vm701_vm8, %v6099_v47  ;;  %6840 = vst.msk [vmem:[#allocation2 + $0xb0] sm:$0xff] %vm701_vm8, %v6776_v0  ;;  %v6102_v38 = vadd.f32 %v15127_v40, %v5615_v2  ;;  %v6774_v28 = vadd.f32 %v19414_v45, %v6287_v27  ;;  %15268 = vmatpush3.msra.mxu1 %v7263_v43  ;;  %v7417_v23 = vmax.f32 %v7413_v58, %v7415_v46  ;;  %v5617_v47 = vld [vmem:[#allocation2 + $0xe8] sm:$0xff]  ;;  %v5622_v27 = vld [vmem:[#allocation2 + $0x110] sm:$0xff] }
 0xa86   :  { %v5919_v21 = vpop.f32.mrf.mxu1  ;;  %v6290_v30 = vld [vmem:[#allocation2 + $0xb8] sm:$0xff]  ;;  %15270 = vmatmul.mubr.msk.f32.vlgmr.msra.gmra.mxu1 %vm701_vm8, %v19563_v41  ;;  %15272 = vmatprep.subr.mxu1 %v21149_v37  ;;  %v7416_v45 = vmax.f32 %v7412_v7, %v7414_v9  ;;  %v7561_v15 = vld [vmem:[#allocation2 + $0x80] sm:$0xff]  ;;  %v7567_v7 = vmax.f32 %v7563_v36, 0.0  ;;  %v19672_v9 = vpop.f32.mrf.mxu0  ;;  %v5621_v36 = vld [vmem:[#allocation2 + $0x108] sm:$0xff] }
 0xa87   :  { %6166 = vst.msk [vmem:[#allocation2 + $0xd8] sm:$0xff] %vm701_vm8, %v6102_v38  ;;  %6838 = vst.msk [vmem:[#allocation2 + $0xa0] sm:$0xff] %vm701_vm8, %v6774_v28  ;;  %v6100_v3 = vadd.f32 %v5919_v21, %v5613_v22  ;;  %v6777_v48 = vadd.f32 %v19422_v42, %v6290_v30  ;;  %15273 = vmatpush3.msra.mxu1 %v7417_v23  ;;  %15276 = vmatprep.mubr.msk.f32.mxu1 %vm15886_vm4, %v21149_v37  ;;  %v7565_v4 = vmax.f32 %v7561_v15, 0.0  ;;  %v5620_v21 = vld [vmem:[#allocation2 + $0x100] sm:$0xff] }
 0xa88   :  { %v15130_v60 = vpop.f32.mrf.mxu1  ;;  %v6288_v61 = vld [vmem:[#allocation2 + $0xa8] sm:$0xff]  ;;  %15274 = vmatprep.subr.mxu1 %v21149_v37  ;;  %v7564_v24 = vld [vmem:[#allocation2 + $0x98] sm:$0xff] }
 0xa89   :  { %6164 = vst.msk [vmem:[#allocation2 + $0xc8] sm:$0xff] %vm701_vm8, %v6100_v3  ;;  %6841 = vst.msk [vmem:[#allocation2 + $0xb8] sm:$0xff] %vm701_vm8, %v6777_v48  ;;  %v6105_v51 = vadd.f32 %v15130_v60, %v5618_v62  ;;  %v6775_v42 = vadd.f32 %v19430_v32, %v6288_v61  ;;  %15275 = vmatpush3.msra.mxu1 %v7416_v45  ;;  %v7568_v13 = vmax.f32 %v7564_v24, 0.0  ;;  %v5623_v24 = vld [vmem:[#allocation2 + $0x118] sm:$0xff] }
 0xa8a   :  { %v5932_v31 = vpop.f32.mrf.mxu1  ;;  %v6293_v43 = vld [vmem:[#allocation2 + $0xd0] sm:$0xff]  ;;  %15277 = vmatmul.mubr.msk.f32.vlgmr.msra.gmra.mxu1 %vm701_vm8, %v19548_v26  ;;  %15279 = vmatprep.subr.mxu1 %v21149_v37  ;;  %v7562_v18 = vld [vmem:[#allocation2 + $0x88] sm:$0xff] }
 0xa8b   :  { %6169 = vst.msk [vmem:[#allocation2 + $0xf0] sm:$0xff] %vm701_vm8, %v6105_v51  ;;  %6839 = vst.msk [vmem:[#allocation2 + $0xa8] sm:$0xff] %vm701_vm8, %v6775_v42  ;;  %v6103_v33 = vadd.f32 %v5932_v31, %v5616_v10  ;;  %v6780_v20 = vadd.f32 %v19438_v53, %v6293_v43  ;;  %15280 = vmatpush3.msra.mxu1 %v7417_v23  ;;  %15283 = vmatprep.mubr.msk.f32.mxu1 %vm15886_vm4, %v21149_v37  ;;  %v7566_v32 = vmax.f32 %v7562_v18, 0.0  ;;  %v19686_v10 = vpop.f32.mrf.mxu0 }
 0xa8c   :  { %v15131_v52 = vpop.f32.mrf.mxu1  ;;  %v6291_v35 = vld [vmem:[#allocation2 + $0xc0] sm:$0xff]  ;;  %15281 = vmatprep.subr.mxu1 %v21149_v37 }
 0xa8d   :  { %6167 = vst.msk [vmem:[#allocation2 + $0xe0] sm:$0xff] %vm701_vm8, %v6103_v33  ;;  %6844 = vst.msk [vmem:[#allocation2 + $0xd0] sm:$0xff] %vm701_vm8, %v6780_v20  ;;  %v6106_v54 = vadd.f32 %v15131_v52, %v5619_v14  ;;  %v6778_v53 = vadd.f32 %v19446_v57, %v6291_v35  ;;  %15282 = vmatpush3.msra.mxu1 %v7416_v45  ;;  %v7570_v17 = vmax.f32 %v7566_v32, %v7568_v13  ;;  %v7716_v45 = vld [vmem:[#allocation2 + $0xb0] sm:$0xff] }
 0xa8e   :  { %v5935_v0 = vpop.f32.mrf.mxu1  ;;  %v6294_v58 = vld [vmem:[#allocation2 + $0xd8] sm:$0xff]  ;;  %15284 = vmatmul.mubr.msk.f32.vlgmr.msra.gmra.mxu1 %vm701_vm8, %v19563_v41  ;;  %15286 = vmatprep.subr.mxu1 %v21149_v37  ;;  %v7569_v57 = vmax.f32 %v7565_v4, %v7567_v7  ;;  %v7714_v40 = vld [vmem:[#allocation2 + $0xa0] sm:$0xff]  ;;  %v7720_v18 = vmax.f32 %v7716_v45, 0.0  ;;  %v5626_v14 = vld [vmem:[#allocation2 + $0x130] sm:$0xff] }
 0xa8f   :  { %6170 = vst.msk [vmem:[#allocation2 + $0xf8] sm:$0xff] %vm701_vm8, %v6106_v54  ;;  %6842 = vst.msk [vmem:[#allocation2 + $0xc0] sm:$0xff] %vm701_vm8, %v6778_v53  ;;  %v6104_v46 = vadd.f32 %v5935_v0, %v5617_v47  ;;  %v6781_v2 = vadd.f32 %v19454_v59, %v6294_v58  ;;  %15287 = vmatpush3.msra.mxu1 %v7570_v17  ;;  %15290 = vmatprep.mubr.msk.f32.mxu1 %vm15886_vm4, %v21149_v37  ;;  %v7718_v15 = vmax.f32 %v7714_v40, 0.0  ;;  %v19700_v53 = vpop.f32.mrf.mxu0  ;;  %v5624_v7 = vld [vmem:[#allocation2 + $0x120] sm:$0xff] }
 0xa90   :  { %v15134_v38 = vpop.f32.mrf.mxu1  ;;  %v6292_v28 = vld [vmem:[#allocation2 + $0xc8] sm:$0xff]  ;;  %15288 = vmatprep.subr.mxu1 %v21149_v37  ;;  %v7717_v23 = vld [vmem:[#allocation2 + $0xb8] sm:$0xff] }
 0xa91   :  { %6168 = vst.msk [vmem:[#allocation2 + $0xe8] sm:$0xff] %vm701_vm8, %v6104_v46  ;;  %6845 = vst.msk [vmem:[#allocation2 + $0xd8] sm:$0xff] %vm701_vm8, %v6781_v2  ;;  %v6109_v22 = vadd.f32 %v15134_v38, %v5622_v27  ;;  %v6779_v59 = vadd.f32 %v19462_v49, %v6292_v28  ;;  %15289 = vmatpush3.msra.mxu1 %v7569_v57  ;;  %v7721_v61 = vmax.f32 %v7717_v23, 0.0  ;;  %v5627_v38 = vld [vmem:[#allocation2 + $0x138] sm:$0xff] }
 0xa92   :  { %v5948_v30 = vpop.f32.mrf.mxu1  ;;  %v6297_v3 = vld [vmem:[#allocation2 + $0xf0] sm:$0xff]  ;;  %15291 = vmatmul.mubr.msk.f32.vlgmr.msra.gmra.mxu1 %vm701_vm8, %v19548_v26  ;;  %15293 = vmatprep.subr.mxu1 %v21149_v37  ;;  %v7715_v48 = vld [vmem:[#allocation2 + $0xa8] sm:$0xff] }
 0xa93   :  { %6173 = vst.msk [vmem:[#allocation2 + $0x110] sm:$0xff] %vm701_vm8, %v6109_v22  ;;  %6843 = vst.msk [vmem:[#allocation2 + $0xc8] sm:$0xff] %vm701_vm8, %v6779_v59  ;;  %v6107_v62 = vadd.f32 %v5948_v30, %v5620_v21  ;;  %v6784_v60 = vadd.f32 %v19470_v63, %v6297_v3  ;;  %15294 = vmatpush3.msra.mxu1 %v7570_v17  ;;  %15297 = vmatprep.mubr.msk.f32.mxu1 %vm15886_vm4, %v21149_v37  ;;  %v7719_v49 = vmax.f32 %v7715_v48, 0.0  ;;  %v19714_v22 = vpop.f32.mrf.mxu0  ;;  %v5625_v3 = vld [vmem:[#allocation2 + $0x128] sm:$0xff] }
 0xa94   :  { %v15135_v51 = vpop.f32.mrf.mxu1  ;;  %v6295_v42 = vld [vmem:[#allocation2 + $0xe0] sm:$0xff]  ;;  %15295 = vmatprep.subr.mxu1 %v21149_v37  ;;  %v7869_v46 = vld [vmem:[#allocation2 + $0xd0] sm:$0xff] }
 0xa95   :  { %6171 = vst.msk [vmem:[#allocation2 + $0x100] sm:$0xff] %vm701_vm8, %v6107_v62  ;;  %6848 = vst.msk [vmem:[#allocation2 + $0xf0] sm:$0xff] %vm701_vm8, %v6784_v60  ;;  %v6110_v31 = vadd.f32 %v15135_v51, %v5623_v24  ;;  %v6782_v63 = vadd.f32 %v19478_v5, %v6295_v42  ;;  %15296 = vmatpush3.msra.mxu1 %v7569_v57  ;;  %v7723_v43 = vmax.f32 %v7719_v49, %v7721_v61  ;;  %v5630_v49 = vld [vmem:[#allocation2 + $0x150] sm:$0xff]  ;;  %v19728_v42 = vpop.f32.mrf.mxu0 }
 0xa96   :  { %v5951_v4 = vpop.f32.mrf.mxu1  ;;  %v6298_v33 = vld [vmem:[#allocation2 + $0xf8] sm:$0xff]  ;;  %15298 = vmatmul.mubr.msk.f32.vlgmr.msra.gmra.mxu1 %vm701_vm8, %v19563_v41  ;;  %15300 = vmatprep.subr.mxu1 %v21149_v37  ;;  %v7722_v5 = vmax.f32 %v7718_v15, %v7720_v18  ;;  %v7867_v13 = vld [vmem:[#allocation2 + $0xc0] sm:$0xff]  ;;  %v7873_v30 = vmax.f32 %v7869_v46, 0.0 }
 0xa97   :  { %6174 = vst.msk [vmem:[#allocation2 + $0x118] sm:$0xff] %vm701_vm8, %v6110_v31  ;;  %6846 = vst.msk [vmem:[#allocation2 + $0xe0] sm:$0xff] %vm701_vm8, %v6782_v63  ;;  %v6108_v20 = vadd.f32 %v5951_v4, %v5621_v36  ;;  %v6785_v32 = vadd.f32 %v19486_v12, %v6298_v33  ;;  %15301 = vmatpush3.msra.mxu1 %v7723_v43  ;;  %15304 = vmatprep.mubr.msk.f32.mxu1 %vm15886_vm4, %v21149_v37  ;;  %v7871_v2 = vmax.f32 %v7867_v13, 0.0  ;;  %v5628_v63 = vld [vmem:[#allocation2 + $0x140] sm:$0xff]  ;;  %v5631_v13 = vld [vmem:[#allocation2 + $0x158] sm:$0xff] }
 0xa98   :  { %v15138_v52 = vpop.f32.mrf.mxu1  ;;  %v6296_v35 = vld [vmem:[#allocation2 + $0xe8] sm:$0xff]  ;;  %15302 = vmatprep.subr.mxu1 %v21149_v37  ;;  %v7870_v54 = vld [vmem:[#allocation2 + $0xd8] sm:$0xff] }
 0xa99   :  { %6172 = vst.msk [vmem:[#allocation2 + $0x108] sm:$0xff] %vm701_vm8, %v6108_v20  ;;  %6849 = vst.msk [vmem:[#allocation2 + $0xf8] sm:$0xff] %vm701_vm8, %v6785_v32  ;;  %v6113_v17 = vadd.f32 %v15138_v52, %v5626_v14  ;;  %v6783_v12 = vadd.f32 %v19494_v29, %v6296_v35  ;;  %15303 = vmatpush3.msra.mxu1 %v7722_v5  ;;  %v7874_v27 = vmax.f32 %v7870_v54, 0.0  ;;  %v19742_v35 = vpop.f32.mrf.mxu0 }
 0xa9a   :  { %v5964_v47 = vpop.f32.mrf.mxu1  ;;  %v6301_v0 = vld [vmem:[#allocation2 + $0x110] sm:$0xff]  ;;  %15305 = vmatmul.mubr.msk.f32.vlgmr.msra.gmra.mxu1 %vm701_vm8, %v19548_v26  ;;  %15307 = vmatprep.subr.mxu1 %v21149_v37  ;;  %v7868_v58 = vld [vmem:[#allocation2 + $0xc8] sm:$0xff] }
 0xa9b   :  { %6177 = vst.msk [vmem:[#allocation2 + $0x130] sm:$0xff] %vm701_vm8, %v6113_v17  ;;  %6847 = vst.msk [vmem:[#allocation2 + $0xe8] sm:$0xff] %vm701_vm8, %v6783_v12  ;;  %v6111_v57 = vadd.f32 %v5964_v47, %v5624_v7  ;;  %v6788_v40 = vadd.f32 %v19502_v11, %v6301_v0  ;;  %15308 = vmatpush3.msra.mxu1 %v7723_v43  ;;  %15311 = vmatprep.mubr.msk.f32.mxu1 %vm15886_vm4, %v21149_v37  ;;  %v7872_v29 = vmax.f32 %v7868_v58, 0.0  ;;  %v5629_v7 = vld [vmem:[#allocation2 + $0x148] sm:$0xff] }
 0xa9c   :  { %v15139_v28 = vpop.f32.mrf.mxu1  ;;  %v6299_v23 = vld [vmem:[#allocation2 + $0x100] sm:$0xff]  ;;  %15309 = vmatprep.subr.mxu1 %v21149_v37  ;;  %v8022_v4 = vld [vmem:[#allocation2 + $0xf0] sm:$0xff] }
 0xa9d   :  { %6175 = vst.msk [vmem:[#allocation2 + $0x120] sm:$0xff] %vm701_vm8, %v6111_v57  ;;  %6852 = vst.msk [vmem:[#allocation2 + $0x110] sm:$0xff] %vm701_vm8, %v6788_v40  ;;  %v6114_v59 = vadd.f32 %v15139_v28, %v5627_v38  ;;  %v6786_v11 = vadd.f32 %v19510_v16, %v6299_v23  ;;  %15310 = vmatpush3.msra.mxu1 %v7722_v5  ;;  %v7876_v21 = vmax.f32 %v7872_v29, %v7874_v27  ;;  %v5634_v57 = vld [vmem:[#allocation2 + $0x170] sm:$0xff]  ;;  %v19756_v38 = vpop.f32.mrf.mxu0  ;;  %v5632_v23 = vld [vmem:[#allocation2 + $0x160] sm:$0xff] }
 0xa9e   :  { %v5967_v48 = vpop.f32.mrf.mxu1  ;;  %v6302_v45 = vld [vmem:[#allocation2 + $0x118] sm:$0xff]  ;;  %15312 = vmatmul.mubr.msk.f32.vlgmr.msra.gmra.mxu1 %vm701_vm8, %v19563_v41  ;;  %15314 = vmatprep.subr.mxu1 %v21149_v37  ;;  %v7875_v16 = vmax.f32 %v7871_v2, %v7873_v30  ;;  %v8020_v60 = vld [vmem:[#allocation2 + $0xe0] sm:$0xff]  ;;  %v8026_v12 = vmax.f32 %v8022_v4, 0.0  ;;  %v5638_v4 = vld [vmem:[#allocation2 + $0x190] sm:$0xff] }
 0xa9f   :  { %6178 = vst.msk [vmem:[#allocation2 + $0x138] sm:$0xff] %vm701_vm8, %v6114_v59  ;;  %6850 = vst.msk [vmem:[#allocation2 + $0x100] sm:$0xff] %vm701_vm8, %v6786_v11  ;;  %v6112_v15 = vadd.f32 %v5967_v48, %v5625_v3  ;;  %v6789_v62 = vadd.f32 %v19519_v34, %v6302_v45  ;;  %15315 = vmatpush3.msra.mxu1 %v7876_v21  ;;  %15318 = vmatprep.mubr.msk.f32.mxu1 %vm15886_vm4, %v21149_v37  ;;  %v8024_v33 = vmax.f32 %v8020_v60, 0.0 }
 0xaa0   :  { %v15142_v61 = vpop.f32.mrf.mxu1  ;;  %v6300_v24 = vld [vmem:[#allocation2 + $0x108] sm:$0xff]  ;;  %15316 = vmatprep.subr.mxu1 %v21149_v37  ;;  %v8023_v51 = vld [vmem:[#allocation2 + $0xf8] sm:$0xff] }
 0xaa1   :  { %6176 = vst.msk [vmem:[#allocation2 + $0x128] sm:$0xff] %vm701_vm8, %v6112_v15  ;;  %6853 = vst.msk [vmem:[#allocation2 + $0x118] sm:$0xff] %vm701_vm8, %v6789_v62  ;;  %v6117_v31 = vadd.f32 %v15142_v61, %v5630_v49  ;;  %v6787_v34 = vadd.f32 %v19527_v56, %v6300_v24  ;;  %15317 = vmatpush3.msra.mxu1 %v7875_v16  ;;  %v8027_v5 = vmax.f32 %v8023_v51, 0.0  ;;  %v5635_v62 = vld [vmem:[#allocation2 + $0x178] sm:$0xff]  ;;  %v19770_v49 = vpop.f32.mrf.mxu0 }
 0xaa2   :  { %v5980_v43 = vpop.f32.mrf.mxu1  ;;  %v6305_v18 = vld [vmem:[#allocation2 + $0x130] sm:$0xff]  ;;  %15319 = vmatmul.mubr.msk.f32.vlgmr.msra.gmra.mxu1 %vm701_vm8, %v19548_v26  ;;  %15321 = vmatprep.subr.mxu1 %v21149_v37  ;;  %v8021_v36 = vld [vmem:[#allocation2 + $0xe8] sm:$0xff] }
 0xaa3   :  { %6181 = vst.msk [vmem:[#allocation2 + $0x150] sm:$0xff] %vm701_vm8, %v6117_v31  ;;  %6851 = vst.msk [vmem:[#allocation2 + $0x108] sm:$0xff] %vm701_vm8, %v6787_v34  ;;  %v6115_v20 = vadd.f32 %v5980_v43, %v5628_v63  ;;  %v6792_v32 = vadd.f32 %v19540_v50, %v6305_v18  ;;  %15322 = vmatpush3.msra.mxu1 %v7876_v21  ;;  %15325 = vmatprep.mubr.msk.f32.mxu1 %vm15886_vm4, %v21149_v37  ;;  %v8025_v56 = vmax.f32 %v8021_v36, 0.0  ;;  %v5633_v31 = vld [vmem:[#allocation2 + $0x168] sm:$0xff] }
 0xaa4   :  { %v15143_v14 = vpop.f32.mrf.mxu1  ;;  %v6303_v52 = vld [vmem:[#allocation2 + $0x120] sm:$0xff]  ;;  %15323 = vmatprep.subr.mxu1 %v21149_v37  ;;  %v8175_v30 = vld [vmem:[#allocation2 + $0x110] sm:$0xff] }
 0xaa5   :  { %6179 = vst.msk [vmem:[#allocation2 + $0x140] sm:$0xff] %vm701_vm8, %v6115_v20  ;;  %6856 = vst.msk [vmem:[#allocation2 + $0x130] sm:$0xff] %vm701_vm8, %v6792_v32  ;;  %v6118_v54 = vadd.f32 %v15143_v14, %v5631_v13  ;;  %v6790_v50 = vadd.f32 %v19555_v6, %v6303_v52  ;;  %15324 = vmatpush3.msra.mxu1 %v7875_v16  ;;  %v8029_v17 = vmax.f32 %v8025_v56, %v8027_v5  ;;  %v19784_v56 = vpop.f32.mrf.mxu0  ;;  %v5636_v13 = vld [vmem:[#allocation2 + $0x180] sm:$0xff] }
 0xaa6   :  { %v5983_v47 = vpop.f32.mrf.mxu1  ;;  %v6306_v0 = vld [vmem:[#allocation2 + $0x138] sm:$0xff]  ;;  %15326 = vmatmul.mubr.msk.f32.vlgmr.msra.gmra.mxu1 %vm701_vm8, %v19563_v41  ;;  %15328 = vmatprep.subr.mxu1 %v21149_v37  ;;  %v8028_v6 = vmax.f32 %v8024_v33, %v8026_v12  ;;  %v8173_v2 = vld [vmem:[#allocation2 + $0x100] sm:$0xff]  ;;  %v8179_v51 = vmax.f32 %v8175_v30, 0.0 }
 0xaa7   :  { %6182 = vst.msk [vmem:[#allocation2 + $0x158] sm:$0xff] %vm701_vm8, %v6118_v54  ;;  %6854 = vst.msk [vmem:[#allocation2 + $0x120] sm:$0xff] %vm701_vm8, %v6790_v50  ;;  %v6116_v58 = vadd.f32 %v5983_v47, %v5629_v7  ;;  %v6793_v46 = vadd.f32 %v19574_v8, %v6306_v0  ;;  %15329 = vmatpush3.msra.mxu1 %v8029_v17  ;;  %15332 = vmatprep.mubr.msk.f32.mxu1 %vm15886_vm4, %v21149_v37  ;;  %v8177_v3 = vmax.f32 %v8173_v2, 0.0  ;;  %v5639_v0 = vld [vmem:[#allocation2 + $0x198] sm:$0xff] }
 0xaa8   :  { %v15146_v40 = vpop.f32.mrf.mxu1  ;;  %v6304_v29 = vld [vmem:[#allocation2 + $0x128] sm:$0xff]  ;;  %15330 = vmatprep.subr.mxu1 %v21149_v37  ;;  %v8176_v27 = vld [vmem:[#allocation2 + $0x118] sm:$0xff] }
 0xaa9   :  { %6180 = vst.msk [vmem:[#allocation2 + $0x148] sm:$0xff] %vm701_vm8, %v6116_v58  ;;  %6857 = vst.msk [vmem:[#allocation2 + $0x138] sm:$0xff] %vm701_vm8, %v6793_v46  ;;  %v6121_v28 = vadd.f32 %v15146_v40, %v5634_v57  ;;  %v6791_v8 = vadd.f32 %v19588_v1, %v6304_v29  ;;  %15331 = vmatpush3.msra.mxu1 %v8028_v6  ;;  %v8180_v15 = vmax.f32 %v8176_v27, 0.0  ;;  %v5637_v29 = vld [vmem:[#allocation2 + $0x188] sm:$0xff] }
 0xaaa   :  { %v5996_v59 = vpop.f32.mrf.mxu1  ;;  %v6309_v11 = vld [vmem:[#allocation2 + $0x150] sm:$0xff]  ;;  %15333 = vmatmul.mubr.msk.f32.vlgmr.msra.gmra.mxu1 %vm701_vm8, %v19548_v26  ;;  %15335 = vmatprep.subr.mxu1 %v21149_v37  ;;  %v8174_v21 = vld [vmem:[#allocation2 + $0x108] sm:$0xff] }
 0xaab   :  { %6185 = vst.msk [vmem:[#allocation2 + $0x170] sm:$0xff] %vm701_vm8, %v6121_v28  ;;  %6855 = vst.msk [vmem:[#allocation2 + $0x128] sm:$0xff] %vm701_vm8, %v6791_v8  ;;  %v6119_v48 = vadd.f32 %v5996_v59, %v5632_v23  ;;  %v6796_v45 = vadd.f32 %v19602_v55, %v6309_v11  ;;  %15336 = vmatpush3.msra.mxu1 %v8029_v17  ;;  %15339 = vmatprep.mubr.msk.f32.mxu1 %vm15886_vm4, %v21149_v37  ;;  %v8178_v1 = vmax.f32 %v8174_v21, 0.0  ;;  %v5642_v11 = vld [vmem:[#allocation2 + $0x1b0] sm:$0xff] }
 0xaac   :  { %v15147_v16 = vpop.f32.mrf.mxu1  ;;  %v6307_v60 = vld [vmem:[#allocation2 + $0x140] sm:$0xff]  ;;  %15337 = vmatprep.subr.mxu1 %v21149_v37  ;;  %v8328_v50 = vld [vmem:[#allocation2 + $0x130] sm:$0xff] }
 0xaad   :  { %6183 = vst.msk [vmem:[#allocation2 + $0x160] sm:$0xff] %vm701_vm8, %v6119_v48  ;;  %6860 = vst.msk [vmem:[#allocation2 + $0x150] sm:$0xff] %vm701_vm8, %v6796_v45  ;;  %v6122_v61 = vadd.f32 %v15147_v16, %v5635_v62  ;;  %v6794_v55 = vadd.f32 %v19616_v19, %v6307_v60  ;;  %15338 = vmatpush3.msra.mxu1 %v8028_v6  ;;  %v8182_v24 = vmax.f32 %v8178_v1, %v8180_v15  ;;  %v19798_v6 = vpop.f32.mrf.mxu0  ;;  %v5640_v1 = vld [vmem:[#allocation2 + $0x1a0] sm:$0xff] }
 0xaae   :  { %v5999_v34 = vpop.f32.mrf.mxu1  ;;  %v6310_v63 = vld [vmem:[#allocation2 + $0x158] sm:$0xff]  ;;  %15340 = vmatmul.mubr.msk.f32.vlgmr.msra.gmra.mxu1 %vm701_vm8, %v19563_v41  ;;  %15342 = vmatprep.subr.mxu1 %v21149_v37  ;;  %v8181_v19 = vmax.f32 %v8177_v3, %v8179_v51  ;;  %v8326_v36 = vld [vmem:[#allocation2 + $0x120] sm:$0xff]  ;;  %v8332_v40 = vmax.f32 %v8328_v50, 0.0 }
 0xaaf   :  { %6186 = vst.msk [vmem:[#allocation2 + $0x178] sm:$0xff] %vm701_vm8, %v6122_v61  ;;  %6858 = vst.msk [vmem:[#allocation2 + $0x140] sm:$0xff] %vm701_vm8, %v6794_v55  ;;  %v6120_v43 = vadd.f32 %v5999_v34, %v5633_v31  ;;  %v6797_v18 = vadd.f32 %v19630_v25, %v6310_v63  ;;  %15343 = vmatpush3.msra.mxu1 %v8182_v24  ;;  %15346 = vmatprep.mubr.msk.f32.mxu1 %vm15886_vm4, %v21149_v37  ;;  %v8330_v17 = vmax.f32 %v8326_v36, 0.0  ;;  %v19814_v48 = vpop.f32.mrf.mxu0  ;;  %v5643_v31 = vld [vmem:[#allocation2 + $0x1b8] sm:$0xff] }
 0xab0   :  { %v15150_v33 = vpop.f32.mrf.mxu1  ;;  %v6308_v20 = vld [vmem:[#allocation2 + $0x148] sm:$0xff]  ;;  %15344 = vmatprep.subr.mxu1 %v21149_v37  ;;  %v8329_v32 = vld [vmem:[#allocation2 + $0x138] sm:$0xff] }
 0xab1   :  { %6184 = vst.msk [vmem:[#allocation2 + $0x168] sm:$0xff] %vm701_vm8, %v6120_v43  ;;  %6861 = vst.msk [vmem:[#allocation2 + $0x158] sm:$0xff] %vm701_vm8, %v6797_v18  ;;  %v6125_v5 = vadd.f32 %v15150_v33, %v5638_v4  ;;  %v6795_v25 = vadd.f32 %v19644_v44, %v6308_v20  ;;  %15345 = vmatpush3.msra.mxu1 %v8181_v19  ;;  %v8333_v47 = vmax.f32 %v8329_v32, 0.0  ;;  %v19869_v43 = vpop.f32.mrf.mxu0  ;;  %v5641_v4 = vld [vmem:[#allocation2 + $0x1a8] sm:$0xff] }
 0xab2   :  { %v6012_v14 = vpop.f32.mrf.mxu1  ;;  %v6313_v52 = vld [vmem:[#allocation2 + $0x170] sm:$0xff]  ;;  %15347 = vmatmul.mubr.msk.f32.vlgmr.msra.gmra.mxu1 %vm701_vm8, %v19548_v26  ;;  %15349 = vmatprep.subr.mxu1 %v21149_v37  ;;  %v8327_v54 = vld [vmem:[#allocation2 + $0x128] sm:$0xff] }
 0xab3   :  { %6189 = vst.msk [vmem:[#allocation2 + $0x190] sm:$0xff] %vm701_vm8, %v6125_v5  ;;  %6859 = vst.msk [vmem:[#allocation2 + $0x148] sm:$0xff] %vm701_vm8, %v6795_v25  ;;  %v6123_v12 = vadd.f32 %v6012_v14, %v5636_v13  ;;  %v6800_v7 = vadd.f32 %v19658_v39, %v6313_v52  ;;  %15350 = vmatpush3.msra.mxu1 %v8182_v24  ;;  %15353 = vmatprep.mubr.msk.f32.mxu1 %vm15886_vm4, %v21149_v37  ;;  %v8331_v44 = vmax.f32 %v8327_v54, 0.0  ;;  %v5646_v13 = vld [vmem:[#allocation2 + $0x1d0] sm:$0xff]  ;;  %v19883_v50 = vpop.f32.mrf.mxu0 }
 0xab4   :  { %v15151_v58 = vpop.f32.mrf.mxu1  ;;  %v6311_v46 = vld [vmem:[#allocation2 + $0x160] sm:$0xff]  ;;  %15351 = vmatprep.subr.mxu1 %v21149_v37  ;;  %v8481_v16 = vld [vmem:[#allocation2 + $0x150] sm:$0xff] }
 0xab5   :  { %6187 = vst.msk [vmem:[#allocation2 + $0x180] sm:$0xff] %vm701_vm8, %v6123_v12  ;;  %6864 = vst.msk [vmem:[#allocation2 + $0x170] sm:$0xff] %vm701_vm8, %v6800_v7  ;;  %v6126_v2 = vadd.f32 %v15151_v58, %v5639_v0  ;;  %v6798_v39 = vadd.f32 %v19672_v9, %v6311_v46  ;;  %15352 = vmatpush3.msra.mxu1 %v8181_v19  ;;  %v8335_v57 = vmax.f32 %v8331_v44, %v8333_v47  ;;  %v5644_v12 = vld [vmem:[#allocation2 + $0x1c0] sm:$0xff] }
 0xab6   :  { %v6015_v27 = vpop.f32.mrf.mxu1  ;;  %v6314_v28 = vld [vmem:[#allocation2 + $0x178] sm:$0xff]  ;;  %15354 = vmatmul.mubr.msk.f32.vlgmr.msra.gmra.mxu1 %vm701_vm8, %v19563_v41  ;;  %15356 = vmatprep.subr.mxu1 %v21149_v37  ;;  %v8334_v9 = vmax.f32 %v8330_v17, %v8332_v40  ;;  %v19811_v59 = vld [vmem:[#allocation2 + $0x140] sm:$0xff]  ;;  %v8485_v36 = vmax.f32 %v8481_v16, 0.0 }
 0xab7   :  { %6190 = vst.msk [vmem:[#allocation2 + $0x198] sm:$0xff] %vm701_vm8, %v6126_v2  ;;  %6862 = vst.msk [vmem:[#allocation2 + $0x160] sm:$0xff] %vm701_vm8, %v6798_v39  ;;  %v6124_v8 = vadd.f32 %v6015_v27, %v5637_v29  ;;  %v6801_v23 = vadd.f32 %v19686_v10, %v6314_v28  ;;  %15357 = vmatpush3.msra.mxu1 %v8335_v57  ;;  %15360 = vmatprep.mubr.msk.f32.mxu1 %vm15886_vm4, %v21149_v37  ;;  %v8483_v60 = vmax.f32 %v19811_v59, 0.0  ;;  %v19897_v27 = vpop.f32.mrf.mxu0  ;;  %v5648_v16 = vld [vmem:[#allocation2 + $0x1e0] sm:$0xff] }
 0xab8   :  { %v15154_v21 = vpop.f32.mrf.mxu1  ;;  %v6312_v30 = vld [vmem:[#allocation2 + $0x168] sm:$0xff]  ;;  %15358 = vmatprep.subr.mxu1 %v21149_v37  ;;  %v8482_v3 = vld [vmem:[#allocation2 + $0x158] sm:$0xff] }
 0xab9   :  { %6188 = vst.msk [vmem:[#allocation2 + $0x188] sm:$0xff] %vm701_vm8, %v6124_v8  ;;  %6865 = vst.msk [vmem:[#allocation2 + $0x178] sm:$0xff] %vm701_vm8, %v6801_v23  ;;  %v6129_v10 = vadd.f32 %v15154_v21, %v5642_v11  ;;  %v6799_v45 = vadd.f32 %v19700_v53, %v6312_v30  ;;  %15359 = vmatpush3.msra.mxu1 %v8334_v9  ;;  %v8486_v51 = vmax.f32 %v8482_v3, 0.0 }
 0xaba   :  { %v6028_v53 = vpop.f32.mrf.mxu1  ;;  %v6317_v15 = vld [vmem:[#allocation2 + $0x190] sm:$0xff]  ;;  %15361 = vmatmul.mubr.msk.f32.vlgmr.msra.gmra.mxu1 %vm701_vm8, %v19548_v26  ;;  %15363 = vmatprep.subr.mxu1 %v21149_v37  ;;  %v8480_v62 = vld [vmem:[#allocation2 + $0x148] sm:$0xff] }
 0xabb   :  { %6193 = vst.msk [vmem:[#allocation2 + $0x1b0] sm:$0xff] %vm701_vm8, %v6129_v10  ;;  %6863 = vst.msk [vmem:[#allocation2 + $0x168] sm:$0xff] %vm701_vm8, %v6799_v45  ;;  %v6127_v61 = vadd.f32 %v6028_v53, %v5640_v1  ;;  %v6804_v55 = vadd.f32 %v19714_v22, %v6317_v15  ;;  %15364 = vmatpush3.msra.mxu1 %v8335_v57  ;;  %15367 = vmatprep.mubr.msk.f32.mxu1 %vm15886_vm4, %v21149_v37  ;;  %v8484_v24 = vmax.f32 %v8480_v62, 0.0  ;;  %v5647_v57 = vld [vmem:[#allocation2 + $0x1d8] sm:$0xff]  ;;  %v5650_v10 = vld [vmem:[#allocation2 + $0x1f0] sm:$0xff]  ;;  %v6726_v15 = vpop.f32.mrf.mxu0 }
 0xabc   :  { %v15155_v34 = vpop.f32.mrf.mxu1  ;;  %v6315_v63 = vld [vmem:[#allocation2 + $0x180] sm:$0xff]  ;;  %15365 = vmatprep.subr.mxu1 %v21149_v37  ;;  %v8634_v0 = vld [vmem:[#allocation2 + $0x170] sm:$0xff] }
 0xabd   :  { %6191 = vst.msk [vmem:[#allocation2 + $0x1a0] sm:$0xff] %vm701_vm8, %v6127_v61  ;;  %6868 = vst.msk [vmem:[#allocation2 + $0x190] sm:$0xff] %vm701_vm8, %v6804_v55  ;;  %v6130_v18 = vadd.f32 %v15155_v34, %v5643_v31  ;;  %v6802_v22 = vadd.f32 %v19728_v42, %v6315_v63  ;;  %15366 = vmatpush3.msra.mxu1 %v8334_v9  ;;  %v8488_v19 = vmax.f32 %v8484_v24, %v8486_v51  ;;  %v5645_v9 = vld [vmem:[#allocation2 + $0x1c8] sm:$0xff]  ;;  %v15228_v31 = vpop.f32.mrf.mxu0 }
 0xabe   :  { %v6031_v33 = vpop.f32.mrf.mxu1  ;;  %v6318_v20 = vld [vmem:[#allocation2 + $0x198] sm:$0xff]  ;;  %15368 = vmatmul.mubr.msk.f32.vlgmr.msra.gmra.mxu1 %vm701_vm8, %v19563_v41  ;;  %15370 = vmatprep.subr.mxu1 %v21149_v37  ;;  %v8487_v42 = vmax.f32 %v8483_v60, %v8485_v36  ;;  %v8632_v25 = vld [vmem:[#allocation2 + $0x160] sm:$0xff]  ;;  %v8638_v23 = vmax.f32 %v8634_v0, 0.0 }
 0xabf   :  { %6194 = vst.msk [vmem:[#allocation2 + $0x1b8] sm:$0xff] %vm701_vm8, %v6130_v18  ;;  %6866 = vst.msk [vmem:[#allocation2 + $0x180] sm:$0xff] %vm701_vm8, %v6802_v22  ;;  %v6128_v32 = vadd.f32 %v6031_v33, %v5641_v4  ;;  %v6805_v5 = vadd.f32 %v19742_v35, %v6318_v20  ;;  %15371 = vmatpush3.msra.mxu1 %v8488_v19  ;;  %15374 = vmatprep.mubr.msk.f32.mxu1 %vm15886_vm4, %v21149_v37  ;;  %v8636_v58 = vmax.f32 %v8632_v25, 0.0  ;;  %v5651_v22 = vld [vmem:[#allocation2 + $0x1f8] sm:$0xff]  ;;  %v9429_v4 = vld [vmem:[%s21071_s10] sm:$0xff] }
 0xac0   :  { %v15158_v14 = vpop.f32.mrf.mxu1  ;;  %v6316_v52 = vld [vmem:[#allocation2 + $0x188] sm:$0xff]  ;;  %15372 = vmatprep.subr.mxu1 %v21149_v37  ;;  %v8635_v54 = vld [vmem:[#allocation2 + $0x178] sm:$0xff] }
 0xac1   :  { %6192 = vst.msk [vmem:[#allocation2 + $0x1a8] sm:$0xff] %vm701_vm8, %v6128_v32  ;;  %6869 = vst.msk [vmem:[#allocation2 + $0x198] sm:$0xff] %vm701_vm8, %v6805_v5  ;;  %v6133_v17 = vadd.f32 %v15158_v14, %v5646_v13  ;;  %v6803_v35 = vadd.f32 %v19756_v38, %v6316_v52  ;;  %15373 = vmatpush3.msra.mxu1 %v8487_v42  ;;  %v8639_v39 = vmax.f32 %v8635_v54, 0.0  ;;  %v9430_v5 = vld [vmem:[%s21071_s10 + $0x8] sm:$0xff]  ;;  %v6739_v14 = vpop.f32.mrf.mxu0 }
 0xac2   :  { %v6044_v7 = vpop.f32.mrf.mxu1  ;;  %v6321_v44 = vld [vmem:[#allocation2 + $0x1b0] sm:$0xff]  ;;  %15375 = vmatmul.mubr.msk.f32.vlgmr.msra.gmra.mxu1 %vm701_vm8, %v19548_v26  ;;  %15377 = vmatprep.subr.mxu1 %v21149_v37  ;;  %v8633_v47 = vld [vmem:[#allocation2 + $0x168] sm:$0xff]  ;;  %v9431_v52 = vpack.c.bf16 %v9430_v5, %v9429_v4  ;;  %v13834_v4 = vld [vmem:[%s21071_s10 + $0x20] sm:$0xff] }
 0xac3   :  { %6197 = vst.msk [vmem:[#allocation2 + $0x1d0] sm:$0xff] %vm701_vm8, %v6133_v17  ;;  %6867 = vst.msk [vmem:[#allocation2 + $0x188] sm:$0xff] %vm701_vm8, %v6803_v35  ;;  %v6131_v46 = vadd.f32 %v6044_v7, %v5644_v12  ;;  %v6808_v2 = vadd.f32 %v19770_v49, %v6321_v44  ;;  %15378 = vmatpush3.msra.mxu1 %v8488_v19  ;;  %15381 = vmatprep.mubr.msk.f32.mxu1 %vm15886_vm4, %v21149_v37  ;;  %v8637_v38 = vmax.f32 %v8633_v47, 0.0  ;;  %v15229_v0 = vpop.f32.mrf.mxu0 }
 0xac4   :  { %v15159_v40 = vpop.f32.mrf.mxu1  ;;  %v6319_v29 = vld [vmem:[#allocation2 + $0x1a0] sm:$0xff]  ;;  %15379 = vmatprep.subr.mxu1 %v21149_v37  ;;  %v8787_v24 = vld [vmem:[#allocation2 + $0x190] sm:$0xff]  ;;  %15454 = vmatprep.subr.bf16.mxu0 %v9431_v52 }
 0xac5   :  { %6195 = vst.msk [vmem:[#allocation2 + $0x1c0] sm:$0xff] %vm701_vm8, %v6131_v46  ;;  %6872 = vst.msk [vmem:[#allocation2 + $0x1b0] sm:$0xff] %vm701_vm8, %v6808_v2  ;;  %v6134_v28 = vadd.f32 %v15159_v40, %v5647_v57  ;;  %v6806_v49 = vadd.f32 %v19784_v56, %v6319_v29  ;;  %15380 = vmatpush3.msra.mxu1 %v8487_v42  ;;  %v8641_v8 = vmax.f32 %v8637_v38, %v8639_v39  ;;  %v5649_v42 = vld [vmem:[#allocation2 + $0x1e8] sm:$0xff] }
 0xac6   :  { %v6047_v59 = vpop.f32.mrf.mxu1  ;;  %v6322_v11 = vld [vmem:[#allocation2 + $0x1b8] sm:$0xff]  ;;  %15382 = vmatmul.mubr.msk.f32.vlgmr.msra.gmra.mxu1 %vm701_vm8, %v19563_v41  ;;  %15384 = vmatprep.subr.mxu1 %v21149_v37  ;;  %v8640_v56 = vmax.f32 %v8636_v58, %v8638_v23  ;;  %v8785_v3 = vld [vmem:[#allocation2 + $0x180] sm:$0xff]  ;;  %v8791_v32 = vmax.f32 %v8787_v24, 0.0 }
 0xac7   :  { %6198 = vst.msk [vmem:[#allocation2 + $0x1d8] sm:$0xff] %vm701_vm8, %v6134_v28  ;;  %6870 = vst.msk [vmem:[#allocation2 + $0x1a0] sm:$0xff] %vm701_vm8, %v6806_v49  ;;  %v6132_v21 = vadd.f32 %v6047_v59, %v5645_v9  ;;  %v6809_v30 = vadd.f32 %v19798_v6, %v6322_v11  ;;  %15385 = vmatpush3.msra.mxu1 %v8641_v8  ;;  %15388 = vmatprep.mubr.msk.f32.mxu1 %vm15886_vm4, %v21149_v37  ;;  %v8789_v51 = vmax.f32 %v8785_v3, 0.0 }
 0xac8   :  { %v15162_v45 = vpop.f32.mrf.mxu1  ;;  %v6320_v1 = vld [vmem:[#allocation2 + $0x1a8] sm:$0xff]  ;;  %15386 = vmatprep.subr.mxu1 %v21149_v37  ;;  %v8788_v53 = vld [vmem:[#allocation2 + $0x198] sm:$0xff]  ;;  %15455 = vmatpush3.bf16.msra.mxu0 %v9431_v52 }
 0xac9   :  { %6196 = vst.msk [vmem:[#allocation2 + $0x1c8] sm:$0xff] %vm701_vm8, %v6132_v21  ;;  %6873 = vst.msk [vmem:[#allocation2 + $0x1b8] sm:$0xff] %vm701_vm8, %v6809_v30  ;;  %v6137_v62 = vadd.f32 %v15162_v45, %v5650_v10  ;;  %v6807_v6 = vadd.f32 %v19814_v48, %v6320_v1  ;;  %15387 = vmatpush3.msra.mxu1 %v8640_v56  ;;  %v8792_v18 = vmax.f32 %v8788_v53, 0.0 }
 0xaca   :  { %v6060_v60 = vpop.f32.mrf.mxu1  ;;  %v6325_v61 = vld [vmem:[#allocation2 + $0x1d0] sm:$0xff]  ;;  %15389 = vmatmul.mubr.msk.f32.vlgmr.msra.gmra.mxu1 %vm701_vm8, %v19548_v26  ;;  %15391 = vmatprep.subr.mxu1 %v21149_v37  ;;  %v8786_v55 = vld [vmem:[#allocation2 + $0x188] sm:$0xff]  ;;  %v8793_v17 = vmax.f32 %v8789_v51, %v8791_v32  ;;  %v13845_v32 = vld [vmem:[%s21071_s10 + $0x38] sm:$0xff] }
 0xacb   :  { %6201 = vst.msk [vmem:[#allocation2 + $0x1f0] sm:$0xff] %vm701_vm8, %v6137_v62  ;;  %6871 = vst.msk [vmem:[#allocation2 + $0x1a8] sm:$0xff] %vm701_vm8, %v6807_v6  ;;  %v6135_v34 = vadd.f32 %v6060_v60, %v5648_v16  ;;  %v6812_v48 = vadd.f32 %v19869_v43, %v6325_v61  ;;  %15392 = vmatpush3.msra.mxu1 %v8641_v8  ;;  %15395 = vmatprep.mubr.msk.f32.mxu1 %vm15886_vm4, %v21149_v37  ;;  %v8790_v63 = vmax.f32 %v8786_v55, 0.0  ;;  %v6742_v8 = vpop.f32.mrf.mxu0 }
 0xacc   :  { %v15163_v19 = vpop.f32.mrf.mxu1  ;;  %v6323_v36 = vld [vmem:[#allocation2 + $0x1c0] sm:$0xff]  ;;  %15393 = vmatprep.subr.mxu1 %v21149_v37  ;;  %v8940_v46 = vld [vmem:[#allocation2 + $0x1b0] sm:$0xff] }
 0xacd   :  { %6199 = vst.msk [vmem:[#allocation2 + $0x1e0] sm:$0xff] %vm701_vm8, %v6135_v34  ;;  %6876 = vst.msk [vmem:[#allocation2 + $0x1d0] sm:$0xff] %vm701_vm8, %v6812_v48  ;;  %v6138_v43 = vadd.f32 %v15163_v19, %v5651_v22  ;;  %v6810_v33 = vadd.f32 %v19883_v50, %v6323_v36  ;;  %15394 = vmatpush3.msra.mxu1 %v8640_v56  ;;  %v8794_v20 = vmax.f32 %v8790_v63, %v8792_v18  ;;  %v13824_v63 = vld [vmem:[%s21071_s10 + $0x10] sm:$0xff]  ;;  %v13825_v18 = vld [vmem:[%s21071_s10 + $0x18] sm:$0xff] }
 0xace   :  { %v6063_v25 = vpop.f32.mrf.mxu1  ;;  %v6326_v13 = vld [vmem:[#allocation2 + $0x1d8] sm:$0xff]  ;;  %15396 = vmatmul.mubr.msk.f32.vlgmr.msra.gmra.mxu1 %vm701_vm8, %v19563_v41  ;;  %15398 = vmatprep.subr.mxu1 %v21149_v37  ;;  %v8938_v7 = vld [vmem:[#allocation2 + $0x1a0] sm:$0xff]  ;;  %v8944_v28 = vmax.f32 %v8940_v46, 0.0  ;;  %v9596_v22 = vpack.c.bf16 %v13825_v18, %v13824_v63 }
 0xacf   :  { %6202 = vst.msk [vmem:[#allocation2 + $0x1f8] sm:$0xff] %vm701_vm8, %v6138_v43  ;;  %6874 = vst.msk [vmem:[#allocation2 + $0x1c0] sm:$0xff] %vm701_vm8, %v6810_v33  ;;  %v6136_v54 = vadd.f32 %v6063_v25, %v5649_v42  ;;  %v6813_v50 = vadd.f32 %v19897_v27, %v6326_v13  ;;  %15399 = vmatpush3.msra.mxu1 %v8794_v20  ;;  %15402 = vmatprep.mubr.msk.f32.mxu1 %vm15886_vm4, %v21149_v37  ;;  %v8942_v57 = vmax.f32 %v8938_v7, 0.0  ;;  %v13835_v43 = vld [vmem:[%s21071_s10 + $0x28] sm:$0xff]  ;;  %v13844_v33 = vld [vmem:[%s21071_s10 + $0x30] sm:$0xff] }
 0xad0   :  { %v6324_v35 = vld [vmem:[#allocation2 + $0x1c8] sm:$0xff]  ;;  %15400 = vmatprep.subr.mxu1 %v21149_v37  ;;  %v8941_v12 = vld [vmem:[#allocation2 + $0x1b8] sm:$0xff]  ;;  %v9926_v42 = vpack.c.bf16 %v13845_v32, %v13844_v33 }
 0xad1   :  { %6200 = vst.msk [vmem:[#allocation2 + $0x1e8] sm:$0xff] %vm701_vm8, %v6136_v54  ;;  %6877 = vst.msk [vmem:[#allocation2 + $0x1d8] sm:$0xff] %vm701_vm8, %v6813_v50  ;;  %v6811_v44 = vadd.f32 %v6726_v15, %v6324_v35  ;;  %15401 = vmatpush3.msra.mxu1 %v8793_v17  ;;  %v8945_v39 = vmax.f32 %v8941_v12, 0.0  ;;  %v8946_v9 = vmax.f32 %v8942_v57, %v8944_v28  ;;  %v9405_v50 = vld [vmem:[#allocation3 + $0x7] sm:$0xff] }
 0xad2   :  { %v6329_v47 = vld [vmem:[#allocation2 + $0x1f0] sm:$0xff]  ;;  %15403 = vmatmul.mubr.msk.f32.vlgmr.msra.gmra.mxu1 %vm701_vm8, %v19548_v26  ;;  %15405 = vmatprep.subr.mxu1 %v21149_v37  ;;  %v8939_v58 = vld [vmem:[#allocation2 + $0x1a8] sm:$0xff] }
 0xad3   :  { %6875 = vst.msk [vmem:[#allocation2 + $0x1c8] sm:$0xff] %vm701_vm8, %v6811_v44  ;;  %v6816_v2 = vadd.f32 %v15228_v31, %v6329_v47  ;;  %15406 = vmatpush3.msra.mxu1 %v8794_v20  ;;  %15409 = vmatprep.mubr.msk.f32.mxu1 %vm15886_vm4, %v21149_v37  ;;  %v8943_v38 = vmax.f32 %v8939_v58, 0.0  ;;  %v9761_v20 = vpack.c.bf16 %v13835_v43, %v13834_v4 }
 0xad4   :  { %v6327_v40 = vld [vmem:[#allocation2 + $0x1e0] sm:$0xff]  ;;  %15407 = vmatprep.subr.mxu1 %v21149_v37  ;;  %v9093_v3 = vld [vmem:[#allocation2 + $0x1d0] sm:$0xff] }
 0xad5   :  { %6880 = vst.msk [vmem:[#allocation2 + $0x1f0] sm:$0xff] %vm701_vm8, %v6816_v2  ;;  %v6814_v29 = vadd.f32 %v6739_v14, %v6327_v40  ;;  %15408 = vmatpush3.msra.mxu1 %v8793_v17  ;;  %v8947_v27 = vmax.f32 %v8943_v38, %v8945_v39  ;;  %v9097_v15 = vmax.f32 %v9093_v3, 0.0  ;;  %15490 = vmatprep.subr.bf16.mxu0 %v9761_v20  ;;  %v9569_v17 = vld [vmem:[#allocation3 + $0x8] sm:$0xff] }
 0xad6   :  { %v6330_v49 = vld [vmem:[#allocation2 + $0x1f8] sm:$0xff]  ;;  %15410 = vmatmul.mubr.msk.f32.vlgmr.msra.gmra.mxu1 %vm701_vm8, %v19563_v41  ;;  %15412 = vmatprep.subr.mxu1 %v21149_v37  ;;  %v9091_v21 = vld [vmem:[#allocation2 + $0x1c0] sm:$0xff] }
 0xad7   :  { %6878 = vst.msk [vmem:[#allocation2 + $0x1e0] sm:$0xff] %vm701_vm8, %v6814_v29  ;;  %v6817_v23 = vadd.f32 %v15229_v0, %v6330_v49  ;;  %15413 = vmatpush3.msra.mxu1 %v8947_v27  ;;  %15416 = vmatprep.mubr.msk.f32.mxu1 %vm15886_vm4, %v21149_v37  ;;  %v9095_v1 = vmax.f32 %v9091_v21, 0.0 }
 0xad8   :  { %v6328_v59 = vld [vmem:[#allocation2 + $0x1e8] sm:$0xff]  ;;  %15414 = vmatprep.subr.mxu1 %v21149_v37  ;;  %v9094_v11 = vld [vmem:[#allocation2 + $0x1d8] sm:$0xff] }
 0xad9   :  { %6881 = vst.msk [vmem:[#allocation2 + $0x1f8] sm:$0xff] %vm701_vm8, %v6817_v23  ;;  %v6815_v30 = vadd.f32 %v6742_v8, %v6328_v59  ;;  %15415 = vmatpush3.msra.mxu1 %v8946_v9  ;;  %v9098_v45 = vmax.f32 %v9094_v11, 0.0  ;;  %v9099_v62 = vmax.f32 %v9095_v1, %v9097_v15  ;;  %v13864_v1 = vld [vmem:[%s21071_s10 + $0x50] sm:$0xff]  ;;  %v13865_v15 = vld [vmem:[%s21071_s10 + $0x58] sm:$0xff] }
 0xada   :  { %15417 = vmatmul.mubr.msk.f32.vlgmr.msra.gmra.mxu1 %vm701_vm8, %v19548_v26  ;;  %15419 = vmatprep.subr.mxu1 %v21149_v37  ;;  %v9092_v56 = vld [vmem:[#allocation2 + $0x1c8] sm:$0xff] }
 0xadb   :  { %6879 = vst.msk [vmem:[#allocation2 + $0x1e8] sm:$0xff] %vm701_vm8, %v6815_v30  ;;  %15420 = vmatpush3.msra.mxu1 %v8947_v27  ;;  %15423 = vmatprep.mubr.msk.f32.mxu1 %vm15886_vm4, %v21149_v37  ;;  %v9096_v10 = vmax.f32 %v9092_v56, 0.0 }
 0xadc   :  { %15421 = vmatprep.subr.mxu1 %v21149_v37  ;;  %v9246_v61 = vld [vmem:[#allocation2 + $0x1f0] sm:$0xff] }
 0xadd   :  { %15422 = vmatpush3.msra.mxu1 %v8946_v9  ;;  %v9100_v53 = vmax.f32 %v9096_v10, %v9098_v45  ;;  %v9250_v34 = vmax.f32 %v9246_v61, 0.0  ;;  %v13854_v10 = vld [vmem:[%s21071_s10 + $0x40] sm:$0xff]  ;;  %v13855_v45 = vld [vmem:[%s21071_s10 + $0x48] sm:$0xff] }
 0xade   :  { %15424 = vmatmul.mubr.msk.f32.vlgmr.msra.gmra.mxu1 %vm701_vm8, %v19563_v41  ;;  %15426 = vmatprep.subr.mxu1 %v21149_v37  ;;  %v9244_v16 = vld [vmem:[#allocation2 + $0x1e0] sm:$0xff] }
 0xadf   :  { %15427 = vmatpush3.msra.mxu1 %v9100_v53  ;;  %15430 = vmatprep.mubr.msk.f32.mxu1 %vm15886_vm4, %v21149_v37  ;;  %v9248_v51 = vmax.f32 %v9244_v16, 0.0 }
 0xae0   :  { %15428 = vmatprep.subr.mxu1 %v21149_v37  ;;  %v9247_v6 = vld [vmem:[#allocation2 + $0x1f8] sm:$0xff] }
 0xae1   :  { %15429 = vmatpush3.msra.mxu1 %v9099_v62  ;;  %v9251_v24 = vmax.f32 %v9247_v6, 0.0  ;;  %v9252_v48 = vmax.f32 %v9248_v51, %v9250_v34  ;;  %v20060_v6 = vpack.c.bf16 %v13865_v15, %v13864_v1 }
 0xae2   :  { %15431 = vmatmul.mubr.msk.f32.vlgmr.msra.gmra.mxu1 %vm701_vm8, %v19548_v26  ;;  %15433 = vmatprep.subr.mxu1 %v21149_v37  ;;  %v9245_v60 = vld [vmem:[#allocation2 + $0x1e8] sm:$0xff] }
 0xae3   :  { %15434 = vmatpush3.msra.mxu1 %v9100_v53  ;;  %15437 = vmatprep.mubr.msk.f32.mxu1 %vm15886_vm4, %v21149_v37  ;;  %v9249_v55 = vmax.f32 %v9245_v60, 0.0  ;;  %v20055_v53 = vpack.c.bf16 %v13855_v45, %v13854_v10 }
 0xae4   :  { %15435 = vmatprep.subr.mxu1 %v21149_v37 }
 0xae5   :  { %15436 = vmatpush3.msra.mxu1 %v9099_v62  ;;  %v9253_v31 = vmax.f32 %v9249_v55, %v9251_v24 }
 0xae6   :  { %15438 = vmatmul.mubr.msk.f32.vlgmr.msra.gmra.mxu1 %vm701_vm8, %v19563_v41  ;;  %15440 = vmatprep.subr.mxu1 %v21149_v37 }
 0xae7   :  { %15441 = vmatpush3.msra.mxu1 %v9253_v31  ;;  %15444 = vmatprep.mubr.msk.f32.mxu1 %vm15886_vm4, %v21149_v37 }
 0xae8   :  { %15442 = vmatprep.subr.mxu1 %v21149_v37 }
 0xae9   :  { %15443 = vmatpush3.msra.mxu1 %v9252_v48 }
 0xaea   :  { %15447 = vmatprep.subr.mxu1 %v21149_v37  ;;  %15445 = vmatmul.mubr.msk.f32.vlgmr.msra.gmra.mxu1 %vm701_vm8, %v19548_v26 }
 0xaeb   :  { %15448 = vmatpush3.msra.mxu1 %v9253_v31  ;;  %15451 = vmatprep.mubr.msk.f32.mxu1 %vm15886_vm4, %v21149_v37 }
 0xaec   :  { %15449 = vmatprep.subr.mxu1 %v21149_v37 }
 0xaed   :  { %15450 = vmatpush3.msra.mxu1 %v9252_v48 }
 0xaee   :  { %15452 = vmatmul.mubr.msk.f32.vlgmr.msra.gmra.mxu1 %vm701_vm8, %v19563_v41  ;;  %15472 = vmatprep.subr.bf16.mxu1 %v9596_v22 }
 0xaef   :  { %15473 = vmatpush3.bf16.msra.mxu1 %v9596_v22 }
 0xaf0   :  { %15508 = vmatprep.subr.bf16.mxu1 %v9926_v42 }
 0xb32   :  { %v7022_v19 = vpop.f32.mrf.mxu1 }
 0xb34   :  { %v15236_v36 = vpop.f32.mrf.mxu1 }
 0xb36   :  { %v7095_v5 = vpop.f32.mrf.mxu1 }
 0xb37   :  { %v7099_v25 = vmax.f32 %v7022_v19, %v7095_v5 }
 0xb38   :  { %v15243_v13 = vpop.f32.mrf.mxu1 }
 0xb39   :  { %7101 = vst.msk [vmem:[#allocation3 + $0x20] sm:$0xff] %vm701_vm8, %v7099_v25 }
 0xb3a   :  { %v7178_v14 = vpop.f32.mrf.mxu1 }
 0xb3c   :  { %v15250_v52 = vpop.f32.mrf.mxu1 }
 0xb3e   :  { %v7248_v54 = vpop.f32.mrf.mxu1 }
 0xb3f   :  { %v7252_v35 = vmax.f32 %v7178_v14, %v7248_v54 }
 0xb40   :  { %v15257_v12 = vpop.f32.mrf.mxu1  ;;  %v20011_v7 = vld [vmem:[#allocation3 + $0x1f] sm:$0xff] }
 0xb41   :  { %v20013_v44 = vld [vmem:[#allocation3 + $0x20] sm:$0xff]  ;;  %7254 = vst.msk [vmem:[#allocation3 + $0x38] sm:$0xff] %vm701_vm8, %v7252_v35  ;;  %v9421_v47 = vpack.c.bf16 %v20011_v7, %v9405_v50 }
 0xb42   :  { %v9585_v0 = vpack.c.bf16 %v20013_v44, %v9569_v17  ;;  %v7331_v58 = vpop.f32.mrf.mxu1 }
 0xb43   :  { %15456 = vmatprep.mubr.msk.bf16.mxu0 %vm701_vm8, %v9421_v47 }
 0xb44   :  { %15474 = vmatprep.mubr.msk.bf16.mxu1 %vm701_vm8, %v9585_v0  ;;  %v15264_v46 = vpop.f32.mrf.mxu1 }
 0xb46   :  { %v7401_v2 = vpop.f32.mrf.mxu1 }
 0xb47   :  { %v7405_v38 = vmax.f32 %v7331_v58, %v7401_v2 }
 0xb48   :  { %v15271_v39 = vpop.f32.mrf.mxu1  ;;  %v20020_v57 = vld [vmem:[#allocation3 + $0x37] sm:$0xff] }
 0xb49   :  { %v20022_v40 = vld [vmem:[#allocation3 + $0x38] sm:$0xff]  ;;  %7407 = vst.msk [vmem:[#allocation3 + $0x50] sm:$0xff] %vm701_vm8, %v7405_v38  ;;  %v9915_v29 = vpack.c.bf16 %v20020_v57, %v20011_v7 }
 0xb4a   :  { %v10080_v27 = vpack.c.bf16 %v20022_v40, %v20013_v44  ;;  %v7484_v28 = vpop.f32.mrf.mxu1  ;;  %v13885_v7 = vld [vmem:[%s21071_s10 + $0x78] sm:$0xff] }
 0xb4c   :  { %v15278_v49 = vpop.f32.mrf.mxu1 }
 0xb4e   :  { %v7554_v8 = vpop.f32.mrf.mxu1 }
 0xb4f   :  { %v7558_v23 = vmax.f32 %v7484_v28, %v7554_v8 }
 0xb50   :  { %v15285_v9 = vpop.f32.mrf.mxu1  ;;  %v20029_v59 = vld [vmem:[#allocation3 + $0x4f] sm:$0xff] }
 0xb51   :  { %v20031_v11 = vld [vmem:[#allocation3 + $0x50] sm:$0xff]  ;;  %7560 = vst.msk [vmem:[#allocation3 + $0x68] sm:$0xff] %vm701_vm8, %v7558_v23  ;;  %v20036_v21 = vpack.c.bf16 %v20029_v59, %v20020_v57  ;;  %v9736_v57 = vld [vmem:[#allocation3 + $0x39] sm:$0xff] }
 0xb52   :  { %v20040_v30 = vpack.c.bf16 %v20031_v11, %v20022_v40  ;;  %v7637_v56 = vpop.f32.mrf.mxu1  ;;  %v9413_v9 = vld [vmem:[#allocation3 + $0xf7] sm:$0xff] }
 0xb53   :  { %15457 = vmatmul.mubr.msk.bf16.vlgmr.msra.gmra.mxu0 %vm701_vm8, %v20036_v21 }
 0xb54   :  { %15475 = vmatmul.mubr.msk.bf16.vlgmr.msra.gmra.mxu1 %vm701_vm8, %v20040_v30  ;;  %v15292_v3 = vpop.f32.mrf.mxu1  ;;  %15491 = vmatpush3.bf16.msra.mxu0 %v9761_v20 }
 0xb55   :  { %15509 = vmatpush3.bf16.msra.mxu1 %v9926_v42  ;;  %15526 = vmatprep.subr.bf16.mxu0 %v20055_v53 }
 0xb56   :  { %v7707_v62 = vpop.f32.mrf.mxu1  ;;  %15544 = vmatprep.subr.bf16.mxu1 %v20060_v6 }
 0xb57   :  { %v7711_v16 = vmax.f32 %v7637_v56, %v7707_v62  ;;  %v9577_v56 = vld [vmem:[#allocation3 + $0xf8] sm:$0xff] }
 0xb58   :  { %v15299_v60 = vpop.f32.mrf.mxu1  ;;  %v20063_v61 = vld [vmem:[#allocation3 + $0x67] sm:$0xff] }
 0xb59   :  { %v20065_v55 = vld [vmem:[#allocation3 + $0x68] sm:$0xff]  ;;  %7713 = vst.msk [vmem:[#allocation3 + $0x80] sm:$0xff] %vm701_vm8, %v7711_v16  ;;  %v9916_v24 = vpack.c.bf16 %v20063_v61, %v20029_v59  ;;  %v9742_v59 = vld [vmem:[#allocation3 + $0xf9] sm:$0xff] }
 0xb5a   :  { %v10081_v51 = vpack.c.bf16 %v20065_v55, %v20031_v11  ;;  %v7790_v31 = vpop.f32.mrf.mxu1 }
 0xb5c   :  { %v15306_v34 = vpop.f32.mrf.mxu1 }
 0xb5e   :  { %v7860_v48 = vpop.f32.mrf.mxu1 }
 0xb5f   :  { %v7864_v63 = vmax.f32 %v7790_v31, %v7860_v48 }
 0xb60   :  { %v15313_v18 = vpop.f32.mrf.mxu1  ;;  %v20073_v22 = vld [vmem:[#allocation3 + $0x7f] sm:$0xff] }
 0xb61   :  { %v20075_v19 = vld [vmem:[#allocation3 + $0x80] sm:$0xff]  ;;  %7866 = vst.msk [vmem:[#allocation3 + $0x98] sm:$0xff] %vm701_vm8, %v7864_v63  ;;  %v20080_v36 = vpack.c.bf16 %v20073_v22, %v20063_v61 }
 0xb62   :  { %v20084_v4 = vpack.c.bf16 %v20075_v19, %v20065_v55  ;;  %v7943_v43 = vpop.f32.mrf.mxu1 }
 0xb63   :  { %15460 = vmatprep.mubr.msk.bf16.mxu0 %vm701_vm8, %v20080_v36 }
 0xb64   :  { %15478 = vmatprep.mubr.msk.bf16.mxu1 %vm701_vm8, %v20084_v4  ;;  %v15320_v33 = vpop.f32.mrf.mxu1 }
 0xb66   :  { %v8013_v20 = vpop.f32.mrf.mxu1 }
 0xb67   :  { %v8017_v32 = vmax.f32 %v7943_v43, %v8013_v20 }
 0xb68   :  { %v15327_v5 = vpop.f32.mrf.mxu1  ;;  %v20090_v42 = vld [vmem:[#allocation3 + $0x97] sm:$0xff] }
 0xb69   :  { %v20092_v25 = vld [vmem:[#allocation3 + $0x98] sm:$0xff]  ;;  %8019 = vst.msk [vmem:[#allocation3 + $0xb0] sm:$0xff] %vm701_vm8, %v8017_v32  ;;  %v9917_v13 = vpack.c.bf16 %v20090_v42, %v20073_v22 }
 0xb6a   :  { %v10082_v14 = vpack.c.bf16 %v20092_v25, %v20075_v19  ;;  %v8096_v52 = vpop.f32.mrf.mxu1 }
 0xb6c   :  { %v15334_v54 = vpop.f32.mrf.mxu1 }
 0xb6e   :  { %v8166_v50 = vpop.f32.mrf.mxu1 }
 0xb6f   :  { %v8170_v17 = vmax.f32 %v8096_v52, %v8166_v50 }
 0xb70   :  { %v15341_v35 = vpop.f32.mrf.mxu1  ;;  %v20099_v12 = vld [vmem:[#allocation3 + $0xaf] sm:$0xff] }
 0xb71   :  { %v20101_v47 = vld [vmem:[#allocation3 + $0xb0] sm:$0xff]  ;;  %8172 = vst.msk [vmem:[#allocation3 + $0xc8] sm:$0xff] %vm701_vm8, %v8170_v17  ;;  %v20106_v0 = vpack.c.bf16 %v20099_v12, %v20090_v42 }
 0xb72   :  { %v20110_v58 = vpack.c.bf16 %v20101_v47, %v20092_v25  ;;  %v8249_v46 = vpop.f32.mrf.mxu1 }
 0xb73   :  { %15461 = vmatmul.mubr.msk.bf16.gmra.mxu0 %vm701_vm8, %v20106_v0 }
 0xb74   :  { %15479 = vmatmul.mubr.msk.bf16.gmra.mxu1 %vm701_vm8, %v20110_v58  ;;  %v15348_v2 = vpop.f32.mrf.mxu1 }
 0xb76   :  { %v8319_v38 = vpop.f32.mrf.mxu1 }
 0xb77   :  { %v8323_v39 = vmax.f32 %v8249_v46, %v8319_v38 }
 0xb78   :  { %v15355_v28 = vpop.f32.mrf.mxu1  ;;  %v10071_v44 = vld [vmem:[#allocation3 + $0xc8] sm:$0xff] }
 0xb79   :  { %8325 = vst.msk [vmem:[#allocation3 + $0x110] sm:$0xff] %vm701_vm8, %v8323_v39  ;;  %v20292_v40 = vld [vmem:[#allocation3 + $0xc9] sm:$0xff] }
 0xb7a   :  { %v8402_v49 = vpop.f32.mrf.mxu1 }
 0xb7c   :  { %v15362_v8 = vpop.f32.mrf.mxu1 }
 0xb7e   :  { %v8472_v23 = vpop.f32.mrf.mxu1 }
 0xb7f   :  { %v8476_v3 = vmax.f32 %v8402_v49, %v8472_v23 }
 0xb80   :  { %v15369_v10 = vpop.f32.mrf.mxu1  ;;  %v20117_v45 = vld [vmem:[#allocation3 + $0x10f] sm:$0xff] }
 0xb81   :  { %v20119_v1 = vld [vmem:[#allocation3 + $0x110] sm:$0xff]  ;;  %8478 = vst.msk [vmem:[#allocation3 + $0x128] sm:$0xff] %vm701_vm8, %v8476_v3  ;;  %v9425_v15 = vpack.c.bf16 %v20117_v45, %v9413_v9 }
 0xb82   :  { %v9589_v62 = vpack.c.bf16 %v20119_v1, %v9577_v56  ;;  %v8555_v16 = vpop.f32.mrf.mxu1  ;;  %v9743_v61 = vld [vmem:[#allocation3 + $0x111] sm:$0xff] }
 0xb83   :  { %15464 = vmatprep.mubr.msk.bf16.mxu0 %vm701_vm8, %v9425_v15  ;;  %v9754_v22 = vpack.c.bf16 %v9743_v61, %v9742_v59 }
 0xb84   :  { %15482 = vmatprep.mubr.msk.bf16.mxu1 %vm701_vm8, %v9589_v62  ;;  %v15376_v60 = vpop.f32.mrf.mxu1 }
 0xb86   :  { %v8625_v31 = vpop.f32.mrf.mxu1 }
 0xb87   :  { %v8629_v34 = vmax.f32 %v8555_v16, %v8625_v31 }
 0xb88   :  { %v15383_v48 = vpop.f32.mrf.mxu1  ;;  %v20126_v63 = vld [vmem:[#allocation3 + $0x128] sm:$0xff] }
 0xb89   :  { %8631 = vst.msk [vmem:[#allocation3 + $0x140] sm:$0xff] %vm701_vm8, %v8629_v34  ;;  %v10084_v18 = vpack.c.bf16 %v20126_v63, %v20119_v1  ;;  %v20131_v52 = vld [vmem:[#allocation3 + $0x127] sm:$0xff] }
 0xb8a   :  { %v8708_v43 = vpop.f32.mrf.mxu1  ;;  %v9919_v42 = vpack.c.bf16 %v20131_v52, %v20117_v45 }
 0xb8c   :  { %v15390_v33 = vpop.f32.mrf.mxu1 }
 0xb8e   :  { %v8778_v20 = vpop.f32.mrf.mxu1 }
 0xb8f   :  { %v8782_v32 = vmax.f32 %v8708_v43, %v8778_v20 }
 0xb90   :  { %v15397_v5 = vpop.f32.mrf.mxu1  ;;  %v20133_v54 = vld [vmem:[#allocation3 + $0x13f] sm:$0xff] }
 0xb91   :  { %v20135_v50 = vld [vmem:[#allocation3 + $0x140] sm:$0xff]  ;;  %8784 = vst.msk [vmem:[#allocation3 + $0x158] sm:$0xff] %vm701_vm8, %v8782_v32  ;;  %v20140_v17 = vpack.c.bf16 %v20133_v54, %v20131_v52 }
 0xb92   :  { %v20144_v35 = vpack.c.bf16 %v20135_v50, %v20126_v63  ;;  %v8861_v46 = vpop.f32.mrf.mxu1 }
 0xb93   :  { %15465 = vmatmul.mubr.msk.bf16.gmra.mxu0 %vm701_vm8, %v20140_v17 }
 0xb94   :  { %15483 = vmatmul.mubr.msk.bf16.gmra.mxu1 %vm701_vm8, %v20144_v35  ;;  %v15404_v2 = vpop.f32.mrf.mxu1 }
 0xb96   :  { %v8931_v38 = vpop.f32.mrf.mxu1 }
 0xb97   :  { %v8935_v39 = vmax.f32 %v8861_v46, %v8931_v38  ;;  %v9734_v38 = vld [vmem:[#allocation3 + $0x9] sm:$0xff] }
 0xb98   :  { %v15411_v28 = vpop.f32.mrf.mxu1  ;;  %v20150_v49 = vld [vmem:[#allocation3 + $0x158] sm:$0xff] }
 0xb99   :  { %8937 = vst.msk [vmem:[#allocation3 + $0x170] sm:$0xff] %vm701_vm8, %v8935_v39  ;;  %v20155_v15 = vld [vmem:[#allocation3 + $0x157] sm:$0xff]  ;;  %v20175_v39 = vld [vmem:[#allocation3 + $0x21] sm:$0xff] }
 0xb9a   :  { %v9014_v23 = vpop.f32.mrf.mxu1  ;;  %v9746_v59 = vld [vmem:[#allocation3 + $0x159] sm:$0xff] }
 0xb9c   :  { %v15418_v9 = vpop.f32.mrf.mxu1 }
 0xb9e   :  { %v9084_v56 = vpop.f32.mrf.mxu1 }
 0xb9f   :  { %v9088_v3 = vmax.f32 %v9014_v23, %v9084_v56 }
 0xba0   :  { %v15425_v10 = vpop.f32.mrf.mxu1  ;;  %v20157_v62 = vld [vmem:[#allocation3 + $0x16f] sm:$0xff] }
 0xba1   :  { %v20159_v16 = vld [vmem:[#allocation3 + $0x170] sm:$0xff]  ;;  %9090 = vst.msk [vmem:[#allocation3 + $0x188] sm:$0xff] %vm701_vm8, %v9088_v3  ;;  %v20164_v60 = vpack.c.bf16 %v20157_v62, %v20155_v15 }
 0xba2   :  { %v20168_v31 = vpack.c.bf16 %v20159_v16, %v20150_v49  ;;  %v9167_v34 = vpop.f32.mrf.mxu1 }
 0xba3   :  { %15468 = vmatprep.mubr.msk.bf16.mxu0 %vm701_vm8, %v20164_v60 }
 0xba4   :  { %15486 = vmatprep.mubr.msk.bf16.mxu1 %vm701_vm8, %v20168_v31  ;;  %v15432_v48 = vpop.f32.mrf.mxu1 }
 0xba5   :  { %v9750_v48 = vpack.c.bf16 %v20175_v39, %v9734_v38 }
 0xba6   :  { %v9237_v43 = vpop.f32.mrf.mxu1 }
 0xba7   :  { %v9241_v33 = vmax.f32 %v9167_v34, %v9237_v43  ;;  %v9737_v43 = vld [vmem:[#allocation3 + $0x51] sm:$0xff] }
 0xba8   :  { %v15439_v20 = vpop.f32.mrf.mxu1  ;;  %v9419_v2 = vld [vmem:[#allocation3 + $0x187] sm:$0xff] }
 0xba9   :  { %9243 = vst.msk [vmem:[#allocation3 + $0x1a0] sm:$0xff] %vm701_vm8, %v9241_v33  ;;  %v20179_v9 = vld [vmem:[#allocation3 + $0x188] sm:$0xff]  ;;  %v13874_v20 = vld [vmem:[%s21071_s10 + $0x60] sm:$0xff]  ;;  %v9921_v45 = vpack.c.bf16 %v9419_v2, %v20157_v62  ;;  %v10245_v62 = vpack.c.bf16 %v9736_v57, %v20175_v39 }
 0xbaa   :  { %v9320_v32 = vpop.f32.mrf.mxu1  ;;  %v20201_v33 = vld [vmem:[#allocation3 + $0x81] sm:$0xff]  ;;  %v10086_v19 = vpack.c.bf16 %v20179_v9, %v20159_v16 }
 0xbab   :  { %v13895_v39 = vld [vmem:[%s21071_s10 + $0x88] sm:$0xff] }
 0xbac   :  { %v15446_v5 = vpop.f32.mrf.mxu1 }
 0xbad   :  { %v13884_v5 = vld [vmem:[%s21071_s10 + $0x70] sm:$0xff] }
 0xbae   :  { %v9390_v46 = vpop.f32.mrf.mxu1 }
 0xbaf   :  { %v9394_v28 = vmax.f32 %v9320_v32, %v9390_v46  ;;  %v13875_v32 = vld [vmem:[%s21071_s10 + $0x68] sm:$0xff] }
 0xbb0   :  { %v20177_v23 = vld [vmem:[#allocation3 + $0x19f] sm:$0xff]  ;;  %v15453_v3 = vpop.f32.mrf.mxu1  ;;  %v9738_v46 = vld [vmem:[#allocation3 + $0x69] sm:$0xff] }
 0xbb1   :  { %v20181_v56 = vld [vmem:[#allocation3 + $0x1a0] sm:$0xff]  ;;  %v20184_v10 = vpack.c.bf16 %v20177_v23, %v9419_v2  ;;  %9396 = vst.msk [vmem:[#allocation3 + $0x1b8] sm:$0xff] %vm701_vm8, %v9394_v28  ;;  %v20218_v38 = vpack.c.bf16 %v20201_v33, %v9738_v46  ;;  %v10421_v28 = vpack.c.bf16 %v13875_v32, %v13874_v20  ;;  %v10586_v3 = vpack.c.bf16 %v13885_v7, %v13884_v5 }
 0xbb2   :  { %v20188_v34 = vpack.c.bf16 %v20181_v56, %v20179_v9  ;;  %v20234_v20 = vld [vmem:[#allocation3 + $0xc7] sm:$0xff] }
 0xbb3   :  { %15469 = vmatmul.mubr.msk.bf16.gmra.mxu0 %vm701_vm8, %v20184_v10  ;;  %v9918_v5 = vpack.c.bf16 %v20234_v20, %v20099_v12  ;;  %v9920_v12 = vpack.c.bf16 %v20155_v15, %v20133_v54  ;;  %v9749_v52 = vld [vmem:[#allocation3 + $0x1a1] sm:$0xff] }
 0xbb4   :  { %15487 = vmatmul.mubr.msk.bf16.gmra.mxu1 %vm701_vm8, %v20188_v34  ;;  %15492 = vmatprep.mubr.msk.bf16.mxu0 %vm701_vm8, %v9750_v48  ;;  %v9741_v48 = vld [vmem:[#allocation3 + $0xb1] sm:$0xff]  ;;  %v13894_v2 = vld [vmem:[%s21071_s10 + $0x80] sm:$0xff]  ;;  %s15862_s10 = scalar_lea.vmem %s13077_s26, 32 }
 0xbb5   :  { %15510 = vmatprep.mubr.msk.bf16.mxu1 %vm701_vm8, %v9915_v29  ;;  %v20215_v29 = vpack.c.bf16 %v9737_v43, %v9736_v57  ;;  %v10248_v11 = vpack.c.bf16 %v20292_v40, %v9741_v48  ;;  %p15863_p0 = scmp.ne.s32.totalorder %s13077_s26, %s15862_s10  ;;  %p15868_p2 = scmp.lt.s32.totalorder %s15862_s10, %s15862_s10 }
 0xbb7   :  { %p15869_p3 = por %p15868_p2, %p15867_p1 }
 0xbb8   :  { %v10244_v1 = vld [vmem:[#allocation3 + $0x1b9] sm:$0xff] }
 0xbb9   :  { %p15870_p4 = pnand %p15869_p3, %p15863_p0 }
 0xbbb   :  { %15493 = vmatmul.mubr.msk.bf16.vlgmr.msra.gmra.mxu0 %vm701_vm8, %v20215_v29 }
 0xbbc   :  { %15511 = vmatmul.mubr.msk.bf16.vlgmr.msra.gmra.mxu1 %vm701_vm8, %v9916_v24  ;;  %15496 = vmatprep.mubr.msk.bf16.mxu0 %vm701_vm8, %v20218_v38  ;;  %v9740_v24 = vld [vmem:[#allocation3 + $0x99] sm:$0xff] }
 0xbbd   :  { %15514 = vmatprep.mubr.msk.bf16.mxu1 %vm701_vm8, %v9917_v13  ;;  %15527 = vmatpush3.bf16.msra.mxu0 %v20055_v53  ;;  %v20236_v32 = vpack.c.bf16 %v9741_v48, %v9740_v24  ;;  %v9745_v53 = vld [vmem:[#allocation3 + $0x141] sm:$0xff]  ;;  %v9744_v13 = vld [vmem:[#allocation3 + $0x129] sm:$0xff]  ;;  %v10247_v57 = vpack.c.bf16 %v9740_v24, %v20201_v33  ;;  %v10739_v48 = vld [vmem:[#allocation3 + $0x1d1] sm:$0xff] }
 0xbbe   :  { %15545 = vmatpush3.bf16.msra.mxu1 %v20060_v6  ;;  %15562 = vmatprep.subr.bf16.mxu0 %v10421_v28  ;;  %v9747_v6 = vld [vmem:[#allocation3 + $0x171] sm:$0xff]  ;;  %v20247_v7 = vpack.c.bf16 %v9745_v53, %v9744_v13  ;;  %v10249_v55 = vpack.c.bf16 %v9744_v13, %v9743_v61 }
 0xbbf   :  { %15580 = vmatprep.subr.bf16.mxu1 %v10586_v3  ;;  %v20251_v8 = vpack.c.bf16 %v9747_v6, %v9746_v59 }
 0xbc3   :  { %15497 = vmatmul.mubr.msk.bf16.gmra.mxu0 %vm701_vm8, %v20236_v32 }
 0xbc4   :  { %15515 = vmatmul.mubr.msk.bf16.gmra.mxu1 %vm701_vm8, %v9918_v5  ;;  %15500 = vmatprep.mubr.msk.bf16.mxu0 %vm701_vm8, %v9754_v22  ;;  %v20260_v5 = vld [vmem:[#allocation3 + $0x1b7] sm:$0xff]  ;;  %v9748_v22 = vld [vmem:[#allocation3 + $0x189] sm:$0xff] }
 0xbc5   :  { %15518 = vmatprep.mubr.msk.bf16.mxu1 %vm701_vm8, %v9919_v42  ;;  %v20262_v54 = vpack.c.bf16 %v9749_v52, %v9748_v22  ;;  %v9922_v15 = vpack.c.bf16 %v20260_v5, %v20177_v23  ;;  %v10246_v23 = vpack.c.bf16 %v9738_v46, %v9737_v43  ;;  %v10751_v42 = vpack.c.bf16 %v13895_v39, %v13894_v2 }
 0xbc6   :  { %v10251_v25 = vpack.c.bf16 %v9748_v22, %v9747_v6 }
 0xbcb   :  { %15501 = vmatmul.mubr.msk.bf16.gmra.mxu0 %vm701_vm8, %v20247_v7 }
 0xbcc   :  { %15519 = vmatmul.mubr.msk.bf16.gmra.mxu1 %vm701_vm8, %v9920_v12  ;;  %15504 = vmatprep.mubr.msk.bf16.mxu0 %vm701_vm8, %v20251_v8 }
 0xbcd   :  { %15522 = vmatprep.mubr.msk.bf16.mxu1 %vm701_vm8, %v9921_v45 }
 0xbd3   :  { %15505 = vmatmul.mubr.msk.bf16.gmra.mxu0 %vm701_vm8, %v20262_v54 }
 0xbd4   :  { %15523 = vmatmul.mubr.msk.bf16.gmra.mxu1 %vm701_vm8, %v9922_v15  ;;  %15528 = vmatprep.mubr.msk.bf16.mxu0 %vm701_vm8, %v10080_v27  ;;  %v10083_v27 = vpack.c.bf16 %v10071_v44, %v20101_v47  ;;  %v10079_v47 = vld [vmem:[#allocation3 + $0x1b8] sm:$0xff] }
 0xbd5   :  { %15546 = vmatprep.mubr.msk.bf16.mxu1 %vm701_vm8, %v10245_v62  ;;  %v10087_v63 = vpack.c.bf16 %v10079_v47, %v20181_v56 }
 0xbdb   :  { %15529 = vmatmul.mubr.msk.bf16.vlgmr.msra.gmra.mxu0 %vm701_vm8, %v10081_v51  ;;  %v10250_v51 = vpack.c.bf16 %v9746_v59, %v9745_v53 }
 0xbdc   :  { %15547 = vmatmul.mubr.msk.bf16.vlgmr.msra.gmra.mxu1 %vm701_vm8, %v10246_v23  ;;  %15532 = vmatprep.mubr.msk.bf16.mxu0 %vm701_vm8, %v10082_v14  ;;  %v21161_v14 = vpack.c.bf16 %v20150_v49, %v20135_v50  ;;  %v10401_v50 = vld [vmem:[#allocation3 + $0xdf] sm:$0xff] }
 0xbdd   :  { %15550 = vmatprep.mubr.msk.bf16.mxu1 %vm701_vm8, %v10247_v57  ;;  %15563 = vmatpush3.bf16.msra.mxu0 %v10421_v28  ;;  %v10566_v49 = vld [vmem:[#allocation3 + $0xe0] sm:$0xff] }
 0xbde   :  { %15581 = vmatpush3.bf16.msra.mxu1 %v10586_v3  ;;  %15598 = vmatprep.subr.bf16.mxu0 %v10751_v42 }
 0xbdf   :  { %15616 = vmatprep.subr.mxu1 %v21149_v37 }
 0xbe3   :  { %15533 = vmatmul.mubr.msk.bf16.gmra.mxu0 %vm701_vm8, %v10083_v27 }
 0xbe4   :  { %15551 = vmatmul.mubr.msk.bf16.gmra.mxu1 %vm701_vm8, %v10248_v11  ;;  %15536 = vmatprep.mubr.msk.bf16.mxu0 %vm701_vm8, %v10084_v18  ;;  %v10252_v18 = vpack.c.bf16 %v10244_v1, %v9749_v52 }
 0xbe5   :  { %15554 = vmatprep.mubr.msk.bf16.mxu1 %vm701_vm8, %v10249_v55 }
 0xbeb   :  { %15537 = vmatmul.mubr.msk.bf16.gmra.mxu0 %vm701_vm8, %v21161_v14 }
 0xbec   :  { %15555 = vmatmul.mubr.msk.bf16.gmra.mxu1 %vm701_vm8, %v10250_v51  ;;  %15540 = vmatprep.mubr.msk.bf16.mxu0 %vm701_vm8, %v10086_v19 }
 0xbed   :  { %15558 = vmatprep.mubr.msk.bf16.mxu1 %vm701_vm8, %v10251_v25 }
 0xbf3   :  { %15541 = vmatmul.mubr.msk.bf16.gmra.mxu0 %vm701_vm8, %v10087_v63 }
 0xbf4   :  { %15559 = vmatmul.mubr.msk.bf16.gmra.mxu1 %vm701_vm8, %v10252_v18  ;;  %15564 = vmatprep.mubr.msk.bf16.mxu0 %vm701_vm8, %v20036_v21  ;;  %v10413_v21 = vpack.c.bf16 %v10401_v50, %v20234_v20  ;;  %v10747_v20 = vpack.c.bf16 %v10739_v48, %v10244_v1 }
 0xbf5   :  { %15582 = vmatprep.mubr.msk.bf16.mxu1 %vm701_vm8, %v20040_v30  ;;  %v10578_v30 = vpack.c.bf16 %v10566_v49, %v10071_v44 }
 0xbfb   :  { %15565 = vmatmul.mubr.msk.bf16.vlgmr.msra.gmra.mxu0 %vm701_vm8, %v20080_v36  ;;  %v10409_v36 = vld [vmem:[#allocation3 + $0x1cf] sm:$0xff] }
 0xbfc   :  { %15583 = vmatmul.mubr.msk.bf16.vlgmr.msra.gmra.mxu1 %vm701_vm8, %v20084_v4  ;;  %15568 = vmatprep.mubr.msk.bf16.mxu0 %vm701_vm8, %v20106_v0  ;;  %v10574_v4 = vld [vmem:[#allocation3 + $0x1d0] sm:$0xff]  ;;  %v10417_v0 = vpack.c.bf16 %v10409_v36, %v20260_v5 }
 0xbfd   :  { %15586 = vmatprep.mubr.msk.bf16.mxu1 %vm701_vm8, %v20110_v58  ;;  %15599 = vmatpush3.bf16.msra.mxu0 %v10751_v42  ;;  %v10582_v58 = vpack.c.bf16 %v10574_v4, %v10079_v47 }
 0xbfe   :  { %15656 = vmatprep.subr.mxu0 %v21149_v37 }
 0xc03   :  { %15569 = vmatmul.mubr.msk.bf16.gmra.mxu0 %vm701_vm8, %v10413_v21 }
 0xc04   :  { %15587 = vmatmul.mubr.msk.bf16.gmra.mxu1 %vm701_vm8, %v10578_v30  ;;  %15572 = vmatprep.mubr.msk.bf16.mxu0 %vm701_vm8, %v20140_v17  ;;  %v20348_v17 = vld [vmem:[%s21072_s11] ss:$0 sm:$0xff] }
 0xc05   :  { %15590 = vmatprep.mubr.msk.bf16.mxu1 %vm701_vm8, %v20144_v35 }
 0xc0b   :  { %15573 = vmatmul.mubr.msk.bf16.gmra.mxu0 %vm701_vm8, %v20164_v60 }
 0xc0c   :  { %15591 = vmatmul.mubr.msk.bf16.gmra.mxu1 %vm701_vm8, %v20168_v31  ;;  %15576 = vmatprep.mubr.msk.bf16.mxu0 %vm701_vm8, %v20184_v10 }
 0xc0d   :  { %15594 = vmatprep.mubr.msk.bf16.mxu1 %vm701_vm8, %v20188_v34 }
 0xc13   :  { %15577 = vmatmul.mubr.msk.bf16.gmra.mxu0 %vm701_vm8, %v10417_v0  ;;  %v15458_v35 = vpop.f32.mrf.mxu0 }
 0xc14   :  { %15595 = vmatmul.mubr.msk.bf16.gmra.mxu1 %vm701_vm8, %v10582_v58  ;;  %v15476_v16 = vpop.f32.mrf.mxu1  ;;  %15600 = vmatprep.mubr.msk.bf16.mxu0 %vm701_vm8, %v20215_v29  ;;  %v9555_v60 = vadd.f32 %v15458_v35, %v20348_v17  ;;  %v10731_v29 = vld [vmem:[#allocation3 + $0xe1] sm:$0xff] }
 0xc15   :  { %15618 = vmatprep.mubr.msk.f32.mxu1 %vm15886_vm4, %v21149_v37  ;;  %v9490_v31 = vpop.f32.mrf.mxu0  ;;  %v10743_v3 = vpack.c.bf16 %v10731_v29, %v20292_v40 }
 0xc16   :  { %v9655_v9 = vpop.f32.mrf.mxu1  ;;  %v20357_v56 = vadd.f32 %v15476_v16, %v9555_v60  ;;  %v9553_v10 = vadd.f32 %v20348_v17, %v9490_v31 }
 0xc17   :  { %v15459_v34 = vpop.f32.mrf.mxu0 }
 0xc18   :  { %v20360_v43 = vadd.f32 %v9655_v9, %v9553_v10  ;;  %v9556_v33 = vadd.f32 %v15459_v34, %v20348_v17  ;;  %v15477_v46 = vpop.f32.mrf.mxu1 }
 0xc1a   :  { %v20363_v28 = vadd.f32 %v15477_v46, %v9556_v33  ;;  %v20379_v61 = vpop.f32.mrf.mxu1 }
 0xc1b   :  { %15601 = vmatmul.mubr.msk.bf16.vlgmr.msra.gmra.mxu0 %vm701_vm8, %v20218_v38  ;;  %v20377_v38 = vpop.f32.mrf.mxu0 }
 0xc1c   :  { %15604 = vmatprep.mubr.msk.bf16.mxu0 %vm701_vm8, %v20236_v32 }
 0xc23   :  { %15605 = vmatmul.mubr.msk.bf16.gmra.mxu0 %vm701_vm8, %v10743_v3 }
 0xc24   :  { %15608 = vmatprep.mubr.msk.bf16.mxu0 %vm701_vm8, %v20247_v7 }
 0xc2b   :  { %15609 = vmatmul.mubr.msk.bf16.gmra.mxu0 %vm701_vm8, %v20251_v8 }
 0xc2c   :  { %15612 = vmatprep.mubr.msk.bf16.mxu0 %vm701_vm8, %v20262_v54 }
 0xc33   :  { %15613 = vmatmul.mubr.msk.bf16.gmra.mxu0 %vm701_vm8, %v10747_v20  ;;  %v15462_v24 = vpop.f32.mrf.mxu0 }
 0xc34   :  { %v15480_v32 = vpop.f32.mrf.mxu1  ;;  %v9559_v53 = vadd.f32 %v15462_v24, %v20348_v17  ;;  %15658 = vmatprep.mubr.msk.f32.mxu0 %vm15886_vm4, %v21149_v37 }
 0xc35   :  { %v9506_v6 = vpop.f32.mrf.mxu0 }
 0xc36   :  { %v9671_v8 = vpop.f32.mrf.mxu1  ;;  %v9724_v13 = vadd.f32 %v15480_v32, %v9559_v53  ;;  %v9557_v7 = vadd.f32 %v20348_v17, %v9506_v6 }
 0xc37   :  { %v15463_v12 = vpop.f32.mrf.mxu0 }
 0xc38   :  { %v9722_v59 = vadd.f32 %v9671_v8, %v9557_v7  ;;  %v9560_v45 = vadd.f32 %v15463_v12, %v20348_v17  ;;  %v15481_v52 = vpop.f32.mrf.mxu1 }
 0xc39   :  { %v20387_v22 = vpop.f32.mrf.mxu0 }
 0xc3a   :  { %v9725_v5 = vadd.f32 %v15481_v52, %v9560_v45  ;;  %v20389_v54 = vpop.f32.mrf.mxu1 }
 0xc53   :  { %v15466_v15 = vpop.f32.mrf.mxu0 }
 0xc54   :  { %v15484_v62 = vpop.f32.mrf.mxu1  ;;  %v9563_v2 = vadd.f32 %v15466_v15, %v20348_v17 }
 0xc55   :  { %v9522_v39 = vpop.f32.mrf.mxu0 }
 0xc56   :  { %v9687_v23 = vpop.f32.mrf.mxu1  ;;  %v9728_v57 = vadd.f32 %v15484_v62, %v9563_v2  ;;  %v9561_v42 = vadd.f32 %v20348_v17, %v9522_v39 }
 0xc57   :  { %v15467_v44 = vpop.f32.mrf.mxu0 }
 0xc58   :  { %v9726_v40 = vadd.f32 %v9687_v23, %v9561_v42  ;;  %v9564_v27 = vadd.f32 %v15467_v44, %v20348_v17  ;;  %v15485_v11 = vpop.f32.mrf.mxu1 }
 0xc59   :  { %v20394_v51 = vpop.f32.mrf.mxu0 }
 0xc5a   :  { %v9729_v55 = vadd.f32 %v15485_v11, %v9564_v27  ;;  %v20396_v19 = vpop.f32.mrf.mxu1 }
 0xc73   :  { %v15470_v25 = vpop.f32.mrf.mxu0 }
 0xc74   :  { %v15488_v14 = vpop.f32.mrf.mxu1  ;;  %v9567_v47 = vadd.f32 %v15470_v25, %v20348_v17 }
 0xc75   :  { %v9538_v1 = vpop.f32.mrf.mxu0 }
 0xc76   :  { %v9703_v63 = vpop.f32.mrf.mxu1  ;;  %v9732_v18 = vadd.f32 %v15488_v14, %v9567_v47  ;;  %v9565_v50 = vadd.f32 %v20348_v17, %v9538_v1 }
 0xc77   :  { %v15471_v49 = vpop.f32.mrf.mxu0 }
 0xc78   :  { %v15489_v21 = vpop.f32.mrf.mxu1  ;;  %v9730_v30 = vadd.f32 %v9703_v63, %v9565_v50  ;;  %v9568_v36 = vadd.f32 %v15471_v49, %v20348_v17 }
 0xc79   :  { %v9541_v4 = vpop.f32.mrf.mxu0 }
 0xc7a   :  { %v9706_v0 = vpop.f32.mrf.mxu1  ;;  %v9733_v58 = vadd.f32 %v15489_v21, %v9568_v36  ;;  %v9566_v35 = vadd.f32 %v20348_v17, %v9541_v4 }
 0xc7b   :  { %v15494_v16 = vpop.f32.mrf.mxu0 }
 0xc7c   :  { %v15512_v60 = vpop.f32.mrf.mxu1  ;;  %v9731_v31 = vadd.f32 %v9706_v0, %v9566_v35  ;;  %v9885_v9 = vadd.f32 %v15494_v16, %v20357_v56 }
 0xc7d   :  { %v9820_v10 = vpop.f32.mrf.mxu0 }
 0xc7e   :  { %v20403_v34 = vpop.f32.mrf.mxu1  ;;  %v10050_v33 = vadd.f32 %v15512_v60, %v9885_v9  ;;  %v20406_v46 = vadd.f32 %v9820_v10, %v20360_v43 }
 0xc7f   :  { %v15495_v29 = vpop.f32.mrf.mxu0 }
 0xc80   :  { %v15513_v3 = vpop.f32.mrf.mxu1  ;;  %v9886_v48 = vadd.f32 %v15495_v29, %v20363_v28 }
 0xc81   :  { %v20409_v20 = vpop.f32.mrf.mxu0 }
 0xc82   :  { %v20411_v24 = vpop.f32.mrf.mxu1  ;;  %v10051_v32 = vadd.f32 %v15513_v3, %v9886_v48 }
 0xc83   :  { %v15498_v53 = vpop.f32.mrf.mxu0 }
 0xc84   :  { %v15516_v6 = vpop.f32.mrf.mxu1  ;;  %v9889_v8 = vadd.f32 %v15498_v53, %v9724_v13 }
 0xc85   :  { %v9836_v56 = vpop.f32.mrf.mxu0 }
 0xc86   :  { %v10001_v7 = vpop.f32.mrf.mxu1  ;;  %v10054_v12 = vadd.f32 %v15516_v6, %v9889_v8  ;;  %v9887_v45 = vadd.f32 %v9836_v56, %v9722_v59 }
 0xc87   :  { %v15499_v52 = vpop.f32.mrf.mxu0 }
 0xc88   :  { %v15517_v15 = vpop.f32.mrf.mxu1  ;;  %v10052_v43 = vadd.f32 %v10001_v7, %v9887_v45  ;;  %v9890_v62 = vadd.f32 %v15499_v52, %v9725_v5 }
 0xc89   :  { %v20413_v2 = vpop.f32.mrf.mxu0 }
 0xc8a   :  { %v20415_v39 = vpop.f32.mrf.mxu1  ;;  %v10055_v28 = vadd.f32 %v15517_v15, %v9890_v62 }
 0xc8b   :  { %v15502_v23 = vpop.f32.mrf.mxu0 }
 0xc8c   :  { %v15520_v42 = vpop.f32.mrf.mxu1  ;;  %v9893_v44 = vadd.f32 %v15502_v23, %v9728_v57 }
 0xc8d   :  { %v9852_v27 = vpop.f32.mrf.mxu0 }
 0xc8e   :  { %v20417_v11 = vpop.f32.mrf.mxu1  ;;  %v10058_v13 = vadd.f32 %v15520_v42, %v9893_v44  ;;  %v20419_v25 = vadd.f32 %v9852_v27, %v9726_v40 }
 0xc8f   :  { %v15503_v14 = vpop.f32.mrf.mxu0 }
 0xc90   :  { %v20421_v59 = vpop.f32.mrf.mxu1  ;;  %v20423_v47 = vadd.f32 %v15503_v14, %v9729_v55 }
 0xc91   :  { %v20425_v5 = vpop.f32.mrf.mxu0 }
 0xc92   :  { %v20427_v1 = vpop.f32.mrf.mxu1 }
 0xc93   :  { %v15506_v63 = vpop.f32.mrf.mxu0 }
 0xc94   :  { %v15524_v50 = vpop.f32.mrf.mxu1  ;;  %v9897_v49 = vadd.f32 %v15506_v63, %v9732_v18 }
 0xc95   :  { %v9868_v21 = vpop.f32.mrf.mxu0 }
 0xc96   :  { %v20429_v57 = vpop.f32.mrf.mxu1  ;;  %v10062_v36 = vadd.f32 %v15524_v50, %v9897_v49  ;;  %v20431_v4 = vadd.f32 %v9868_v21, %v9730_v30 }
 0xc97   :  { %21162 = vst [vmem:[#allocation12_spill] sm:$0xff] %v20429_v57  ;;  %v15507_v40 = vpop.f32.mrf.mxu0 }
 0xc98   :  { %v20433_v0 = vpop.f32.mrf.mxu1  ;;  %v20435_v35 = vadd.f32 %v15507_v40, %v9733_v58 }
 0xc99   :  { %21163 = vst [vmem:[#allocation13_spill] sm:$0xff] %v20433_v0  ;;  %v9871_v55 = vpop.f32.mrf.mxu0 }
 0xc9a   :  { %21164 = vst [vmem:[#allocation14_spill] sm:$0xff] %v20435_v35  ;;  %v20437_v16 = vpop.f32.mrf.mxu1  ;;  %v20439_v60 = vadd.f32 %v9871_v55, %v9731_v31 }
 0xc9b   :  { %21165 = vst [vmem:[#allocation15_spill] sm:$0xff] %v20437_v16  ;;  %v15530_v9 = vpop.f32.mrf.mxu0 }
 0xc9c   :  { %21166 = vst [vmem:[#allocation16_spill] sm:$0xff] %v20439_v60  ;;  %v20441_v10 = vpop.f32.mrf.mxu1  ;;  %v20443_v18 = vadd.f32 %v15530_v9, %v10050_v33 }
 0xc9d   :  { %v10150_v29 = vpop.f32.mrf.mxu0 }
 0xc9e   :  { %v20445_v3 = vpop.f32.mrf.mxu1 }
 0xc9f   :  { %v15531_v30 = vpop.f32.mrf.mxu0 }
 0xca0   :  { %v20447_v48 = vpop.f32.mrf.mxu1  ;;  %v20449_v53 = vadd.f32 %v15531_v30, %v10051_v32 }
 0xca1   :  { %v10153_v58 = vpop.f32.mrf.mxu0 }
 0xca2   :  { %v20451_v6 = vpop.f32.mrf.mxu1 }
 0xca3   :  { %v15534_v8 = vpop.f32.mrf.mxu0 }
 0xca4   :  { %v20453_v56 = vpop.f32.mrf.mxu1  ;;  %v20455_v31 = vadd.f32 %v15534_v8, %v10054_v12 }
 0xca5   :  { %v10166_v7 = vpop.f32.mrf.mxu0 }
 0xca6   :  { %v20457_v45 = vpop.f32.mrf.mxu1  ;;  %v20459_v33 = vadd.f32 %v10166_v7, %v10052_v43 }
 0xca7   :  { %v15535_v52 = vpop.f32.mrf.mxu0 }
 0xca8   :  { %v20461_v15 = vpop.f32.mrf.mxu1  ;;  %v20463_v62 = vadd.f32 %v15535_v52, %v10055_v28 }
 0xca9   :  { %v20465_v32 = vpop.f32.mrf.mxu0 }
 0xcaa   :  { %v20467_v23 = vpop.f32.mrf.mxu1 }
 0xcab   :  { %v15538_v42 = vpop.f32.mrf.mxu0 }
 0xcac   :  { %v20469_v44 = vpop.f32.mrf.mxu1  ;;  %v20471_v27 = vadd.f32 %v15538_v42, %v10058_v13 }
 0xcad   :  { %v20473_v12 = vpop.f32.mrf.mxu0 }
 0xcae   :  { %v20475_v14 = vpop.f32.mrf.mxu1 }
 0xcaf   :  { %21167 = vst [vmem:[#allocation17_spill] sm:$0xff] %v20475_v14  ;;  %v20477_v43 = vpop.f32.mrf.mxu0 }
 0xcb0   :  { %v20479_v63 = vpop.f32.mrf.mxu1 }
 0xcb1   :  { %21168 = vst [vmem:[#allocation18_spill] sm:$0xff] %v20479_v63  ;;  %v20481_v50 = vpop.f32.mrf.mxu0  ;;  %v9558_v63 = vadd.f32 %v20348_v17, %v20387_v22 }
 0xcb2   :  { %v20483_v28 = vpop.f32.mrf.mxu1 }
 0xcb3   :  { %21169 = vst [vmem:[#allocation19_spill] sm:$0xff] %v20483_v28  ;;  %v15542_v49 = vpop.f32.mrf.mxu0 }
 0xcb4   :  { %v20485_v21 = vpop.f32.mrf.mxu1  ;;  %v20487_v40 = vadd.f32 %v15542_v49, %v10062_v36 }
 0xcb5   :  { %21170 = vst [vmem:[#allocation8_spill] sm:$0xff] %v20485_v21  ;;  %v20489_v55 = vpop.f32.mrf.mxu0 }
 0xcb6   :  { %21171 = vst [vmem:[#allocation20_spill] sm:$0xff] %v20487_v40  ;;  %21172 = vst [vmem:[#allocation21_spill] sm:$0xff] %v20489_v55  ;;  %v20491_v13 = vpop.f32.mrf.mxu1 }
 0xcb7   :  { %21173 = vst [vmem:[#allocation22_spill] sm:$0xff] %v20491_v13  ;;  %v20493_v9 = vpop.f32.mrf.mxu0 }
 0xcb8   :  { %21174 = vst [vmem:[#allocation23_spill] sm:$0xff] %v20493_v9  ;;  %v20495_v30 = vpop.f32.mrf.mxu1 }
 0xcb9   :  { %21175 = vst [vmem:[#allocation24_spill] sm:$0xff] %v20495_v30  ;;  %v20497_v8 = vpop.f32.mrf.mxu0  ;;  %v9554_v30 = vadd.f32 %v20348_v17, %v20377_v38  ;;  %v10048_v38 = vadd.f32 %v20403_v34, %v20406_v46 }
 0xcba   :  { %21176 = vst [vmem:[#allocation25_spill] sm:$0xff] %v20497_v8  ;;  %v20499_v7 = vpop.f32.mrf.mxu1 }
 0xcbb   :  { %21177 = vst [vmem:[#allocation26_spill] sm:$0xff] %v20499_v7  ;;  %v15566_v52 = vpop.f32.mrf.mxu0  ;;  %v9719_v26 = vadd.f32 %v20379_v61, %v9554_v30  ;;  %v10213_v30 = vadd.f32 %v10150_v29, %v10048_v38 }
 0xcbc   :  { %v15584_v42 = vpop.f32.mrf.mxu1 }
 0xcbd   :  { %v10480_v41 = vpop.f32.mrf.mxu0  ;;  %v9884_v35 = vadd.f32 %v20409_v20, %v9719_v26  ;;  %v10380_v26 = vadd.f32 %v20441_v10, %v20443_v18  ;;  %v10378_v46 = vadd.f32 %v20445_v3, %v10213_v30 }
 0xcbe   :  { %v10645_v16 = vpop.f32.mrf.mxu1 }
 0xcbf   :  { %v15567_v60 = vpop.f32.mrf.mxu0  ;;  %v10049_v61 = vadd.f32 %v20411_v24, %v9884_v35  ;;  %v10381_v24 = vadd.f32 %v20447_v48, %v20449_v53  ;;  %v10545_v35 = vadd.f32 %v15566_v52, %v10380_v26  ;;  %v10543_v18 = vadd.f32 %v10480_v41, %v10378_v46 }
 0xcc0   :  { %v15585_v36 = vpop.f32.mrf.mxu1  ;;  %v10384_v48 = vadd.f32 %v20453_v56, %v20455_v31 }
 0xcc1   :  { %v10483_v21 = vpop.f32.mrf.mxu0  ;;  %v10214_v22 = vadd.f32 %v10153_v58, %v10049_v61  ;;  %v10546_v58 = vadd.f32 %v15567_v60, %v10381_v24  ;;  %v10710_v38 = vadd.f32 %v15584_v42, %v10545_v35  ;;  %v10708_v53 = vadd.f32 %v10645_v16, %v10543_v18  ;;  %v21182_v35 = vld [vmem:[#allocation12_spill] sm:$0xff] }
 0xcc2   :  { %v10648_v55 = vpop.f32.mrf.mxu1  ;;  %v10056_v16 = vadd.f32 %v20417_v11, %v20419_v25 }
 0xcc3   :  { %v15570_v49 = vpop.f32.mrf.mxu0  ;;  %v10379_v10 = vadd.f32 %v20451_v6, %v10214_v22  ;;  %v10711_v52 = vadd.f32 %v15585_v36, %v10546_v58 }
 0xcc4   :  { %v15588_v9 = vpop.f32.mrf.mxu1  ;;  %v10549_v60 = vadd.f32 %v15570_v49, %v10384_v48  ;;  %v21188_v48 = vld [vmem:[#allocation19_spill] sm:$0xff] }
 0xcc5   :  { %v10496_v40 = vpop.f32.mrf.mxu0  ;;  %v10544_v3 = vadd.f32 %v10483_v21, %v10379_v10 }
 0xcc6   :  { %v20510_v28 = vpop.f32.mrf.mxu1 }
 0xcc7   :  { %v15571_v37 = vpop.f32.mrf.mxu0  ;;  %v10709_v42 = vadd.f32 %v10648_v55, %v10544_v3  ;;  %v10714_v55 = vadd.f32 %v15588_v9, %v10549_v60 }
 0xcc8   :  { %v20521_v57 = vpop.f32.mrf.mxu1 }
 0xcc9   :  { %v20501_v13 = vpop.f32.mrf.mxu0 }
 0xccb   :  { %v20505_v8 = vpop.f32.mrf.mxu0 }
 0xccc   :  { %21178 = vst [vmem:[#allocation27_spill] sm:$0xff] %v20505_v8 }
 0xccd   :  { %v20507_v7 = vpop.f32.mrf.mxu0 }
 0xcce   :  { %21179 = vst [vmem:[#allocation28_spill] sm:$0xff] %v20507_v7  ;;  %v9723_v7 = vadd.f32 %v20389_v54, %v9558_v63  ;;  %v9562_v54 = vadd.f32 %v20348_v17, %v20394_v51 }
 0xccf   :  { %v20512_v0 = vpop.f32.mrf.mxu0 }
 0xcd0   :  { %21180 = vst [vmem:[#allocation29_spill] sm:$0xff] %v20512_v0  ;;  %v9888_v20 = vadd.f32 %v20413_v2, %v9723_v7  ;;  %v9727_v61 = vadd.f32 %v20396_v19, %v9562_v54  ;;  %v10385_v19 = vadd.f32 %v20461_v15, %v20463_v62  ;;  %v10221_v15 = vadd.f32 %v20473_v12, %v10056_v16  ;;  %v21183_v54 = vld [vmem:[#allocation17_spill] sm:$0xff] }
 0xcd1   :  { %v20517_v14 = vpop.f32.mrf.mxu0 }
 0xcd2   :  { %21181 = vst [vmem:[#allocation30_spill] sm:$0xff] %v20517_v14  ;;  %v20532_v14 = vpop.f32.mrf.mxu1  ;;  %v10053_v2 = vadd.f32 %v20415_v39, %v9888_v20  ;;  %v9892_v41 = vadd.f32 %v20425_v5, %v9727_v61  ;;  %v10382_v39 = vadd.f32 %v20457_v45, %v20459_v33  ;;  %v10550_v33 = vadd.f32 %v15571_v37, %v10385_v19  ;;  %v21193_v19 = vld [vmem:[#allocation16_spill] sm:$0xff] }
 0xcd3   :  { %v20523_v8 = vpop.f32.mrf.mxu0  ;;  %v10388_v37 = vadd.f32 %v20469_v44, %v20471_v27  ;;  %v10386_v10 = vadd.f32 %v21183_v54, %v10221_v15  ;;  %v21184_v18 = vld [vmem:[#allocation27_spill] sm:$0xff]  ;;  %v21185_v44 = vld [vmem:[#allocation18_spill] sm:$0xff] }
 0xcd4   :  { %v20545_v63 = vpop.f32.mrf.mxu1  ;;  %v10218_v17 = vadd.f32 %v20465_v32, %v10053_v2  ;;  %v10059_v32 = vadd.f32 %v20421_v59, %v20423_v47  ;;  %v10547_v36 = vadd.f32 %v10496_v40, %v10382_v39  ;;  %v10057_v20 = vadd.f32 %v20427_v1, %v9892_v41 }
 0xcd5   :  { %v20527_v0 = vpop.f32.mrf.mxu0  ;;  %v10715_v12 = vadd.f32 %v20521_v57, %v10550_v33  ;;  %v10553_v58 = vadd.f32 %v21184_v18, %v10388_v37  ;;  %v21187_v57 = vld [vmem:[#allocation13_spill] sm:$0xff] }
 0xcd6   :  { %v20554_v30 = vpop.f32.mrf.mxu1  ;;  %v10383_v5 = vadd.f32 %v20467_v23, %v10218_v17  ;;  %v10224_v62 = vadd.f32 %v20477_v43, %v10059_v32  ;;  %v10222_v40 = vadd.f32 %v20481_v50, %v10057_v20  ;;  %v10712_v1 = vadd.f32 %v20510_v28, %v10547_v36  ;;  %v21186_v28 = vld [vmem:[#allocation14_spill] sm:$0xff]  ;;  %v21196_v32 = vld [vmem:[#allocation23_spill] sm:$0xff] }
 0xcd7   :  { %v20534_v34 = vpop.f32.mrf.mxu0  ;;  %v10063_v61 = vadd.f32 %v21187_v57, %v21186_v28  ;;  %v21192_v41 = vld [vmem:[#allocation29_spill] sm:$0xff]  ;;  %v10718_v36 = vadd.f32 %v20545_v63, %v10553_v58  ;;  %v21204_v58 = vld [vmem:[#allocation26_spill] sm:$0xff] }
 0xcd8   :  { %v15593_v46 = vpop.f32.mrf.mxu1  ;;  %v10548_v25 = vadd.f32 %v20501_v13, %v10383_v5  ;;  %v10060_v13 = vadd.f32 %v21182_v35, %v20431_v4  ;;  %v10389_v27 = vadd.f32 %v21185_v44, %v10224_v62  ;;  %v10387_v17 = vadd.f32 %v21188_v48, %v10222_v40  ;;  %v21198_v62 = vld [vmem:[#allocation20_spill] sm:$0xff]  ;;  %v21201_v40 = vld [vmem:[#allocation11_spill] sm:$0xff] }
 0xcd9   :  { %v20541_v29 = vpop.f32.mrf.mxu0  ;;  %v10228_v5 = vadd.f32 %v21196_v32, %v10063_v61 }
 0xcda   :  { %v10680_v2 = vpop.f32.mrf.mxu1  ;;  %v10713_v50 = vadd.f32 %v20532_v14, %v10548_v25  ;;  %v10554_v39 = vadd.f32 %v21192_v41, %v10389_v27  ;;  %v21200_v25 = vld [vmem:[#allocation25_spill] sm:$0xff] }
 0xcdb   :  { %v15602_v7 = vpop.f32.mrf.mxu0 }
 0xcdc   :  { %v10875_v6 = vadd.f32 %v15602_v7, %v10710_v38  ;;  %v10719_v63 = vadd.f32 %v15593_v46, %v10554_v39 }
 0xcdd   :  { %v10810_v51 = vpop.f32.mrf.mxu0 }
 0xcde   :  { %v10873_v56 = vadd.f32 %v10810_v51, %v10708_v53  ;;  %v10891_v49 = vmax.f32 %v10875_v6, 0.0  ;;  %v21189_v51 = vld [vmem:[#allocation28_spill] sm:$0xff]  ;;  %v21191_v6 = vmov 0.0  }
 0xcdf   :  { %v15603_v21 = vpop.f32.mrf.mxu0  ;;  %v10551_v4 = vadd.f32 %v21189_v51, %v10386_v10 }
 0xce0   :  { %v10876_v31 = vadd.f32 %v15603_v21, %v10711_v52  ;;  %v10889_v59 = vmax.f32 %v10873_v56, 0.0  ;;  %v21190_v52 = vld [vmem:[#allocation10_spill] sm:$0xff] }
 0xce1   :  { %v10813_v45 = vpop.f32.mrf.mxu0 }
 0xce2   :  { %v10892_v26 = vmax.f32 %v10876_v31, 0.0  ;;  %v10874_v22 = vadd.f32 %v10813_v45, %v10709_v42  ;;  %v21194_v42 = vld [vmem:[#allocation15_spill] sm:$0xff]  ;;  %v21195_v31 = vld [vmem:[#allocation21_spill] sm:$0xff]  ;;  %v15596_v45 = vpop.f32.mrf.mxu1 }
 0xce3   :  { %v15606_v11 = vpop.f32.mrf.mxu0  ;;  %v10061_v56 = vadd.f32 %v21194_v42, %v21193_v19  ;;  %v10225_v16 = vadd.f32 %v21195_v31, %v10060_v13 }
 0xce4   :  { %v20567_v47 = vmax.f32 %v10891_v49, %v10892_v26  ;;  %v10890_v23 = vmax.f32 %v10874_v22, 0.0  ;;  %v10879_v9 = vadd.f32 %v15606_v11, %v10714_v55  ;;  %v21197_v49 = vld [vmem:[#allocation30_spill] sm:$0xff]  ;;  %v21199_v55 = vld [vmem:[#allocation8_spill] sm:$0xff]  ;;  %v10693_v35 = vpop.f32.mrf.mxu1 }
 0xce5   :  { %v10826_v24 = vpop.f32.mrf.mxu0  ;;  %v10552_v26 = vadd.f32 %v21197_v49, %v10387_v17  ;;  %v10392_v11 = vadd.f32 %v21199_v55, %v21198_v62  ;;  %v12073_v49 = vld [vmem:[%s21073_s12 + $0x18] sm:$0xff]  ;;  %v12070_v62 = vld [vmem:[%s21073_s12] sm:$0xff]  ;;  %v12071_v55 = vld [vmem:[%s21073_s12 + $0x8] sm:$0xff] }
 0xce6   :  { %v10905_v43 = vmax.f32 %v10889_v59, %v10890_v23  ;;  %v10877_v38 = vadd.f32 %v10826_v24, %v10712_v1  ;;  %v10895_v60 = vmax.f32 %v10879_v9, 0.0  ;;  %v10226_v59 = vadd.f32 %v21200_v25, %v10061_v56  ;;  %v15597_v28 = vpop.f32.mrf.mxu1 }
 0xce7   :  { %v15607_v7 = vpop.f32.mrf.mxu0  ;;  %v10716_v23 = vadd.f32 %v20554_v30, %v10551_v4  ;;  %v10557_v9 = vadd.f32 %v20523_v8, %v10392_v11  ;;  %v21203_v30 = vld [vmem:[#allocation24_spill] sm:$0xff]  ;;  %v10717_v10 = vadd.f32 %v10680_v2, %v10552_v26  ;;  %v12144_v11 = vpack.c.bf16 %v12071_v55, %v12070_v62 }
 0xce8   :  { %v10880_v3 = vadd.f32 %v15607_v7, %v10715_v12  ;;  %15617 = vmatpush3.msra.mxu1 %v10905_v43  ;;  %v10893_v22 = vmax.f32 %v10877_v38, 0.0  ;;  %v21202_v12 = vld [vmem:[#allocation22_spill] sm:$0xff]  ;;  %v10393_v54 = vadd.f32 %v21203_v30, %v10228_v5  ;;  %v10391_v7 = vadd.f32 %v21204_v58, %v10226_v59  ;;  %v10696_v41 = vpop.f32.mrf.mxu1  ;;  %v12074_v26 = vld [vmem:[%s21073_s12 + $0x20] sm:$0xff] }
 0xce9   :  { %v10829_v53 = vpop.f32.mrf.mxu0  ;;  %15619 = vmatmul.mubr.msk.f32.vlgmr.msra.gmra.mxu1 %vm10906_vm12, %v21190_v52  ;;  %15621 = vmatprep.subr.mxu1 %v21191_v6  ;;  %v10722_v2 = vadd.f32 %v15596_v45, %v10557_v9  ;;  %v12072_v45 = vld [vmem:[%s21073_s12 + $0x10] sm:$0xff] }
 0xcea   :  { %v10896_v14 = vmax.f32 %v10880_v3, 0.0  ;;  %v10878_v21 = vadd.f32 %v10829_v53, %v10713_v50  ;;  %15622 = vmatpush3.msra.mxu1 %v10905_v43  ;;  %15623 = vmatprep.mubr.msk.f32.mxu1 %vm15886_vm4, %v21191_v6  ;;  %v10390_v43 = vadd.f32 %v21202_v12, %v10225_v16  ;;  %v10558_v50 = vadd.f32 %v20534_v34, %v10393_v54 }
 0xceb   :  { %v15610_v33 = vpop.f32.mrf.mxu0  ;;  %15626 = vmatprep.subr.mxu1 %v21191_v6 }
 0xcec   :  { %v20597_v20 = vmax.f32 %v10895_v60, %v10896_v14  ;;  %v10894_v15 = vmax.f32 %v10878_v21, 0.0  ;;  %v10883_v1 = vadd.f32 %v15610_v33, %v10718_v36  ;;  %v10555_v44 = vadd.f32 %v20527_v0, %v10390_v43  ;;  %v12077_v36 = vld [vmem:[%s21073_s12 + $0x38] sm:$0xff] }
 0xced   :  { %v10842_v37 = vpop.f32.mrf.mxu0  ;;  %15624 = vmatmul.mubr.msk.f32.vlgmr.msra.gmra.mxu1 %vm10906_vm12, %v21201_v40  ;;  %v10556_v0 = vadd.f32 %v20541_v29, %v10391_v7  ;;  %v10723_v4 = vadd.f32 %v15597_v28, %v10558_v50 }
 0xcee   :  { %v11198_v24 = vmax.f32 %v10893_v22, %v10894_v15  ;;  %15627 = vmatpush3.msra.mxu1 %v20567_v47  ;;  %15628 = vmatprep.mubr.msk.f32.mxu1 %vm15886_vm4, %v21191_v6  ;;  %v10881_v18 = vadd.f32 %v10842_v37, %v10716_v23  ;;  %v10899_v8 = vmax.f32 %v10883_v1, 0.0  ;;  %v10720_v51 = vadd.f32 %v10693_v35, %v10555_v44  ;;  %v12075_v22 = vld [vmem:[%s21073_s12 + $0x28] sm:$0xff] }
 0xcef   :  { %v15611_v13 = vpop.f32.mrf.mxu0  ;;  %15631 = vmatprep.subr.mxu1 %v21191_v6  ;;  %v10721_v29 = vadd.f32 %v10696_v41, %v10556_v0  ;;  %v12198_v15 = vpack.c.bf16 %v12075_v22, %v12074_v26 }
 0xcf0   :  { %v10884_v46 = vadd.f32 %v15611_v13, %v10719_v63  ;;  %v10897_v61 = vmax.f32 %v10881_v18, 0.0 }
 0xcf1   :  { %v10845_v27 = vpop.f32.mrf.mxu0  ;;  %15629 = vmatmul.mubr.msk.f32.vlgmr.msra.gmra.mxu1 %vm10906_vm12, %v21190_v52 }
 0xcf2   :  { %v10900_v38 = vmax.f32 %v10884_v46, 0.0  ;;  %v10882_v3 = vadd.f32 %v10845_v27, %v10717_v10  ;;  %15632 = vmatpush3.msra.mxu1 %v20567_v47  ;;  %15633 = vmatprep.mubr.msk.f32.mxu1 %vm15886_vm4, %v21191_v6 }
 0xcf3   :  { %v15614_v57 = vpop.f32.mrf.mxu0  ;;  %15636 = vmatprep.subr.mxu1 %v21191_v6 }
 0xcf4   :  { %v11630_v48 = vmax.f32 %v10899_v8, %v10900_v38  ;;  %v10898_v17 = vmax.f32 %v10882_v3, 0.0  ;;  %v10887_v53 = vadd.f32 %v15614_v57, %v10722_v2 }
 0xcf5   :  { %v10858_v34 = vpop.f32.mrf.mxu0  ;;  %15634 = vmatmul.mubr.msk.f32.vlgmr.msra.gmra.mxu1 %vm10906_vm12, %v21201_v40 }
 0xcf6   :  { %v11486_v47 = vmax.f32 %v10897_v61, %v10898_v17  ;;  %15637 = vmatpush3.msra.mxu1 %v11198_v24  ;;  %15638 = vmatprep.mubr.msk.f32.mxu1 %vm15886_vm4, %v21191_v6  ;;  %v10885_v60 = vadd.f32 %v10858_v34, %v10720_v51  ;;  %v10903_v19 = vmax.f32 %v10887_v53, 0.0 }
 0xcf7   :  { %v15615_v39 = vpop.f32.mrf.mxu0  ;;  %15641 = vmatprep.subr.mxu1 %v21191_v6 }
 0xcf8   :  { %v10888_v14 = vadd.f32 %v15615_v39, %v10723_v4  ;;  %15657 = vmatpush3.msra.mxu0 %v11486_v47  ;;  %v10901_v31 = vmax.f32 %v10885_v60, 0.0 }
 0xcf9   :  { %v10861_v21 = vpop.f32.mrf.mxu0  ;;  %15639 = vmatmul.mubr.msk.f32.vlgmr.msra.gmra.mxu1 %vm10906_vm12, %v21190_v52  ;;  %15666 = vmatprep.subr.mxu0 %v21191_v6 }
 0xcfa   :  { %v10904_v42 = vmax.f32 %v10888_v14, 0.0  ;;  %v10886_v56 = vadd.f32 %v10861_v21, %v10721_v29  ;;  %15642 = vmatpush3.msra.mxu1 %v11198_v24  ;;  %15659 = vmatmul.mubr.msk.f32.vlgmr.msra.gmra.mxu0 %vm10906_vm12, %v21190_v52  ;;  %v12084_v14 = vld [vmem:[%s21073_s12 + $0x70] sm:$0xff]  ;;  %v12085_v21 = vld [vmem:[%s21073_s12 + $0x78] sm:$0xff] }
 0xcfb   :  { %15667 = vmatpush3.msra.mxu0 %v11630_v48  ;;  %15643 = vmatprep.mubr.msk.f32.mxu1 %vm15886_vm4, %v21191_v6 }
 0xcfc   :  { %v11918_v16 = vmax.f32 %v10903_v19, %v10904_v42  ;;  %v10902_v32 = vmax.f32 %v10886_v56, 0.0  ;;  %15646 = vmatprep.subr.mxu1 %v21191_v6  ;;  %15668 = vmatprep.mubr.msk.f32.mxu0 %vm15886_vm4, %v21191_v6 }
 0xcfd   :  { %15644 = vmatmul.mubr.msk.f32.vlgmr.msra.gmra.mxu1 %vm10906_vm12, %v21201_v40  ;;  %15676 = vmatprep.subr.mxu0 %v21191_v6 }
 0xcfe   :  { %v11774_v5 = vmax.f32 %v10901_v31, %v10902_v32  ;;  %15647 = vmatpush3.msra.mxu1 %v20597_v20  ;;  %15669 = vmatmul.mubr.msk.f32.vlgmr.msra.gmra.mxu0 %vm10906_vm12, %v21190_v52  ;;  %v12081_v32 = vld [vmem:[%s21073_s12 + $0x58] sm:$0xff] }
 0xcff   :  { %15648 = vmatprep.mubr.msk.f32.mxu1 %vm15886_vm4, %v21191_v6  ;;  %15651 = vmatprep.subr.mxu1 %v21191_v6 }
 0xd00   :  { %15677 = vmatpush3.msra.mxu0 %v11774_v5  ;;  %15678 = vmatprep.mubr.msk.f32.mxu0 %vm15886_vm4, %v21191_v6 }
 0xd01   :  { %15649 = vmatmul.mubr.msk.f32.vlgmr.msra.gmra.mxu1 %vm10906_vm12, %v21190_v52  ;;  %15686 = vmatprep.subr.mxu0 %v21191_v6 }
 0xd02   :  { %15652 = vmatpush3.msra.mxu1 %v20597_v20  ;;  %15679 = vmatmul.mubr.msk.f32.vlgmr.msra.gmra.mxu0 %vm10906_vm12, %v21190_v52  ;;  %v12145_v20 = vpack.c.bf16 %v12073_v49, %v12072_v45  ;;  %v12083_v49 = vld [vmem:[%s21073_s12 + $0x68] sm:$0xff] }
 0xd03   :  { %15687 = vmatpush3.msra.mxu0 %v11918_v16  ;;  %15653 = vmatprep.mubr.msk.f32.mxu1 %vm15886_vm4, %v21191_v6 }
 0xd04   :  { %15661 = vmatprep.subr.mxu1 %v21191_v6  ;;  %15688 = vmatprep.mubr.msk.f32.mxu0 %vm15886_vm4, %v21191_v6 }
 0xd05   :  { %15654 = vmatmul.mubr.msk.f32.vlgmr.msra.gmra.mxu1 %vm10906_vm12, %v21201_v40  ;;  %15696 = vmatprep.subr.bf16.mxu0 %v21191_v6 }
 0xd06   :  { %15662 = vmatpush3.msra.mxu1 %v11486_v47  ;;  %15663 = vmatprep.mubr.msk.f32.mxu1 %vm15886_vm4, %v21191_v6 }
 0xd07   :  { %15671 = vmatprep.subr.mxu1 %v21191_v6  ;;  %15689 = vmatmul.mubr.msk.f32.vlgmr.msra.gmra.mxu0 %vm10906_vm12, %v21190_v52  ;;  %v12076_v52 = vld [vmem:[%s21073_s12 + $0x30] sm:$0xff] }
 0xd08   :  { %15700 = vmatprep.mubr.msk.bf16.mxu0 %vm15886_vm4, %v21191_v6  ;;  %v12199_v33 = vpack.c.bf16 %v12077_v36, %v12076_v52  ;;  %15697 = vmatpush3.bf16.msra.mxu0 %v12145_v20  ;;  %v12298_v36 = vpack.c.bf16 %v12085_v21, %v12084_v14 }
 0xd09   :  { %15664 = vmatmul.mubr.msk.f32.vlgmr.msra.gmra.mxu1 %vm10906_vm12, %v21201_v40  ;;  %15698 = vmatprep.subr.bf16.mxu0 %v21191_v6 }
 0xd0a   :  { %15672 = vmatpush3.msra.mxu1 %v11630_v48  ;;  %15673 = vmatprep.mubr.msk.f32.mxu1 %vm15886_vm4, %v21191_v6 }
 0xd0b   :  { %15681 = vmatprep.subr.mxu1 %v21191_v6 }
 0xd0c   :  { %15699 = vmatpush3.bf16.msra.mxu0 %v12144_v11 }
 0xd0d   :  { %15674 = vmatmul.mubr.msk.f32.vlgmr.msra.gmra.mxu1 %vm10906_vm12, %v21201_v40  ;;  %15712 = vmatprep.subr.bf16.mxu0 %v21191_v6 }
 0xd0e   :  { %15682 = vmatpush3.msra.mxu1 %v11774_v5  ;;  %15683 = vmatprep.mubr.msk.f32.mxu1 %vm15886_vm4, %v21191_v6 }
 0xd0f   :  { %15691 = vmatprep.subr.mxu1 %v21191_v6 }
 0xd11   :  { %15684 = vmatmul.mubr.msk.f32.vlgmr.msra.gmra.mxu1 %vm10906_vm12, %v21201_v40 }
 0xd12   :  { %15692 = vmatpush3.msra.mxu1 %v11918_v16  ;;  %15693 = vmatprep.mubr.msk.f32.mxu1 %vm15886_vm4, %v21191_v6  ;;  %v12080_v16 = vld [vmem:[%s21073_s12 + $0x50] sm:$0xff] }
 0xd13   :  { %15704 = vmatprep.subr.bf16.mxu1 %v21191_v6  ;;  %v12248_v62 = vpack.c.bf16 %v12081_v32, %v12080_v16 }
 0xd15   :  { %15694 = vmatmul.mubr.msk.f32.vlgmr.msra.gmra.mxu1 %vm10906_vm12, %v21201_v40 }
 0xd16   :  { %15708 = vmatprep.mubr.msk.bf16.mxu1 %vm15886_vm4, %v21191_v6  ;;  %15705 = vmatpush3.bf16.msra.mxu1 %v12199_v33  ;;  %v12082_v33 = vld [vmem:[%s21073_s12 + $0x60] sm:$0xff] }
 0xd17   :  { %15706 = vmatprep.subr.bf16.mxu1 %v21191_v6 }
 0xd1a   :  { %15707 = vmatpush3.bf16.msra.mxu1 %v12198_v15 }
 0xd1b   :  { %15720 = vmatprep.subr.bf16.mxu1 %v21191_v6 }
 0xda9   :  { %v10975_v25 = vpop.f32.mrf.mxu1 }
 0xdab   :  { %v15620_v59 = vpop.f32.mrf.mxu1 }
 0xdac   :  { %v12078_v59 = vld [vmem:[%s21073_s12 + $0x40] sm:$0xff] }
 0xdad   :  { %v11047_v23 = vpop.f32.mrf.mxu1 }
 0xdae   :  { %v11051_v37 = vmax.f32 %v10975_v25, %v11047_v23  ;;  %v12297_v25 = vpack.c.bf16 %v12083_v49, %v12082_v33  ;;  %v12079_v23 = vld [vmem:[%s21073_s12 + $0x48] sm:$0xff] }
 0xdaf   :  { %v15625_v40 = vpop.f32.mrf.mxu1 }
 0xdb0   :  { %11053 = vst.msk [vmem:[#allocation4] sm:$0xf] %vm11052_vm13, %v11051_v37 }
 0xdb1   :  { %v11121_v63 = vpop.f32.mrf.mxu1 }
 0xdb3   :  { %v15630_v24 = vpop.f32.mrf.mxu1 }
 0xdb5   :  { %v11191_v1 = vpop.f32.mrf.mxu1 }
 0xdb6   :  { %v11195_v12 = vmax.f32 %v11121_v63, %v11191_v1  ;;  %v12092_v1 = vld [vmem:[%s21073_s12 + $0xb0] sm:$0xff] }
 0xdb7   :  { %v15635_v43 = vpop.f32.mrf.mxu1  ;;  %v12062_v48 = vld [vmem:[#allocation4] sm:$0xf] }
 0xdb8   :  { %11197 = vst.msk [vmem:[#allocation4 + $0x4] sm:$0xf] %vm11052_vm13, %v11195_v12  ;;  %v12142_v34 = vpack.c.bf16 %v12062_v48, %v12062_v48  ;;  %v12093_v12 = vld [vmem:[%s21073_s12 + $0xb8] sm:$0xff]  ;;  %v12247_v43 = vpack.c.bf16 %v12079_v23, %v12078_v59  ;;  %v12107_v59 = vld [vmem:[%s21073_s12 + $0x128] sm:$0xff] }
 0xdb9   :  { %v11265_v9 = vpop.f32.mrf.mxu1 }
 0xdba   :  { %v11553_v35 = vpop.f32.mrf.mxu0  ;;  %v12148_v53 = vunpack.c.l.b16 %v12142_v34 }
 0xdbb   :  { %v15640_v13 = vpop.f32.mrf.mxu1 }
 0xdbc   :  { %v15660_v30 = vpop.f32.mrf.mxu0  ;;  %v12200_v56 = vrot.slane %v12148_v53, 1  ;;  %v12299_v37 = vrot.slane %v12148_v53, 3  ;;  %v12088_v13 = vld [vmem:[%s21073_s12 + $0x90] sm:$0xff] }
 0xdbd   :  { %v11335_v54 = vpop.f32.mrf.mxu1  ;;  %v12089_v30 = vld [vmem:[%s21073_s12 + $0x98] sm:$0xff] }
 0xdbe   :  { %v11339_v10 = vmax.f32 %v11265_v9, %v11335_v54  ;;  %v11697_v18 = vpop.f32.mrf.mxu0  ;;  %v12403_v54 = vpack.c.bf16 %v12093_v12, %v12092_v1 }
 0xdbf   :  { %v15645_v46 = vpop.f32.mrf.mxu1  ;;  %v12063_v22 = vld [vmem:[#allocation4 + $0x4] sm:$0xf] }
 0xdc0   :  { %11341 = vst.msk [vmem:[#allocation4 + $0x8] sm:$0xf] %vm11052_vm13, %v11339_v10  ;;  %v15670_v58 = vpop.f32.mrf.mxu0  ;;  %v12347_v63 = vpack.c.bf16 %v12063_v22, %v12063_v22  ;;  %v12105_v22 = vld [vmem:[%s21073_s12 + $0x118] sm:$0xff] }
 0xdc1   :  { %v11409_v7 = vpop.f32.mrf.mxu1 }
 0xdc2   :  { %v11841_v44 = vpop.f32.mrf.mxu0 }
 0xdc3   :  { %v15650_v27 = vpop.f32.mrf.mxu1 }
 0xdc4   :  { %v15680_v50 = vpop.f32.mrf.mxu0  ;;  %v12350_v27 = vpack.c.bf16 %v12089_v30, %v12088_v13  ;;  %v12112_v30 = vld [vmem:[%s21073_s12 + $0x150] sm:$0xff] }
 0xdc5   :  { %v11479_v8 = vpop.f32.mrf.mxu1 }
 0xdc6   :  { %v11483_v38 = vmax.f32 %v11409_v7, %v11479_v8  ;;  %v12090_v7 = vld [vmem:[%s21073_s12 + $0xa0] sm:$0xff] }
 0xdc7   :  { %v15655_v3 = vpop.f32.mrf.mxu1  ;;  %v11985_v2 = vpop.f32.mrf.mxu0  ;;  %v12086_v8 = vld [vmem:[%s21073_s12 + $0x80] sm:$0xff] }
 0xdc8   :  { %11485 = vst.msk [vmem:[#allocation4 + $0xc] sm:$0xf] %vm11052_vm13, %v11483_v38  ;;  %v12087_v38 = vld [vmem:[%s21073_s12 + $0x88] sm:$0xff] }
 0xdc9   :  { %v11623_v28 = vpop.f32.mrf.mxu1  ;;  %v15690_v57 = vpop.f32.mrf.mxu0 }
 0xdca   :  { %v11627_v0 = vmax.f32 %v11553_v35, %v11623_v28  ;;  %v12249_v35 = vrot.slane %v12148_v53, 2  ;;  %v12100_v57 = vld [vmem:[%s21073_s12 + $0xf0] sm:$0xff] }
 0xdcb   :  { %v15665_v61 = vpop.f32.mrf.mxu1 }
 0xdcc   :  { %11629 = vst.msk [vmem:[#allocation4 + $0x10] sm:$0xf] %vm11052_vm13, %v11627_v0  ;;  %v12101_v0 = vld [vmem:[%s21073_s12 + $0xf8] sm:$0xff]  ;;  %v12349_v61 = vpack.c.bf16 %v12087_v38, %v12086_v8 }
 0xdcd   :  { %v11767_v17 = vpop.f32.mrf.mxu1  ;;  %v12502_v34 = vpack.c.bf16 %v12101_v0, %v12100_v57 }
 0xdce   :  { %v11771_v51 = vmax.f32 %v11697_v18, %v11767_v17  ;;  %v20772_v18 = vunpack.c.l.b16 %v12347_v63  ;;  %v12096_v17 = vld [vmem:[%s21073_s12 + $0xd0] sm:$0xff]  ;;  %v12103_v63 = vld [vmem:[%s21073_s12 + $0x108] sm:$0xff] }
 0xdcf   :  { %v15675_v4 = vpop.f32.mrf.mxu1 }
 0xdd0   :  { %11773 = vst.msk [vmem:[#allocation4 + $0x14] sm:$0xf] %vm11052_vm13, %v11771_v51  ;;  %v12097_v51 = vld [vmem:[%s21073_s12 + $0xd8] sm:$0xff]  ;;  %v12453_v49 = vrot.slane %v20772_v18, 2 }
 0xdd1   :  { %v11911_v47 = vpop.f32.mrf.mxu1 }
 0xdd2   :  { %v11915_v41 = vmax.f32 %v11841_v44, %v11911_v47  ;;  %v12091_v44 = vld [vmem:[%s21073_s12 + $0xa8] sm:$0xff]  ;;  %v12098_v47 = vld [vmem:[%s21073_s12 + $0xe0] sm:$0xff] }
 0xdd3   :  { %v12066_v39 = vld [vmem:[#allocation4 + $0x10] sm:$0xf]  ;;  %v15685_v29 = vpop.f32.mrf.mxu1  ;;  %v12402_v3 = vpack.c.bf16 %v12091_v44, %v12090_v7  ;;  %v12065_v44 = vld [vmem:[#allocation4 + $0xc] sm:$0xf] }
 0xdd4   :  { %v12143_v60 = vpack.c.bf16 %v12066_v39, %v12066_v39  ;;  %11917 = vst.msk [vmem:[#allocation4 + $0x18] sm:$0xf] %vm11052_vm13, %v11915_v41  ;;  %v12064_v39 = vld [vmem:[#allocation4 + $0x8] sm:$0xf] }
 0xdd5   :  { %v12055_v19 = vpop.f32.mrf.mxu1  ;;  %v12551_v32 = vpack.c.bf16 %v12064_v39, %v12064_v39 }
 0xdd6   :  { %v12149_v42 = vunpack.c.l.b16 %v12143_v60  ;;  %v12059_v31 = vmax.f32 %v11985_v2, %v12055_v19  ;;  %v12404_v2 = vrot.slane %v20772_v18, 1  ;;  %v12452_v60 = vpack.c.bf16 %v12097_v51, %v12096_v17  ;;  %v12124_v17 = vld [vmem:[%s21073_s12 + $0x1b0] sm:$0xff]  ;;  %v12125_v51 = vld [vmem:[%s21073_s12 + $0x1b8] sm:$0xff] }
 0xdd7   :  { %v15695_v5 = vpop.f32.mrf.mxu1  ;;  %v12067_v20 = vld [vmem:[#allocation4 + $0x14] sm:$0xf]  ;;  %v12811_v39 = vpack.c.bf16 %v12125_v51, %v12124_v17 }
 0xdd8   :  { %v12201_v52 = vsel %vm12151_vm14, %v12149_v42, %v12200_v56  ;;  %v12150_v45 = vrot.slane %v12149_v42, 7  ;;  %12061 = vst.msk [vmem:[#allocation4 + $0x1c] sm:$0xf] %vm11052_vm13, %v12059_v31  ;;  %v12300_v55 = vrot.slane %v12149_v42, 2  ;;  %v12250_v40 = vrot.slane %v12149_v42, 1  ;;  %v12094_v42 = vld [vmem:[%s21073_s12 + $0xc0] sm:$0xff] }
 0xdd9   :  { %v12202_v26 = vpack.c.b16 %v12201_v52, %v12201_v52  ;;  %v12348_v24 = vpack.c.bf16 %v12067_v20, %v12067_v20  ;;  %v12095_v56 = vld [vmem:[%s21073_s12 + $0xc8] sm:$0xff]  ;;  %v12503_v31 = vrot.slane %v20772_v18, 3  ;;  %v12108_v52 = vld [vmem:[%s21073_s12 + $0x130] sm:$0xff] }
 0xdda   :  { %v12152_v15 = vsel %vm12151_vm14, %v12150_v45, %v12148_v53  ;;  %v12301_v9 = vsel %vm12151_vm14, %v12300_v55, %v12299_v37  ;;  %v12251_v10 = vsel %vm12151_vm14, %v12250_v40, %v12249_v35  ;;  %v12099_v53 = vld [vmem:[%s21073_s12 + $0xe8] sm:$0xff]  ;;  %v12451_v45 = vpack.c.bf16 %v12095_v56, %v12094_v42  ;;  %v12102_v40 = vld [vmem:[%s21073_s12 + $0x100] sm:$0xff] }
 0xddb   :  { %15709 = vmatmul.mubr.msk.bf16.vlgmr.msra.gmra.mxu1 %vm178_vm5, %v12202_v26  ;;  %v12153_v11 = vpack.c.b16 %v12152_v15, %v12152_v15  ;;  %v20774_v46 = vunpack.c.l.b16 %v12348_v24  ;;  %v12302_v58 = vpack.c.b16 %v12301_v9, %v12301_v9  ;;  %v12252_v50 = vpack.c.b16 %v12251_v10, %v12251_v10  ;;  %v12068_v29 = vld [vmem:[#allocation4 + $0x18] sm:$0xf]  ;;  %v12104_v26 = vld [vmem:[%s21073_s12 + $0x110] sm:$0xff]  ;;  %v12123_v42 = vld [vmem:[%s21073_s12 + $0x1a8] sm:$0xff] }
 0xddc   :  { %15721 = vmatpush3.bf16.msra.mxu1 %v12298_v36  ;;  %15724 = vmatprep.mubr.msk.bf16.mxu1 %vm15886_vm4, %v21191_v6  ;;  %v12501_v19 = vpack.c.bf16 %v12099_v53, %v12098_v47  ;;  %v12552_v5 = vpack.c.bf16 %v12068_v29, %v12068_v29  ;;  %v12109_v36 = vld [vmem:[%s21073_s12 + $0x138] sm:$0xff]  ;;  %v12554_v23 = vpack.c.bf16 %v12105_v22, %v12104_v26  ;;  %v12120_v53 = vld [vmem:[%s21073_s12 + $0x190] sm:$0xff] }
 0xddd   :  { %15701 = vmatmul.mubr.msk.bf16.vlgmr.msra.gmra.mxu0 %vm178_vm5, %v12153_v11  ;;  %15722 = vmatprep.subr.bf16.mxu1 %v21191_v6  ;;  %v12355_v28 = vrot.slane %v20774_v46, 7  ;;  %v12405_v48 = vsel %vm12151_vm14, %v20774_v46, %v12404_v2  ;;  %v12504_v14 = vrot.slane %v20774_v46, 2  ;;  %v12454_v16 = vrot.slane %v20774_v46, 1  ;;  %v12117_v9 = vld [vmem:[%s21073_s12 + $0x178] sm:$0xff]  ;;  %v12114_v46 = vld [vmem:[%s21073_s12 + $0x160] sm:$0xff]  ;;  %v12128_v22 = vld [vmem:[%s21073_s12 + $0x1d0] sm:$0xff] }
 0xdde   :  { %15713 = vmatpush3.bf16.msra.mxu0 %v12248_v62  ;;  %15716 = vmatprep.mubr.msk.bf16.mxu0 %vm15886_vm4, %v21191_v6  ;;  %v12406_v41 = vpack.c.b16 %v12405_v48, %v12405_v48  ;;  %v12607_v20 = vpack.c.bf16 %v12109_v36, %v12108_v52  ;;  %v20856_v62 = vunpack.c.l.b16 %v12551_v32  ;;  %v20858_v55 = vunpack.c.l.b16 %v12552_v5  ;;  %v12110_v2 = vld [vmem:[%s21073_s12 + $0x140] sm:$0xff]  ;;  %v12119_v32 = vld [vmem:[%s21073_s12 + $0x188] sm:$0xff] }
 0xddf   :  { %15714 = vmatprep.subr.bf16.mxu0 %v21191_v6  ;;  %v12356_v4 = vsel %vm12151_vm14, %v12355_v28, %v20772_v18  ;;  %v12505_v33 = vsel %vm12151_vm14, %v12504_v14, %v12503_v31  ;;  %v12455_v15 = vsel %vm12151_vm14, %v12454_v16, %v12453_v49  ;;  %v12553_v35 = vpack.c.bf16 %v12103_v63, %v12102_v40  ;;  %v12111_v28 = vld [vmem:[%s21073_s12 + $0x148] sm:$0xff]  ;;  %v12118_v16 = vld [vmem:[%s21073_s12 + $0x180] sm:$0xff] }
 0xde0   :  { %15723 = vmatpush3.bf16.msra.mxu1 %v12297_v25  ;;  %v12357_v21 = vpack.c.b16 %v12356_v4, %v12356_v4  ;;  %v12506_v11 = vpack.c.b16 %v12505_v33, %v12505_v33  ;;  %v12106_v25 = vld [vmem:[%s21073_s12 + $0x120] sm:$0xff]  ;;  %v12456_v37 = vpack.c.b16 %v12455_v15, %v12455_v15  ;;  %v12608_v1 = vrot.slane %v20856_v62, 1  ;;  %v12133_v33 = vld [vmem:[%s21073_s12 + $0x1f8] sm:$0xff]  ;;  %v12127_v63 = vld [vmem:[%s21073_s12 + $0x1c8] sm:$0xff] }
 0xde1   :  { %15736 = vmatprep.subr.bf16.mxu1 %v21191_v6  ;;  %v12606_v24 = vpack.c.bf16 %v12107_v59, %v12106_v25  ;;  %v12559_v12 = vrot.slane %v20858_v55, 7  ;;  %v12708_v8 = vrot.slane %v20858_v55, 2  ;;  %v12707_v57 = vrot.slane %v20856_v62, 3  ;;  %v12131_v25 = vld [vmem:[%s21073_s12 + $0x1e8] sm:$0xff]  ;;  %v12126_v40 = vld [vmem:[%s21073_s12 + $0x1c0] sm:$0xff] }
 0xde2   :  { %15715 = vmatpush3.bf16.msra.mxu0 %v12247_v43  ;;  %v12116_v43 = vld [vmem:[%s21073_s12 + $0x170] sm:$0xff]  ;;  %v12609_v13 = vsel %vm12151_vm14, %v20858_v55, %v12608_v1  ;;  %v12658_v0 = vrot.slane %v20858_v55, 1  ;;  %v12657_v47 = vrot.slane %v20856_v62, 2  ;;  %v12757_v49 = vpack.c.bf16 %v12119_v32, %v12118_v16 }
 0xde3   :  { %15725 = vmatmul.mubr.msk.bf16.vlgmr.msra.gmra.mxu1 %vm178_vm5, %v12302_v58  ;;  %15728 = vmatprep.subr.bf16.mxu0 %v21191_v6  ;;  %v12706_v10 = vpack.c.bf16 %v12117_v9, %v12116_v43  ;;  %v12560_v18 = vsel %vm12151_vm14, %v12559_v12, %v20856_v62  ;;  %v12115_v58 = vld [vmem:[%s21073_s12 + $0x168] sm:$0xff]  ;;  %v12610_v7 = vpack.c.b16 %v12609_v13, %v12609_v13  ;;  %v12964_v43 = vld [vmem:[%s21075_s14 + $0x10] sm:$0xff]  ;;  %v12965_v9 = vld [vmem:[%s21075_s14 + $0x18] sm:$0xff] }
 0xde4   :  { %15737 = vmatpush3.bf16.msra.mxu1 %v12403_v54  ;;  %15740 = vmatprep.mubr.msk.bf16.mxu1 %vm15886_vm4, %v21191_v6  ;;  %v12113_v54 = vld [vmem:[%s21073_s12 + $0x158] sm:$0xff]  ;;  %v12561_v38 = vpack.c.b16 %v12560_v18, %v12560_v18  ;;  %v12709_v4 = vsel %vm12151_vm14, %v12708_v8, %v12707_v57  ;;  %v12659_v29 = vsel %vm12151_vm14, %v12658_v0, %v12657_v47  ;;  %v12969_v0 = vld [vmem:[%s21075_s14 + $0x20] sm:$0xff] }
 0xde5   :  { %15717 = vmatmul.mubr.msk.bf16.vlgmr.msra.gmra.mxu0 %vm178_vm5, %v12252_v50  ;;  %15738 = vmatprep.subr.bf16.mxu1 %v21191_v6  ;;  %v12656_v50 = vpack.c.bf16 %v12113_v54, %v12112_v30  ;;  %v12660_v31 = vpack.c.b16 %v12659_v29, %v12659_v29  ;;  %v12859_v13 = vpack.c.bf16 %v12127_v63, %v12126_v40 }
 0xde6   :  { %15729 = vmatpush3.bf16.msra.mxu0 %v12350_v27  ;;  %15732 = vmatprep.mubr.msk.bf16.mxu0 %vm15886_vm4, %v21191_v6  ;;  %v12069_v27 = vld [vmem:[#allocation4 + $0x1c] sm:$0xf] }
 0xde7   :  { %15730 = vmatprep.subr.bf16.mxu0 %v21191_v6  ;;  %v12756_v48 = vpack.c.bf16 %v12069_v27, %v12069_v27  ;;  %v12963_v27 = vld [vmem:[%s21075_s14 + $0x8] sm:$0xff] }
 0xde8   :  { %15739 = vmatpush3.bf16.msra.mxu1 %v12402_v3  ;;  %v12705_v3 = vpack.c.bf16 %v12115_v58, %v12114_v46  ;;  %v21205_v46 = vld [vmem:[#allocation9_spill] sm:$0xff] }
 0xde9   :  { %15752 = vmatprep.subr.bf16.mxu1 %v21191_v6  ;;  %v20942_v14 = vunpack.c.l.b16 %v12756_v48 }
 0xdea   :  { %15731 = vmatpush3.bf16.msra.mxu0 %v12349_v61  ;;  %v12755_v61 = vpack.c.bf16 %v12065_v44, %v12065_v44  ;;  %v12962_v44 = vld [vmem:[%s21075_s14] sm:$0xff] }
 0xdeb   :  { %15741 = vmatmul.mubr.msk.bf16.vlgmr.msra.gmra.mxu1 %vm178_vm5, %v12406_v41  ;;  %15744 = vmatprep.subr.bf16.mxu0 %v21191_v6  ;;  %v12121_v41 = vld [vmem:[%s21073_s12 + $0x198] sm:$0xff]  ;;  %v12763_v36 = vrot.slane %v20942_v14, 7  ;;  %v12862_v12 = vrot.slane %v20942_v14, 1  ;;  %v12966_v8 = vpack.c.bf16 %v12963_v27, %v12962_v44 }
 0xdec   :  { %15753 = vmatpush3.bf16.msra.mxu1 %v12502_v34  ;;  %15756 = vmatprep.mubr.msk.bf16.mxu1 %vm15886_vm4, %v21191_v6  ;;  %v12655_v34 = vpack.c.bf16 %v12111_v28, %v12110_v2  ;;  %v12758_v56 = vpack.c.bf16 %v12121_v41, %v12120_v53  ;;  %v12971_v2 = vld [vmem:[%s21075_s14 + $0x30] sm:$0xff]  ;;  %v12972_v28 = vld [vmem:[%s21075_s14 + $0x38] sm:$0xff] }
 0xded   :  { %15733 = vmatmul.mubr.msk.bf16.vlgmr.msra.gmra.mxu0 %vm178_vm5, %v12357_v21  ;;  %15754 = vmatprep.subr.bf16.mxu1 %v21191_v6  ;;  %v12710_v21 = vpack.c.b16 %v12709_v4, %v12709_v4  ;;  %v12974_v57 = vpack.c.bf16 %v12972_v28, %v12971_v2 }
 0xdee   :  { %15745 = vmatpush3.bf16.msra.mxu0 %v12452_v60  ;;  %15748 = vmatprep.mubr.msk.bf16.mxu0 %vm15886_vm4, %v21191_v6  ;;  %v20940_v60 = vunpack.c.l.b16 %v12755_v61  ;;  %v12970_v61 = vld [vmem:[%s21075_s14 + $0x28] sm:$0xff] }
 0xdef   :  { %15746 = vmatprep.subr.bf16.mxu0 %v21191_v6  ;;  %v12973_v48 = vpack.c.bf16 %v12970_v61, %v12969_v0 }
 0xdf0   :  { %15755 = vmatpush3.bf16.msra.mxu1 %v12501_v19  ;;  %v12122_v19 = vld [vmem:[%s21073_s12 + $0x1a0] sm:$0xff]  ;;  %v12812_v52 = vrot.slane %v20940_v60, 1  ;;  %v12764_v62 = vsel %vm12151_vm14, %v12763_v36, %v20940_v60  ;;  %v12911_v1 = vrot.slane %v20940_v60, 3  ;;  %v12861_v54 = vrot.slane %v20940_v60, 2 }
 0xdf1   :  { %15768 = vmatprep.subr.bf16.mxu1 %v21191_v6  ;;  %v12810_v5 = vpack.c.bf16 %v12123_v42, %v12122_v19  ;;  %v13920_v19 = vld [vmem:[%s21074_s13] ss:$0 sm:$0xff] }
 0xdf2   :  { %15747 = vmatpush3.bf16.msra.mxu0 %v12451_v45  ;;  %v12132_v45 = vld [vmem:[%s21073_s12 + $0x1f0] sm:$0xff]  ;;  %v12813_v26 = vsel %vm12151_vm14, %v20942_v14, %v12812_v52  ;;  %v12863_v18 = vsel %vm12151_vm14, %v12862_v12, %v12861_v54 }
 0xdf3   :  { %15757 = vmatmul.mubr.msk.bf16.vlgmr.msra.gmra.mxu1 %vm178_vm5, %v12506_v11  ;;  %15760 = vmatprep.subr.bf16.mxu0 %v21191_v6  ;;  %v12910_v15 = vpack.c.bf16 %v12133_v33, %v12132_v45  ;;  %v12814_v55 = vpack.c.b16 %v12813_v26, %v12813_v26  ;;  %v12130_v11 = vld [vmem:[%s21073_s12 + $0x1e0] sm:$0xff] }
 0xdf4   :  { %15769 = vmatpush3.bf16.msra.mxu1 %v12607_v20  ;;  %15772 = vmatprep.mubr.msk.bf16.mxu1 %vm15886_vm4, %v21191_v6  ;;  %v12129_v20 = vld [vmem:[%s21073_s12 + $0x1d8] sm:$0xff] }
 0xdf5   :  { %15749 = vmatmul.mubr.msk.bf16.vlgmr.msra.gmra.mxu0 %vm178_vm5, %v12456_v37  ;;  %15770 = vmatprep.subr.bf16.mxu1 %v21191_v6  ;;  %v12860_v59 = vpack.c.bf16 %v12129_v20, %v12128_v22  ;;  %v12765_v37 = vpack.c.b16 %v12764_v62, %v12764_v62 }
 0xdf6   :  { %15761 = vmatpush3.bf16.msra.mxu0 %v12554_v23  ;;  %15764 = vmatprep.mubr.msk.bf16.mxu0 %vm15886_vm4, %v21191_v6  ;;  %v12912_v23 = vrot.slane %v20942_v14, 2 }
 0xdf7   :  { %15762 = vmatprep.subr.bf16.mxu0 %v21191_v6 }
 0xdf8   :  { %15771 = vmatpush3.bf16.msra.mxu1 %v12606_v24  ;;  %v12909_v24 = vpack.c.bf16 %v12131_v25, %v12130_v11  ;;  %v12913_v30 = vsel %vm12151_vm14, %v12912_v23, %v12911_v1 }
 0xdf9   :  { %15784 = vmatprep.subr.bf16.mxu1 %v21191_v6 }
 0xdfa   :  { %15763 = vmatpush3.bf16.msra.mxu0 %v12553_v35  ;;  %v13098_v35 = vld [vmem:[%s21067_s6] ss:$0 sm:$0xff] }
 0xdfb   :  { %15773 = vmatmul.mubr.msk.bf16.vlgmr.msra.gmra.mxu1 %vm178_vm5, %v12610_v7  ;;  %15776 = vmatprep.subr.bf16.mxu0 %v21191_v6  ;;  %v678_v58 = vadd.f32 %v13098_v35, %v21205_v46  ;;  %v12914_v7 = vpack.c.b16 %v12913_v30, %v12913_v30 }
 0xdfc   :  { %15785 = vmatpush3.bf16.msra.mxu1 %v12706_v10  ;;  %15788 = vmatprep.mubr.msk.bf16.mxu1 %vm15886_vm4, %v21191_v6  ;;  %v12967_v10 = vpack.c.bf16 %v12965_v9, %v12964_v43 }
 0xdfd   :  { %15765 = vmatmul.mubr.msk.bf16.vlgmr.msra.gmra.mxu0 %vm178_vm5, %v12561_v38  ;;  %15786 = vmatprep.subr.bf16.mxu1 %v21191_v6  ;;  %v12959_v38 = vmax.f32 %v678_v58, 0.0 }
 0xdfe   :  { %15777 = vmatpush3.bf16.msra.mxu0 %v12656_v50  ;;  %15780 = vmatprep.mubr.msk.bf16.mxu0 %vm15886_vm4, %v21191_v6  ;;  %v12864_v50 = vpack.c.b16 %v12863_v18, %v12863_v18 }
 0xdff   :  { %15778 = vmatprep.subr.bf16.mxu0 %v21191_v6 }
 0xe00   :  { %15787 = vmatpush3.bf16.msra.mxu1 %v12705_v3  ;;  %v12961_v3 = vpack.c.bf16 %v12959_v38, %v12959_v38 }
 0xe01   :  { %15800 = vmatprep.subr.bf16.mxu1 %v21191_v6 }
 0xe02   :  { %15779 = vmatpush3.bf16.msra.mxu0 %v12655_v34 }
 0xe03   :  { %15789 = vmatmul.mubr.msk.bf16.vlgmr.msra.gmra.mxu1 %vm178_vm5, %v12710_v21  ;;  %15792 = vmatprep.subr.bf16.mxu0 %v21191_v6 }
 0xe04   :  { %15801 = vmatpush3.bf16.msra.mxu1 %v12811_v39  ;;  %15804 = vmatprep.mubr.msk.bf16.mxu1 %vm15886_vm4, %v21191_v6 }
 0xe05   :  { %15781 = vmatmul.mubr.msk.bf16.vlgmr.msra.gmra.mxu0 %vm178_vm5, %v12660_v31  ;;  %15802 = vmatprep.subr.bf16.mxu1 %v21191_v6 }
 0xe06   :  { %15793 = vmatpush3.bf16.msra.mxu0 %v12758_v56  ;;  %15796 = vmatprep.mubr.msk.bf16.mxu0 %vm15886_vm4, %v21191_v6 }
 0xe07   :  { %15794 = vmatprep.subr.bf16.mxu0 %v21191_v6 }
 0xe08   :  { %15803 = vmatpush3.bf16.msra.mxu1 %v12810_v5 }
 0xe09   :  { %15816 = vmatprep.subr.bf16.mxu1 %v21191_v6 }
 0xe0a   :  { %15795 = vmatpush3.bf16.msra.mxu0 %v12757_v49 }
 0xe0b   :  { %15805 = vmatmul.mubr.msk.bf16.vlgmr.msra.gmra.mxu1 %vm178_vm5, %v12814_v55  ;;  %15808 = vmatprep.subr.bf16.mxu0 %v21191_v6 }
 0xe0c   :  { %15817 = vmatpush3.bf16.msra.mxu1 %v12910_v15  ;;  %15820 = vmatprep.mubr.msk.bf16.mxu1 %vm15886_vm4, %v21191_v6 }
 0xe0d   :  { %15797 = vmatmul.mubr.msk.bf16.vlgmr.msra.gmra.mxu0 %vm178_vm5, %v12765_v37  ;;  %15818 = vmatprep.subr.bf16.mxu1 %v21191_v6 }
 0xe0e   :  { %15809 = vmatpush3.bf16.msra.mxu0 %v12860_v59  ;;  %15812 = vmatprep.mubr.msk.bf16.mxu0 %vm15886_vm4, %v21191_v6 }
 0xe0f   :  { %15810 = vmatprep.subr.bf16.mxu0 %v21191_v6 }
 0xe10   :  { %15819 = vmatpush3.bf16.msra.mxu1 %v12909_v24 }
 0xe11   :  { %15832 = vmatprep.subr.bf16.mxu1 %v21191_v6 }
 0xe12   :  { %15811 = vmatpush3.bf16.msra.mxu0 %v12859_v13 }
 0xe13   :  { %15821 = vmatmul.mubr.msk.bf16.vlgmr.msra.gmra.mxu1 %vm178_vm5, %v12914_v7  ;;  %15824 = vmatprep.subr.bf16.mxu0 %v21191_v6 }
 0xe14   :  { %15833 = vmatpush3.bf16.msra.mxu1 %v12967_v10  ;;  %15836 = vmatprep.mubr.msk.bf16.mxu1 %vm15886_vm4, %v21191_v6 }
 0xe15   :  { %15813 = vmatmul.mubr.msk.bf16.vlgmr.msra.gmra.mxu0 %vm178_vm5, %v12864_v50  ;;  %15834 = vmatprep.subr.bf16.mxu1 %v21191_v6 }
 0xe16   :  { %15828 = vmatprep.mubr.msk.bf16.mxu0 %vm15886_vm4, %v21191_v6  ;;  %15825 = vmatpush3.bf16.msra.mxu0 %v12974_v57 }
 0xe17   :  { %15826 = vmatprep.subr.bf16.mxu0 %v21191_v6 }
 0xe18   :  { %15835 = vmatpush3.bf16.msra.mxu1 %v12966_v8 }
 0xe1a   :  { %15827 = vmatpush3.bf16.msra.mxu0 %v12973_v48 }
 0xe1b   :  { %15837 = vmatmul.mubr.msk.bf16.vlgmr.msra.gmra.mxu1 %vm178_vm5, %v12961_v3 }
 0xe9b   :  { %v12240_v17 = vpop.f32.mrf.mxu1 }
 0xe9d   :  { %v12191_v51 = vpop.f32.mrf.mxu0  ;;  %v15710_v34 = vpop.f32.mrf.mxu1 }
 0xe9e   :  { %v12197_v32 = vadd.f32 %v13920_v19, %v12191_v51 }
 0xe9f   :  { %v15702_v4 = vpop.f32.mrf.mxu0  ;;  %v12243_v47 = vpop.f32.mrf.mxu1 }
 0xea0   :  { %v12246_v33 = vadd.f32 %v12240_v17, %v12197_v32 }
 0xea1   :  { %v12194_v53 = vpop.f32.mrf.mxu0  ;;  %v15711_v41 = vpop.f32.mrf.mxu1 }
 0xea3   :  { %v15703_v39 = vpop.f32.mrf.mxu0  ;;  %v12340_v29 = vpop.f32.mrf.mxu1 }
 0xea5   :  { %v12290_v6 = vpop.f32.mrf.mxu0  ;;  %v15726_v60 = vpop.f32.mrf.mxu1 }
 0xea6   :  { %v12296_v22 = vadd.f32 %v12290_v6, %v12246_v33 }
 0xea7   :  { %v15718_v14 = vpop.f32.mrf.mxu0  ;;  %v12343_v21 = vpop.f32.mrf.mxu1 }
 0xea8   :  { %v12346_v11 = vadd.f32 %v12340_v29, %v12296_v22 }
 0xea9   :  { %v12293_v42 = vpop.f32.mrf.mxu0  ;;  %v15727_v56 = vpop.f32.mrf.mxu1 }
 0xeab   :  { %v15719_v31 = vpop.f32.mrf.mxu0  ;;  %v12444_v16 = vpop.f32.mrf.mxu1 }
 0xead   :  { %v12395_v5 = vpop.f32.mrf.mxu0  ;;  %v15742_v52 = vpop.f32.mrf.mxu1 }
 0xeae   :  { %v12401_v23 = vadd.f32 %v12395_v5, %v12346_v11 }
 0xeaf   :  { %v15734_v36 = vpop.f32.mrf.mxu0  ;;  %v12447_v45 = vpop.f32.mrf.mxu1 }
 0xeb0   :  { %v12450_v1 = vadd.f32 %v12444_v16, %v12401_v23 }
 0xeb1   :  { %v12398_v49 = vpop.f32.mrf.mxu0  ;;  %v15743_v26 = vpop.f32.mrf.mxu1 }
 0xeb2   :  { %v13939_v49 = vld [vmem:[%s21076_s15] ss:$0 sm:$0xff] }
 0xeb3   :  { %v15735_v20 = vpop.f32.mrf.mxu0  ;;  %v12544_v15 = vpop.f32.mrf.mxu1 }
 0xeb5   :  { %v12494_v62 = vpop.f32.mrf.mxu0  ;;  %v15758_v55 = vpop.f32.mrf.mxu1 }
 0xeb6   :  { %v12500_v9 = vadd.f32 %v12494_v62, %v12450_v1 }
 0xeb7   :  { %v15750_v25 = vpop.f32.mrf.mxu0  ;;  %v12547_v59 = vpop.f32.mrf.mxu1 }
 0xeb8   :  { %v12550_v10 = vadd.f32 %v12544_v15, %v12500_v9 }
 0xeb9   :  { %v12497_v37 = vpop.f32.mrf.mxu0  ;;  %v15759_v40 = vpop.f32.mrf.mxu1 }
 0xebb   :  { %v15751_v63 = vpop.f32.mrf.mxu0  ;;  %v12648_v24 = vpop.f32.mrf.mxu1 }
 0xebd   :  { %v12599_v12 = vpop.f32.mrf.mxu0  ;;  %v15774_v43 = vpop.f32.mrf.mxu1 }
 0xebe   :  { %v12605_v58 = vadd.f32 %v12599_v12, %v12550_v10 }
 0xebf   :  { %v15766_v35 = vpop.f32.mrf.mxu0  ;;  %v12651_v13 = vpop.f32.mrf.mxu1 }
 0xec0   :  { %v12654_v8 = vadd.f32 %v12648_v24, %v12605_v58 }
 0xec1   :  { %v12602_v30 = vpop.f32.mrf.mxu0  ;;  %v15775_v54 = vpop.f32.mrf.mxu1 }
 0xec3   :  { %v15767_v18 = vpop.f32.mrf.mxu0  ;;  %v12748_v46 = vpop.f32.mrf.mxu1 }
 0xec5   :  { %v12698_v7 = vpop.f32.mrf.mxu0  ;;  %v15790_v44 = vpop.f32.mrf.mxu1 }
 0xec6   :  { %v12704_v2 = vadd.f32 %v12698_v7, %v12654_v8 }
 0xec7   :  { %v15782_v27 = vpop.f32.mrf.mxu0  ;;  %v12751_v50 = vpop.f32.mrf.mxu1 }
 0xec8   :  { %v12754_v48 = vadd.f32 %v12748_v46, %v12704_v2 }
 0xec9   :  { %v12701_v38 = vpop.f32.mrf.mxu0  ;;  %v15791_v3 = vpop.f32.mrf.mxu1 }
 0xecb   :  { %v15783_v28 = vpop.f32.mrf.mxu0  ;;  %v12852_v57 = vpop.f32.mrf.mxu1 }
 0xecd   :  { %v12803_v0 = vpop.f32.mrf.mxu0  ;;  %v15806_v61 = vpop.f32.mrf.mxu1 }
 0xece   :  { %v12809_v34 = vadd.f32 %v12803_v0, %v12754_v48 }
 0xecf   :  { %v15798_v17 = vpop.f32.mrf.mxu0  ;;  %v12855_v51 = vpop.f32.mrf.mxu1 }
 0xed0   :  { %v12858_v39 = vadd.f32 %v12852_v57, %v12809_v34 }
 0xed1   :  { %v12806_v4 = vpop.f32.mrf.mxu0  ;;  %v15807_v47 = vpop.f32.mrf.mxu1 }
 0xed3   :  { %v15799_v53 = vpop.f32.mrf.mxu0  ;;  %v12952_v41 = vpop.f32.mrf.mxu1 }
 0xed5   :  { %v12902_v29 = vpop.f32.mrf.mxu0  ;;  %v15822_v6 = vpop.f32.mrf.mxu1 }
 0xed6   :  { %v12908_v60 = vadd.f32 %v12902_v29, %v12858_v39 }
 0xed7   :  { %v12955_v14 = vpop.f32.mrf.mxu1  ;;  %v15814_v21 = vpop.f32.mrf.mxu0 }
 0xed8   :  { %v12958_v19 = vadd.f32 %v12952_v41, %v12908_v60 }
 0xed9   :  { %v15823_v42 = vpop.f32.mrf.mxu1  ;;  %v12905_v56 = vpop.f32.mrf.mxu0 }
 0xeda   :  { %v12960_v31 = vmax.f32 %v12958_v19, 0.0 }
 0xedb   :  { %v13055_v16 = vpop.f32.mrf.mxu1  ;;  %v15815_v32 = vpop.f32.mrf.mxu0 }
 0xedc   :  { %v12968_v5 = vpack.c.bf16 %v12960_v31, %v12960_v31 }
 0xedd   :  { %v15838_v52 = vpop.f32.mrf.mxu1 }
 0xede   :  { %15829 = vmatmul.mubr.msk.bf16.vlgmr.msra.gmra.mxu0 %vm178_vm5, %v12968_v5 }
 0xedf   :  { %v13058_v36 = vpop.f32.mrf.mxu1 }
 0xee1   :  { %v15839_v45 = vpop.f32.mrf.mxu1 }
 0xf9e   :  { %v13012_v33 = vpop.f32.mrf.mxu0 }
 0xf9f   :  { %v13056_v26 = vadd.f32 %v13055_v16, %v13012_v33 }
 0xfa0   :  { %v15830_v22 = vpop.f32.mrf.mxu0 }
 0xfa1   :  { %v13068_v20 = vadd.f32 %v13939_v49, %v13056_v26 }
 0xfa2   :  { %v13015_v15 = vpop.f32.mrf.mxu0 }
 0xfa3   :  { %13069 = vst [vmem:[#allocation5] sm:$0x3] %v13068_v20 }
 0xfa4   :  { %v15831_v62 = vpop.f32.mrf.mxu0 }
 0xfa5   :  { %15873 = shalt.err (!%p15870_p4)
}
 0xfa6   :  { %13079 = dma.vmem_to_hbm [thread:$0]  %s13077_s26, 32, %s21077_s16, [#allocation6]  }
 0xfa7   :  { %15882 = dma.done.wait [#allocation6], 32  }
 0xfa8   :  { %15883 = vsyncadd [#allocation6], 4294967264 }
 0xfa9   :  { %13083 = vsyncpa [#allocation6], 1 }

</bundles_post_ra>
